<compile_context>
chip_gen: v7x
topology: tpu7x:2x2x1
jax: 0.10.0
libtpu: 0.0.40
codegen_flags: <defaults>
</compile_context>

<pallas_src>
import functools

import jax
import jax.numpy as jnp
from jax.experimental import pallas as pl
from jax.experimental.pallas import tpu as pltpu


# ----------------------------------------------------------------------------- kernel


def temporal_attn_kernel(x_ref, w_ref, o_ref, qkv_scr, *, heads, head_dim, seq):
    """One grid step: a bn_tile-wide slab of (b, n) temporal slices.

    x_ref:   (T*D, bn)        input rows ordered (t, d); bn = b*N + n on lanes.
    w_ref:   (3*hid*T, T*D)   fused projection weight, block-diagonal over time,
                              rows ordered (qkv, head, channel, t); q rows pre-scaled.
    o_ref:   (heads, hd, T, bn) output (lane-dense stores).
    qkv_scr: (3*hid*T, bn)    VMEM scratch holding projected q/k/v rows.
    """
    T = seq
    hd = head_dim
    hid = heads * hd
    k_off = hid * T
    v_off = 2 * hid * T

    # ---- fused q/k/v projection: a single MXU matmul, lane-dense result -------
    x = x_ref[...].astype(jnp.float32)
    qkv_scr[...] = jnp.dot(w_ref[...], x, preferred_element_type=jnp.float32)

    # ---- attention, fully batch-on-lanes (VPU/EUP only, no tiny batched matmuls)
    for h in range(heads):
        # scores[j]: (T_query sublanes, bn lanes) slab of  q_i . k_j  (scale in q)
        scores = [None] * T
        for e in range(hd):
            q_slab = qkv_scr[pl.ds((h * hd + e) * T, T), :]            # (T, bn)
            k_base = k_off + (h * hd + e) * T
            for j in range(T):
                # (bn,) row broadcasts across the T query sublanes.
                term = q_slab * qkv_scr[k_base + j, :]
                scores[j] = term if scores[j] is None else scores[j] + term

        # softmax over j: j indexes a Python list of slabs -> plain VPU max/add + EUP exp
        m = scores[0]
        for j in range(1, T):
            m = jnp.maximum(m, scores[j])
        probs = [jnp.exp(sj - m) for sj in scores]
        den = probs[0]
        for j in range(1, T):
            den = den + probs[j]
        inv = pl.reciprocal(den, approx=False)        # exact: rows sum to 1
        probs = [pj * inv for pj in probs]

        # out[h, e] slab = sum_j probs[j] * v[h, j, e]; stored directly (no concat).
        for e in range(hd):
            v_base = v_off + (h * hd + e) * T
            acc = probs[0] * qkv_scr[v_base, :]
            for j in range(1, T):
                acc = acc + probs[j] * qkv_scr[v_base + j, :]
            o_ref[h, e, :, :] = acc.astype(o_ref.dtype)


# ----------------------------------------------------------------------------- tiling


def _round_up(x, m):
    return (x + m - 1) // m * m


def _tpu_vmem_budget_and_cores():
    """Per-generation usable VMEM budget (bytes) and TensorCore count per device."""
    try:
        kind = jax.devices()[0].device_kind.lower()
    except Exception:  # pragma: no cover
        kind = ""
    if "v7" in kind:
        return 40 * (1 << 20), 2      # 64 MiB physical VMEM / TC, 2 TCs per chip
    if "v4" in kind or "v5p" in kind:
        return 64 * (1 << 20), 2      # megacore parts
    return 96 * (1 << 20), 1          # v5e / v6e: 128 MiB VMEM, single TensorCore


def _per_bn_row_vmem_bytes(T, D, hid, heads):
    """Rough padded-VMEM bytes per batch row (lane) of one tile."""
    it = 4  # f32
    x_bytes = 2 * T * D * it               # x block, double-buffered
    out_bytes = 2 * hid * T * it           # output block, double-buffered
    qkv_bytes = 3 * hid * T * it           # projection scratch
    live_bytes = 3 * heads * T * T * it    # score/prob slabs + working values / spill
    return x_bytes + out_bytes + qkv_bytes + live_bytes


def _pick_bn_tile(BN, per_row_bytes, budget_bytes, num_cores):
    """Lane-dense batch tile (multiple of 128) sized from the padded VMEM footprint."""
    lanes = 128
    bn_ceil = _round_up(max(BN, 1), lanes)
    vmem_rows = max(lanes, (budget_bytes // max(per_row_bytes, 1)) // lanes * lanes)
    tile = min(vmem_rows, bn_ceil)
    steps = pl.cdiv(bn_ceil, tile)

    # Single maximal tile on 1-TC parts; when the tile is VMEM-limited prefer >=3
    # steps (hide first-input / last-output DMA edges); on multi-TC parts keep the
    # step count a multiple of the core count so no core idles on the tail.
    min_steps = 1
    if steps > 1:
        min_steps = 3
    if num_cores > 1 and bn_ceil // lanes >= num_cores:
        min_steps = max(min_steps, num_cores)
    if min_steps > 1:
        steps = max(steps, min_steps)
        if num_cores > 1:
            steps = _round_up(steps, num_cores)
        tile = max(lanes, _round_up(pl.cdiv(bn_ceil, steps), lanes))
    return tile


# ----------------------------------------------------------------------------- wrapper


def temporal_attn(x, wq, wk, wv, heads, *, bn_tile=None,
                  agg=False, tmp_info=None, attn_drop=0.0):
    """Pallas TPU forward of TemporalAttn (agg=False, tmp_info=None, attn_drop=0)."""
    if agg or tmp_info is not None or attn_drop != 0.0:
        raise NotImplementedError(
            "Only the agg=False / tmp_info=None / attn_drop=0 path is implemented.")

    B, T, N, D = x.shape
    hid = wq.shape[0]
    assert hid % heads == 0
    hd = hid // heads
    scale = float(hd) ** -0.5
    BN = B * N

    # Fused projection weight (3*hid*T, T*D): block-diagonal over time, rows ordered
    # (qkv, head, channel, t); softmax scale folded into q rows, f32 cast hoisted.
    w3 = jnp.stack([wq.astype(jnp.float32) * scale,
                    wk.astype(jnp.float32),
                    wv.astype(jnp.float32)], axis=0)                # (3, hid, D)
    eye_t = jnp.eye(T, dtype=jnp.float32)
    w_proj = jnp.einsum("chd,tu->chtud", w3, eye_t).reshape(3 * hid * T, T * D)

    # x: (B, T, N, D) -> (T, D, B, N) -> (T*D, BN): batch on the lane axis.
    xr = jnp.transpose(x, (1, 3, 0, 2)).reshape(T * D, BN)

    budget, num_cores = _tpu_vmem_budget_and_cores()
    if bn_tile is None:
        bn_tile = _pick_bn_tile(BN, _per_bn_row_vmem_bytes(T, D, hid, heads),
                                budget, num_cores)
    assert bn_tile % 128 == 0
    BN_pad = _round_up(BN, bn_tile)
    if BN_pad != BN:
        xr = jnp.pad(xr, ((0, 0), (0, BN_pad - BN)))    # zero pad: harmless rows

    grid = (BN_pad // bn_tile,)
    kernel = functools.partial(temporal_attn_kernel, heads=heads, head_dim=hd, seq=T)

    out = pl.pallas_call(
        kernel,
        out_shape=jax.ShapeDtypeStruct((heads, hd, T, BN_pad), x.dtype),
        grid_spec=pltpu.PrefetchScalarGridSpec(
            num_scalar_prefetch=0,
            grid=grid,
            in_specs=[
                pl.BlockSpec((T * D, bn_tile), lambda i: (0, i)),
                pl.BlockSpec((3 * hid * T, T * D), lambda i: (0, 0)),   # grid-invariant
            ],
            out_specs=pl.BlockSpec((heads, hd, T, bn_tile), lambda i: (0, 0, 0, i)),
            scratch_shapes=[pltpu.VMEM((3 * hid * T, bn_tile), jnp.float32)],
        ),
        compiler_params=pltpu.CompilerParams(
            dimension_semantics=("parallel",),
            vmem_limit_bytes=budget + 8 * (1 << 20),
        ),
    )(xr, w_proj)

    # (heads, hd, T, BN_pad) -> (B, T, N, hid): matches the module's output layout.
    out = out[:, :, :, :BN].reshape(heads, hd, T, B, N)
    return jnp.transpose(out, (3, 2, 4, 0, 1)).reshape(B, T, N, hid)


# ----------------------------------------------------------------------------- reference


def temporal_attn_reference(x, wq, wk, wv, heads):
    """Pure-JAX reference mirroring the PyTorch forward (agg=False, tmp_info=None)."""
    B, T, N, D = x.shape
    hid = wq.shape[0]
    hd = hid // heads
    scale = float(hd) ** -0.5
    q = jnp.einsum("btnd,ed->bnte", x, wq)
    k = jnp.einsum("btnd,ed->bnte", x, wk)
    v = jnp.einsum("btnd,ed->bnte", x, wv)

    def hsplit(z):
        return jnp.transpose(z.reshape(B, N, T, heads, hd), (0, 1, 3, 2, 4))

    q, k, v = hsplit(q), hsplit(k), hsplit(v)
    attn = jnp.einsum("bnhte,bnhse->bnhts", q, k) * scale
    attn = jax.nn.softmax(attn, axis=-1)
    o = jnp.einsum("bnhts,bnhse->bnhte", attn, v)
    o = jnp.transpose(o, (0, 1, 3, 2, 4)).reshape(B, N, T, hid)
    return jnp.transpose(o, (0, 2, 1, 3))


# ----------------------------------------------------------------------------- test


if __name__ == "__main__":
    B, T, N, D = 2, 8, 16, 4     # x: (B, T, N, D)
    hid, heads = 32, 4           # hid_dim=32, heads=4 -> head_dim=8

    key = jax.random.PRNGKey(0)
    kx, kq, kk, kv = jax.random.split(key, 4)
    x = jax.random.normal(kx, (B, T, N, D), dtype=jnp.float32)
    # Conv2d(q_dim/kv_dim -> hid, kernel_size=1, bias=False): weight (hid, D)
    wq = jax.random.normal(kq, (hid, D), dtype=jnp.float32) * 0.1
    wk = jax.random.normal(kk, (hid, D), dtype=jnp.float32) * 0.1
    wv = jax.random.normal(kv, (hid, D), dtype=jnp.float32) * 0.1

    out = jax.block_until_ready(temporal_attn(x, wq, wk, wv, heads))
    ref = jax.block_until_ready(temporal_attn_reference(x, wq, wk, wv, heads))

    assert out.shape == (B, T, N, hid), out.shape
    err = float(jnp.max(jnp.abs(out - ref)))
    # tolerance covers default-precision (bf16-pass) MXU f32 matmuls on TPU
    assert jnp.allclose(out, ref, atol=2e-3, rtol=2e-3), err
    print("KERNEL_OK")
</pallas_src>

<mosaic_0001>
module attributes {stable_mosaic.version = 11 : i64} {
  func.func @temporal_attn_kernel(%arg0: i32, %arg1: memref<32x128xf32, #tpu.memory_space<vmem>>, %arg2: memref<768x32xf32, #tpu.memory_space<vmem>>, %arg3: memref<4x8x8x128xf32, #tpu.memory_space<vmem>>, %arg4: memref<768x128xf32, #tpu.memory_space<vmem>>) attributes {dimension_semantics = [#tpu.dimension_semantics<parallel>], iteration_bounds = array<i64: 1>, scalar_prefetch = 0 : i64, scratch_operands = 1 : i64, tpu.core_type = #tpu.core_type<tc>, window_params = [{transform_indices = @transform_0, window_bounds = array<i64: 32, 128>}, {pipeline_mode = #tpu.pipeline_mode<synchronous>, transform_indices = @transform_1, window_bounds = array<i64: 768, 32>}, {transform_indices = @transform_2, window_bounds = array<i64: 4, 8, 8, 128>}]} {
    %c0 = arith.constant 0 : index
    %c0_0 = arith.constant 0 : index
    %0 = vector.load %arg1[%c0, %c0_0] : memref<32x128xf32, #tpu.memory_space<vmem>>, vector<32x128xf32>
    %c0_1 = arith.constant 0 : index
    %c0_2 = arith.constant 0 : index
    %1 = vector.load %arg2[%c0_1, %c0_2] : memref<768x32xf32, #tpu.memory_space<vmem>>, vector<768x32xf32>
    %cst = arith.constant dense<0.000000e+00> : vector<768x128xf32>
    %2 = tpu.matmul %1, %0, %cst {dimension_numbers = #tpu.dot_dimension_numbers<[1], [0], [0], [1], [0, 0, 1, 1], [], []>} : vector<768x32xf32>, vector<32x128xf32>, vector<768x128xf32> -> vector<768x128xf32>
    %c0_3 = arith.constant 0 : index
    %c0_4 = arith.constant 0 : index
    %3 = vector.load %arg4[%c0_3, %c0_4] : memref<768x128xf32, #tpu.memory_space<vmem>>, vector<768x128xf32>
    tpu.vector_store %arg4[%c0_3, %c0_4], %2 {strides = array<i32>} : memref<768x128xf32, #tpu.memory_space<vmem>>, vector<768x128xf32>,
    %c0_5 = arith.constant 0 : index
    %c0_6 = arith.constant 0 : index
    %4 = vector.load %arg4[%c0_5, %c0_6] : memref<768x128xf32, #tpu.memory_space<vmem>>, vector<8x128xf32>
    %c256 = arith.constant 256 : index
    %c0_7 = arith.constant 0 : index
    %5 = vector.load %arg4[%c256, %c0_7] : memref<768x128xf32, #tpu.memory_space<vmem>>, vector<1x128xf32>
    %6 = vector.shape_cast %5 : vector<1x128xf32> to vector<128xf32>
    %7 = vector.shape_cast %6 : vector<128xf32> to vector<1x128xf32>
    %8 = vector.broadcast %7 : vector<1x128xf32> to vector<8x128xf32>
    %9 = arith.mulf %4, %8 : vector<8x128xf32>
    %c257 = arith.constant 257 : index
    %c0_8 = arith.constant 0 : index
    %10 = vector.load %arg4[%c257, %c0_8] : memref<768x128xf32, #tpu.memory_space<vmem>>, vector<1x128xf32>
    %11 = vector.shape_cast %10 : vector<1x128xf32> to vector<128xf32>
    %12 = vector.shape_cast %11 : vector<128xf32> to vector<1x128xf32>
    %13 = vector.broadcast %12 : vector<1x128xf32> to vector<8x128xf32>
    %14 = arith.mulf %4, %13 : vector<8x128xf32>
    %c258 = arith.constant 258 : index
    %c0_9 = arith.constant 0 : index
    %15 = vector.load %arg4[%c258, %c0_9] : memref<768x128xf32, #tpu.memory_space<vmem>>, vector<1x128xf32>
    %16 = vector.shape_cast %15 : vector<1x128xf32> to vector<128xf32>
    %17 = vector.shape_cast %16 : vector<128xf32> to vector<1x128xf32>
    %18 = vector.broadcast %17 : vector<1x128xf32> to vector<8x128xf32>
    %19 = arith.mulf %4, %18 : vector<8x128xf32>
    %c259 = arith.constant 259 : index
    %c0_10 = arith.constant 0 : index
    %20 = vector.load %arg4[%c259, %c0_10] : memref<768x128xf32, #tpu.memory_space<vmem>>, vector<1x128xf32>
    %21 = vector.shape_cast %20 : vector<1x128xf32> to vector<128xf32>
    %22 = vector.shape_cast %21 : vector<128xf32> to vector<1x128xf32>
    %23 = vector.broadcast %22 : vector<1x128xf32> to vector<8x128xf32>
    %24 = arith.mulf %4, %23 : vector<8x128xf32>
    %c260 = arith.constant 260 : index
    %c0_11 = arith.constant 0 : index
    %25 = vector.load %arg4[%c260, %c0_11] : memref<768x128xf32, #tpu.memory_space<vmem>>, vector<1x128xf32>
    %26 = vector.shape_cast %25 : vector<1x128xf32> to vector<128xf32>
    %27 = vector.shape_cast %26 : vector<128xf32> to vector<1x128xf32>
    %28 = vector.broadcast %27 : vector<1x128xf32> to vector<8x128xf32>
    %29 = arith.mulf %4, %28 : vector<8x128xf32>
    %c261 = arith.constant 261 : index
    %c0_12 = arith.constant 0 : index
    %30 = vector.load %arg4[%c261, %c0_12] : memref<768x128xf32, #tpu.memory_space<vmem>>, vector<1x128xf32>
    %31 = vector.shape_cast %30 : vector<1x128xf32> to vector<128xf32>
    %32 = vector.shape_cast %31 : vector<128xf32> to vector<1x128xf32>
    %33 = vector.broadcast %32 : vector<1x128xf32> to vector<8x128xf32>
    %34 = arith.mulf %4, %33 : vector<8x128xf32>
    %c262 = arith.constant 262 : index
    %c0_13 = arith.constant 0 : index
    %35 = vector.load %arg4[%c262, %c0_13] : memref<768x128xf32, #tpu.memory_space<vmem>>, vector<1x128xf32>
    %36 = vector.shape_cast %35 : vector<1x128xf32> to vector<128xf32>
    %37 = vector.shape_cast %36 : vector<128xf32> to vector<1x128xf32>
    %38 = vector.broadcast %37 : vector<1x128xf32> to vector<8x128xf32>
    %39 = arith.mulf %4, %38 : vector<8x128xf32>
    %c263 = arith.constant 263 : index
    %c0_14 = arith.constant 0 : index
    %40 = vector.load %arg4[%c263, %c0_14] : memref<768x128xf32, #tpu.memory_space<vmem>>, vector<1x128xf32>
    %41 = vector.shape_cast %40 : vector<1x128xf32> to vector<128xf32>
    %42 = vector.shape_cast %41 : vector<128xf32> to vector<1x128xf32>
    %43 = vector.broadcast %42 : vector<1x128xf32> to vector<8x128xf32>
    %44 = arith.mulf %4, %43 : vector<8x128xf32>
    %c8 = arith.constant 8 : index
    %c0_15 = arith.constant 0 : index
    %45 = vector.load %arg4[%c8, %c0_15] : memref<768x128xf32, #tpu.memory_space<vmem>>, vector<8x128xf32>
    %c264 = arith.constant 264 : index
    %c0_16 = arith.constant 0 : index
    %46 = vector.load %arg4[%c264, %c0_16] : memref<768x128xf32, #tpu.memory_space<vmem>>, vector<1x128xf32>
    %47 = vector.shape_cast %46 : vector<1x128xf32> to vector<128xf32>
    %48 = vector.shape_cast %47 : vector<128xf32> to vector<1x128xf32>
    %49 = vector.broadcast %48 : vector<1x128xf32> to vector<8x128xf32>
    %50 = arith.mulf %45, %49 : vector<8x128xf32>
    %51 = arith.addf %9, %50 : vector<8x128xf32>
    %c265 = arith.constant 265 : index
    %c0_17 = arith.constant 0 : index
    %52 = vector.load %arg4[%c265, %c0_17] : memref<768x128xf32, #tpu.memory_space<vmem>>, vector<1x128xf32>
    %53 = vector.shape_cast %52 : vector<1x128xf32> to vector<128xf32>
    %54 = vector.shape_cast %53 : vector<128xf32> to vector<1x128xf32>
    %55 = vector.broadcast %54 : vector<1x128xf32> to vector<8x128xf32>
    %56 = arith.mulf %45, %55 : vector<8x128xf32>
    %57 = arith.addf %14, %56 : vector<8x128xf32>
    %c266 = arith.constant 266 : index
    %c0_18 = arith.constant 0 : index
    %58 = vector.load %arg4[%c266, %c0_18] : memref<768x128xf32, #tpu.memory_space<vmem>>, vector<1x128xf32>
    %59 = vector.shape_cast %58 : vector<1x128xf32> to vector<128xf32>
    %60 = vector.shape_cast %59 : vector<128xf32> to vector<1x128xf32>
    %61 = vector.broadcast %60 : vector<1x128xf32> to vector<8x128xf32>
    %62 = arith.mulf %45, %61 : vector<8x128xf32>
    %63 = arith.addf %19, %62 : vector<8x128xf32>
    %c267 = arith.constant 267 : index
    %c0_19 = arith.constant 0 : index
    %64 = vector.load %arg4[%c267, %c0_19] : memref<768x128xf32, #tpu.memory_space<vmem>>, vector<1x128xf32>
    %65 = vector.shape_cast %64 : vector<1x128xf32> to vector<128xf32>
    %66 = vector.shape_cast %65 : vector<128xf32> to vector<1x128xf32>
    %67 = vector.broadcast %66 : vector<1x128xf32> to vector<8x128xf32>
    %68 = arith.mulf %45, %67 : vector<8x128xf32>
    %69 = arith.addf %24, %68 : vector<8x128xf32>
    %c268 = arith.constant 268 : index
    %c0_20 = arith.constant 0 : index
    %70 = vector.load %arg4[%c268, %c0_20] : memref<768x128xf32, #tpu.memory_space<vmem>>, vector<1x128xf32>
    %71 = vector.shape_cast %70 : vector<1x128xf32> to vector<128xf32>
    %72 = vector.shape_cast %71 : vector<128xf32> to vector<1x128xf32>
    %73 = vector.broadcast %72 : vector<1x128xf32> to vector<8x128xf32>
    %74 = arith.mulf %45, %73 : vector<8x128xf32>
    %75 = arith.addf %29, %74 : vector<8x128xf32>
    %c269 = arith.constant 269 : index
    %c0_21 = arith.constant 0 : index
    %76 = vector.load %arg4[%c269, %c0_21] : memref<768x128xf32, #tpu.memory_space<vmem>>, vector<1x128xf32>
    %77 = vector.shape_cast %76 : vector<1x128xf32> to vector<128xf32>
    %78 = vector.shape_cast %77 : vector<128xf32> to vector<1x128xf32>
    %79 = vector.broadcast %78 : vector<1x128xf32> to vector<8x128xf32>
    %80 = arith.mulf %45, %79 : vector<8x128xf32>
    %81 = arith.addf %34, %80 : vector<8x128xf32>
    %c270 = arith.constant 270 : index
    %c0_22 = arith.constant 0 : index
    %82 = vector.load %arg4[%c270, %c0_22] : memref<768x128xf32, #tpu.memory_space<vmem>>, vector<1x128xf32>
    %83 = vector.shape_cast %82 : vector<1x128xf32> to vector<128xf32>
    %84 = vector.shape_cast %83 : vector<128xf32> to vector<1x128xf32>
    %85 = vector.broadcast %84 : vector<1x128xf32> to vector<8x128xf32>
    %86 = arith.mulf %45, %85 : vector<8x128xf32>
    %87 = arith.addf %39, %86 : vector<8x128xf32>
    %c271 = arith.constant 271 : index
    %c0_23 = arith.constant 0 : index
    %88 = vector.load %arg4[%c271, %c0_23] : memref<768x128xf32, #tpu.memory_space<vmem>>, vector<1x128xf32>
    %89 = vector.shape_cast %88 : vector<1x128xf32> to vector<128xf32>
    %90 = vector.shape_cast %89 : vector<128xf32> to vector<1x128xf32>
    %91 = vector.broadcast %90 : vector<1x128xf32> to vector<8x128xf32>
    %92 = arith.mulf %45, %91 : vector<8x128xf32>
    %93 = arith.addf %44, %92 : vector<8x128xf32>
    %c16 = arith.constant 16 : index
    %c0_24 = arith.constant 0 : index
    %94 = vector.load %arg4[%c16, %c0_24] : memref<768x128xf32, #tpu.memory_space<vmem>>, vector<8x128xf32>
    %c272 = arith.constant 272 : index
    %c0_25 = arith.constant 0 : index
    %95 = vector.load %arg4[%c272, %c0_25] : memref<768x128xf32, #tpu.memory_space<vmem>>, vector<1x128xf32>
    %96 = vector.shape_cast %95 : vector<1x128xf32> to vector<128xf32>
    %97 = vector.shape_cast %96 : vector<128xf32> to vector<1x128xf32>
    %98 = vector.broadcast %97 : vector<1x128xf32> to vector<8x128xf32>
    %99 = arith.mulf %94, %98 : vector<8x128xf32>
    %100 = arith.addf %51, %99 : vector<8x128xf32>
    %c273 = arith.constant 273 : index
    %c0_26 = arith.constant 0 : index
    %101 = vector.load %arg4[%c273, %c0_26] : memref<768x128xf32, #tpu.memory_space<vmem>>, vector<1x128xf32>
    %102 = vector.shape_cast %101 : vector<1x128xf32> to vector<128xf32>
    %103 = vector.shape_cast %102 : vector<128xf32> to vector<1x128xf32>
    %104 = vector.broadcast %103 : vector<1x128xf32> to vector<8x128xf32>
    %105 = arith.mulf %94, %104 : vector<8x128xf32>
    %106 = arith.addf %57, %105 : vector<8x128xf32>
    %c274 = arith.constant 274 : index
    %c0_27 = arith.constant 0 : index
    %107 = vector.load %arg4[%c274, %c0_27] : memref<768x128xf32, #tpu.memory_space<vmem>>, vector<1x128xf32>
    %108 = vector.shape_cast %107 : vector<1x128xf32> to vector<128xf32>
    %109 = vector.shape_cast %108 : vector<128xf32> to vector<1x128xf32>
    %110 = vector.broadcast %109 : vector<1x128xf32> to vector<8x128xf32>
    %111 = arith.mulf %94, %110 : vector<8x128xf32>
    %112 = arith.addf %63, %111 : vector<8x128xf32>
    %c275 = arith.constant 275 : index
    %c0_28 = arith.constant 0 : index
    %113 = vector.load %arg4[%c275, %c0_28] : memref<768x128xf32, #tpu.memory_space<vmem>>, vector<1x128xf32>
    %114 = vector.shape_cast %113 : vector<1x128xf32> to vector<128xf32>
    %115 = vector.shape_cast %114 : vector<128xf32> to vector<1x128xf32>
    %116 = vector.broadcast %115 : vector<1x128xf32> to vector<8x128xf32>
    %117 = arith.mulf %94, %116 : vector<8x128xf32>
    %118 = arith.addf %69, %117 : vector<8x128xf32>
    %c276 = arith.constant 276 : index
    %c0_29 = arith.constant 0 : index
    %119 = vector.load %arg4[%c276, %c0_29] : memref<768x128xf32, #tpu.memory_space<vmem>>, vector<1x128xf32>
    %120 = vector.shape_cast %119 : vector<1x128xf32> to vector<128xf32>
    %121 = vector.shape_cast %120 : vector<128xf32> to vector<1x128xf32>
    %122 = vector.broadcast %121 : vector<1x128xf32> to vector<8x128xf32>
    %123 = arith.mulf %94, %122 : vector<8x128xf32>
    %124 = arith.addf %75, %123 : vector<8x128xf32>
    %c277 = arith.constant 277 : index
    %c0_30 = arith.constant 0 : index
    %125 = vector.load %arg4[%c277, %c0_30] : memref<768x128xf32, #tpu.memory_space<vmem>>, vector<1x128xf32>
    %126 = vector.shape_cast %125 : vector<1x128xf32> to vector<128xf32>
    %127 = vector.shape_cast %126 : vector<128xf32> to vector<1x128xf32>
    %128 = vector.broadcast %127 : vector<1x128xf32> to vector<8x128xf32>
    %129 = arith.mulf %94, %128 : vector<8x128xf32>
    %130 = arith.addf %81, %129 : vector<8x128xf32>
    %c278 = arith.constant 278 : index
    %c0_31 = arith.constant 0 : index
    %131 = vector.load %arg4[%c278, %c0_31] : memref<768x128xf32, #tpu.memory_space<vmem>>, vector<1x128xf32>
    %132 = vector.shape_cast %131 : vector<1x128xf32> to vector<128xf32>
    %133 = vector.shape_cast %132 : vector<128xf32> to vector<1x128xf32>
    %134 = vector.broadcast %133 : vector<1x128xf32> to vector<8x128xf32>
    %135 = arith.mulf %94, %134 : vector<8x128xf32>
    %136 = arith.addf %87, %135 : vector<8x128xf32>
    %c279 = arith.constant 279 : index
    %c0_32 = arith.constant 0 : index
    %137 = vector.load %arg4[%c279, %c0_32] : memref<768x128xf32, #tpu.memory_space<vmem>>, vector<1x128xf32>
    %138 = vector.shape_cast %137 : vector<1x128xf32> to vector<128xf32>
    %139 = vector.shape_cast %138 : vector<128xf32> to vector<1x128xf32>
    %140 = vector.broadcast %139 : vector<1x128xf32> to vector<8x128xf32>
    %141 = arith.mulf %94, %140 : vector<8x128xf32>
    %142 = arith.addf %93, %141 : vector<8x128xf32>
    %c24 = arith.constant 24 : index
    %c0_33 = arith.constant 0 : index
    %143 = vector.load %arg4[%c24, %c0_33] : memref<768x128xf32, #tpu.memory_space<vmem>>, vector<8x128xf32>
    %c280 = arith.constant 280 : index
    %c0_34 = arith.constant 0 : index
    %144 = vector.load %arg4[%c280, %c0_34] : memref<768x128xf32, #tpu.memory_space<vmem>>, vector<1x128xf32>
    %145 = vector.shape_cast %144 : vector<1x128xf32> to vector<128xf32>
    %146 = vector.shape_cast %145 : vector<128xf32> to vector<1x128xf32>
    %147 = vector.broadcast %146 : vector<1x128xf32> to vector<8x128xf32>
    %148 = arith.mulf %143, %147 : vector<8x128xf32>
    %149 = arith.addf %100, %148 : vector<8x128xf32>
    %c281 = arith.constant 281 : index
    %c0_35 = arith.constant 0 : index
    %150 = vector.load %arg4[%c281, %c0_35] : memref<768x128xf32, #tpu.memory_space<vmem>>, vector<1x128xf32>
    %151 = vector.shape_cast %150 : vector<1x128xf32> to vector<128xf32>
    %152 = vector.shape_cast %151 : vector<128xf32> to vector<1x128xf32>
    %153 = vector.broadcast %152 : vector<1x128xf32> to vector<8x128xf32>
    %154 = arith.mulf %143, %153 : vector<8x128xf32>
    %155 = arith.addf %106, %154 : vector<8x128xf32>
    %c282 = arith.constant 282 : index
    %c0_36 = arith.constant 0 : index
    %156 = vector.load %arg4[%c282, %c0_36] : memref<768x128xf32, #tpu.memory_space<vmem>>, vector<1x128xf32>
    %157 = vector.shape_cast %156 : vector<1x128xf32> to vector<128xf32>
    %158 = vector.shape_cast %157 : vector<128xf32> to vector<1x128xf32>
    %159 = vector.broadcast %158 : vector<1x128xf32> to vector<8x128xf32>
    %160 = arith.mulf %143, %159 : vector<8x128xf32>
    %161 = arith.addf %112, %160 : vector<8x128xf32>
    %c283 = arith.constant 283 : index
    %c0_37 = arith.constant 0 : index
    %162 = vector.load %arg4[%c283, %c0_37] : memref<768x128xf32, #tpu.memory_space<vmem>>, vector<1x128xf32>
    %163 = vector.shape_cast %162 : vector<1x128xf32> to vector<128xf32>
    %164 = vector.shape_cast %163 : vector<128xf32> to vector<1x128xf32>
    %165 = vector.broadcast %164 : vector<1x128xf32> to vector<8x128xf32>
    %166 = arith.mulf %143, %165 : vector<8x128xf32>
    %167 = arith.addf %118, %166 : vector<8x128xf32>
    %c284 = arith.constant 284 : index
    %c0_38 = arith.constant 0 : index
    %168 = vector.load %arg4[%c284, %c0_38] : memref<768x128xf32, #tpu.memory_space<vmem>>, vector<1x128xf32>
    %169 = vector.shape_cast %168 : vector<1x128xf32> to vector<128xf32>
    %170 = vector.shape_cast %169 : vector<128xf32> to vector<1x128xf32>
    %171 = vector.broadcast %170 : vector<1x128xf32> to vector<8x128xf32>
    %172 = arith.mulf %143, %171 : vector<8x128xf32>
    %173 = arith.addf %124, %172 : vector<8x128xf32>
    %c285 = arith.constant 285 : index
    %c0_39 = arith.constant 0 : index
    %174 = vector.load %arg4[%c285, %c0_39] : memref<768x128xf32, #tpu.memory_space<vmem>>, vector<1x128xf32>
    %175 = vector.shape_cast %174 : vector<1x128xf32> to vector<128xf32>
    %176 = vector.shape_cast %175 : vector<128xf32> to vector<1x128xf32>
    %177 = vector.broadcast %176 : vector<1x128xf32> to vector<8x128xf32>
    %178 = arith.mulf %143, %177 : vector<8x128xf32>
    %179 = arith.addf %130, %178 : vector<8x128xf32>
    %c286 = arith.constant 286 : index
    %c0_40 = arith.constant 0 : index
    %180 = vector.load %arg4[%c286, %c0_40] : memref<768x128xf32, #tpu.memory_space<vmem>>, vector<1x128xf32>
    %181 = vector.shape_cast %180 : vector<1x128xf32> to vector<128xf32>
    %182 = vector.shape_cast %181 : vector<128xf32> to vector<1x128xf32>
    %183 = vector.broadcast %182 : vector<1x128xf32> to vector<8x128xf32>
    %184 = arith.mulf %143, %183 : vector<8x128xf32>
    %185 = arith.addf %136, %184 : vector<8x128xf32>
    %c287 = arith.constant 287 : index
    %c0_41 = arith.constant 0 : index
    %186 = vector.load %arg4[%c287, %c0_41] : memref<768x128xf32, #tpu.memory_space<vmem>>, vector<1x128xf32>
    %187 = vector.shape_cast %186 : vector<1x128xf32> to vector<128xf32>
    %188 = vector.shape_cast %187 : vector<128xf32> to vector<1x128xf32>
    %189 = vector.broadcast %188 : vector<1x128xf32> to vector<8x128xf32>
    %190 = arith.mulf %143, %189 : vector<8x128xf32>
    %191 = arith.addf %142, %190 : vector<8x128xf32>
    %c32 = arith.constant 32 : index
    %c0_42 = arith.constant 0 : index
    %192 = vector.load %arg4[%c32, %c0_42] : memref<768x128xf32, #tpu.memory_space<vmem>>, vector<8x128xf32>
    %c288 = arith.constant 288 : index
    %c0_43 = arith.constant 0 : index
    %193 = vector.load %arg4[%c288, %c0_43] : memref<768x128xf32, #tpu.memory_space<vmem>>, vector<1x128xf32>
    %194 = vector.shape_cast %193 : vector<1x128xf32> to vector<128xf32>
    %195 = vector.shape_cast %194 : vector<128xf32> to vector<1x128xf32>
    %196 = vector.broadcast %195 : vector<1x128xf32> to vector<8x128xf32>
    %197 = arith.mulf %192, %196 : vector<8x128xf32>
    %198 = arith.addf %149, %197 : vector<8x128xf32>
    %c289 = arith.constant 289 : index
    %c0_44 = arith.constant 0 : index
    %199 = vector.load %arg4[%c289, %c0_44] : memref<768x128xf32, #tpu.memory_space<vmem>>, vector<1x128xf32>
    %200 = vector.shape_cast %199 : vector<1x128xf32> to vector<128xf32>
    %201 = vector.shape_cast %200 : vector<128xf32> to vector<1x128xf32>
    %202 = vector.broadcast %201 : vector<1x128xf32> to vector<8x128xf32>
    %203 = arith.mulf %192, %202 : vector<8x128xf32>
    %204 = arith.addf %155, %203 : vector<8x128xf32>
    %c290 = arith.constant 290 : index
    %c0_45 = arith.constant 0 : index
    %205 = vector.load %arg4[%c290, %c0_45] : memref<768x128xf32, #tpu.memory_space<vmem>>, vector<1x128xf32>
    %206 = vector.shape_cast %205 : vector<1x128xf32> to vector<128xf32>
    %207 = vector.shape_cast %206 : vector<128xf32> to vector<1x128xf32>
    %208 = vector.broadcast %207 : vector<1x128xf32> to vector<8x128xf32>
    %209 = arith.mulf %192, %208 : vector<8x128xf32>
    %210 = arith.addf %161, %209 : vector<8x128xf32>
    %c291 = arith.constant 291 : index
    %c0_46 = arith.constant 0 : index
    %211 = vector.load %arg4[%c291, %c0_46] : memref<768x128xf32, #tpu.memory_space<vmem>>, vector<1x128xf32>
    %212 = vector.shape_cast %211 : vector<1x128xf32> to vector<128xf32>
    %213 = vector.shape_cast %212 : vector<128xf32> to vector<1x128xf32>
    %214 = vector.broadcast %213 : vector<1x128xf32> to vector<8x128xf32>
    %215 = arith.mulf %192, %214 : vector<8x128xf32>
    %216 = arith.addf %167, %215 : vector<8x128xf32>
    %c292 = arith.constant 292 : index
    %c0_47 = arith.constant 0 : index
    %217 = vector.load %arg4[%c292, %c0_47] : memref<768x128xf32, #tpu.memory_space<vmem>>, vector<1x128xf32>
    %218 = vector.shape_cast %217 : vector<1x128xf32> to vector<128xf32>
    %219 = vector.shape_cast %218 : vector<128xf32> to vector<1x128xf32>
    %220 = vector.broadcast %219 : vector<1x128xf32> to vector<8x128xf32>
    %221 = arith.mulf %192, %220 : vector<8x128xf32>
    %222 = arith.addf %173, %221 : vector<8x128xf32>
    %c293 = arith.constant 293 : index
    %c0_48 = arith.constant 0 : index
    %223 = vector.load %arg4[%c293, %c0_48] : memref<768x128xf32, #tpu.memory_space<vmem>>, vector<1x128xf32>
    %224 = vector.shape_cast %223 : vector<1x128xf32> to vector<128xf32>
    %225 = vector.shape_cast %224 : vector<128xf32> to vector<1x128xf32>
    %226 = vector.broadcast %225 : vector<1x128xf32> to vector<8x128xf32>
    %227 = arith.mulf %192, %226 : vector<8x128xf32>
    %228 = arith.addf %179, %227 : vector<8x128xf32>
    %c294 = arith.constant 294 : index
    %c0_49 = arith.constant 0 : index
    %229 = vector.load %arg4[%c294, %c0_49] : memref<768x128xf32, #tpu.memory_space<vmem>>, vector<1x128xf32>
    %230 = vector.shape_cast %229 : vector<1x128xf32> to vector<128xf32>
    %231 = vector.shape_cast %230 : vector<128xf32> to vector<1x128xf32>
    %232 = vector.broadcast %231 : vector<1x128xf32> to vector<8x128xf32>
    %233 = arith.mulf %192, %232 : vector<8x128xf32>
    %234 = arith.addf %185, %233 : vector<8x128xf32>
    %c295 = arith.constant 295 : index
    %c0_50 = arith.constant 0 : index
    %235 = vector.load %arg4[%c295, %c0_50] : memref<768x128xf32, #tpu.memory_space<vmem>>, vector<1x128xf32>
    %236 = vector.shape_cast %235 : vector<1x128xf32> to vector<128xf32>
    %237 = vector.shape_cast %236 : vector<128xf32> to vector<1x128xf32>
    %238 = vector.broadcast %237 : vector<1x128xf32> to vector<8x128xf32>
    %239 = arith.mulf %192, %238 : vector<8x128xf32>
    %240 = arith.addf %191, %239 : vector<8x128xf32>
    %c40 = arith.constant 40 : index
    %c0_51 = arith.constant 0 : index
    %241 = vector.load %arg4[%c40, %c0_51] : memref<768x128xf32, #tpu.memory_space<vmem>>, vector<8x128xf32>
    %c296 = arith.constant 296 : index
    %c0_52 = arith.constant 0 : index
    %242 = vector.load %arg4[%c296, %c0_52] : memref<768x128xf32, #tpu.memory_space<vmem>>, vector<1x128xf32>
    %243 = vector.shape_cast %242 : vector<1x128xf32> to vector<128xf32>
    %244 = vector.shape_cast %243 : vector<128xf32> to vector<1x128xf32>
    %245 = vector.broadcast %244 : vector<1x128xf32> to vector<8x128xf32>
    %246 = arith.mulf %241, %245 : vector<8x128xf32>
    %247 = arith.addf %198, %246 : vector<8x128xf32>
    %c297 = arith.constant 297 : index
    %c0_53 = arith.constant 0 : index
    %248 = vector.load %arg4[%c297, %c0_53] : memref<768x128xf32, #tpu.memory_space<vmem>>, vector<1x128xf32>
    %249 = vector.shape_cast %248 : vector<1x128xf32> to vector<128xf32>
    %250 = vector.shape_cast %249 : vector<128xf32> to vector<1x128xf32>
    %251 = vector.broadcast %250 : vector<1x128xf32> to vector<8x128xf32>
    %252 = arith.mulf %241, %251 : vector<8x128xf32>
    %253 = arith.addf %204, %252 : vector<8x128xf32>
    %c298 = arith.constant 298 : index
    %c0_54 = arith.constant 0 : index
    %254 = vector.load %arg4[%c298, %c0_54] : memref<768x128xf32, #tpu.memory_space<vmem>>, vector<1x128xf32>
    %255 = vector.shape_cast %254 : vector<1x128xf32> to vector<128xf32>
    %256 = vector.shape_cast %255 : vector<128xf32> to vector<1x128xf32>
    %257 = vector.broadcast %256 : vector<1x128xf32> to vector<8x128xf32>
    %258 = arith.mulf %241, %257 : vector<8x128xf32>
    %259 = arith.addf %210, %258 : vector<8x128xf32>
    %c299 = arith.constant 299 : index
    %c0_55 = arith.constant 0 : index
    %260 = vector.load %arg4[%c299, %c0_55] : memref<768x128xf32, #tpu.memory_space<vmem>>, vector<1x128xf32>
    %261 = vector.shape_cast %260 : vector<1x128xf32> to vector<128xf32>
    %262 = vector.shape_cast %261 : vector<128xf32> to vector<1x128xf32>
    %263 = vector.broadcast %262 : vector<1x128xf32> to vector<8x128xf32>
    %264 = arith.mulf %241, %263 : vector<8x128xf32>
    %265 = arith.addf %216, %264 : vector<8x128xf32>
    %c300 = arith.constant 300 : index
    %c0_56 = arith.constant 0 : index
    %266 = vector.load %arg4[%c300, %c0_56] : memref<768x128xf32, #tpu.memory_space<vmem>>, vector<1x128xf32>
    %267 = vector.shape_cast %266 : vector<1x128xf32> to vector<128xf32>
    %268 = vector.shape_cast %267 : vector<128xf32> to vector<1x128xf32>
    %269 = vector.broadcast %268 : vector<1x128xf32> to vector<8x128xf32>
    %270 = arith.mulf %241, %269 : vector<8x128xf32>
    %271 = arith.addf %222, %270 : vector<8x128xf32>
    %c301 = arith.constant 301 : index
    %c0_57 = arith.constant 0 : index
    %272 = vector.load %arg4[%c301, %c0_57] : memref<768x128xf32, #tpu.memory_space<vmem>>, vector<1x128xf32>
    %273 = vector.shape_cast %272 : vector<1x128xf32> to vector<128xf32>
    %274 = vector.shape_cast %273 : vector<128xf32> to vector<1x128xf32>
    %275 = vector.broadcast %274 : vector<1x128xf32> to vector<8x128xf32>
    %276 = arith.mulf %241, %275 : vector<8x128xf32>
    %277 = arith.addf %228, %276 : vector<8x128xf32>
    %c302 = arith.constant 302 : index
    %c0_58 = arith.constant 0 : index
    %278 = vector.load %arg4[%c302, %c0_58] : memref<768x128xf32, #tpu.memory_space<vmem>>, vector<1x128xf32>
    %279 = vector.shape_cast %278 : vector<1x128xf32> to vector<128xf32>
    %280 = vector.shape_cast %279 : vector<128xf32> to vector<1x128xf32>
    %281 = vector.broadcast %280 : vector<1x128xf32> to vector<8x128xf32>
    %282 = arith.mulf %241, %281 : vector<8x128xf32>
    %283 = arith.addf %234, %282 : vector<8x128xf32>
    %c303 = arith.constant 303 : index
    %c0_59 = arith.constant 0 : index
    %284 = vector.load %arg4[%c303, %c0_59] : memref<768x128xf32, #tpu.memory_space<vmem>>, vector<1x128xf32>
    %285 = vector.shape_cast %284 : vector<1x128xf32> to vector<128xf32>
    %286 = vector.shape_cast %285 : vector<128xf32> to vector<1x128xf32>
    %287 = vector.broadcast %286 : vector<1x128xf32> to vector<8x128xf32>
    %288 = arith.mulf %241, %287 : vector<8x128xf32>
    %289 = arith.addf %240, %288 : vector<8x128xf32>
    %c48 = arith.constant 48 : index
    %c0_60 = arith.constant 0 : index
    %290 = vector.load %arg4[%c48, %c0_60] : memref<768x128xf32, #tpu.memory_space<vmem>>, vector<8x128xf32>
    %c304 = arith.constant 304 : index
    %c0_61 = arith.constant 0 : index
    %291 = vector.load %arg4[%c304, %c0_61] : memref<768x128xf32, #tpu.memory_space<vmem>>, vector<1x128xf32>
    %292 = vector.shape_cast %291 : vector<1x128xf32> to vector<128xf32>
    %293 = vector.shape_cast %292 : vector<128xf32> to vector<1x128xf32>
    %294 = vector.broadcast %293 : vector<1x128xf32> to vector<8x128xf32>
    %295 = arith.mulf %290, %294 : vector<8x128xf32>
    %296 = arith.addf %247, %295 : vector<8x128xf32>
    %c305 = arith.constant 305 : index
    %c0_62 = arith.constant 0 : index
    %297 = vector.load %arg4[%c305, %c0_62] : memref<768x128xf32, #tpu.memory_space<vmem>>, vector<1x128xf32>
    %298 = vector.shape_cast %297 : vector<1x128xf32> to vector<128xf32>
    %299 = vector.shape_cast %298 : vector<128xf32> to vector<1x128xf32>
    %300 = vector.broadcast %299 : vector<1x128xf32> to vector<8x128xf32>
    %301 = arith.mulf %290, %300 : vector<8x128xf32>
    %302 = arith.addf %253, %301 : vector<8x128xf32>
    %c306 = arith.constant 306 : index
    %c0_63 = arith.constant 0 : index
    %303 = vector.load %arg4[%c306, %c0_63] : memref<768x128xf32, #tpu.memory_space<vmem>>, vector<1x128xf32>
    %304 = vector.shape_cast %303 : vector<1x128xf32> to vector<128xf32>
    %305 = vector.shape_cast %304 : vector<128xf32> to vector<1x128xf32>
    %306 = vector.broadcast %305 : vector<1x128xf32> to vector<8x128xf32>
    %307 = arith.mulf %290, %306 : vector<8x128xf32>
    %308 = arith.addf %259, %307 : vector<8x128xf32>
    %c307 = arith.constant 307 : index
    %c0_64 = arith.constant 0 : index
    %309 = vector.load %arg4[%c307, %c0_64] : memref<768x128xf32, #tpu.memory_space<vmem>>, vector<1x128xf32>
    %310 = vector.shape_cast %309 : vector<1x128xf32> to vector<128xf32>
    %311 = vector.shape_cast %310 : vector<128xf32> to vector<1x128xf32>
    %312 = vector.broadcast %311 : vector<1x128xf32> to vector<8x128xf32>
    %313 = arith.mulf %290, %312 : vector<8x128xf32>
    %314 = arith.addf %265, %313 : vector<8x128xf32>
    %c308 = arith.constant 308 : index
    %c0_65 = arith.constant 0 : index
    %315 = vector.load %arg4[%c308, %c0_65] : memref<768x128xf32, #tpu.memory_space<vmem>>, vector<1x128xf32>
    %316 = vector.shape_cast %315 : vector<1x128xf32> to vector<128xf32>
    %317 = vector.shape_cast %316 : vector<128xf32> to vector<1x128xf32>
    %318 = vector.broadcast %317 : vector<1x128xf32> to vector<8x128xf32>
    %319 = arith.mulf %290, %318 : vector<8x128xf32>
    %320 = arith.addf %271, %319 : vector<8x128xf32>
    %c309 = arith.constant 309 : index
    %c0_66 = arith.constant 0 : index
    %321 = vector.load %arg4[%c309, %c0_66] : memref<768x128xf32, #tpu.memory_space<vmem>>, vector<1x128xf32>
    %322 = vector.shape_cast %321 : vector<1x128xf32> to vector<128xf32>
    %323 = vector.shape_cast %322 : vector<128xf32> to vector<1x128xf32>
    %324 = vector.broadcast %323 : vector<1x128xf32> to vector<8x128xf32>
    %325 = arith.mulf %290, %324 : vector<8x128xf32>
    %326 = arith.addf %277, %325 : vector<8x128xf32>
    %c310 = arith.constant 310 : index
    %c0_67 = arith.constant 0 : index
    %327 = vector.load %arg4[%c310, %c0_67] : memref<768x128xf32, #tpu.memory_space<vmem>>, vector<1x128xf32>
    %328 = vector.shape_cast %327 : vector<1x128xf32> to vector<128xf32>
    %329 = vector.shape_cast %328 : vector<128xf32> to vector<1x128xf32>
    %330 = vector.broadcast %329 : vector<1x128xf32> to vector<8x128xf32>
    %331 = arith.mulf %290, %330 : vector<8x128xf32>
    %332 = arith.addf %283, %331 : vector<8x128xf32>
    %c311 = arith.constant 311 : index
    %c0_68 = arith.constant 0 : index
    %333 = vector.load %arg4[%c311, %c0_68] : memref<768x128xf32, #tpu.memory_space<vmem>>, vector<1x128xf32>
    %334 = vector.shape_cast %333 : vector<1x128xf32> to vector<128xf32>
    %335 = vector.shape_cast %334 : vector<128xf32> to vector<1x128xf32>
    %336 = vector.broadcast %335 : vector<1x128xf32> to vector<8x128xf32>
    %337 = arith.mulf %290, %336 : vector<8x128xf32>
    %338 = arith.addf %289, %337 : vector<8x128xf32>
    %c56 = arith.constant 56 : index
    %c0_69 = arith.constant 0 : index
    %339 = vector.load %arg4[%c56, %c0_69] : memref<768x128xf32, #tpu.memory_space<vmem>>, vector<8x128xf32>
    %c312 = arith.constant 312 : index
    %c0_70 = arith.constant 0 : index
    %340 = vector.load %arg4[%c312, %c0_70] : memref<768x128xf32, #tpu.memory_space<vmem>>, vector<1x128xf32>
    %341 = vector.shape_cast %340 : vector<1x128xf32> to vector<128xf32>
    %342 = vector.shape_cast %341 : vector<128xf32> to vector<1x128xf32>
    %343 = vector.broadcast %342 : vector<1x128xf32> to vector<8x128xf32>
    %344 = arith.mulf %339, %343 : vector<8x128xf32>
    %345 = arith.addf %296, %344 : vector<8x128xf32>
    %c313 = arith.constant 313 : index
    %c0_71 = arith.constant 0 : index
    %346 = vector.load %arg4[%c313, %c0_71] : memref<768x128xf32, #tpu.memory_space<vmem>>, vector<1x128xf32>
    %347 = vector.shape_cast %346 : vector<1x128xf32> to vector<128xf32>
    %348 = vector.shape_cast %347 : vector<128xf32> to vector<1x128xf32>
    %349 = vector.broadcast %348 : vector<1x128xf32> to vector<8x128xf32>
    %350 = arith.mulf %339, %349 : vector<8x128xf32>
    %351 = arith.addf %302, %350 : vector<8x128xf32>
    %c314 = arith.constant 314 : index
    %c0_72 = arith.constant 0 : index
    %352 = vector.load %arg4[%c314, %c0_72] : memref<768x128xf32, #tpu.memory_space<vmem>>, vector<1x128xf32>
    %353 = vector.shape_cast %352 : vector<1x128xf32> to vector<128xf32>
    %354 = vector.shape_cast %353 : vector<128xf32> to vector<1x128xf32>
    %355 = vector.broadcast %354 : vector<1x128xf32> to vector<8x128xf32>
    %356 = arith.mulf %339, %355 : vector<8x128xf32>
    %357 = arith.addf %308, %356 : vector<8x128xf32>
    %c315 = arith.constant 315 : index
    %c0_73 = arith.constant 0 : index
    %358 = vector.load %arg4[%c315, %c0_73] : memref<768x128xf32, #tpu.memory_space<vmem>>, vector<1x128xf32>
    %359 = vector.shape_cast %358 : vector<1x128xf32> to vector<128xf32>
    %360 = vector.shape_cast %359 : vector<128xf32> to vector<1x128xf32>
    %361 = vector.broadcast %360 : vector<1x128xf32> to vector<8x128xf32>
    %362 = arith.mulf %339, %361 : vector<8x128xf32>
    %363 = arith.addf %314, %362 : vector<8x128xf32>
    %c316 = arith.constant 316 : index
    %c0_74 = arith.constant 0 : index
    %364 = vector.load %arg4[%c316, %c0_74] : memref<768x128xf32, #tpu.memory_space<vmem>>, vector<1x128xf32>
    %365 = vector.shape_cast %364 : vector<1x128xf32> to vector<128xf32>
    %366 = vector.shape_cast %365 : vector<128xf32> to vector<1x128xf32>
    %367 = vector.broadcast %366 : vector<1x128xf32> to vector<8x128xf32>
    %368 = arith.mulf %339, %367 : vector<8x128xf32>
    %369 = arith.addf %320, %368 : vector<8x128xf32>
    %c317 = arith.constant 317 : index
    %c0_75 = arith.constant 0 : index
    %370 = vector.load %arg4[%c317, %c0_75] : memref<768x128xf32, #tpu.memory_space<vmem>>, vector<1x128xf32>
    %371 = vector.shape_cast %370 : vector<1x128xf32> to vector<128xf32>
    %372 = vector.shape_cast %371 : vector<128xf32> to vector<1x128xf32>
    %373 = vector.broadcast %372 : vector<1x128xf32> to vector<8x128xf32>
    %374 = arith.mulf %339, %373 : vector<8x128xf32>
    %375 = arith.addf %326, %374 : vector<8x128xf32>
    %c318 = arith.constant 318 : index
    %c0_76 = arith.constant 0 : index
    %376 = vector.load %arg4[%c318, %c0_76] : memref<768x128xf32, #tpu.memory_space<vmem>>, vector<1x128xf32>
    %377 = vector.shape_cast %376 : vector<1x128xf32> to vector<128xf32>
    %378 = vector.shape_cast %377 : vector<128xf32> to vector<1x128xf32>
    %379 = vector.broadcast %378 : vector<1x128xf32> to vector<8x128xf32>
    %380 = arith.mulf %339, %379 : vector<8x128xf32>
    %381 = arith.addf %332, %380 : vector<8x128xf32>
    %c319 = arith.constant 319 : index
    %c0_77 = arith.constant 0 : index
    %382 = vector.load %arg4[%c319, %c0_77] : memref<768x128xf32, #tpu.memory_space<vmem>>, vector<1x128xf32>
    %383 = vector.shape_cast %382 : vector<1x128xf32> to vector<128xf32>
    %384 = vector.shape_cast %383 : vector<128xf32> to vector<1x128xf32>
    %385 = vector.broadcast %384 : vector<1x128xf32> to vector<8x128xf32>
    %386 = arith.mulf %339, %385 : vector<8x128xf32>
    %387 = arith.addf %338, %386 : vector<8x128xf32>
    %388 = arith.maximumf %345, %351 : vector<8x128xf32>
    %389 = arith.maximumf %388, %357 : vector<8x128xf32>
    %390 = arith.maximumf %389, %363 : vector<8x128xf32>
    %391 = arith.maximumf %390, %369 : vector<8x128xf32>
    %392 = arith.maximumf %391, %375 : vector<8x128xf32>
    %393 = arith.maximumf %392, %381 : vector<8x128xf32>
    %394 = arith.maximumf %393, %387 : vector<8x128xf32>
    %395 = arith.subf %345, %394 : vector<8x128xf32>
    %396 = math.exp %395 : vector<8x128xf32>
    %397 = arith.subf %351, %394 : vector<8x128xf32>
    %398 = math.exp %397 : vector<8x128xf32>
    %399 = arith.subf %357, %394 : vector<8x128xf32>
    %400 = math.exp %399 : vector<8x128xf32>
    %401 = arith.subf %363, %394 : vector<8x128xf32>
    %402 = math.exp %401 : vector<8x128xf32>
    %403 = arith.subf %369, %394 : vector<8x128xf32>
    %404 = math.exp %403 : vector<8x128xf32>
    %405 = arith.subf %375, %394 : vector<8x128xf32>
    %406 = math.exp %405 : vector<8x128xf32>
    %407 = arith.subf %381, %394 : vector<8x128xf32>
    %408 = math.exp %407 : vector<8x128xf32>
    %409 = arith.subf %387, %394 : vector<8x128xf32>
    %410 = math.exp %409 : vector<8x128xf32>
    %411 = arith.addf %396, %398 : vector<8x128xf32>
    %412 = arith.addf %411, %400 : vector<8x128xf32>
    %413 = arith.addf %412, %402 : vector<8x128xf32>
    %414 = arith.addf %413, %404 : vector<8x128xf32>
    %415 = arith.addf %414, %406 : vector<8x128xf32>
    %416 = arith.addf %415, %408 : vector<8x128xf32>
    %417 = arith.addf %416, %410 : vector<8x128xf32>
    %418 = tpu.reciprocal %417 : vector<8x128xf32> -> vector<8x128xf32>
    %419 = arith.mulf %396, %418 : vector<8x128xf32>
    %420 = arith.mulf %398, %418 : vector<8x128xf32>
    %421 = arith.mulf %400, %418 : vector<8x128xf32>
    %422 = arith.mulf %402, %418 : vector<8x128xf32>
    %423 = arith.mulf %404, %418 : vector<8x128xf32>
    %424 = arith.mulf %406, %418 : vector<8x128xf32>
    %425 = arith.mulf %408, %418 : vector<8x128xf32>
    %426 = arith.mulf %410, %418 : vector<8x128xf32>
    %c512 = arith.constant 512 : index
    %c0_78 = arith.constant 0 : index
    %427 = vector.load %arg4[%c512, %c0_78] : memref<768x128xf32, #tpu.memory_space<vmem>>, vector<1x128xf32>
    %428 = vector.shape_cast %427 : vector<1x128xf32> to vector<128xf32>
    %429 = vector.shape_cast %428 : vector<128xf32> to vector<1x128xf32>
    %430 = vector.broadcast %429 : vector<1x128xf32> to vector<8x128xf32>
    %431 = arith.mulf %419, %430 : vector<8x128xf32>
    %c513 = arith.constant 513 : index
    %c0_79 = arith.constant 0 : index
    %432 = vector.load %arg4[%c513, %c0_79] : memref<768x128xf32, #tpu.memory_space<vmem>>, vector<1x128xf32>
    %433 = vector.shape_cast %432 : vector<1x128xf32> to vector<128xf32>
    %434 = vector.shape_cast %433 : vector<128xf32> to vector<1x128xf32>
    %435 = vector.broadcast %434 : vector<1x128xf32> to vector<8x128xf32>
    %436 = arith.mulf %420, %435 : vector<8x128xf32>
    %437 = arith.addf %431, %436 : vector<8x128xf32>
    %c514 = arith.constant 514 : index
    %c0_80 = arith.constant 0 : index
    %438 = vector.load %arg4[%c514, %c0_80] : memref<768x128xf32, #tpu.memory_space<vmem>>, vector<1x128xf32>
    %439 = vector.shape_cast %438 : vector<1x128xf32> to vector<128xf32>
    %440 = vector.shape_cast %439 : vector<128xf32> to vector<1x128xf32>
    %441 = vector.broadcast %440 : vector<1x128xf32> to vector<8x128xf32>
    %442 = arith.mulf %421, %441 : vector<8x128xf32>
    %443 = arith.addf %437, %442 : vector<8x128xf32>
    %c515 = arith.constant 515 : index
    %c0_81 = arith.constant 0 : index
    %444 = vector.load %arg4[%c515, %c0_81] : memref<768x128xf32, #tpu.memory_space<vmem>>, vector<1x128xf32>
    %445 = vector.shape_cast %444 : vector<1x128xf32> to vector<128xf32>
    %446 = vector.shape_cast %445 : vector<128xf32> to vector<1x128xf32>
    %447 = vector.broadcast %446 : vector<1x128xf32> to vector<8x128xf32>
    %448 = arith.mulf %422, %447 : vector<8x128xf32>
    %449 = arith.addf %443, %448 : vector<8x128xf32>
    %c516 = arith.constant 516 : index
    %c0_82 = arith.constant 0 : index
    %450 = vector.load %arg4[%c516, %c0_82] : memref<768x128xf32, #tpu.memory_space<vmem>>, vector<1x128xf32>
    %451 = vector.shape_cast %450 : vector<1x128xf32> to vector<128xf32>
    %452 = vector.shape_cast %451 : vector<128xf32> to vector<1x128xf32>
    %453 = vector.broadcast %452 : vector<1x128xf32> to vector<8x128xf32>
    %454 = arith.mulf %423, %453 : vector<8x128xf32>
    %455 = arith.addf %449, %454 : vector<8x128xf32>
    %c517 = arith.constant 517 : index
    %c0_83 = arith.constant 0 : index
    %456 = vector.load %arg4[%c517, %c0_83] : memref<768x128xf32, #tpu.memory_space<vmem>>, vector<1x128xf32>
    %457 = vector.shape_cast %456 : vector<1x128xf32> to vector<128xf32>
    %458 = vector.shape_cast %457 : vector<128xf32> to vector<1x128xf32>
    %459 = vector.broadcast %458 : vector<1x128xf32> to vector<8x128xf32>
    %460 = arith.mulf %424, %459 : vector<8x128xf32>
    %461 = arith.addf %455, %460 : vector<8x128xf32>
    %c518 = arith.constant 518 : index
    %c0_84 = arith.constant 0 : index
    %462 = vector.load %arg4[%c518, %c0_84] : memref<768x128xf32, #tpu.memory_space<vmem>>, vector<1x128xf32>
    %463 = vector.shape_cast %462 : vector<1x128xf32> to vector<128xf32>
    %464 = vector.shape_cast %463 : vector<128xf32> to vector<1x128xf32>
    %465 = vector.broadcast %464 : vector<1x128xf32> to vector<8x128xf32>
    %466 = arith.mulf %425, %465 : vector<8x128xf32>
    %467 = arith.addf %461, %466 : vector<8x128xf32>
    %c519 = arith.constant 519 : index
    %c0_85 = arith.constant 0 : index
    %468 = vector.load %arg4[%c519, %c0_85] : memref<768x128xf32, #tpu.memory_space<vmem>>, vector<1x128xf32>
    %469 = vector.shape_cast %468 : vector<1x128xf32> to vector<128xf32>
    %470 = vector.shape_cast %469 : vector<128xf32> to vector<1x128xf32>
    %471 = vector.broadcast %470 : vector<1x128xf32> to vector<8x128xf32>
    %472 = arith.mulf %426, %471 : vector<8x128xf32>
    %473 = arith.addf %467, %472 : vector<8x128xf32>
    %c0_86 = arith.constant 0 : index
    %c0_87 = arith.constant 0 : index
    %c0_88 = arith.constant 0 : index
    %c0_89 = arith.constant 0 : index
    %474 = vector.load %arg3[%c0_86, %c0_87, %c0_88, %c0_89] : memref<4x8x8x128xf32, #tpu.memory_space<vmem>>, vector<1x1x8x128xf32>
    %475 = vector.shape_cast %474 : vector<1x1x8x128xf32> to vector<8x128xf32>
    %476 = vector.shape_cast %473 : vector<8x128xf32> to vector<1x1x8x128xf32>
    tpu.vector_store %arg3[%c0_86, %c0_87, %c0_88, %c0_89], %476 {strides = array<i32>} : memref<4x8x8x128xf32, #tpu.memory_space<vmem>>, vector<1x1x8x128xf32>,
    %c520 = arith.constant 520 : index
    %c0_90 = arith.constant 0 : index
    %477 = vector.load %arg4[%c520, %c0_90] : memref<768x128xf32, #tpu.memory_space<vmem>>, vector<1x128xf32>
    %478 = vector.shape_cast %477 : vector<1x128xf32> to vector<128xf32>
    %479 = vector.shape_cast %478 : vector<128xf32> to vector<1x128xf32>
    %480 = vector.broadcast %479 : vector<1x128xf32> to vector<8x128xf32>
    %481 = arith.mulf %419, %480 : vector<8x128xf32>
    %c521 = arith.constant 521 : index
    %c0_91 = arith.constant 0 : index
    %482 = vector.load %arg4[%c521, %c0_91] : memref<768x128xf32, #tpu.memory_space<vmem>>, vector<1x128xf32>
    %483 = vector.shape_cast %482 : vector<1x128xf32> to vector<128xf32>
    %484 = vector.shape_cast %483 : vector<128xf32> to vector<1x128xf32>
    %485 = vector.broadcast %484 : vector<1x128xf32> to vector<8x128xf32>
    %486 = arith.mulf %420, %485 : vector<8x128xf32>
    %487 = arith.addf %481, %486 : vector<8x128xf32>
    %c522 = arith.constant 522 : index
    %c0_92 = arith.constant 0 : index
    %488 = vector.load %arg4[%c522, %c0_92] : memref<768x128xf32, #tpu.memory_space<vmem>>, vector<1x128xf32>
    %489 = vector.shape_cast %488 : vector<1x128xf32> to vector<128xf32>
    %490 = vector.shape_cast %489 : vector<128xf32> to vector<1x128xf32>
    %491 = vector.broadcast %490 : vector<1x128xf32> to vector<8x128xf32>
    %492 = arith.mulf %421, %491 : vector<8x128xf32>
    %493 = arith.addf %487, %492 : vector<8x128xf32>
    %c523 = arith.constant 523 : index
    %c0_93 = arith.constant 0 : index
    %494 = vector.load %arg4[%c523, %c0_93] : memref<768x128xf32, #tpu.memory_space<vmem>>, vector<1x128xf32>
    %495 = vector.shape_cast %494 : vector<1x128xf32> to vector<128xf32>
    %496 = vector.shape_cast %495 : vector<128xf32> to vector<1x128xf32>
    %497 = vector.broadcast %496 : vector<1x128xf32> to vector<8x128xf32>
    %498 = arith.mulf %422, %497 : vector<8x128xf32>
    %499 = arith.addf %493, %498 : vector<8x128xf32>
    %c524 = arith.constant 524 : index
    %c0_94 = arith.constant 0 : index
    %500 = vector.load %arg4[%c524, %c0_94] : memref<768x128xf32, #tpu.memory_space<vmem>>, vector<1x128xf32>
    %501 = vector.shape_cast %500 : vector<1x128xf32> to vector<128xf32>
    %502 = vector.shape_cast %501 : vector<128xf32> to vector<1x128xf32>
    %503 = vector.broadcast %502 : vector<1x128xf32> to vector<8x128xf32>
    %504 = arith.mulf %423, %503 : vector<8x128xf32>
    %505 = arith.addf %499, %504 : vector<8x128xf32>
    %c525 = arith.constant 525 : index
    %c0_95 = arith.constant 0 : index
    %506 = vector.load %arg4[%c525, %c0_95] : memref<768x128xf32, #tpu.memory_space<vmem>>, vector<1x128xf32>
    %507 = vector.shape_cast %506 : vector<1x128xf32> to vector<128xf32>
    %508 = vector.shape_cast %507 : vector<128xf32> to vector<1x128xf32>
    %509 = vector.broadcast %508 : vector<1x128xf32> to vector<8x128xf32>
    %510 = arith.mulf %424, %509 : vector<8x128xf32>
    %511 = arith.addf %505, %510 : vector<8x128xf32>
    %c526 = arith.constant 526 : index
    %c0_96 = arith.constant 0 : index
    %512 = vector.load %arg4[%c526, %c0_96] : memref<768x128xf32, #tpu.memory_space<vmem>>, vector<1x128xf32>
    %513 = vector.shape_cast %512 : vector<1x128xf32> to vector<128xf32>
    %514 = vector.shape_cast %513 : vector<128xf32> to vector<1x128xf32>
    %515 = vector.broadcast %514 : vector<1x128xf32> to vector<8x128xf32>
    %516 = arith.mulf %425, %515 : vector<8x128xf32>
    %517 = arith.addf %511, %516 : vector<8x128xf32>
    %c527 = arith.constant 527 : index
    %c0_97 = arith.constant 0 : index
    %518 = vector.load %arg4[%c527, %c0_97] : memref<768x128xf32, #tpu.memory_space<vmem>>, vector<1x128xf32>
    %519 = vector.shape_cast %518 : vector<1x128xf32> to vector<128xf32>
    %520 = vector.shape_cast %519 : vector<128xf32> to vector<1x128xf32>
    %521 = vector.broadcast %520 : vector<1x128xf32> to vector<8x128xf32>
    %522 = arith.mulf %426, %521 : vector<8x128xf32>
    %523 = arith.addf %517, %522 : vector<8x128xf32>
    %c0_98 = arith.constant 0 : index
    %c1 = arith.constant 1 : index
    %c0_99 = arith.constant 0 : index
    %c0_100 = arith.constant 0 : index
    %524 = vector.load %arg3[%c0_98, %c1, %c0_99, %c0_100] : memref<4x8x8x128xf32, #tpu.memory_space<vmem>>, vector<1x1x8x128xf32>
    %525 = vector.shape_cast %524 : vector<1x1x8x128xf32> to vector<8x128xf32>
    %526 = vector.shape_cast %523 : vector<8x128xf32> to vector<1x1x8x128xf32>
    tpu.vector_store %arg3[%c0_98, %c1, %c0_99, %c0_100], %526 {strides = array<i32>} : memref<4x8x8x128xf32, #tpu.memory_space<vmem>>, vector<1x1x8x128xf32>,
    %c528 = arith.constant 528 : index
    %c0_101 = arith.constant 0 : index
    %527 = vector.load %arg4[%c528, %c0_101] : memref<768x128xf32, #tpu.memory_space<vmem>>, vector<1x128xf32>
    %528 = vector.shape_cast %527 : vector<1x128xf32> to vector<128xf32>
    %529 = vector.shape_cast %528 : vector<128xf32> to vector<1x128xf32>
    %530 = vector.broadcast %529 : vector<1x128xf32> to vector<8x128xf32>
    %531 = arith.mulf %419, %530 : vector<8x128xf32>
    %c529 = arith.constant 529 : index
    %c0_102 = arith.constant 0 : index
    %532 = vector.load %arg4[%c529, %c0_102] : memref<768x128xf32, #tpu.memory_space<vmem>>, vector<1x128xf32>
    %533 = vector.shape_cast %532 : vector<1x128xf32> to vector<128xf32>
    %534 = vector.shape_cast %533 : vector<128xf32> to vector<1x128xf32>
    %535 = vector.broadcast %534 : vector<1x128xf32> to vector<8x128xf32>
    %536 = arith.mulf %420, %535 : vector<8x128xf32>
    %537 = arith.addf %531, %536 : vector<8x128xf32>
    %c530 = arith.constant 530 : index
    %c0_103 = arith.constant 0 : index
    %538 = vector.load %arg4[%c530, %c0_103] : memref<768x128xf32, #tpu.memory_space<vmem>>, vector<1x128xf32>
    %539 = vector.shape_cast %538 : vector<1x128xf32> to vector<128xf32>
    %540 = vector.shape_cast %539 : vector<128xf32> to vector<1x128xf32>
    %541 = vector.broadcast %540 : vector<1x128xf32> to vector<8x128xf32>
    %542 = arith.mulf %421, %541 : vector<8x128xf32>
    %543 = arith.addf %537, %542 : vector<8x128xf32>
    %c531 = arith.constant 531 : index
    %c0_104 = arith.constant 0 : index
    %544 = vector.load %arg4[%c531, %c0_104] : memref<768x128xf32, #tpu.memory_space<vmem>>, vector<1x128xf32>
    %545 = vector.shape_cast %544 : vector<1x128xf32> to vector<128xf32>
    %546 = vector.shape_cast %545 : vector<128xf32> to vector<1x128xf32>
    %547 = vector.broadcast %546 : vector<1x128xf32> to vector<8x128xf32>
    %548 = arith.mulf %422, %547 : vector<8x128xf32>
    %549 = arith.addf %543, %548 : vector<8x128xf32>
    %c532 = arith.constant 532 : index
    %c0_105 = arith.constant 0 : index
    %550 = vector.load %arg4[%c532, %c0_105] : memref<768x128xf32, #tpu.memory_space<vmem>>, vector<1x128xf32>
    %551 = vector.shape_cast %550 : vector<1x128xf32> to vector<128xf32>
    %552 = vector.shape_cast %551 : vector<128xf32> to vector<1x128xf32>
    %553 = vector.broadcast %552 : vector<1x128xf32> to vector<8x128xf32>
    %554 = arith.mulf %423, %553 : vector<8x128xf32>
    %555 = arith.addf %549, %554 : vector<8x128xf32>
    %c533 = arith.constant 533 : index
    %c0_106 = arith.constant 0 : index
    %556 = vector.load %arg4[%c533, %c0_106] : memref<768x128xf32, #tpu.memory_space<vmem>>, vector<1x128xf32>
    %557 = vector.shape_cast %556 : vector<1x128xf32> to vector<128xf32>
    %558 = vector.shape_cast %557 : vector<128xf32> to vector<1x128xf32>
    %559 = vector.broadcast %558 : vector<1x128xf32> to vector<8x128xf32>
    %560 = arith.mulf %424, %559 : vector<8x128xf32>
    %561 = arith.addf %555, %560 : vector<8x128xf32>
    %c534 = arith.constant 534 : index
    %c0_107 = arith.constant 0 : index
    %562 = vector.load %arg4[%c534, %c0_107] : memref<768x128xf32, #tpu.memory_space<vmem>>, vector<1x128xf32>
    %563 = vector.shape_cast %562 : vector<1x128xf32> to vector<128xf32>
    %564 = vector.shape_cast %563 : vector<128xf32> to vector<1x128xf32>
    %565 = vector.broadcast %564 : vector<1x128xf32> to vector<8x128xf32>
    %566 = arith.mulf %425, %565 : vector<8x128xf32>
    %567 = arith.addf %561, %566 : vector<8x128xf32>
    %c535 = arith.constant 535 : index
    %c0_108 = arith.constant 0 : index
    %568 = vector.load %arg4[%c535, %c0_108] : memref<768x128xf32, #tpu.memory_space<vmem>>, vector<1x128xf32>
    %569 = vector.shape_cast %568 : vector<1x128xf32> to vector<128xf32>
    %570 = vector.shape_cast %569 : vector<128xf32> to vector<1x128xf32>
    %571 = vector.broadcast %570 : vector<1x128xf32> to vector<8x128xf32>
    %572 = arith.mulf %426, %571 : vector<8x128xf32>
    %573 = arith.addf %567, %572 : vector<8x128xf32>
    %c0_109 = arith.constant 0 : index
    %c2 = arith.constant 2 : index
    %c0_110 = arith.constant 0 : index
    %c0_111 = arith.constant 0 : index
    %574 = vector.load %arg3[%c0_109, %c2, %c0_110, %c0_111] : memref<4x8x8x128xf32, #tpu.memory_space<vmem>>, vector<1x1x8x128xf32>
    %575 = vector.shape_cast %574 : vector<1x1x8x128xf32> to vector<8x128xf32>
    %576 = vector.shape_cast %573 : vector<8x128xf32> to vector<1x1x8x128xf32>
    tpu.vector_store %arg3[%c0_109, %c2, %c0_110, %c0_111], %576 {strides = array<i32>} : memref<4x8x8x128xf32, #tpu.memory_space<vmem>>, vector<1x1x8x128xf32>,
    %c536 = arith.constant 536 : index
    %c0_112 = arith.constant 0 : index
    %577 = vector.load %arg4[%c536, %c0_112] : memref<768x128xf32, #tpu.memory_space<vmem>>, vector<1x128xf32>
    %578 = vector.shape_cast %577 : vector<1x128xf32> to vector<128xf32>
    %579 = vector.shape_cast %578 : vector<128xf32> to vector<1x128xf32>
    %580 = vector.broadcast %579 : vector<1x128xf32> to vector<8x128xf32>
    %581 = arith.mulf %419, %580 : vector<8x128xf32>
    %c537 = arith.constant 537 : index
    %c0_113 = arith.constant 0 : index
    %582 = vector.load %arg4[%c537, %c0_113] : memref<768x128xf32, #tpu.memory_space<vmem>>, vector<1x128xf32>
    %583 = vector.shape_cast %582 : vector<1x128xf32> to vector<128xf32>
    %584 = vector.shape_cast %583 : vector<128xf32> to vector<1x128xf32>
    %585 = vector.broadcast %584 : vector<1x128xf32> to vector<8x128xf32>
    %586 = arith.mulf %420, %585 : vector<8x128xf32>
    %587 = arith.addf %581, %586 : vector<8x128xf32>
    %c538 = arith.constant 538 : index
    %c0_114 = arith.constant 0 : index
    %588 = vector.load %arg4[%c538, %c0_114] : memref<768x128xf32, #tpu.memory_space<vmem>>, vector<1x128xf32>
    %589 = vector.shape_cast %588 : vector<1x128xf32> to vector<128xf32>
    %590 = vector.shape_cast %589 : vector<128xf32> to vector<1x128xf32>
    %591 = vector.broadcast %590 : vector<1x128xf32> to vector<8x128xf32>
    %592 = arith.mulf %421, %591 : vector<8x128xf32>
    %593 = arith.addf %587, %592 : vector<8x128xf32>
    %c539 = arith.constant 539 : index
    %c0_115 = arith.constant 0 : index
    %594 = vector.load %arg4[%c539, %c0_115] : memref<768x128xf32, #tpu.memory_space<vmem>>, vector<1x128xf32>
    %595 = vector.shape_cast %594 : vector<1x128xf32> to vector<128xf32>
    %596 = vector.shape_cast %595 : vector<128xf32> to vector<1x128xf32>
    %597 = vector.broadcast %596 : vector<1x128xf32> to vector<8x128xf32>
    %598 = arith.mulf %422, %597 : vector<8x128xf32>
    %599 = arith.addf %593, %598 : vector<8x128xf32>
    %c540 = arith.constant 540 : index
    %c0_116 = arith.constant 0 : index
    %600 = vector.load %arg4[%c540, %c0_116] : memref<768x128xf32, #tpu.memory_space<vmem>>, vector<1x128xf32>
    %601 = vector.shape_cast %600 : vector<1x128xf32> to vector<128xf32>
    %602 = vector.shape_cast %601 : vector<128xf32> to vector<1x128xf32>
    %603 = vector.broadcast %602 : vector<1x128xf32> to vector<8x128xf32>
    %604 = arith.mulf %423, %603 : vector<8x128xf32>
    %605 = arith.addf %599, %604 : vector<8x128xf32>
    %c541 = arith.constant 541 : index
    %c0_117 = arith.constant 0 : index
    %606 = vector.load %arg4[%c541, %c0_117] : memref<768x128xf32, #tpu.memory_space<vmem>>, vector<1x128xf32>
    %607 = vector.shape_cast %606 : vector<1x128xf32> to vector<128xf32>
    %608 = vector.shape_cast %607 : vector<128xf32> to vector<1x128xf32>
    %609 = vector.broadcast %608 : vector<1x128xf32> to vector<8x128xf32>
    %610 = arith.mulf %424, %609 : vector<8x128xf32>
    %611 = arith.addf %605, %610 : vector<8x128xf32>
    %c542 = arith.constant 542 : index
    %c0_118 = arith.constant 0 : index
    %612 = vector.load %arg4[%c542, %c0_118] : memref<768x128xf32, #tpu.memory_space<vmem>>, vector<1x128xf32>
    %613 = vector.shape_cast %612 : vector<1x128xf32> to vector<128xf32>
    %614 = vector.shape_cast %613 : vector<128xf32> to vector<1x128xf32>
    %615 = vector.broadcast %614 : vector<1x128xf32> to vector<8x128xf32>
    %616 = arith.mulf %425, %615 : vector<8x128xf32>
    %617 = arith.addf %611, %616 : vector<8x128xf32>
    %c543 = arith.constant 543 : index
    %c0_119 = arith.constant 0 : index
    %618 = vector.load %arg4[%c543, %c0_119] : memref<768x128xf32, #tpu.memory_space<vmem>>, vector<1x128xf32>
    %619 = vector.shape_cast %618 : vector<1x128xf32> to vector<128xf32>
    %620 = vector.shape_cast %619 : vector<128xf32> to vector<1x128xf32>
    %621 = vector.broadcast %620 : vector<1x128xf32> to vector<8x128xf32>
    %622 = arith.mulf %426, %621 : vector<8x128xf32>
    %623 = arith.addf %617, %622 : vector<8x128xf32>
    %c0_120 = arith.constant 0 : index
    %c3 = arith.constant 3 : index
    %c0_121 = arith.constant 0 : index
    %c0_122 = arith.constant 0 : index
    %624 = vector.load %arg3[%c0_120, %c3, %c0_121, %c0_122] : memref<4x8x8x128xf32, #tpu.memory_space<vmem>>, vector<1x1x8x128xf32>
    %625 = vector.shape_cast %624 : vector<1x1x8x128xf32> to vector<8x128xf32>
    %626 = vector.shape_cast %623 : vector<8x128xf32> to vector<1x1x8x128xf32>
    tpu.vector_store %arg3[%c0_120, %c3, %c0_121, %c0_122], %626 {strides = array<i32>} : memref<4x8x8x128xf32, #tpu.memory_space<vmem>>, vector<1x1x8x128xf32>,
    %c544 = arith.constant 544 : index
    %c0_123 = arith.constant 0 : index
    %627 = vector.load %arg4[%c544, %c0_123] : memref<768x128xf32, #tpu.memory_space<vmem>>, vector<1x128xf32>
    %628 = vector.shape_cast %627 : vector<1x128xf32> to vector<128xf32>
    %629 = vector.shape_cast %628 : vector<128xf32> to vector<1x128xf32>
    %630 = vector.broadcast %629 : vector<1x128xf32> to vector<8x128xf32>
    %631 = arith.mulf %419, %630 : vector<8x128xf32>
    %c545 = arith.constant 545 : index
    %c0_124 = arith.constant 0 : index
    %632 = vector.load %arg4[%c545, %c0_124] : memref<768x128xf32, #tpu.memory_space<vmem>>, vector<1x128xf32>
    %633 = vector.shape_cast %632 : vector<1x128xf32> to vector<128xf32>
    %634 = vector.shape_cast %633 : vector<128xf32> to vector<1x128xf32>
    %635 = vector.broadcast %634 : vector<1x128xf32> to vector<8x128xf32>
    %636 = arith.mulf %420, %635 : vector<8x128xf32>
    %637 = arith.addf %631, %636 : vector<8x128xf32>
    %c546 = arith.constant 546 : index
    %c0_125 = arith.constant 0 : index
    %638 = vector.load %arg4[%c546, %c0_125] : memref<768x128xf32, #tpu.memory_space<vmem>>, vector<1x128xf32>
    %639 = vector.shape_cast %638 : vector<1x128xf32> to vector<128xf32>
    %640 = vector.shape_cast %639 : vector<128xf32> to vector<1x128xf32>
    %641 = vector.broadcast %640 : vector<1x128xf32> to vector<8x128xf32>
    %642 = arith.mulf %421, %641 : vector<8x128xf32>
    %643 = arith.addf %637, %642 : vector<8x128xf32>
    %c547 = arith.constant 547 : index
    %c0_126 = arith.constant 0 : index
    %644 = vector.load %arg4[%c547, %c0_126] : memref<768x128xf32, #tpu.memory_space<vmem>>, vector<1x128xf32>
    %645 = vector.shape_cast %644 : vector<1x128xf32> to vector<128xf32>
    %646 = vector.shape_cast %645 : vector<128xf32> to vector<1x128xf32>
    %647 = vector.broadcast %646 : vector<1x128xf32> to vector<8x128xf32>
    %648 = arith.mulf %422, %647 : vector<8x128xf32>
    %649 = arith.addf %643, %648 : vector<8x128xf32>
    %c548 = arith.constant 548 : index
    %c0_127 = arith.constant 0 : index
    %650 = vector.load %arg4[%c548, %c0_127] : memref<768x128xf32, #tpu.memory_space<vmem>>, vector<1x128xf32>
    %651 = vector.shape_cast %650 : vector<1x128xf32> to vector<128xf32>
    %652 = vector.shape_cast %651 : vector<128xf32> to vector<1x128xf32>
    %653 = vector.broadcast %652 : vector<1x128xf32> to vector<8x128xf32>
    %654 = arith.mulf %423, %653 : vector<8x128xf32>
    %655 = arith.addf %649, %654 : vector<8x128xf32>
    %c549 = arith.constant 549 : index
    %c0_128 = arith.constant 0 : index
    %656 = vector.load %arg4[%c549, %c0_128] : memref<768x128xf32, #tpu.memory_space<vmem>>, vector<1x128xf32>
    %657 = vector.shape_cast %656 : vector<1x128xf32> to vector<128xf32>
    %658 = vector.shape_cast %657 : vector<128xf32> to vector<1x128xf32>
    %659 = vector.broadcast %658 : vector<1x128xf32> to vector<8x128xf32>
    %660 = arith.mulf %424, %659 : vector<8x128xf32>
    %661 = arith.addf %655, %660 : vector<8x128xf32>
    %c550 = arith.constant 550 : index
    %c0_129 = arith.constant 0 : index
    %662 = vector.load %arg4[%c550, %c0_129] : memref<768x128xf32, #tpu.memory_space<vmem>>, vector<1x128xf32>
    %663 = vector.shape_cast %662 : vector<1x128xf32> to vector<128xf32>
    %664 = vector.shape_cast %663 : vector<128xf32> to vector<1x128xf32>
    %665 = vector.broadcast %664 : vector<1x128xf32> to vector<8x128xf32>
    %666 = arith.mulf %425, %665 : vector<8x128xf32>
    %667 = arith.addf %661, %666 : vector<8x128xf32>
    %c551 = arith.constant 551 : index
    %c0_130 = arith.constant 0 : index
    %668 = vector.load %arg4[%c551, %c0_130] : memref<768x128xf32, #tpu.memory_space<vmem>>, vector<1x128xf32>
    %669 = vector.shape_cast %668 : vector<1x128xf32> to vector<128xf32>
    %670 = vector.shape_cast %669 : vector<128xf32> to vector<1x128xf32>
    %671 = vector.broadcast %670 : vector<1x128xf32> to vector<8x128xf32>
    %672 = arith.mulf %426, %671 : vector<8x128xf32>
    %673 = arith.addf %667, %672 : vector<8x128xf32>
    %c0_131 = arith.constant 0 : index
    %c4 = arith.constant 4 : index
    %c0_132 = arith.constant 0 : index
    %c0_133 = arith.constant 0 : index
    %674 = vector.load %arg3[%c0_131, %c4, %c0_132, %c0_133] : memref<4x8x8x128xf32, #tpu.memory_space<vmem>>, vector<1x1x8x128xf32>
    %675 = vector.shape_cast %674 : vector<1x1x8x128xf32> to vector<8x128xf32>
    %676 = vector.shape_cast %673 : vector<8x128xf32> to vector<1x1x8x128xf32>
    tpu.vector_store %arg3[%c0_131, %c4, %c0_132, %c0_133], %676 {strides = array<i32>} : memref<4x8x8x128xf32, #tpu.memory_space<vmem>>, vector<1x1x8x128xf32>,
    %c552 = arith.constant 552 : index
    %c0_134 = arith.constant 0 : index
    %677 = vector.load %arg4[%c552, %c0_134] : memref<768x128xf32, #tpu.memory_space<vmem>>, vector<1x128xf32>
    %678 = vector.shape_cast %677 : vector<1x128xf32> to vector<128xf32>
    %679 = vector.shape_cast %678 : vector<128xf32> to vector<1x128xf32>
    %680 = vector.broadcast %679 : vector<1x128xf32> to vector<8x128xf32>
    %681 = arith.mulf %419, %680 : vector<8x128xf32>
    %c553 = arith.constant 553 : index
    %c0_135 = arith.constant 0 : index
    %682 = vector.load %arg4[%c553, %c0_135] : memref<768x128xf32, #tpu.memory_space<vmem>>, vector<1x128xf32>
    %683 = vector.shape_cast %682 : vector<1x128xf32> to vector<128xf32>
    %684 = vector.shape_cast %683 : vector<128xf32> to vector<1x128xf32>
    %685 = vector.broadcast %684 : vector<1x128xf32> to vector<8x128xf32>
    %686 = arith.mulf %420, %685 : vector<8x128xf32>
    %687 = arith.addf %681, %686 : vector<8x128xf32>
    %c554 = arith.constant 554 : index
    %c0_136 = arith.constant 0 : index
    %688 = vector.load %arg4[%c554, %c0_136] : memref<768x128xf32, #tpu.memory_space<vmem>>, vector<1x128xf32>
    %689 = vector.shape_cast %688 : vector<1x128xf32> to vector<128xf32>
    %690 = vector.shape_cast %689 : vector<128xf32> to vector<1x128xf32>
    %691 = vector.broadcast %690 : vector<1x128xf32> to vector<8x128xf32>
    %692 = arith.mulf %421, %691 : vector<8x128xf32>
    %693 = arith.addf %687, %692 : vector<8x128xf32>
    %c555 = arith.constant 555 : index
    %c0_137 = arith.constant 0 : index
    %694 = vector.load %arg4[%c555, %c0_137] : memref<768x128xf32, #tpu.memory_space<vmem>>, vector<1x128xf32>
    %695 = vector.shape_cast %694 : vector<1x128xf32> to vector<128xf32>
    %696 = vector.shape_cast %695 : vector<128xf32> to vector<1x128xf32>
    %697 = vector.broadcast %696 : vector<1x128xf32> to vector<8x128xf32>
    %698 = arith.mulf %422, %697 : vector<8x128xf32>
    %699 = arith.addf %693, %698 : vector<8x128xf32>
    %c556 = arith.constant 556 : index
    %c0_138 = arith.constant 0 : index
    %700 = vector.load %arg4[%c556, %c0_138] : memref<768x128xf32, #tpu.memory_space<vmem>>, vector<1x128xf32>
    %701 = vector.shape_cast %700 : vector<1x128xf32> to vector<128xf32>
    %702 = vector.shape_cast %701 : vector<128xf32> to vector<1x128xf32>
    %703 = vector.broadcast %702 : vector<1x128xf32> to vector<8x128xf32>
    %704 = arith.mulf %423, %703 : vector<8x128xf32>
    %705 = arith.addf %699, %704 : vector<8x128xf32>
    %c557 = arith.constant 557 : index
    %c0_139 = arith.constant 0 : index
    %706 = vector.load %arg4[%c557, %c0_139] : memref<768x128xf32, #tpu.memory_space<vmem>>, vector<1x128xf32>
    %707 = vector.shape_cast %706 : vector<1x128xf32> to vector<128xf32>
    %708 = vector.shape_cast %707 : vector<128xf32> to vector<1x128xf32>
    %709 = vector.broadcast %708 : vector<1x128xf32> to vector<8x128xf32>
    %710 = arith.mulf %424, %709 : vector<8x128xf32>
    %711 = arith.addf %705, %710 : vector<8x128xf32>
    %c558 = arith.constant 558 : index
    %c0_140 = arith.constant 0 : index
    %712 = vector.load %arg4[%c558, %c0_140] : memref<768x128xf32, #tpu.memory_space<vmem>>, vector<1x128xf32>
    %713 = vector.shape_cast %712 : vector<1x128xf32> to vector<128xf32>
    %714 = vector.shape_cast %713 : vector<128xf32> to vector<1x128xf32>
    %715 = vector.broadcast %714 : vector<1x128xf32> to vector<8x128xf32>
    %716 = arith.mulf %425, %715 : vector<8x128xf32>
    %717 = arith.addf %711, %716 : vector<8x128xf32>
    %c559 = arith.constant 559 : index
    %c0_141 = arith.constant 0 : index
    %718 = vector.load %arg4[%c559, %c0_141] : memref<768x128xf32, #tpu.memory_space<vmem>>, vector<1x128xf32>
    %719 = vector.shape_cast %718 : vector<1x128xf32> to vector<128xf32>
    %720 = vector.shape_cast %719 : vector<128xf32> to vector<1x128xf32>
    %721 = vector.broadcast %720 : vector<1x128xf32> to vector<8x128xf32>
    %722 = arith.mulf %426, %721 : vector<8x128xf32>
    %723 = arith.addf %717, %722 : vector<8x128xf32>
    %c0_142 = arith.constant 0 : index
    %c5 = arith.constant 5 : index
    %c0_143 = arith.constant 0 : index
    %c0_144 = arith.constant 0 : index
    %724 = vector.load %arg3[%c0_142, %c5, %c0_143, %c0_144] : memref<4x8x8x128xf32, #tpu.memory_space<vmem>>, vector<1x1x8x128xf32>
    %725 = vector.shape_cast %724 : vector<1x1x8x128xf32> to vector<8x128xf32>
    %726 = vector.shape_cast %723 : vector<8x128xf32> to vector<1x1x8x128xf32>
    tpu.vector_store %arg3[%c0_142, %c5, %c0_143, %c0_144], %726 {strides = array<i32>} : memref<4x8x8x128xf32, #tpu.memory_space<vmem>>, vector<1x1x8x128xf32>,
    %c560 = arith.constant 560 : index
    %c0_145 = arith.constant 0 : index
    %727 = vector.load %arg4[%c560, %c0_145] : memref<768x128xf32, #tpu.memory_space<vmem>>, vector<1x128xf32>
    %728 = vector.shape_cast %727 : vector<1x128xf32> to vector<128xf32>
    %729 = vector.shape_cast %728 : vector<128xf32> to vector<1x128xf32>
    %730 = vector.broadcast %729 : vector<1x128xf32> to vector<8x128xf32>
    %731 = arith.mulf %419, %730 : vector<8x128xf32>
    %c561 = arith.constant 561 : index
    %c0_146 = arith.constant 0 : index
    %732 = vector.load %arg4[%c561, %c0_146] : memref<768x128xf32, #tpu.memory_space<vmem>>, vector<1x128xf32>
    %733 = vector.shape_cast %732 : vector<1x128xf32> to vector<128xf32>
    %734 = vector.shape_cast %733 : vector<128xf32> to vector<1x128xf32>
    %735 = vector.broadcast %734 : vector<1x128xf32> to vector<8x128xf32>
    %736 = arith.mulf %420, %735 : vector<8x128xf32>
    %737 = arith.addf %731, %736 : vector<8x128xf32>
    %c562 = arith.constant 562 : index
    %c0_147 = arith.constant 0 : index
    %738 = vector.load %arg4[%c562, %c0_147] : memref<768x128xf32, #tpu.memory_space<vmem>>, vector<1x128xf32>
    %739 = vector.shape_cast %738 : vector<1x128xf32> to vector<128xf32>
    %740 = vector.shape_cast %739 : vector<128xf32> to vector<1x128xf32>
    %741 = vector.broadcast %740 : vector<1x128xf32> to vector<8x128xf32>
    %742 = arith.mulf %421, %741 : vector<8x128xf32>
    %743 = arith.addf %737, %742 : vector<8x128xf32>
    %c563 = arith.constant 563 : index
    %c0_148 = arith.constant 0 : index
    %744 = vector.load %arg4[%c563, %c0_148] : memref<768x128xf32, #tpu.memory_space<vmem>>, vector<1x128xf32>
    %745 = vector.shape_cast %744 : vector<1x128xf32> to vector<128xf32>
    %746 = vector.shape_cast %745 : vector<128xf32> to vector<1x128xf32>
    %747 = vector.broadcast %746 : vector<1x128xf32> to vector<8x128xf32>
    %748 = arith.mulf %422, %747 : vector<8x128xf32>
    %749 = arith.addf %743, %748 : vector<8x128xf32>
    %c564 = arith.constant 564 : index
    %c0_149 = arith.constant 0 : index
    %750 = vector.load %arg4[%c564, %c0_149] : memref<768x128xf32, #tpu.memory_space<vmem>>, vector<1x128xf32>
    %751 = vector.shape_cast %750 : vector<1x128xf32> to vector<128xf32>
    %752 = vector.shape_cast %751 : vector<128xf32> to vector<1x128xf32>
    %753 = vector.broadcast %752 : vector<1x128xf32> to vector<8x128xf32>
    %754 = arith.mulf %423, %753 : vector<8x128xf32>
    %755 = arith.addf %749, %754 : vector<8x128xf32>
    %c565 = arith.constant 565 : index
    %c0_150 = arith.constant 0 : index
    %756 = vector.load %arg4[%c565, %c0_150] : memref<768x128xf32, #tpu.memory_space<vmem>>, vector<1x128xf32>
    %757 = vector.shape_cast %756 : vector<1x128xf32> to vector<128xf32>
    %758 = vector.shape_cast %757 : vector<128xf32> to vector<1x128xf32>
    %759 = vector.broadcast %758 : vector<1x128xf32> to vector<8x128xf32>
    %760 = arith.mulf %424, %759 : vector<8x128xf32>
    %761 = arith.addf %755, %760 : vector<8x128xf32>
    %c566 = arith.constant 566 : index
    %c0_151 = arith.constant 0 : index
    %762 = vector.load %arg4[%c566, %c0_151] : memref<768x128xf32, #tpu.memory_space<vmem>>, vector<1x128xf32>
    %763 = vector.shape_cast %762 : vector<1x128xf32> to vector<128xf32>
    %764 = vector.shape_cast %763 : vector<128xf32> to vector<1x128xf32>
    %765 = vector.broadcast %764 : vector<1x128xf32> to vector<8x128xf32>
    %766 = arith.mulf %425, %765 : vector<8x128xf32>
    %767 = arith.addf %761, %766 : vector<8x128xf32>
    %c567 = arith.constant 567 : index
    %c0_152 = arith.constant 0 : index
    %768 = vector.load %arg4[%c567, %c0_152] : memref<768x128xf32, #tpu.memory_space<vmem>>, vector<1x128xf32>
    %769 = vector.shape_cast %768 : vector<1x128xf32> to vector<128xf32>
    %770 = vector.shape_cast %769 : vector<128xf32> to vector<1x128xf32>
    %771 = vector.broadcast %770 : vector<1x128xf32> to vector<8x128xf32>
    %772 = arith.mulf %426, %771 : vector<8x128xf32>
    %773 = arith.addf %767, %772 : vector<8x128xf32>
    %c0_153 = arith.constant 0 : index
    %c6 = arith.constant 6 : index
    %c0_154 = arith.constant 0 : index
    %c0_155 = arith.constant 0 : index
    %774 = vector.load %arg3[%c0_153, %c6, %c0_154, %c0_155] : memref<4x8x8x128xf32, #tpu.memory_space<vmem>>, vector<1x1x8x128xf32>
    %775 = vector.shape_cast %774 : vector<1x1x8x128xf32> to vector<8x128xf32>
    %776 = vector.shape_cast %773 : vector<8x128xf32> to vector<1x1x8x128xf32>
    tpu.vector_store %arg3[%c0_153, %c6, %c0_154, %c0_155], %776 {strides = array<i32>} : memref<4x8x8x128xf32, #tpu.memory_space<vmem>>, vector<1x1x8x128xf32>,
    %c568 = arith.constant 568 : index
    %c0_156 = arith.constant 0 : index
    %777 = vector.load %arg4[%c568, %c0_156] : memref<768x128xf32, #tpu.memory_space<vmem>>, vector<1x128xf32>
    %778 = vector.shape_cast %777 : vector<1x128xf32> to vector<128xf32>
    %779 = vector.shape_cast %778 : vector<128xf32> to vector<1x128xf32>
    %780 = vector.broadcast %779 : vector<1x128xf32> to vector<8x128xf32>
    %781 = arith.mulf %419, %780 : vector<8x128xf32>
    %c569 = arith.constant 569 : index
    %c0_157 = arith.constant 0 : index
    %782 = vector.load %arg4[%c569, %c0_157] : memref<768x128xf32, #tpu.memory_space<vmem>>, vector<1x128xf32>
    %783 = vector.shape_cast %782 : vector<1x128xf32> to vector<128xf32>
    %784 = vector.shape_cast %783 : vector<128xf32> to vector<1x128xf32>
    %785 = vector.broadcast %784 : vector<1x128xf32> to vector<8x128xf32>
    %786 = arith.mulf %420, %785 : vector<8x128xf32>
    %787 = arith.addf %781, %786 : vector<8x128xf32>
    %c570 = arith.constant 570 : index
    %c0_158 = arith.constant 0 : index
    %788 = vector.load %arg4[%c570, %c0_158] : memref<768x128xf32, #tpu.memory_space<vmem>>, vector<1x128xf32>
    %789 = vector.shape_cast %788 : vector<1x128xf32> to vector<128xf32>
    %790 = vector.shape_cast %789 : vector<128xf32> to vector<1x128xf32>
    %791 = vector.broadcast %790 : vector<1x128xf32> to vector<8x128xf32>
    %792 = arith.mulf %421, %791 : vector<8x128xf32>
    %793 = arith.addf %787, %792 : vector<8x128xf32>
    %c571 = arith.constant 571 : index
    %c0_159 = arith.constant 0 : index
    %794 = vector.load %arg4[%c571, %c0_159] : memref<768x128xf32, #tpu.memory_space<vmem>>, vector<1x128xf32>
    %795 = vector.shape_cast %794 : vector<1x128xf32> to vector<128xf32>
    %796 = vector.shape_cast %795 : vector<128xf32> to vector<1x128xf32>
    %797 = vector.broadcast %796 : vector<1x128xf32> to vector<8x128xf32>
    %798 = arith.mulf %422, %797 : vector<8x128xf32>
    %799 = arith.addf %793, %798 : vector<8x128xf32>
    %c572 = arith.constant 572 : index
    %c0_160 = arith.constant 0 : index
    %800 = vector.load %arg4[%c572, %c0_160] : memref<768x128xf32, #tpu.memory_space<vmem>>, vector<1x128xf32>
    %801 = vector.shape_cast %800 : vector<1x128xf32> to vector<128xf32>
    %802 = vector.shape_cast %801 : vector<128xf32> to vector<1x128xf32>
    %803 = vector.broadcast %802 : vector<1x128xf32> to vector<8x128xf32>
    %804 = arith.mulf %423, %803 : vector<8x128xf32>
    %805 = arith.addf %799, %804 : vector<8x128xf32>
    %c573 = arith.constant 573 : index
    %c0_161 = arith.constant 0 : index
    %806 = vector.load %arg4[%c573, %c0_161] : memref<768x128xf32, #tpu.memory_space<vmem>>, vector<1x128xf32>
    %807 = vector.shape_cast %806 : vector<1x128xf32> to vector<128xf32>
    %808 = vector.shape_cast %807 : vector<128xf32> to vector<1x128xf32>
    %809 = vector.broadcast %808 : vector<1x128xf32> to vector<8x128xf32>
    %810 = arith.mulf %424, %809 : vector<8x128xf32>
    %811 = arith.addf %805, %810 : vector<8x128xf32>
    %c574 = arith.constant 574 : index
    %c0_162 = arith.constant 0 : index
    %812 = vector.load %arg4[%c574, %c0_162] : memref<768x128xf32, #tpu.memory_space<vmem>>, vector<1x128xf32>
    %813 = vector.shape_cast %812 : vector<1x128xf32> to vector<128xf32>
    %814 = vector.shape_cast %813 : vector<128xf32> to vector<1x128xf32>
    %815 = vector.broadcast %814 : vector<1x128xf32> to vector<8x128xf32>
    %816 = arith.mulf %425, %815 : vector<8x128xf32>
    %817 = arith.addf %811, %816 : vector<8x128xf32>
    %c575 = arith.constant 575 : index
    %c0_163 = arith.constant 0 : index
    %818 = vector.load %arg4[%c575, %c0_163] : memref<768x128xf32, #tpu.memory_space<vmem>>, vector<1x128xf32>
    %819 = vector.shape_cast %818 : vector<1x128xf32> to vector<128xf32>
    %820 = vector.shape_cast %819 : vector<128xf32> to vector<1x128xf32>
    %821 = vector.broadcast %820 : vector<1x128xf32> to vector<8x128xf32>
    %822 = arith.mulf %426, %821 : vector<8x128xf32>
    %823 = arith.addf %817, %822 : vector<8x128xf32>
    %c0_164 = arith.constant 0 : index
    %c7 = arith.constant 7 : index
    %c0_165 = arith.constant 0 : index
    %c0_166 = arith.constant 0 : index
    %824 = vector.load %arg3[%c0_164, %c7, %c0_165, %c0_166] : memref<4x8x8x128xf32, #tpu.memory_space<vmem>>, vector<1x1x8x128xf32>
    %825 = vector.shape_cast %824 : vector<1x1x8x128xf32> to vector<8x128xf32>
    %826 = vector.shape_cast %823 : vector<8x128xf32> to vector<1x1x8x128xf32>
    tpu.vector_store %arg3[%c0_164, %c7, %c0_165, %c0_166], %826 {strides = array<i32>} : memref<4x8x8x128xf32, #tpu.memory_space<vmem>>, vector<1x1x8x128xf32>,
    %c64 = arith.constant 64 : index
    %c0_167 = arith.constant 0 : index
    %827 = vector.load %arg4[%c64, %c0_167] : memref<768x128xf32, #tpu.memory_space<vmem>>, vector<8x128xf32>
    %c320 = arith.constant 320 : index
    %c0_168 = arith.constant 0 : index
    %828 = vector.load %arg4[%c320, %c0_168] : memref<768x128xf32, #tpu.memory_space<vmem>>, vector<1x128xf32>
    %829 = vector.shape_cast %828 : vector<1x128xf32> to vector<128xf32>
    %830 = vector.shape_cast %829 : vector<128xf32> to vector<1x128xf32>
    %831 = vector.broadcast %830 : vector<1x128xf32> to vector<8x128xf32>
    %832 = arith.mulf %827, %831 : vector<8x128xf32>
    %c321 = arith.constant 321 : index
    %c0_169 = arith.constant 0 : index
    %833 = vector.load %arg4[%c321, %c0_169] : memref<768x128xf32, #tpu.memory_space<vmem>>, vector<1x128xf32>
    %834 = vector.shape_cast %833 : vector<1x128xf32> to vector<128xf32>
    %835 = vector.shape_cast %834 : vector<128xf32> to vector<1x128xf32>
    %836 = vector.broadcast %835 : vector<1x128xf32> to vector<8x128xf32>
    %837 = arith.mulf %827, %836 : vector<8x128xf32>
    %c322 = arith.constant 322 : index
    %c0_170 = arith.constant 0 : index
    %838 = vector.load %arg4[%c322, %c0_170] : memref<768x128xf32, #tpu.memory_space<vmem>>, vector<1x128xf32>
    %839 = vector.shape_cast %838 : vector<1x128xf32> to vector<128xf32>
    %840 = vector.shape_cast %839 : vector<128xf32> to vector<1x128xf32>
    %841 = vector.broadcast %840 : vector<1x128xf32> to vector<8x128xf32>
    %842 = arith.mulf %827, %841 : vector<8x128xf32>
    %c323 = arith.constant 323 : index
    %c0_171 = arith.constant 0 : index
    %843 = vector.load %arg4[%c323, %c0_171] : memref<768x128xf32, #tpu.memory_space<vmem>>, vector<1x128xf32>
    %844 = vector.shape_cast %843 : vector<1x128xf32> to vector<128xf32>
    %845 = vector.shape_cast %844 : vector<128xf32> to vector<1x128xf32>
    %846 = vector.broadcast %845 : vector<1x128xf32> to vector<8x128xf32>
    %847 = arith.mulf %827, %846 : vector<8x128xf32>
    %c324 = arith.constant 324 : index
    %c0_172 = arith.constant 0 : index
    %848 = vector.load %arg4[%c324, %c0_172] : memref<768x128xf32, #tpu.memory_space<vmem>>, vector<1x128xf32>
    %849 = vector.shape_cast %848 : vector<1x128xf32> to vector<128xf32>
    %850 = vector.shape_cast %849 : vector<128xf32> to vector<1x128xf32>
    %851 = vector.broadcast %850 : vector<1x128xf32> to vector<8x128xf32>
    %852 = arith.mulf %827, %851 : vector<8x128xf32>
    %c325 = arith.constant 325 : index
    %c0_173 = arith.constant 0 : index
    %853 = vector.load %arg4[%c325, %c0_173] : memref<768x128xf32, #tpu.memory_space<vmem>>, vector<1x128xf32>
    %854 = vector.shape_cast %853 : vector<1x128xf32> to vector<128xf32>
    %855 = vector.shape_cast %854 : vector<128xf32> to vector<1x128xf32>
    %856 = vector.broadcast %855 : vector<1x128xf32> to vector<8x128xf32>
    %857 = arith.mulf %827, %856 : vector<8x128xf32>
    %c326 = arith.constant 326 : index
    %c0_174 = arith.constant 0 : index
    %858 = vector.load %arg4[%c326, %c0_174] : memref<768x128xf32, #tpu.memory_space<vmem>>, vector<1x128xf32>
    %859 = vector.shape_cast %858 : vector<1x128xf32> to vector<128xf32>
    %860 = vector.shape_cast %859 : vector<128xf32> to vector<1x128xf32>
    %861 = vector.broadcast %860 : vector<1x128xf32> to vector<8x128xf32>
    %862 = arith.mulf %827, %861 : vector<8x128xf32>
    %c327 = arith.constant 327 : index
    %c0_175 = arith.constant 0 : index
    %863 = vector.load %arg4[%c327, %c0_175] : memref<768x128xf32, #tpu.memory_space<vmem>>, vector<1x128xf32>
    %864 = vector.shape_cast %863 : vector<1x128xf32> to vector<128xf32>
    %865 = vector.shape_cast %864 : vector<128xf32> to vector<1x128xf32>
    %866 = vector.broadcast %865 : vector<1x128xf32> to vector<8x128xf32>
    %867 = arith.mulf %827, %866 : vector<8x128xf32>
    %c72 = arith.constant 72 : index
    %c0_176 = arith.constant 0 : index
    %868 = vector.load %arg4[%c72, %c0_176] : memref<768x128xf32, #tpu.memory_space<vmem>>, vector<8x128xf32>
    %c328 = arith.constant 328 : index
    %c0_177 = arith.constant 0 : index
    %869 = vector.load %arg4[%c328, %c0_177] : memref<768x128xf32, #tpu.memory_space<vmem>>, vector<1x128xf32>
    %870 = vector.shape_cast %869 : vector<1x128xf32> to vector<128xf32>
    %871 = vector.shape_cast %870 : vector<128xf32> to vector<1x128xf32>
    %872 = vector.broadcast %871 : vector<1x128xf32> to vector<8x128xf32>
    %873 = arith.mulf %868, %872 : vector<8x128xf32>
    %874 = arith.addf %832, %873 : vector<8x128xf32>
    %c329 = arith.constant 329 : index
    %c0_178 = arith.constant 0 : index
    %875 = vector.load %arg4[%c329, %c0_178] : memref<768x128xf32, #tpu.memory_space<vmem>>, vector<1x128xf32>
    %876 = vector.shape_cast %875 : vector<1x128xf32> to vector<128xf32>
    %877 = vector.shape_cast %876 : vector<128xf32> to vector<1x128xf32>
    %878 = vector.broadcast %877 : vector<1x128xf32> to vector<8x128xf32>
    %879 = arith.mulf %868, %878 : vector<8x128xf32>
    %880 = arith.addf %837, %879 : vector<8x128xf32>
    %c330 = arith.constant 330 : index
    %c0_179 = arith.constant 0 : index
    %881 = vector.load %arg4[%c330, %c0_179] : memref<768x128xf32, #tpu.memory_space<vmem>>, vector<1x128xf32>
    %882 = vector.shape_cast %881 : vector<1x128xf32> to vector<128xf32>
    %883 = vector.shape_cast %882 : vector<128xf32> to vector<1x128xf32>
    %884 = vector.broadcast %883 : vector<1x128xf32> to vector<8x128xf32>
    %885 = arith.mulf %868, %884 : vector<8x128xf32>
    %886 = arith.addf %842, %885 : vector<8x128xf32>
    %c331 = arith.constant 331 : index
    %c0_180 = arith.constant 0 : index
    %887 = vector.load %arg4[%c331, %c0_180] : memref<768x128xf32, #tpu.memory_space<vmem>>, vector<1x128xf32>
    %888 = vector.shape_cast %887 : vector<1x128xf32> to vector<128xf32>
    %889 = vector.shape_cast %888 : vector<128xf32> to vector<1x128xf32>
    %890 = vector.broadcast %889 : vector<1x128xf32> to vector<8x128xf32>
    %891 = arith.mulf %868, %890 : vector<8x128xf32>
    %892 = arith.addf %847, %891 : vector<8x128xf32>
    %c332 = arith.constant 332 : index
    %c0_181 = arith.constant 0 : index
    %893 = vector.load %arg4[%c332, %c0_181] : memref<768x128xf32, #tpu.memory_space<vmem>>, vector<1x128xf32>
    %894 = vector.shape_cast %893 : vector<1x128xf32> to vector<128xf32>
    %895 = vector.shape_cast %894 : vector<128xf32> to vector<1x128xf32>
    %896 = vector.broadcast %895 : vector<1x128xf32> to vector<8x128xf32>
    %897 = arith.mulf %868, %896 : vector<8x128xf32>
    %898 = arith.addf %852, %897 : vector<8x128xf32>
    %c333 = arith.constant 333 : index
    %c0_182 = arith.constant 0 : index
    %899 = vector.load %arg4[%c333, %c0_182] : memref<768x128xf32, #tpu.memory_space<vmem>>, vector<1x128xf32>
    %900 = vector.shape_cast %899 : vector<1x128xf32> to vector<128xf32>
    %901 = vector.shape_cast %900 : vector<128xf32> to vector<1x128xf32>
    %902 = vector.broadcast %901 : vector<1x128xf32> to vector<8x128xf32>
    %903 = arith.mulf %868, %902 : vector<8x128xf32>
    %904 = arith.addf %857, %903 : vector<8x128xf32>
    %c334 = arith.constant 334 : index
    %c0_183 = arith.constant 0 : index
    %905 = vector.load %arg4[%c334, %c0_183] : memref<768x128xf32, #tpu.memory_space<vmem>>, vector<1x128xf32>
    %906 = vector.shape_cast %905 : vector<1x128xf32> to vector<128xf32>
    %907 = vector.shape_cast %906 : vector<128xf32> to vector<1x128xf32>
    %908 = vector.broadcast %907 : vector<1x128xf32> to vector<8x128xf32>
    %909 = arith.mulf %868, %908 : vector<8x128xf32>
    %910 = arith.addf %862, %909 : vector<8x128xf32>
    %c335 = arith.constant 335 : index
    %c0_184 = arith.constant 0 : index
    %911 = vector.load %arg4[%c335, %c0_184] : memref<768x128xf32, #tpu.memory_space<vmem>>, vector<1x128xf32>
    %912 = vector.shape_cast %911 : vector<1x128xf32> to vector<128xf32>
    %913 = vector.shape_cast %912 : vector<128xf32> to vector<1x128xf32>
    %914 = vector.broadcast %913 : vector<1x128xf32> to vector<8x128xf32>
    %915 = arith.mulf %868, %914 : vector<8x128xf32>
    %916 = arith.addf %867, %915 : vector<8x128xf32>
    %c80 = arith.constant 80 : index
    %c0_185 = arith.constant 0 : index
    %917 = vector.load %arg4[%c80, %c0_185] : memref<768x128xf32, #tpu.memory_space<vmem>>, vector<8x128xf32>
    %c336 = arith.constant 336 : index
    %c0_186 = arith.constant 0 : index
    %918 = vector.load %arg4[%c336, %c0_186] : memref<768x128xf32, #tpu.memory_space<vmem>>, vector<1x128xf32>
    %919 = vector.shape_cast %918 : vector<1x128xf32> to vector<128xf32>
    %920 = vector.shape_cast %919 : vector<128xf32> to vector<1x128xf32>
    %921 = vector.broadcast %920 : vector<1x128xf32> to vector<8x128xf32>
    %922 = arith.mulf %917, %921 : vector<8x128xf32>
    %923 = arith.addf %874, %922 : vector<8x128xf32>
    %c337 = arith.constant 337 : index
    %c0_187 = arith.constant 0 : index
    %924 = vector.load %arg4[%c337, %c0_187] : memref<768x128xf32, #tpu.memory_space<vmem>>, vector<1x128xf32>
    %925 = vector.shape_cast %924 : vector<1x128xf32> to vector<128xf32>
    %926 = vector.shape_cast %925 : vector<128xf32> to vector<1x128xf32>
    %927 = vector.broadcast %926 : vector<1x128xf32> to vector<8x128xf32>
    %928 = arith.mulf %917, %927 : vector<8x128xf32>
    %929 = arith.addf %880, %928 : vector<8x128xf32>
    %c338 = arith.constant 338 : index
    %c0_188 = arith.constant 0 : index
    %930 = vector.load %arg4[%c338, %c0_188] : memref<768x128xf32, #tpu.memory_space<vmem>>, vector<1x128xf32>
    %931 = vector.shape_cast %930 : vector<1x128xf32> to vector<128xf32>
    %932 = vector.shape_cast %931 : vector<128xf32> to vector<1x128xf32>
    %933 = vector.broadcast %932 : vector<1x128xf32> to vector<8x128xf32>
    %934 = arith.mulf %917, %933 : vector<8x128xf32>
    %935 = arith.addf %886, %934 : vector<8x128xf32>
    %c339 = arith.constant 339 : index
    %c0_189 = arith.constant 0 : index
    %936 = vector.load %arg4[%c339, %c0_189] : memref<768x128xf32, #tpu.memory_space<vmem>>, vector<1x128xf32>
    %937 = vector.shape_cast %936 : vector<1x128xf32> to vector<128xf32>
    %938 = vector.shape_cast %937 : vector<128xf32> to vector<1x128xf32>
    %939 = vector.broadcast %938 : vector<1x128xf32> to vector<8x128xf32>
    %940 = arith.mulf %917, %939 : vector<8x128xf32>
    %941 = arith.addf %892, %940 : vector<8x128xf32>
    %c340 = arith.constant 340 : index
    %c0_190 = arith.constant 0 : index
    %942 = vector.load %arg4[%c340, %c0_190] : memref<768x128xf32, #tpu.memory_space<vmem>>, vector<1x128xf32>
    %943 = vector.shape_cast %942 : vector<1x128xf32> to vector<128xf32>
    %944 = vector.shape_cast %943 : vector<128xf32> to vector<1x128xf32>
    %945 = vector.broadcast %944 : vector<1x128xf32> to vector<8x128xf32>
    %946 = arith.mulf %917, %945 : vector<8x128xf32>
    %947 = arith.addf %898, %946 : vector<8x128xf32>
    %c341 = arith.constant 341 : index
    %c0_191 = arith.constant 0 : index
    %948 = vector.load %arg4[%c341, %c0_191] : memref<768x128xf32, #tpu.memory_space<vmem>>, vector<1x128xf32>
    %949 = vector.shape_cast %948 : vector<1x128xf32> to vector<128xf32>
    %950 = vector.shape_cast %949 : vector<128xf32> to vector<1x128xf32>
    %951 = vector.broadcast %950 : vector<1x128xf32> to vector<8x128xf32>
    %952 = arith.mulf %917, %951 : vector<8x128xf32>
    %953 = arith.addf %904, %952 : vector<8x128xf32>
    %c342 = arith.constant 342 : index
    %c0_192 = arith.constant 0 : index
    %954 = vector.load %arg4[%c342, %c0_192] : memref<768x128xf32, #tpu.memory_space<vmem>>, vector<1x128xf32>
    %955 = vector.shape_cast %954 : vector<1x128xf32> to vector<128xf32>
    %956 = vector.shape_cast %955 : vector<128xf32> to vector<1x128xf32>
    %957 = vector.broadcast %956 : vector<1x128xf32> to vector<8x128xf32>
    %958 = arith.mulf %917, %957 : vector<8x128xf32>
    %959 = arith.addf %910, %958 : vector<8x128xf32>
    %c343 = arith.constant 343 : index
    %c0_193 = arith.constant 0 : index
    %960 = vector.load %arg4[%c343, %c0_193] : memref<768x128xf32, #tpu.memory_space<vmem>>, vector<1x128xf32>
    %961 = vector.shape_cast %960 : vector<1x128xf32> to vector<128xf32>
    %962 = vector.shape_cast %961 : vector<128xf32> to vector<1x128xf32>
    %963 = vector.broadcast %962 : vector<1x128xf32> to vector<8x128xf32>
    %964 = arith.mulf %917, %963 : vector<8x128xf32>
    %965 = arith.addf %916, %964 : vector<8x128xf32>
    %c88 = arith.constant 88 : index
    %c0_194 = arith.constant 0 : index
    %966 = vector.load %arg4[%c88, %c0_194] : memref<768x128xf32, #tpu.memory_space<vmem>>, vector<8x128xf32>
    %c344 = arith.constant 344 : index
    %c0_195 = arith.constant 0 : index
    %967 = vector.load %arg4[%c344, %c0_195] : memref<768x128xf32, #tpu.memory_space<vmem>>, vector<1x128xf32>
    %968 = vector.shape_cast %967 : vector<1x128xf32> to vector<128xf32>
    %969 = vector.shape_cast %968 : vector<128xf32> to vector<1x128xf32>
    %970 = vector.broadcast %969 : vector<1x128xf32> to vector<8x128xf32>
    %971 = arith.mulf %966, %970 : vector<8x128xf32>
    %972 = arith.addf %923, %971 : vector<8x128xf32>
    %c345 = arith.constant 345 : index
    %c0_196 = arith.constant 0 : index
    %973 = vector.load %arg4[%c345, %c0_196] : memref<768x128xf32, #tpu.memory_space<vmem>>, vector<1x128xf32>
    %974 = vector.shape_cast %973 : vector<1x128xf32> to vector<128xf32>
    %975 = vector.shape_cast %974 : vector<128xf32> to vector<1x128xf32>
    %976 = vector.broadcast %975 : vector<1x128xf32> to vector<8x128xf32>
    %977 = arith.mulf %966, %976 : vector<8x128xf32>
    %978 = arith.addf %929, %977 : vector<8x128xf32>
    %c346 = arith.constant 346 : index
    %c0_197 = arith.constant 0 : index
    %979 = vector.load %arg4[%c346, %c0_197] : memref<768x128xf32, #tpu.memory_space<vmem>>, vector<1x128xf32>
    %980 = vector.shape_cast %979 : vector<1x128xf32> to vector<128xf32>
    %981 = vector.shape_cast %980 : vector<128xf32> to vector<1x128xf32>
    %982 = vector.broadcast %981 : vector<1x128xf32> to vector<8x128xf32>
    %983 = arith.mulf %966, %982 : vector<8x128xf32>
    %984 = arith.addf %935, %983 : vector<8x128xf32>
    %c347 = arith.constant 347 : index
    %c0_198 = arith.constant 0 : index
    %985 = vector.load %arg4[%c347, %c0_198] : memref<768x128xf32, #tpu.memory_space<vmem>>, vector<1x128xf32>
    %986 = vector.shape_cast %985 : vector<1x128xf32> to vector<128xf32>
    %987 = vector.shape_cast %986 : vector<128xf32> to vector<1x128xf32>
    %988 = vector.broadcast %987 : vector<1x128xf32> to vector<8x128xf32>
    %989 = arith.mulf %966, %988 : vector<8x128xf32>
    %990 = arith.addf %941, %989 : vector<8x128xf32>
    %c348 = arith.constant 348 : index
    %c0_199 = arith.constant 0 : index
    %991 = vector.load %arg4[%c348, %c0_199] : memref<768x128xf32, #tpu.memory_space<vmem>>, vector<1x128xf32>
    %992 = vector.shape_cast %991 : vector<1x128xf32> to vector<128xf32>
    %993 = vector.shape_cast %992 : vector<128xf32> to vector<1x128xf32>
    %994 = vector.broadcast %993 : vector<1x128xf32> to vector<8x128xf32>
    %995 = arith.mulf %966, %994 : vector<8x128xf32>
    %996 = arith.addf %947, %995 : vector<8x128xf32>
    %c349 = arith.constant 349 : index
    %c0_200 = arith.constant 0 : index
    %997 = vector.load %arg4[%c349, %c0_200] : memref<768x128xf32, #tpu.memory_space<vmem>>, vector<1x128xf32>
    %998 = vector.shape_cast %997 : vector<1x128xf32> to vector<128xf32>
    %999 = vector.shape_cast %998 : vector<128xf32> to vector<1x128xf32>
    %1000 = vector.broadcast %999 : vector<1x128xf32> to vector<8x128xf32>
    %1001 = arith.mulf %966, %1000 : vector<8x128xf32>
    %1002 = arith.addf %953, %1001 : vector<8x128xf32>
    %c350 = arith.constant 350 : index
    %c0_201 = arith.constant 0 : index
    %1003 = vector.load %arg4[%c350, %c0_201] : memref<768x128xf32, #tpu.memory_space<vmem>>, vector<1x128xf32>
    %1004 = vector.shape_cast %1003 : vector<1x128xf32> to vector<128xf32>
    %1005 = vector.shape_cast %1004 : vector<128xf32> to vector<1x128xf32>
    %1006 = vector.broadcast %1005 : vector<1x128xf32> to vector<8x128xf32>
    %1007 = arith.mulf %966, %1006 : vector<8x128xf32>
    %1008 = arith.addf %959, %1007 : vector<8x128xf32>
    %c351 = arith.constant 351 : index
    %c0_202 = arith.constant 0 : index
    %1009 = vector.load %arg4[%c351, %c0_202] : memref<768x128xf32, #tpu.memory_space<vmem>>, vector<1x128xf32>
    %1010 = vector.shape_cast %1009 : vector<1x128xf32> to vector<128xf32>
    %1011 = vector.shape_cast %1010 : vector<128xf32> to vector<1x128xf32>
    %1012 = vector.broadcast %1011 : vector<1x128xf32> to vector<8x128xf32>
    %1013 = arith.mulf %966, %1012 : vector<8x128xf32>
    %1014 = arith.addf %965, %1013 : vector<8x128xf32>
    %c96 = arith.constant 96 : index
    %c0_203 = arith.constant 0 : index
    %1015 = vector.load %arg4[%c96, %c0_203] : memref<768x128xf32, #tpu.memory_space<vmem>>, vector<8x128xf32>
    %c352 = arith.constant 352 : index
    %c0_204 = arith.constant 0 : index
    %1016 = vector.load %arg4[%c352, %c0_204] : memref<768x128xf32, #tpu.memory_space<vmem>>, vector<1x128xf32>
    %1017 = vector.shape_cast %1016 : vector<1x128xf32> to vector<128xf32>
    %1018 = vector.shape_cast %1017 : vector<128xf32> to vector<1x128xf32>
    %1019 = vector.broadcast %1018 : vector<1x128xf32> to vector<8x128xf32>
    %1020 = arith.mulf %1015, %1019 : vector<8x128xf32>
    %1021 = arith.addf %972, %1020 : vector<8x128xf32>
    %c353 = arith.constant 353 : index
    %c0_205 = arith.constant 0 : index
    %1022 = vector.load %arg4[%c353, %c0_205] : memref<768x128xf32, #tpu.memory_space<vmem>>, vector<1x128xf32>
    %1023 = vector.shape_cast %1022 : vector<1x128xf32> to vector<128xf32>
    %1024 = vector.shape_cast %1023 : vector<128xf32> to vector<1x128xf32>
    %1025 = vector.broadcast %1024 : vector<1x128xf32> to vector<8x128xf32>
    %1026 = arith.mulf %1015, %1025 : vector<8x128xf32>
    %1027 = arith.addf %978, %1026 : vector<8x128xf32>
    %c354 = arith.constant 354 : index
    %c0_206 = arith.constant 0 : index
    %1028 = vector.load %arg4[%c354, %c0_206] : memref<768x128xf32, #tpu.memory_space<vmem>>, vector<1x128xf32>
    %1029 = vector.shape_cast %1028 : vector<1x128xf32> to vector<128xf32>
    %1030 = vector.shape_cast %1029 : vector<128xf32> to vector<1x128xf32>
    %1031 = vector.broadcast %1030 : vector<1x128xf32> to vector<8x128xf32>
    %1032 = arith.mulf %1015, %1031 : vector<8x128xf32>
    %1033 = arith.addf %984, %1032 : vector<8x128xf32>
    %c355 = arith.constant 355 : index
    %c0_207 = arith.constant 0 : index
    %1034 = vector.load %arg4[%c355, %c0_207] : memref<768x128xf32, #tpu.memory_space<vmem>>, vector<1x128xf32>
    %1035 = vector.shape_cast %1034 : vector<1x128xf32> to vector<128xf32>
    %1036 = vector.shape_cast %1035 : vector<128xf32> to vector<1x128xf32>
    %1037 = vector.broadcast %1036 : vector<1x128xf32> to vector<8x128xf32>
    %1038 = arith.mulf %1015, %1037 : vector<8x128xf32>
    %1039 = arith.addf %990, %1038 : vector<8x128xf32>
    %c356 = arith.constant 356 : index
    %c0_208 = arith.constant 0 : index
    %1040 = vector.load %arg4[%c356, %c0_208] : memref<768x128xf32, #tpu.memory_space<vmem>>, vector<1x128xf32>
    %1041 = vector.shape_cast %1040 : vector<1x128xf32> to vector<128xf32>
    %1042 = vector.shape_cast %1041 : vector<128xf32> to vector<1x128xf32>
    %1043 = vector.broadcast %1042 : vector<1x128xf32> to vector<8x128xf32>
    %1044 = arith.mulf %1015, %1043 : vector<8x128xf32>
    %1045 = arith.addf %996, %1044 : vector<8x128xf32>
    %c357 = arith.constant 357 : index
    %c0_209 = arith.constant 0 : index
    %1046 = vector.load %arg4[%c357, %c0_209] : memref<768x128xf32, #tpu.memory_space<vmem>>, vector<1x128xf32>
    %1047 = vector.shape_cast %1046 : vector<1x128xf32> to vector<128xf32>
    %1048 = vector.shape_cast %1047 : vector<128xf32> to vector<1x128xf32>
    %1049 = vector.broadcast %1048 : vector<1x128xf32> to vector<8x128xf32>
    %1050 = arith.mulf %1015, %1049 : vector<8x128xf32>
    %1051 = arith.addf %1002, %1050 : vector<8x128xf32>
    %c358 = arith.constant 358 : index
    %c0_210 = arith.constant 0 : index
    %1052 = vector.load %arg4[%c358, %c0_210] : memref<768x128xf32, #tpu.memory_space<vmem>>, vector<1x128xf32>
    %1053 = vector.shape_cast %1052 : vector<1x128xf32> to vector<128xf32>
    %1054 = vector.shape_cast %1053 : vector<128xf32> to vector<1x128xf32>
    %1055 = vector.broadcast %1054 : vector<1x128xf32> to vector<8x128xf32>
    %1056 = arith.mulf %1015, %1055 : vector<8x128xf32>
    %1057 = arith.addf %1008, %1056 : vector<8x128xf32>
    %c359 = arith.constant 359 : index
    %c0_211 = arith.constant 0 : index
    %1058 = vector.load %arg4[%c359, %c0_211] : memref<768x128xf32, #tpu.memory_space<vmem>>, vector<1x128xf32>
    %1059 = vector.shape_cast %1058 : vector<1x128xf32> to vector<128xf32>
    %1060 = vector.shape_cast %1059 : vector<128xf32> to vector<1x128xf32>
    %1061 = vector.broadcast %1060 : vector<1x128xf32> to vector<8x128xf32>
    %1062 = arith.mulf %1015, %1061 : vector<8x128xf32>
    %1063 = arith.addf %1014, %1062 : vector<8x128xf32>
    %c104 = arith.constant 104 : index
    %c0_212 = arith.constant 0 : index
    %1064 = vector.load %arg4[%c104, %c0_212] : memref<768x128xf32, #tpu.memory_space<vmem>>, vector<8x128xf32>
    %c360 = arith.constant 360 : index
    %c0_213 = arith.constant 0 : index
    %1065 = vector.load %arg4[%c360, %c0_213] : memref<768x128xf32, #tpu.memory_space<vmem>>, vector<1x128xf32>
    %1066 = vector.shape_cast %1065 : vector<1x128xf32> to vector<128xf32>
    %1067 = vector.shape_cast %1066 : vector<128xf32> to vector<1x128xf32>
    %1068 = vector.broadcast %1067 : vector<1x128xf32> to vector<8x128xf32>
    %1069 = arith.mulf %1064, %1068 : vector<8x128xf32>
    %1070 = arith.addf %1021, %1069 : vector<8x128xf32>
    %c361 = arith.constant 361 : index
    %c0_214 = arith.constant 0 : index
    %1071 = vector.load %arg4[%c361, %c0_214] : memref<768x128xf32, #tpu.memory_space<vmem>>, vector<1x128xf32>
    %1072 = vector.shape_cast %1071 : vector<1x128xf32> to vector<128xf32>
    %1073 = vector.shape_cast %1072 : vector<128xf32> to vector<1x128xf32>
    %1074 = vector.broadcast %1073 : vector<1x128xf32> to vector<8x128xf32>
    %1075 = arith.mulf %1064, %1074 : vector<8x128xf32>
    %1076 = arith.addf %1027, %1075 : vector<8x128xf32>
    %c362 = arith.constant 362 : index
    %c0_215 = arith.constant 0 : index
    %1077 = vector.load %arg4[%c362, %c0_215] : memref<768x128xf32, #tpu.memory_space<vmem>>, vector<1x128xf32>
    %1078 = vector.shape_cast %1077 : vector<1x128xf32> to vector<128xf32>
    %1079 = vector.shape_cast %1078 : vector<128xf32> to vector<1x128xf32>
    %1080 = vector.broadcast %1079 : vector<1x128xf32> to vector<8x128xf32>
    %1081 = arith.mulf %1064, %1080 : vector<8x128xf32>
    %1082 = arith.addf %1033, %1081 : vector<8x128xf32>
    %c363 = arith.constant 363 : index
    %c0_216 = arith.constant 0 : index
    %1083 = vector.load %arg4[%c363, %c0_216] : memref<768x128xf32, #tpu.memory_space<vmem>>, vector<1x128xf32>
    %1084 = vector.shape_cast %1083 : vector<1x128xf32> to vector<128xf32>
    %1085 = vector.shape_cast %1084 : vector<128xf32> to vector<1x128xf32>
    %1086 = vector.broadcast %1085 : vector<1x128xf32> to vector<8x128xf32>
    %1087 = arith.mulf %1064, %1086 : vector<8x128xf32>
    %1088 = arith.addf %1039, %1087 : vector<8x128xf32>
    %c364 = arith.constant 364 : index
    %c0_217 = arith.constant 0 : index
    %1089 = vector.load %arg4[%c364, %c0_217] : memref<768x128xf32, #tpu.memory_space<vmem>>, vector<1x128xf32>
    %1090 = vector.shape_cast %1089 : vector<1x128xf32> to vector<128xf32>
    %1091 = vector.shape_cast %1090 : vector<128xf32> to vector<1x128xf32>
    %1092 = vector.broadcast %1091 : vector<1x128xf32> to vector<8x128xf32>
    %1093 = arith.mulf %1064, %1092 : vector<8x128xf32>
    %1094 = arith.addf %1045, %1093 : vector<8x128xf32>
    %c365 = arith.constant 365 : index
    %c0_218 = arith.constant 0 : index
    %1095 = vector.load %arg4[%c365, %c0_218] : memref<768x128xf32, #tpu.memory_space<vmem>>, vector<1x128xf32>
    %1096 = vector.shape_cast %1095 : vector<1x128xf32> to vector<128xf32>
    %1097 = vector.shape_cast %1096 : vector<128xf32> to vector<1x128xf32>
    %1098 = vector.broadcast %1097 : vector<1x128xf32> to vector<8x128xf32>
    %1099 = arith.mulf %1064, %1098 : vector<8x128xf32>
    %1100 = arith.addf %1051, %1099 : vector<8x128xf32>
    %c366 = arith.constant 366 : index
    %c0_219 = arith.constant 0 : index
    %1101 = vector.load %arg4[%c366, %c0_219] : memref<768x128xf32, #tpu.memory_space<vmem>>, vector<1x128xf32>
    %1102 = vector.shape_cast %1101 : vector<1x128xf32> to vector<128xf32>
    %1103 = vector.shape_cast %1102 : vector<128xf32> to vector<1x128xf32>
    %1104 = vector.broadcast %1103 : vector<1x128xf32> to vector<8x128xf32>
    %1105 = arith.mulf %1064, %1104 : vector<8x128xf32>
    %1106 = arith.addf %1057, %1105 : vector<8x128xf32>
    %c367 = arith.constant 367 : index
    %c0_220 = arith.constant 0 : index
    %1107 = vector.load %arg4[%c367, %c0_220] : memref<768x128xf32, #tpu.memory_space<vmem>>, vector<1x128xf32>
    %1108 = vector.shape_cast %1107 : vector<1x128xf32> to vector<128xf32>
    %1109 = vector.shape_cast %1108 : vector<128xf32> to vector<1x128xf32>
    %1110 = vector.broadcast %1109 : vector<1x128xf32> to vector<8x128xf32>
    %1111 = arith.mulf %1064, %1110 : vector<8x128xf32>
    %1112 = arith.addf %1063, %1111 : vector<8x128xf32>
    %c112 = arith.constant 112 : index
    %c0_221 = arith.constant 0 : index
    %1113 = vector.load %arg4[%c112, %c0_221] : memref<768x128xf32, #tpu.memory_space<vmem>>, vector<8x128xf32>
    %c368 = arith.constant 368 : index
    %c0_222 = arith.constant 0 : index
    %1114 = vector.load %arg4[%c368, %c0_222] : memref<768x128xf32, #tpu.memory_space<vmem>>, vector<1x128xf32>
    %1115 = vector.shape_cast %1114 : vector<1x128xf32> to vector<128xf32>
    %1116 = vector.shape_cast %1115 : vector<128xf32> to vector<1x128xf32>
    %1117 = vector.broadcast %1116 : vector<1x128xf32> to vector<8x128xf32>
    %1118 = arith.mulf %1113, %1117 : vector<8x128xf32>
    %1119 = arith.addf %1070, %1118 : vector<8x128xf32>
    %c369 = arith.constant 369 : index
    %c0_223 = arith.constant 0 : index
    %1120 = vector.load %arg4[%c369, %c0_223] : memref<768x128xf32, #tpu.memory_space<vmem>>, vector<1x128xf32>
    %1121 = vector.shape_cast %1120 : vector<1x128xf32> to vector<128xf32>
    %1122 = vector.shape_cast %1121 : vector<128xf32> to vector<1x128xf32>
    %1123 = vector.broadcast %1122 : vector<1x128xf32> to vector<8x128xf32>
    %1124 = arith.mulf %1113, %1123 : vector<8x128xf32>
    %1125 = arith.addf %1076, %1124 : vector<8x128xf32>
    %c370 = arith.constant 370 : index
    %c0_224 = arith.constant 0 : index
    %1126 = vector.load %arg4[%c370, %c0_224] : memref<768x128xf32, #tpu.memory_space<vmem>>, vector<1x128xf32>
    %1127 = vector.shape_cast %1126 : vector<1x128xf32> to vector<128xf32>
    %1128 = vector.shape_cast %1127 : vector<128xf32> to vector<1x128xf32>
    %1129 = vector.broadcast %1128 : vector<1x128xf32> to vector<8x128xf32>
    %1130 = arith.mulf %1113, %1129 : vector<8x128xf32>
    %1131 = arith.addf %1082, %1130 : vector<8x128xf32>
    %c371 = arith.constant 371 : index
    %c0_225 = arith.constant 0 : index
    %1132 = vector.load %arg4[%c371, %c0_225] : memref<768x128xf32, #tpu.memory_space<vmem>>, vector<1x128xf32>
    %1133 = vector.shape_cast %1132 : vector<1x128xf32> to vector<128xf32>
    %1134 = vector.shape_cast %1133 : vector<128xf32> to vector<1x128xf32>
    %1135 = vector.broadcast %1134 : vector<1x128xf32> to vector<8x128xf32>
    %1136 = arith.mulf %1113, %1135 : vector<8x128xf32>
    %1137 = arith.addf %1088, %1136 : vector<8x128xf32>
    %c372 = arith.constant 372 : index
    %c0_226 = arith.constant 0 : index
    %1138 = vector.load %arg4[%c372, %c0_226] : memref<768x128xf32, #tpu.memory_space<vmem>>, vector<1x128xf32>
    %1139 = vector.shape_cast %1138 : vector<1x128xf32> to vector<128xf32>
    %1140 = vector.shape_cast %1139 : vector<128xf32> to vector<1x128xf32>
    %1141 = vector.broadcast %1140 : vector<1x128xf32> to vector<8x128xf32>
    %1142 = arith.mulf %1113, %1141 : vector<8x128xf32>
    %1143 = arith.addf %1094, %1142 : vector<8x128xf32>
    %c373 = arith.constant 373 : index
    %c0_227 = arith.constant 0 : index
    %1144 = vector.load %arg4[%c373, %c0_227] : memref<768x128xf32, #tpu.memory_space<vmem>>, vector<1x128xf32>
    %1145 = vector.shape_cast %1144 : vector<1x128xf32> to vector<128xf32>
    %1146 = vector.shape_cast %1145 : vector<128xf32> to vector<1x128xf32>
    %1147 = vector.broadcast %1146 : vector<1x128xf32> to vector<8x128xf32>
    %1148 = arith.mulf %1113, %1147 : vector<8x128xf32>
    %1149 = arith.addf %1100, %1148 : vector<8x128xf32>
    %c374 = arith.constant 374 : index
    %c0_228 = arith.constant 0 : index
    %1150 = vector.load %arg4[%c374, %c0_228] : memref<768x128xf32, #tpu.memory_space<vmem>>, vector<1x128xf32>
    %1151 = vector.shape_cast %1150 : vector<1x128xf32> to vector<128xf32>
    %1152 = vector.shape_cast %1151 : vector<128xf32> to vector<1x128xf32>
    %1153 = vector.broadcast %1152 : vector<1x128xf32> to vector<8x128xf32>
    %1154 = arith.mulf %1113, %1153 : vector<8x128xf32>
    %1155 = arith.addf %1106, %1154 : vector<8x128xf32>
    %c375 = arith.constant 375 : index
    %c0_229 = arith.constant 0 : index
    %1156 = vector.load %arg4[%c375, %c0_229] : memref<768x128xf32, #tpu.memory_space<vmem>>, vector<1x128xf32>
    %1157 = vector.shape_cast %1156 : vector<1x128xf32> to vector<128xf32>
    %1158 = vector.shape_cast %1157 : vector<128xf32> to vector<1x128xf32>
    %1159 = vector.broadcast %1158 : vector<1x128xf32> to vector<8x128xf32>
    %1160 = arith.mulf %1113, %1159 : vector<8x128xf32>
    %1161 = arith.addf %1112, %1160 : vector<8x128xf32>
    %c120 = arith.constant 120 : index
    %c0_230 = arith.constant 0 : index
    %1162 = vector.load %arg4[%c120, %c0_230] : memref<768x128xf32, #tpu.memory_space<vmem>>, vector<8x128xf32>
    %c376 = arith.constant 376 : index
    %c0_231 = arith.constant 0 : index
    %1163 = vector.load %arg4[%c376, %c0_231] : memref<768x128xf32, #tpu.memory_space<vmem>>, vector<1x128xf32>
    %1164 = vector.shape_cast %1163 : vector<1x128xf32> to vector<128xf32>
    %1165 = vector.shape_cast %1164 : vector<128xf32> to vector<1x128xf32>
    %1166 = vector.broadcast %1165 : vector<1x128xf32> to vector<8x128xf32>
    %1167 = arith.mulf %1162, %1166 : vector<8x128xf32>
    %1168 = arith.addf %1119, %1167 : vector<8x128xf32>
    %c377 = arith.constant 377 : index
    %c0_232 = arith.constant 0 : index
    %1169 = vector.load %arg4[%c377, %c0_232] : memref<768x128xf32, #tpu.memory_space<vmem>>, vector<1x128xf32>
    %1170 = vector.shape_cast %1169 : vector<1x128xf32> to vector<128xf32>
    %1171 = vector.shape_cast %1170 : vector<128xf32> to vector<1x128xf32>
    %1172 = vector.broadcast %1171 : vector<1x128xf32> to vector<8x128xf32>
    %1173 = arith.mulf %1162, %1172 : vector<8x128xf32>
    %1174 = arith.addf %1125, %1173 : vector<8x128xf32>
    %c378 = arith.constant 378 : index
    %c0_233 = arith.constant 0 : index
    %1175 = vector.load %arg4[%c378, %c0_233] : memref<768x128xf32, #tpu.memory_space<vmem>>, vector<1x128xf32>
    %1176 = vector.shape_cast %1175 : vector<1x128xf32> to vector<128xf32>
    %1177 = vector.shape_cast %1176 : vector<128xf32> to vector<1x128xf32>
    %1178 = vector.broadcast %1177 : vector<1x128xf32> to vector<8x128xf32>
    %1179 = arith.mulf %1162, %1178 : vector<8x128xf32>
    %1180 = arith.addf %1131, %1179 : vector<8x128xf32>
    %c379 = arith.constant 379 : index
    %c0_234 = arith.constant 0 : index
    %1181 = vector.load %arg4[%c379, %c0_234] : memref<768x128xf32, #tpu.memory_space<vmem>>, vector<1x128xf32>
    %1182 = vector.shape_cast %1181 : vector<1x128xf32> to vector<128xf32>
    %1183 = vector.shape_cast %1182 : vector<128xf32> to vector<1x128xf32>
    %1184 = vector.broadcast %1183 : vector<1x128xf32> to vector<8x128xf32>
    %1185 = arith.mulf %1162, %1184 : vector<8x128xf32>
    %1186 = arith.addf %1137, %1185 : vector<8x128xf32>
    %c380 = arith.constant 380 : index
    %c0_235 = arith.constant 0 : index
    %1187 = vector.load %arg4[%c380, %c0_235] : memref<768x128xf32, #tpu.memory_space<vmem>>, vector<1x128xf32>
    %1188 = vector.shape_cast %1187 : vector<1x128xf32> to vector<128xf32>
    %1189 = vector.shape_cast %1188 : vector<128xf32> to vector<1x128xf32>
    %1190 = vector.broadcast %1189 : vector<1x128xf32> to vector<8x128xf32>
    %1191 = arith.mulf %1162, %1190 : vector<8x128xf32>
    %1192 = arith.addf %1143, %1191 : vector<8x128xf32>
    %c381 = arith.constant 381 : index
    %c0_236 = arith.constant 0 : index
    %1193 = vector.load %arg4[%c381, %c0_236] : memref<768x128xf32, #tpu.memory_space<vmem>>, vector<1x128xf32>
    %1194 = vector.shape_cast %1193 : vector<1x128xf32> to vector<128xf32>
    %1195 = vector.shape_cast %1194 : vector<128xf32> to vector<1x128xf32>
    %1196 = vector.broadcast %1195 : vector<1x128xf32> to vector<8x128xf32>
    %1197 = arith.mulf %1162, %1196 : vector<8x128xf32>
    %1198 = arith.addf %1149, %1197 : vector<8x128xf32>
    %c382 = arith.constant 382 : index
    %c0_237 = arith.constant 0 : index
    %1199 = vector.load %arg4[%c382, %c0_237] : memref<768x128xf32, #tpu.memory_space<vmem>>, vector<1x128xf32>
    %1200 = vector.shape_cast %1199 : vector<1x128xf32> to vector<128xf32>
    %1201 = vector.shape_cast %1200 : vector<128xf32> to vector<1x128xf32>
    %1202 = vector.broadcast %1201 : vector<1x128xf32> to vector<8x128xf32>
    %1203 = arith.mulf %1162, %1202 : vector<8x128xf32>
    %1204 = arith.addf %1155, %1203 : vector<8x128xf32>
    %c383 = arith.constant 383 : index
    %c0_238 = arith.constant 0 : index
    %1205 = vector.load %arg4[%c383, %c0_238] : memref<768x128xf32, #tpu.memory_space<vmem>>, vector<1x128xf32>
    %1206 = vector.shape_cast %1205 : vector<1x128xf32> to vector<128xf32>
    %1207 = vector.shape_cast %1206 : vector<128xf32> to vector<1x128xf32>
    %1208 = vector.broadcast %1207 : vector<1x128xf32> to vector<8x128xf32>
    %1209 = arith.mulf %1162, %1208 : vector<8x128xf32>
    %1210 = arith.addf %1161, %1209 : vector<8x128xf32>
    %1211 = arith.maximumf %1168, %1174 : vector<8x128xf32>
    %1212 = arith.maximumf %1211, %1180 : vector<8x128xf32>
    %1213 = arith.maximumf %1212, %1186 : vector<8x128xf32>
    %1214 = arith.maximumf %1213, %1192 : vector<8x128xf32>
    %1215 = arith.maximumf %1214, %1198 : vector<8x128xf32>
    %1216 = arith.maximumf %1215, %1204 : vector<8x128xf32>
    %1217 = arith.maximumf %1216, %1210 : vector<8x128xf32>
    %1218 = arith.subf %1168, %1217 : vector<8x128xf32>
    %1219 = math.exp %1218 : vector<8x128xf32>
    %1220 = arith.subf %1174, %1217 : vector<8x128xf32>
    %1221 = math.exp %1220 : vector<8x128xf32>
    %1222 = arith.subf %1180, %1217 : vector<8x128xf32>
    %1223 = math.exp %1222 : vector<8x128xf32>
    %1224 = arith.subf %1186, %1217 : vector<8x128xf32>
    %1225 = math.exp %1224 : vector<8x128xf32>
    %1226 = arith.subf %1192, %1217 : vector<8x128xf32>
    %1227 = math.exp %1226 : vector<8x128xf32>
    %1228 = arith.subf %1198, %1217 : vector<8x128xf32>
    %1229 = math.exp %1228 : vector<8x128xf32>
    %1230 = arith.subf %1204, %1217 : vector<8x128xf32>
    %1231 = math.exp %1230 : vector<8x128xf32>
    %1232 = arith.subf %1210, %1217 : vector<8x128xf32>
    %1233 = math.exp %1232 : vector<8x128xf32>
    %1234 = arith.addf %1219, %1221 : vector<8x128xf32>
    %1235 = arith.addf %1234, %1223 : vector<8x128xf32>
    %1236 = arith.addf %1235, %1225 : vector<8x128xf32>
    %1237 = arith.addf %1236, %1227 : vector<8x128xf32>
    %1238 = arith.addf %1237, %1229 : vector<8x128xf32>
    %1239 = arith.addf %1238, %1231 : vector<8x128xf32>
    %1240 = arith.addf %1239, %1233 : vector<8x128xf32>
    %1241 = tpu.reciprocal %1240 : vector<8x128xf32> -> vector<8x128xf32>
    %1242 = arith.mulf %1219, %1241 : vector<8x128xf32>
    %1243 = arith.mulf %1221, %1241 : vector<8x128xf32>
    %1244 = arith.mulf %1223, %1241 : vector<8x128xf32>
    %1245 = arith.mulf %1225, %1241 : vector<8x128xf32>
    %1246 = arith.mulf %1227, %1241 : vector<8x128xf32>
    %1247 = arith.mulf %1229, %1241 : vector<8x128xf32>
    %1248 = arith.mulf %1231, %1241 : vector<8x128xf32>
    %1249 = arith.mulf %1233, %1241 : vector<8x128xf32>
    %c576 = arith.constant 576 : index
    %c0_239 = arith.constant 0 : index
    %1250 = vector.load %arg4[%c576, %c0_239] : memref<768x128xf32, #tpu.memory_space<vmem>>, vector<1x128xf32>
    %1251 = vector.shape_cast %1250 : vector<1x128xf32> to vector<128xf32>
    %1252 = vector.shape_cast %1251 : vector<128xf32> to vector<1x128xf32>
    %1253 = vector.broadcast %1252 : vector<1x128xf32> to vector<8x128xf32>
    %1254 = arith.mulf %1242, %1253 : vector<8x128xf32>
    %c577 = arith.constant 577 : index
    %c0_240 = arith.constant 0 : index
    %1255 = vector.load %arg4[%c577, %c0_240] : memref<768x128xf32, #tpu.memory_space<vmem>>, vector<1x128xf32>
    %1256 = vector.shape_cast %1255 : vector<1x128xf32> to vector<128xf32>
    %1257 = vector.shape_cast %1256 : vector<128xf32> to vector<1x128xf32>
    %1258 = vector.broadcast %1257 : vector<1x128xf32> to vector<8x128xf32>
    %1259 = arith.mulf %1243, %1258 : vector<8x128xf32>
    %1260 = arith.addf %1254, %1259 : vector<8x128xf32>
    %c578 = arith.constant 578 : index
    %c0_241 = arith.constant 0 : index
    %1261 = vector.load %arg4[%c578, %c0_241] : memref<768x128xf32, #tpu.memory_space<vmem>>, vector<1x128xf32>
    %1262 = vector.shape_cast %1261 : vector<1x128xf32> to vector<128xf32>
    %1263 = vector.shape_cast %1262 : vector<128xf32> to vector<1x128xf32>
    %1264 = vector.broadcast %1263 : vector<1x128xf32> to vector<8x128xf32>
    %1265 = arith.mulf %1244, %1264 : vector<8x128xf32>
    %1266 = arith.addf %1260, %1265 : vector<8x128xf32>
    %c579 = arith.constant 579 : index
    %c0_242 = arith.constant 0 : index
    %1267 = vector.load %arg4[%c579, %c0_242] : memref<768x128xf32, #tpu.memory_space<vmem>>, vector<1x128xf32>
    %1268 = vector.shape_cast %1267 : vector<1x128xf32> to vector<128xf32>
    %1269 = vector.shape_cast %1268 : vector<128xf32> to vector<1x128xf32>
    %1270 = vector.broadcast %1269 : vector<1x128xf32> to vector<8x128xf32>
    %1271 = arith.mulf %1245, %1270 : vector<8x128xf32>
    %1272 = arith.addf %1266, %1271 : vector<8x128xf32>
    %c580 = arith.constant 580 : index
    %c0_243 = arith.constant 0 : index
    %1273 = vector.load %arg4[%c580, %c0_243] : memref<768x128xf32, #tpu.memory_space<vmem>>, vector<1x128xf32>
    %1274 = vector.shape_cast %1273 : vector<1x128xf32> to vector<128xf32>
    %1275 = vector.shape_cast %1274 : vector<128xf32> to vector<1x128xf32>
    %1276 = vector.broadcast %1275 : vector<1x128xf32> to vector<8x128xf32>
    %1277 = arith.mulf %1246, %1276 : vector<8x128xf32>
    %1278 = arith.addf %1272, %1277 : vector<8x128xf32>
    %c581 = arith.constant 581 : index
    %c0_244 = arith.constant 0 : index
    %1279 = vector.load %arg4[%c581, %c0_244] : memref<768x128xf32, #tpu.memory_space<vmem>>, vector<1x128xf32>
    %1280 = vector.shape_cast %1279 : vector<1x128xf32> to vector<128xf32>
    %1281 = vector.shape_cast %1280 : vector<128xf32> to vector<1x128xf32>
    %1282 = vector.broadcast %1281 : vector<1x128xf32> to vector<8x128xf32>
    %1283 = arith.mulf %1247, %1282 : vector<8x128xf32>
    %1284 = arith.addf %1278, %1283 : vector<8x128xf32>
    %c582 = arith.constant 582 : index
    %c0_245 = arith.constant 0 : index
    %1285 = vector.load %arg4[%c582, %c0_245] : memref<768x128xf32, #tpu.memory_space<vmem>>, vector<1x128xf32>
    %1286 = vector.shape_cast %1285 : vector<1x128xf32> to vector<128xf32>
    %1287 = vector.shape_cast %1286 : vector<128xf32> to vector<1x128xf32>
    %1288 = vector.broadcast %1287 : vector<1x128xf32> to vector<8x128xf32>
    %1289 = arith.mulf %1248, %1288 : vector<8x128xf32>
    %1290 = arith.addf %1284, %1289 : vector<8x128xf32>
    %c583 = arith.constant 583 : index
    %c0_246 = arith.constant 0 : index
    %1291 = vector.load %arg4[%c583, %c0_246] : memref<768x128xf32, #tpu.memory_space<vmem>>, vector<1x128xf32>
    %1292 = vector.shape_cast %1291 : vector<1x128xf32> to vector<128xf32>
    %1293 = vector.shape_cast %1292 : vector<128xf32> to vector<1x128xf32>
    %1294 = vector.broadcast %1293 : vector<1x128xf32> to vector<8x128xf32>
    %1295 = arith.mulf %1249, %1294 : vector<8x128xf32>
    %1296 = arith.addf %1290, %1295 : vector<8x128xf32>
    %c1_247 = arith.constant 1 : index
    %c0_248 = arith.constant 0 : index
    %c0_249 = arith.constant 0 : index
    %c0_250 = arith.constant 0 : index
    %1297 = vector.load %arg3[%c1_247, %c0_248, %c0_249, %c0_250] : memref<4x8x8x128xf32, #tpu.memory_space<vmem>>, vector<1x1x8x128xf32>
    %1298 = vector.shape_cast %1297 : vector<1x1x8x128xf32> to vector<8x128xf32>
    %1299 = vector.shape_cast %1296 : vector<8x128xf32> to vector<1x1x8x128xf32>
    tpu.vector_store %arg3[%c1_247, %c0_248, %c0_249, %c0_250], %1299 {strides = array<i32>} : memref<4x8x8x128xf32, #tpu.memory_space<vmem>>, vector<1x1x8x128xf32>,
    %c584 = arith.constant 584 : index
    %c0_251 = arith.constant 0 : index
    %1300 = vector.load %arg4[%c584, %c0_251] : memref<768x128xf32, #tpu.memory_space<vmem>>, vector<1x128xf32>
    %1301 = vector.shape_cast %1300 : vector<1x128xf32> to vector<128xf32>
    %1302 = vector.shape_cast %1301 : vector<128xf32> to vector<1x128xf32>
    %1303 = vector.broadcast %1302 : vector<1x128xf32> to vector<8x128xf32>
    %1304 = arith.mulf %1242, %1303 : vector<8x128xf32>
    %c585 = arith.constant 585 : index
    %c0_252 = arith.constant 0 : index
    %1305 = vector.load %arg4[%c585, %c0_252] : memref<768x128xf32, #tpu.memory_space<vmem>>, vector<1x128xf32>
    %1306 = vector.shape_cast %1305 : vector<1x128xf32> to vector<128xf32>
    %1307 = vector.shape_cast %1306 : vector<128xf32> to vector<1x128xf32>
    %1308 = vector.broadcast %1307 : vector<1x128xf32> to vector<8x128xf32>
    %1309 = arith.mulf %1243, %1308 : vector<8x128xf32>
    %1310 = arith.addf %1304, %1309 : vector<8x128xf32>
    %c586 = arith.constant 586 : index
    %c0_253 = arith.constant 0 : index
    %1311 = vector.load %arg4[%c586, %c0_253] : memref<768x128xf32, #tpu.memory_space<vmem>>, vector<1x128xf32>
    %1312 = vector.shape_cast %1311 : vector<1x128xf32> to vector<128xf32>
    %1313 = vector.shape_cast %1312 : vector<128xf32> to vector<1x128xf32>
    %1314 = vector.broadcast %1313 : vector<1x128xf32> to vector<8x128xf32>
    %1315 = arith.mulf %1244, %1314 : vector<8x128xf32>
    %1316 = arith.addf %1310, %1315 : vector<8x128xf32>
    %c587 = arith.constant 587 : index
    %c0_254 = arith.constant 0 : index
    %1317 = vector.load %arg4[%c587, %c0_254] : memref<768x128xf32, #tpu.memory_space<vmem>>, vector<1x128xf32>
    %1318 = vector.shape_cast %1317 : vector<1x128xf32> to vector<128xf32>
    %1319 = vector.shape_cast %1318 : vector<128xf32> to vector<1x128xf32>
    %1320 = vector.broadcast %1319 : vector<1x128xf32> to vector<8x128xf32>
    %1321 = arith.mulf %1245, %1320 : vector<8x128xf32>
    %1322 = arith.addf %1316, %1321 : vector<8x128xf32>
    %c588 = arith.constant 588 : index
    %c0_255 = arith.constant 0 : index
    %1323 = vector.load %arg4[%c588, %c0_255] : memref<768x128xf32, #tpu.memory_space<vmem>>, vector<1x128xf32>
    %1324 = vector.shape_cast %1323 : vector<1x128xf32> to vector<128xf32>
    %1325 = vector.shape_cast %1324 : vector<128xf32> to vector<1x128xf32>
    %1326 = vector.broadcast %1325 : vector<1x128xf32> to vector<8x128xf32>
    %1327 = arith.mulf %1246, %1326 : vector<8x128xf32>
    %1328 = arith.addf %1322, %1327 : vector<8x128xf32>
    %c589 = arith.constant 589 : index
    %c0_256 = arith.constant 0 : index
    %1329 = vector.load %arg4[%c589, %c0_256] : memref<768x128xf32, #tpu.memory_space<vmem>>, vector<1x128xf32>
    %1330 = vector.shape_cast %1329 : vector<1x128xf32> to vector<128xf32>
    %1331 = vector.shape_cast %1330 : vector<128xf32> to vector<1x128xf32>
    %1332 = vector.broadcast %1331 : vector<1x128xf32> to vector<8x128xf32>
    %1333 = arith.mulf %1247, %1332 : vector<8x128xf32>
    %1334 = arith.addf %1328, %1333 : vector<8x128xf32>
    %c590 = arith.constant 590 : index
    %c0_257 = arith.constant 0 : index
    %1335 = vector.load %arg4[%c590, %c0_257] : memref<768x128xf32, #tpu.memory_space<vmem>>, vector<1x128xf32>
    %1336 = vector.shape_cast %1335 : vector<1x128xf32> to vector<128xf32>
    %1337 = vector.shape_cast %1336 : vector<128xf32> to vector<1x128xf32>
    %1338 = vector.broadcast %1337 : vector<1x128xf32> to vector<8x128xf32>
    %1339 = arith.mulf %1248, %1338 : vector<8x128xf32>
    %1340 = arith.addf %1334, %1339 : vector<8x128xf32>
    %c591 = arith.constant 591 : index
    %c0_258 = arith.constant 0 : index
    %1341 = vector.load %arg4[%c591, %c0_258] : memref<768x128xf32, #tpu.memory_space<vmem>>, vector<1x128xf32>
    %1342 = vector.shape_cast %1341 : vector<1x128xf32> to vector<128xf32>
    %1343 = vector.shape_cast %1342 : vector<128xf32> to vector<1x128xf32>
    %1344 = vector.broadcast %1343 : vector<1x128xf32> to vector<8x128xf32>
    %1345 = arith.mulf %1249, %1344 : vector<8x128xf32>
    %1346 = arith.addf %1340, %1345 : vector<8x128xf32>
    %c1_259 = arith.constant 1 : index
    %c1_260 = arith.constant 1 : index
    %c0_261 = arith.constant 0 : index
    %c0_262 = arith.constant 0 : index
    %1347 = vector.load %arg3[%c1_259, %c1_260, %c0_261, %c0_262] : memref<4x8x8x128xf32, #tpu.memory_space<vmem>>, vector<1x1x8x128xf32>
    %1348 = vector.shape_cast %1347 : vector<1x1x8x128xf32> to vector<8x128xf32>
    %1349 = vector.shape_cast %1346 : vector<8x128xf32> to vector<1x1x8x128xf32>
    tpu.vector_store %arg3[%c1_259, %c1_260, %c0_261, %c0_262], %1349 {strides = array<i32>} : memref<4x8x8x128xf32, #tpu.memory_space<vmem>>, vector<1x1x8x128xf32>,
    %c592 = arith.constant 592 : index
    %c0_263 = arith.constant 0 : index
    %1350 = vector.load %arg4[%c592, %c0_263] : memref<768x128xf32, #tpu.memory_space<vmem>>, vector<1x128xf32>
    %1351 = vector.shape_cast %1350 : vector<1x128xf32> to vector<128xf32>
    %1352 = vector.shape_cast %1351 : vector<128xf32> to vector<1x128xf32>
    %1353 = vector.broadcast %1352 : vector<1x128xf32> to vector<8x128xf32>
    %1354 = arith.mulf %1242, %1353 : vector<8x128xf32>
    %c593 = arith.constant 593 : index
    %c0_264 = arith.constant 0 : index
    %1355 = vector.load %arg4[%c593, %c0_264] : memref<768x128xf32, #tpu.memory_space<vmem>>, vector<1x128xf32>
    %1356 = vector.shape_cast %1355 : vector<1x128xf32> to vector<128xf32>
    %1357 = vector.shape_cast %1356 : vector<128xf32> to vector<1x128xf32>
    %1358 = vector.broadcast %1357 : vector<1x128xf32> to vector<8x128xf32>
    %1359 = arith.mulf %1243, %1358 : vector<8x128xf32>
    %1360 = arith.addf %1354, %1359 : vector<8x128xf32>
    %c594 = arith.constant 594 : index
    %c0_265 = arith.constant 0 : index
    %1361 = vector.load %arg4[%c594, %c0_265] : memref<768x128xf32, #tpu.memory_space<vmem>>, vector<1x128xf32>
    %1362 = vector.shape_cast %1361 : vector<1x128xf32> to vector<128xf32>
    %1363 = vector.shape_cast %1362 : vector<128xf32> to vector<1x128xf32>
    %1364 = vector.broadcast %1363 : vector<1x128xf32> to vector<8x128xf32>
    %1365 = arith.mulf %1244, %1364 : vector<8x128xf32>
    %1366 = arith.addf %1360, %1365 : vector<8x128xf32>
    %c595 = arith.constant 595 : index
    %c0_266 = arith.constant 0 : index
    %1367 = vector.load %arg4[%c595, %c0_266] : memref<768x128xf32, #tpu.memory_space<vmem>>, vector<1x128xf32>
    %1368 = vector.shape_cast %1367 : vector<1x128xf32> to vector<128xf32>
    %1369 = vector.shape_cast %1368 : vector<128xf32> to vector<1x128xf32>
    %1370 = vector.broadcast %1369 : vector<1x128xf32> to vector<8x128xf32>
    %1371 = arith.mulf %1245, %1370 : vector<8x128xf32>
    %1372 = arith.addf %1366, %1371 : vector<8x128xf32>
    %c596 = arith.constant 596 : index
    %c0_267 = arith.constant 0 : index
    %1373 = vector.load %arg4[%c596, %c0_267] : memref<768x128xf32, #tpu.memory_space<vmem>>, vector<1x128xf32>
    %1374 = vector.shape_cast %1373 : vector<1x128xf32> to vector<128xf32>
    %1375 = vector.shape_cast %1374 : vector<128xf32> to vector<1x128xf32>
    %1376 = vector.broadcast %1375 : vector<1x128xf32> to vector<8x128xf32>
    %1377 = arith.mulf %1246, %1376 : vector<8x128xf32>
    %1378 = arith.addf %1372, %1377 : vector<8x128xf32>
    %c597 = arith.constant 597 : index
    %c0_268 = arith.constant 0 : index
    %1379 = vector.load %arg4[%c597, %c0_268] : memref<768x128xf32, #tpu.memory_space<vmem>>, vector<1x128xf32>
    %1380 = vector.shape_cast %1379 : vector<1x128xf32> to vector<128xf32>
    %1381 = vector.shape_cast %1380 : vector<128xf32> to vector<1x128xf32>
    %1382 = vector.broadcast %1381 : vector<1x128xf32> to vector<8x128xf32>
    %1383 = arith.mulf %1247, %1382 : vector<8x128xf32>
    %1384 = arith.addf %1378, %1383 : vector<8x128xf32>
    %c598 = arith.constant 598 : index
    %c0_269 = arith.constant 0 : index
    %1385 = vector.load %arg4[%c598, %c0_269] : memref<768x128xf32, #tpu.memory_space<vmem>>, vector<1x128xf32>
    %1386 = vector.shape_cast %1385 : vector<1x128xf32> to vector<128xf32>
    %1387 = vector.shape_cast %1386 : vector<128xf32> to vector<1x128xf32>
    %1388 = vector.broadcast %1387 : vector<1x128xf32> to vector<8x128xf32>
    %1389 = arith.mulf %1248, %1388 : vector<8x128xf32>
    %1390 = arith.addf %1384, %1389 : vector<8x128xf32>
    %c599 = arith.constant 599 : index
    %c0_270 = arith.constant 0 : index
    %1391 = vector.load %arg4[%c599, %c0_270] : memref<768x128xf32, #tpu.memory_space<vmem>>, vector<1x128xf32>
    %1392 = vector.shape_cast %1391 : vector<1x128xf32> to vector<128xf32>
    %1393 = vector.shape_cast %1392 : vector<128xf32> to vector<1x128xf32>
    %1394 = vector.broadcast %1393 : vector<1x128xf32> to vector<8x128xf32>
    %1395 = arith.mulf %1249, %1394 : vector<8x128xf32>
    %1396 = arith.addf %1390, %1395 : vector<8x128xf32>
    %c1_271 = arith.constant 1 : index
    %c2_272 = arith.constant 2 : index
    %c0_273 = arith.constant 0 : index
    %c0_274 = arith.constant 0 : index
    %1397 = vector.load %arg3[%c1_271, %c2_272, %c0_273, %c0_274] : memref<4x8x8x128xf32, #tpu.memory_space<vmem>>, vector<1x1x8x128xf32>
    %1398 = vector.shape_cast %1397 : vector<1x1x8x128xf32> to vector<8x128xf32>
    %1399 = vector.shape_cast %1396 : vector<8x128xf32> to vector<1x1x8x128xf32>
    tpu.vector_store %arg3[%c1_271, %c2_272, %c0_273, %c0_274], %1399 {strides = array<i32>} : memref<4x8x8x128xf32, #tpu.memory_space<vmem>>, vector<1x1x8x128xf32>,
    %c600 = arith.constant 600 : index
    %c0_275 = arith.constant 0 : index
    %1400 = vector.load %arg4[%c600, %c0_275] : memref<768x128xf32, #tpu.memory_space<vmem>>, vector<1x128xf32>
    %1401 = vector.shape_cast %1400 : vector<1x128xf32> to vector<128xf32>
    %1402 = vector.shape_cast %1401 : vector<128xf32> to vector<1x128xf32>
    %1403 = vector.broadcast %1402 : vector<1x128xf32> to vector<8x128xf32>
    %1404 = arith.mulf %1242, %1403 : vector<8x128xf32>
    %c601 = arith.constant 601 : index
    %c0_276 = arith.constant 0 : index
    %1405 = vector.load %arg4[%c601, %c0_276] : memref<768x128xf32, #tpu.memory_space<vmem>>, vector<1x128xf32>
    %1406 = vector.shape_cast %1405 : vector<1x128xf32> to vector<128xf32>
    %1407 = vector.shape_cast %1406 : vector<128xf32> to vector<1x128xf32>
    %1408 = vector.broadcast %1407 : vector<1x128xf32> to vector<8x128xf32>
    %1409 = arith.mulf %1243, %1408 : vector<8x128xf32>
    %1410 = arith.addf %1404, %1409 : vector<8x128xf32>
    %c602 = arith.constant 602 : index
    %c0_277 = arith.constant 0 : index
    %1411 = vector.load %arg4[%c602, %c0_277] : memref<768x128xf32, #tpu.memory_space<vmem>>, vector<1x128xf32>
    %1412 = vector.shape_cast %1411 : vector<1x128xf32> to vector<128xf32>
    %1413 = vector.shape_cast %1412 : vector<128xf32> to vector<1x128xf32>
    %1414 = vector.broadcast %1413 : vector<1x128xf32> to vector<8x128xf32>
    %1415 = arith.mulf %1244, %1414 : vector<8x128xf32>
    %1416 = arith.addf %1410, %1415 : vector<8x128xf32>
    %c603 = arith.constant 603 : index
    %c0_278 = arith.constant 0 : index
    %1417 = vector.load %arg4[%c603, %c0_278] : memref<768x128xf32, #tpu.memory_space<vmem>>, vector<1x128xf32>
    %1418 = vector.shape_cast %1417 : vector<1x128xf32> to vector<128xf32>
    %1419 = vector.shape_cast %1418 : vector<128xf32> to vector<1x128xf32>
    %1420 = vector.broadcast %1419 : vector<1x128xf32> to vector<8x128xf32>
    %1421 = arith.mulf %1245, %1420 : vector<8x128xf32>
    %1422 = arith.addf %1416, %1421 : vector<8x128xf32>
    %c604 = arith.constant 604 : index
    %c0_279 = arith.constant 0 : index
    %1423 = vector.load %arg4[%c604, %c0_279] : memref<768x128xf32, #tpu.memory_space<vmem>>, vector<1x128xf32>
    %1424 = vector.shape_cast %1423 : vector<1x128xf32> to vector<128xf32>
    %1425 = vector.shape_cast %1424 : vector<128xf32> to vector<1x128xf32>
    %1426 = vector.broadcast %1425 : vector<1x128xf32> to vector<8x128xf32>
    %1427 = arith.mulf %1246, %1426 : vector<8x128xf32>
    %1428 = arith.addf %1422, %1427 : vector<8x128xf32>
    %c605 = arith.constant 605 : index
    %c0_280 = arith.constant 0 : index
    %1429 = vector.load %arg4[%c605, %c0_280] : memref<768x128xf32, #tpu.memory_space<vmem>>, vector<1x128xf32>
    %1430 = vector.shape_cast %1429 : vector<1x128xf32> to vector<128xf32>
    %1431 = vector.shape_cast %1430 : vector<128xf32> to vector<1x128xf32>
    %1432 = vector.broadcast %1431 : vector<1x128xf32> to vector<8x128xf32>
    %1433 = arith.mulf %1247, %1432 : vector<8x128xf32>
    %1434 = arith.addf %1428, %1433 : vector<8x128xf32>
    %c606 = arith.constant 606 : index
    %c0_281 = arith.constant 0 : index
    %1435 = vector.load %arg4[%c606, %c0_281] : memref<768x128xf32, #tpu.memory_space<vmem>>, vector<1x128xf32>
    %1436 = vector.shape_cast %1435 : vector<1x128xf32> to vector<128xf32>
    %1437 = vector.shape_cast %1436 : vector<128xf32> to vector<1x128xf32>
    %1438 = vector.broadcast %1437 : vector<1x128xf32> to vector<8x128xf32>
    %1439 = arith.mulf %1248, %1438 : vector<8x128xf32>
    %1440 = arith.addf %1434, %1439 : vector<8x128xf32>
    %c607 = arith.constant 607 : index
    %c0_282 = arith.constant 0 : index
    %1441 = vector.load %arg4[%c607, %c0_282] : memref<768x128xf32, #tpu.memory_space<vmem>>, vector<1x128xf32>
    %1442 = vector.shape_cast %1441 : vector<1x128xf32> to vector<128xf32>
    %1443 = vector.shape_cast %1442 : vector<128xf32> to vector<1x128xf32>
    %1444 = vector.broadcast %1443 : vector<1x128xf32> to vector<8x128xf32>
    %1445 = arith.mulf %1249, %1444 : vector<8x128xf32>
    %1446 = arith.addf %1440, %1445 : vector<8x128xf32>
    %c1_283 = arith.constant 1 : index
    %c3_284 = arith.constant 3 : index
    %c0_285 = arith.constant 0 : index
    %c0_286 = arith.constant 0 : index
    %1447 = vector.load %arg3[%c1_283, %c3_284, %c0_285, %c0_286] : memref<4x8x8x128xf32, #tpu.memory_space<vmem>>, vector<1x1x8x128xf32>
    %1448 = vector.shape_cast %1447 : vector<1x1x8x128xf32> to vector<8x128xf32>
    %1449 = vector.shape_cast %1446 : vector<8x128xf32> to vector<1x1x8x128xf32>
    tpu.vector_store %arg3[%c1_283, %c3_284, %c0_285, %c0_286], %1449 {strides = array<i32>} : memref<4x8x8x128xf32, #tpu.memory_space<vmem>>, vector<1x1x8x128xf32>,
    %c608 = arith.constant 608 : index
    %c0_287 = arith.constant 0 : index
    %1450 = vector.load %arg4[%c608, %c0_287] : memref<768x128xf32, #tpu.memory_space<vmem>>, vector<1x128xf32>
    %1451 = vector.shape_cast %1450 : vector<1x128xf32> to vector<128xf32>
    %1452 = vector.shape_cast %1451 : vector<128xf32> to vector<1x128xf32>
    %1453 = vector.broadcast %1452 : vector<1x128xf32> to vector<8x128xf32>
    %1454 = arith.mulf %1242, %1453 : vector<8x128xf32>
    %c609 = arith.constant 609 : index
    %c0_288 = arith.constant 0 : index
    %1455 = vector.load %arg4[%c609, %c0_288] : memref<768x128xf32, #tpu.memory_space<vmem>>, vector<1x128xf32>
    %1456 = vector.shape_cast %1455 : vector<1x128xf32> to vector<128xf32>
    %1457 = vector.shape_cast %1456 : vector<128xf32> to vector<1x128xf32>
    %1458 = vector.broadcast %1457 : vector<1x128xf32> to vector<8x128xf32>
    %1459 = arith.mulf %1243, %1458 : vector<8x128xf32>
    %1460 = arith.addf %1454, %1459 : vector<8x128xf32>
    %c610 = arith.constant 610 : index
    %c0_289 = arith.constant 0 : index
    %1461 = vector.load %arg4[%c610, %c0_289] : memref<768x128xf32, #tpu.memory_space<vmem>>, vector<1x128xf32>
    %1462 = vector.shape_cast %1461 : vector<1x128xf32> to vector<128xf32>
    %1463 = vector.shape_cast %1462 : vector<128xf32> to vector<1x128xf32>
    %1464 = vector.broadcast %1463 : vector<1x128xf32> to vector<8x128xf32>
    %1465 = arith.mulf %1244, %1464 : vector<8x128xf32>
    %1466 = arith.addf %1460, %1465 : vector<8x128xf32>
    %c611 = arith.constant 611 : index
    %c0_290 = arith.constant 0 : index
    %1467 = vector.load %arg4[%c611, %c0_290] : memref<768x128xf32, #tpu.memory_space<vmem>>, vector<1x128xf32>
    %1468 = vector.shape_cast %1467 : vector<1x128xf32> to vector<128xf32>
    %1469 = vector.shape_cast %1468 : vector<128xf32> to vector<1x128xf32>
    %1470 = vector.broadcast %1469 : vector<1x128xf32> to vector<8x128xf32>
    %1471 = arith.mulf %1245, %1470 : vector<8x128xf32>
    %1472 = arith.addf %1466, %1471 : vector<8x128xf32>
    %c612 = arith.constant 612 : index
    %c0_291 = arith.constant 0 : index
    %1473 = vector.load %arg4[%c612, %c0_291] : memref<768x128xf32, #tpu.memory_space<vmem>>, vector<1x128xf32>
    %1474 = vector.shape_cast %1473 : vector<1x128xf32> to vector<128xf32>
    %1475 = vector.shape_cast %1474 : vector<128xf32> to vector<1x128xf32>
    %1476 = vector.broadcast %1475 : vector<1x128xf32> to vector<8x128xf32>
    %1477 = arith.mulf %1246, %1476 : vector<8x128xf32>
    %1478 = arith.addf %1472, %1477 : vector<8x128xf32>
    %c613 = arith.constant 613 : index
    %c0_292 = arith.constant 0 : index
    %1479 = vector.load %arg4[%c613, %c0_292] : memref<768x128xf32, #tpu.memory_space<vmem>>, vector<1x128xf32>
    %1480 = vector.shape_cast %1479 : vector<1x128xf32> to vector<128xf32>
    %1481 = vector.shape_cast %1480 : vector<128xf32> to vector<1x128xf32>
    %1482 = vector.broadcast %1481 : vector<1x128xf32> to vector<8x128xf32>
    %1483 = arith.mulf %1247, %1482 : vector<8x128xf32>
    %1484 = arith.addf %1478, %1483 : vector<8x128xf32>
    %c614 = arith.constant 614 : index
    %c0_293 = arith.constant 0 : index
    %1485 = vector.load %arg4[%c614, %c0_293] : memref<768x128xf32, #tpu.memory_space<vmem>>, vector<1x128xf32>
    %1486 = vector.shape_cast %1485 : vector<1x128xf32> to vector<128xf32>
    %1487 = vector.shape_cast %1486 : vector<128xf32> to vector<1x128xf32>
    %1488 = vector.broadcast %1487 : vector<1x128xf32> to vector<8x128xf32>
    %1489 = arith.mulf %1248, %1488 : vector<8x128xf32>
    %1490 = arith.addf %1484, %1489 : vector<8x128xf32>
    %c615 = arith.constant 615 : index
    %c0_294 = arith.constant 0 : index
    %1491 = vector.load %arg4[%c615, %c0_294] : memref<768x128xf32, #tpu.memory_space<vmem>>, vector<1x128xf32>
    %1492 = vector.shape_cast %1491 : vector<1x128xf32> to vector<128xf32>
    %1493 = vector.shape_cast %1492 : vector<128xf32> to vector<1x128xf32>
    %1494 = vector.broadcast %1493 : vector<1x128xf32> to vector<8x128xf32>
    %1495 = arith.mulf %1249, %1494 : vector<8x128xf32>
    %1496 = arith.addf %1490, %1495 : vector<8x128xf32>
    %c1_295 = arith.constant 1 : index
    %c4_296 = arith.constant 4 : index
    %c0_297 = arith.constant 0 : index
    %c0_298 = arith.constant 0 : index
    %1497 = vector.load %arg3[%c1_295, %c4_296, %c0_297, %c0_298] : memref<4x8x8x128xf32, #tpu.memory_space<vmem>>, vector<1x1x8x128xf32>
    %1498 = vector.shape_cast %1497 : vector<1x1x8x128xf32> to vector<8x128xf32>
    %1499 = vector.shape_cast %1496 : vector<8x128xf32> to vector<1x1x8x128xf32>
    tpu.vector_store %arg3[%c1_295, %c4_296, %c0_297, %c0_298], %1499 {strides = array<i32>} : memref<4x8x8x128xf32, #tpu.memory_space<vmem>>, vector<1x1x8x128xf32>,
    %c616 = arith.constant 616 : index
    %c0_299 = arith.constant 0 : index
    %1500 = vector.load %arg4[%c616, %c0_299] : memref<768x128xf32, #tpu.memory_space<vmem>>, vector<1x128xf32>
    %1501 = vector.shape_cast %1500 : vector<1x128xf32> to vector<128xf32>
    %1502 = vector.shape_cast %1501 : vector<128xf32> to vector<1x128xf32>
    %1503 = vector.broadcast %1502 : vector<1x128xf32> to vector<8x128xf32>
    %1504 = arith.mulf %1242, %1503 : vector<8x128xf32>
    %c617 = arith.constant 617 : index
    %c0_300 = arith.constant 0 : index
    %1505 = vector.load %arg4[%c617, %c0_300] : memref<768x128xf32, #tpu.memory_space<vmem>>, vector<1x128xf32>
    %1506 = vector.shape_cast %1505 : vector<1x128xf32> to vector<128xf32>
    %1507 = vector.shape_cast %1506 : vector<128xf32> to vector<1x128xf32>
    %1508 = vector.broadcast %1507 : vector<1x128xf32> to vector<8x128xf32>
    %1509 = arith.mulf %1243, %1508 : vector<8x128xf32>
    %1510 = arith.addf %1504, %1509 : vector<8x128xf32>
    %c618 = arith.constant 618 : index
    %c0_301 = arith.constant 0 : index
    %1511 = vector.load %arg4[%c618, %c0_301] : memref<768x128xf32, #tpu.memory_space<vmem>>, vector<1x128xf32>
    %1512 = vector.shape_cast %1511 : vector<1x128xf32> to vector<128xf32>
    %1513 = vector.shape_cast %1512 : vector<128xf32> to vector<1x128xf32>
    %1514 = vector.broadcast %1513 : vector<1x128xf32> to vector<8x128xf32>
    %1515 = arith.mulf %1244, %1514 : vector<8x128xf32>
    %1516 = arith.addf %1510, %1515 : vector<8x128xf32>
    %c619 = arith.constant 619 : index
    %c0_302 = arith.constant 0 : index
    %1517 = vector.load %arg4[%c619, %c0_302] : memref<768x128xf32, #tpu.memory_space<vmem>>, vector<1x128xf32>
    %1518 = vector.shape_cast %1517 : vector<1x128xf32> to vector<128xf32>
    %1519 = vector.shape_cast %1518 : vector<128xf32> to vector<1x128xf32>
    %1520 = vector.broadcast %1519 : vector<1x128xf32> to vector<8x128xf32>
    %1521 = arith.mulf %1245, %1520 : vector<8x128xf32>
    %1522 = arith.addf %1516, %1521 : vector<8x128xf32>
    %c620 = arith.constant 620 : index
    %c0_303 = arith.constant 0 : index
    %1523 = vector.load %arg4[%c620, %c0_303] : memref<768x128xf32, #tpu.memory_space<vmem>>, vector<1x128xf32>
    %1524 = vector.shape_cast %1523 : vector<1x128xf32> to vector<128xf32>
    %1525 = vector.shape_cast %1524 : vector<128xf32> to vector<1x128xf32>
    %1526 = vector.broadcast %1525 : vector<1x128xf32> to vector<8x128xf32>
    %1527 = arith.mulf %1246, %1526 : vector<8x128xf32>
    %1528 = arith.addf %1522, %1527 : vector<8x128xf32>
    %c621 = arith.constant 621 : index
    %c0_304 = arith.constant 0 : index
    %1529 = vector.load %arg4[%c621, %c0_304] : memref<768x128xf32, #tpu.memory_space<vmem>>, vector<1x128xf32>
    %1530 = vector.shape_cast %1529 : vector<1x128xf32> to vector<128xf32>
    %1531 = vector.shape_cast %1530 : vector<128xf32> to vector<1x128xf32>
    %1532 = vector.broadcast %1531 : vector<1x128xf32> to vector<8x128xf32>
    %1533 = arith.mulf %1247, %1532 : vector<8x128xf32>
    %1534 = arith.addf %1528, %1533 : vector<8x128xf32>
    %c622 = arith.constant 622 : index
    %c0_305 = arith.constant 0 : index
    %1535 = vector.load %arg4[%c622, %c0_305] : memref<768x128xf32, #tpu.memory_space<vmem>>, vector<1x128xf32>
    %1536 = vector.shape_cast %1535 : vector<1x128xf32> to vector<128xf32>
    %1537 = vector.shape_cast %1536 : vector<128xf32> to vector<1x128xf32>
    %1538 = vector.broadcast %1537 : vector<1x128xf32> to vector<8x128xf32>
    %1539 = arith.mulf %1248, %1538 : vector<8x128xf32>
    %1540 = arith.addf %1534, %1539 : vector<8x128xf32>
    %c623 = arith.constant 623 : index
    %c0_306 = arith.constant 0 : index
    %1541 = vector.load %arg4[%c623, %c0_306] : memref<768x128xf32, #tpu.memory_space<vmem>>, vector<1x128xf32>
    %1542 = vector.shape_cast %1541 : vector<1x128xf32> to vector<128xf32>
    %1543 = vector.shape_cast %1542 : vector<128xf32> to vector<1x128xf32>
    %1544 = vector.broadcast %1543 : vector<1x128xf32> to vector<8x128xf32>
    %1545 = arith.mulf %1249, %1544 : vector<8x128xf32>
    %1546 = arith.addf %1540, %1545 : vector<8x128xf32>
    %c1_307 = arith.constant 1 : index
    %c5_308 = arith.constant 5 : index
    %c0_309 = arith.constant 0 : index
    %c0_310 = arith.constant 0 : index
    %1547 = vector.load %arg3[%c1_307, %c5_308, %c0_309, %c0_310] : memref<4x8x8x128xf32, #tpu.memory_space<vmem>>, vector<1x1x8x128xf32>
    %1548 = vector.shape_cast %1547 : vector<1x1x8x128xf32> to vector<8x128xf32>
    %1549 = vector.shape_cast %1546 : vector<8x128xf32> to vector<1x1x8x128xf32>
    tpu.vector_store %arg3[%c1_307, %c5_308, %c0_309, %c0_310], %1549 {strides = array<i32>} : memref<4x8x8x128xf32, #tpu.memory_space<vmem>>, vector<1x1x8x128xf32>,
    %c624 = arith.constant 624 : index
    %c0_311 = arith.constant 0 : index
    %1550 = vector.load %arg4[%c624, %c0_311] : memref<768x128xf32, #tpu.memory_space<vmem>>, vector<1x128xf32>
    %1551 = vector.shape_cast %1550 : vector<1x128xf32> to vector<128xf32>
    %1552 = vector.shape_cast %1551 : vector<128xf32> to vector<1x128xf32>
    %1553 = vector.broadcast %1552 : vector<1x128xf32> to vector<8x128xf32>
    %1554 = arith.mulf %1242, %1553 : vector<8x128xf32>
    %c625 = arith.constant 625 : index
    %c0_312 = arith.constant 0 : index
    %1555 = vector.load %arg4[%c625, %c0_312] : memref<768x128xf32, #tpu.memory_space<vmem>>, vector<1x128xf32>
    %1556 = vector.shape_cast %1555 : vector<1x128xf32> to vector<128xf32>
    %1557 = vector.shape_cast %1556 : vector<128xf32> to vector<1x128xf32>
    %1558 = vector.broadcast %1557 : vector<1x128xf32> to vector<8x128xf32>
    %1559 = arith.mulf %1243, %1558 : vector<8x128xf32>
    %1560 = arith.addf %1554, %1559 : vector<8x128xf32>
    %c626 = arith.constant 626 : index
    %c0_313 = arith.constant 0 : index
    %1561 = vector.load %arg4[%c626, %c0_313] : memref<768x128xf32, #tpu.memory_space<vmem>>, vector<1x128xf32>
    %1562 = vector.shape_cast %1561 : vector<1x128xf32> to vector<128xf32>
    %1563 = vector.shape_cast %1562 : vector<128xf32> to vector<1x128xf32>
    %1564 = vector.broadcast %1563 : vector<1x128xf32> to vector<8x128xf32>
    %1565 = arith.mulf %1244, %1564 : vector<8x128xf32>
    %1566 = arith.addf %1560, %1565 : vector<8x128xf32>
    %c627 = arith.constant 627 : index
    %c0_314 = arith.constant 0 : index
    %1567 = vector.load %arg4[%c627, %c0_314] : memref<768x128xf32, #tpu.memory_space<vmem>>, vector<1x128xf32>
    %1568 = vector.shape_cast %1567 : vector<1x128xf32> to vector<128xf32>
    %1569 = vector.shape_cast %1568 : vector<128xf32> to vector<1x128xf32>
    %1570 = vector.broadcast %1569 : vector<1x128xf32> to vector<8x128xf32>
    %1571 = arith.mulf %1245, %1570 : vector<8x128xf32>
    %1572 = arith.addf %1566, %1571 : vector<8x128xf32>
    %c628 = arith.constant 628 : index
    %c0_315 = arith.constant 0 : index
    %1573 = vector.load %arg4[%c628, %c0_315] : memref<768x128xf32, #tpu.memory_space<vmem>>, vector<1x128xf32>
    %1574 = vector.shape_cast %1573 : vector<1x128xf32> to vector<128xf32>
    %1575 = vector.shape_cast %1574 : vector<128xf32> to vector<1x128xf32>
    %1576 = vector.broadcast %1575 : vector<1x128xf32> to vector<8x128xf32>
    %1577 = arith.mulf %1246, %1576 : vector<8x128xf32>
    %1578 = arith.addf %1572, %1577 : vector<8x128xf32>
    %c629 = arith.constant 629 : index
    %c0_316 = arith.constant 0 : index
    %1579 = vector.load %arg4[%c629, %c0_316] : memref<768x128xf32, #tpu.memory_space<vmem>>, vector<1x128xf32>
    %1580 = vector.shape_cast %1579 : vector<1x128xf32> to vector<128xf32>
    %1581 = vector.shape_cast %1580 : vector<128xf32> to vector<1x128xf32>
    %1582 = vector.broadcast %1581 : vector<1x128xf32> to vector<8x128xf32>
    %1583 = arith.mulf %1247, %1582 : vector<8x128xf32>
    %1584 = arith.addf %1578, %1583 : vector<8x128xf32>
    %c630 = arith.constant 630 : index
    %c0_317 = arith.constant 0 : index
    %1585 = vector.load %arg4[%c630, %c0_317] : memref<768x128xf32, #tpu.memory_space<vmem>>, vector<1x128xf32>
    %1586 = vector.shape_cast %1585 : vector<1x128xf32> to vector<128xf32>
    %1587 = vector.shape_cast %1586 : vector<128xf32> to vector<1x128xf32>
    %1588 = vector.broadcast %1587 : vector<1x128xf32> to vector<8x128xf32>
    %1589 = arith.mulf %1248, %1588 : vector<8x128xf32>
    %1590 = arith.addf %1584, %1589 : vector<8x128xf32>
    %c631 = arith.constant 631 : index
    %c0_318 = arith.constant 0 : index
    %1591 = vector.load %arg4[%c631, %c0_318] : memref<768x128xf32, #tpu.memory_space<vmem>>, vector<1x128xf32>
    %1592 = vector.shape_cast %1591 : vector<1x128xf32> to vector<128xf32>
    %1593 = vector.shape_cast %1592 : vector<128xf32> to vector<1x128xf32>
    %1594 = vector.broadcast %1593 : vector<1x128xf32> to vector<8x128xf32>
    %1595 = arith.mulf %1249, %1594 : vector<8x128xf32>
    %1596 = arith.addf %1590, %1595 : vector<8x128xf32>
    %c1_319 = arith.constant 1 : index
    %c6_320 = arith.constant 6 : index
    %c0_321 = arith.constant 0 : index
    %c0_322 = arith.constant 0 : index
    %1597 = vector.load %arg3[%c1_319, %c6_320, %c0_321, %c0_322] : memref<4x8x8x128xf32, #tpu.memory_space<vmem>>, vector<1x1x8x128xf32>
    %1598 = vector.shape_cast %1597 : vector<1x1x8x128xf32> to vector<8x128xf32>
    %1599 = vector.shape_cast %1596 : vector<8x128xf32> to vector<1x1x8x128xf32>
    tpu.vector_store %arg3[%c1_319, %c6_320, %c0_321, %c0_322], %1599 {strides = array<i32>} : memref<4x8x8x128xf32, #tpu.memory_space<vmem>>, vector<1x1x8x128xf32>,
    %c632 = arith.constant 632 : index
    %c0_323 = arith.constant 0 : index
    %1600 = vector.load %arg4[%c632, %c0_323] : memref<768x128xf32, #tpu.memory_space<vmem>>, vector<1x128xf32>
    %1601 = vector.shape_cast %1600 : vector<1x128xf32> to vector<128xf32>
    %1602 = vector.shape_cast %1601 : vector<128xf32> to vector<1x128xf32>
    %1603 = vector.broadcast %1602 : vector<1x128xf32> to vector<8x128xf32>
    %1604 = arith.mulf %1242, %1603 : vector<8x128xf32>
    %c633 = arith.constant 633 : index
    %c0_324 = arith.constant 0 : index
    %1605 = vector.load %arg4[%c633, %c0_324] : memref<768x128xf32, #tpu.memory_space<vmem>>, vector<1x128xf32>
    %1606 = vector.shape_cast %1605 : vector<1x128xf32> to vector<128xf32>
    %1607 = vector.shape_cast %1606 : vector<128xf32> to vector<1x128xf32>
    %1608 = vector.broadcast %1607 : vector<1x128xf32> to vector<8x128xf32>
    %1609 = arith.mulf %1243, %1608 : vector<8x128xf32>
    %1610 = arith.addf %1604, %1609 : vector<8x128xf32>
    %c634 = arith.constant 634 : index
    %c0_325 = arith.constant 0 : index
    %1611 = vector.load %arg4[%c634, %c0_325] : memref<768x128xf32, #tpu.memory_space<vmem>>, vector<1x128xf32>
    %1612 = vector.shape_cast %1611 : vector<1x128xf32> to vector<128xf32>
    %1613 = vector.shape_cast %1612 : vector<128xf32> to vector<1x128xf32>
    %1614 = vector.broadcast %1613 : vector<1x128xf32> to vector<8x128xf32>
    %1615 = arith.mulf %1244, %1614 : vector<8x128xf32>
    %1616 = arith.addf %1610, %1615 : vector<8x128xf32>
    %c635 = arith.constant 635 : index
    %c0_326 = arith.constant 0 : index
    %1617 = vector.load %arg4[%c635, %c0_326] : memref<768x128xf32, #tpu.memory_space<vmem>>, vector<1x128xf32>
    %1618 = vector.shape_cast %1617 : vector<1x128xf32> to vector<128xf32>
    %1619 = vector.shape_cast %1618 : vector<128xf32> to vector<1x128xf32>
    %1620 = vector.broadcast %1619 : vector<1x128xf32> to vector<8x128xf32>
    %1621 = arith.mulf %1245, %1620 : vector<8x128xf32>
    %1622 = arith.addf %1616, %1621 : vector<8x128xf32>
    %c636 = arith.constant 636 : index
    %c0_327 = arith.constant 0 : index
    %1623 = vector.load %arg4[%c636, %c0_327] : memref<768x128xf32, #tpu.memory_space<vmem>>, vector<1x128xf32>
    %1624 = vector.shape_cast %1623 : vector<1x128xf32> to vector<128xf32>
    %1625 = vector.shape_cast %1624 : vector<128xf32> to vector<1x128xf32>
    %1626 = vector.broadcast %1625 : vector<1x128xf32> to vector<8x128xf32>
    %1627 = arith.mulf %1246, %1626 : vector<8x128xf32>
    %1628 = arith.addf %1622, %1627 : vector<8x128xf32>
    %c637 = arith.constant 637 : index
    %c0_328 = arith.constant 0 : index
    %1629 = vector.load %arg4[%c637, %c0_328] : memref<768x128xf32, #tpu.memory_space<vmem>>, vector<1x128xf32>
    %1630 = vector.shape_cast %1629 : vector<1x128xf32> to vector<128xf32>
    %1631 = vector.shape_cast %1630 : vector<128xf32> to vector<1x128xf32>
    %1632 = vector.broadcast %1631 : vector<1x128xf32> to vector<8x128xf32>
    %1633 = arith.mulf %1247, %1632 : vector<8x128xf32>
    %1634 = arith.addf %1628, %1633 : vector<8x128xf32>
    %c638 = arith.constant 638 : index
    %c0_329 = arith.constant 0 : index
    %1635 = vector.load %arg4[%c638, %c0_329] : memref<768x128xf32, #tpu.memory_space<vmem>>, vector<1x128xf32>
    %1636 = vector.shape_cast %1635 : vector<1x128xf32> to vector<128xf32>
    %1637 = vector.shape_cast %1636 : vector<128xf32> to vector<1x128xf32>
    %1638 = vector.broadcast %1637 : vector<1x128xf32> to vector<8x128xf32>
    %1639 = arith.mulf %1248, %1638 : vector<8x128xf32>
    %1640 = arith.addf %1634, %1639 : vector<8x128xf32>
    %c639 = arith.constant 639 : index
    %c0_330 = arith.constant 0 : index
    %1641 = vector.load %arg4[%c639, %c0_330] : memref<768x128xf32, #tpu.memory_space<vmem>>, vector<1x128xf32>
    %1642 = vector.shape_cast %1641 : vector<1x128xf32> to vector<128xf32>
    %1643 = vector.shape_cast %1642 : vector<128xf32> to vector<1x128xf32>
    %1644 = vector.broadcast %1643 : vector<1x128xf32> to vector<8x128xf32>
    %1645 = arith.mulf %1249, %1644 : vector<8x128xf32>
    %1646 = arith.addf %1640, %1645 : vector<8x128xf32>
    %c1_331 = arith.constant 1 : index
    %c7_332 = arith.constant 7 : index
    %c0_333 = arith.constant 0 : index
    %c0_334 = arith.constant 0 : index
    %1647 = vector.load %arg3[%c1_331, %c7_332, %c0_333, %c0_334] : memref<4x8x8x128xf32, #tpu.memory_space<vmem>>, vector<1x1x8x128xf32>
    %1648 = vector.shape_cast %1647 : vector<1x1x8x128xf32> to vector<8x128xf32>
    %1649 = vector.shape_cast %1646 : vector<8x128xf32> to vector<1x1x8x128xf32>
    tpu.vector_store %arg3[%c1_331, %c7_332, %c0_333, %c0_334], %1649 {strides = array<i32>} : memref<4x8x8x128xf32, #tpu.memory_space<vmem>>, vector<1x1x8x128xf32>,
    %c128 = arith.constant 128 : index
    %c0_335 = arith.constant 0 : index
    %1650 = vector.load %arg4[%c128, %c0_335] : memref<768x128xf32, #tpu.memory_space<vmem>>, vector<8x128xf32>
    %c384 = arith.constant 384 : index
    %c0_336 = arith.constant 0 : index
    %1651 = vector.load %arg4[%c384, %c0_336] : memref<768x128xf32, #tpu.memory_space<vmem>>, vector<1x128xf32>
    %1652 = vector.shape_cast %1651 : vector<1x128xf32> to vector<128xf32>
    %1653 = vector.shape_cast %1652 : vector<128xf32> to vector<1x128xf32>
    %1654 = vector.broadcast %1653 : vector<1x128xf32> to vector<8x128xf32>
    %1655 = arith.mulf %1650, %1654 : vector<8x128xf32>
    %c385 = arith.constant 385 : index
    %c0_337 = arith.constant 0 : index
    %1656 = vector.load %arg4[%c385, %c0_337] : memref<768x128xf32, #tpu.memory_space<vmem>>, vector<1x128xf32>
    %1657 = vector.shape_cast %1656 : vector<1x128xf32> to vector<128xf32>
    %1658 = vector.shape_cast %1657 : vector<128xf32> to vector<1x128xf32>
    %1659 = vector.broadcast %1658 : vector<1x128xf32> to vector<8x128xf32>
    %1660 = arith.mulf %1650, %1659 : vector<8x128xf32>
    %c386 = arith.constant 386 : index
    %c0_338 = arith.constant 0 : index
    %1661 = vector.load %arg4[%c386, %c0_338] : memref<768x128xf32, #tpu.memory_space<vmem>>, vector<1x128xf32>
    %1662 = vector.shape_cast %1661 : vector<1x128xf32> to vector<128xf32>
    %1663 = vector.shape_cast %1662 : vector<128xf32> to vector<1x128xf32>
    %1664 = vector.broadcast %1663 : vector<1x128xf32> to vector<8x128xf32>
    %1665 = arith.mulf %1650, %1664 : vector<8x128xf32>
    %c387 = arith.constant 387 : index
    %c0_339 = arith.constant 0 : index
    %1666 = vector.load %arg4[%c387, %c0_339] : memref<768x128xf32, #tpu.memory_space<vmem>>, vector<1x128xf32>
    %1667 = vector.shape_cast %1666 : vector<1x128xf32> to vector<128xf32>
    %1668 = vector.shape_cast %1667 : vector<128xf32> to vector<1x128xf32>
    %1669 = vector.broadcast %1668 : vector<1x128xf32> to vector<8x128xf32>
    %1670 = arith.mulf %1650, %1669 : vector<8x128xf32>
    %c388 = arith.constant 388 : index
    %c0_340 = arith.constant 0 : index
    %1671 = vector.load %arg4[%c388, %c0_340] : memref<768x128xf32, #tpu.memory_space<vmem>>, vector<1x128xf32>
    %1672 = vector.shape_cast %1671 : vector<1x128xf32> to vector<128xf32>
    %1673 = vector.shape_cast %1672 : vector<128xf32> to vector<1x128xf32>
    %1674 = vector.broadcast %1673 : vector<1x128xf32> to vector<8x128xf32>
    %1675 = arith.mulf %1650, %1674 : vector<8x128xf32>
    %c389 = arith.constant 389 : index
    %c0_341 = arith.constant 0 : index
    %1676 = vector.load %arg4[%c389, %c0_341] : memref<768x128xf32, #tpu.memory_space<vmem>>, vector<1x128xf32>
    %1677 = vector.shape_cast %1676 : vector<1x128xf32> to vector<128xf32>
    %1678 = vector.shape_cast %1677 : vector<128xf32> to vector<1x128xf32>
    %1679 = vector.broadcast %1678 : vector<1x128xf32> to vector<8x128xf32>
    %1680 = arith.mulf %1650, %1679 : vector<8x128xf32>
    %c390 = arith.constant 390 : index
    %c0_342 = arith.constant 0 : index
    %1681 = vector.load %arg4[%c390, %c0_342] : memref<768x128xf32, #tpu.memory_space<vmem>>, vector<1x128xf32>
    %1682 = vector.shape_cast %1681 : vector<1x128xf32> to vector<128xf32>
    %1683 = vector.shape_cast %1682 : vector<128xf32> to vector<1x128xf32>
    %1684 = vector.broadcast %1683 : vector<1x128xf32> to vector<8x128xf32>
    %1685 = arith.mulf %1650, %1684 : vector<8x128xf32>
    %c391 = arith.constant 391 : index
    %c0_343 = arith.constant 0 : index
    %1686 = vector.load %arg4[%c391, %c0_343] : memref<768x128xf32, #tpu.memory_space<vmem>>, vector<1x128xf32>
    %1687 = vector.shape_cast %1686 : vector<1x128xf32> to vector<128xf32>
    %1688 = vector.shape_cast %1687 : vector<128xf32> to vector<1x128xf32>
    %1689 = vector.broadcast %1688 : vector<1x128xf32> to vector<8x128xf32>
    %1690 = arith.mulf %1650, %1689 : vector<8x128xf32>
    %c136 = arith.constant 136 : index
    %c0_344 = arith.constant 0 : index
    %1691 = vector.load %arg4[%c136, %c0_344] : memref<768x128xf32, #tpu.memory_space<vmem>>, vector<8x128xf32>
    %c392 = arith.constant 392 : index
    %c0_345 = arith.constant 0 : index
    %1692 = vector.load %arg4[%c392, %c0_345] : memref<768x128xf32, #tpu.memory_space<vmem>>, vector<1x128xf32>
    %1693 = vector.shape_cast %1692 : vector<1x128xf32> to vector<128xf32>
    %1694 = vector.shape_cast %1693 : vector<128xf32> to vector<1x128xf32>
    %1695 = vector.broadcast %1694 : vector<1x128xf32> to vector<8x128xf32>
    %1696 = arith.mulf %1691, %1695 : vector<8x128xf32>
    %1697 = arith.addf %1655, %1696 : vector<8x128xf32>
    %c393 = arith.constant 393 : index
    %c0_346 = arith.constant 0 : index
    %1698 = vector.load %arg4[%c393, %c0_346] : memref<768x128xf32, #tpu.memory_space<vmem>>, vector<1x128xf32>
    %1699 = vector.shape_cast %1698 : vector<1x128xf32> to vector<128xf32>
    %1700 = vector.shape_cast %1699 : vector<128xf32> to vector<1x128xf32>
    %1701 = vector.broadcast %1700 : vector<1x128xf32> to vector<8x128xf32>
    %1702 = arith.mulf %1691, %1701 : vector<8x128xf32>
    %1703 = arith.addf %1660, %1702 : vector<8x128xf32>
    %c394 = arith.constant 394 : index
    %c0_347 = arith.constant 0 : index
    %1704 = vector.load %arg4[%c394, %c0_347] : memref<768x128xf32, #tpu.memory_space<vmem>>, vector<1x128xf32>
    %1705 = vector.shape_cast %1704 : vector<1x128xf32> to vector<128xf32>
    %1706 = vector.shape_cast %1705 : vector<128xf32> to vector<1x128xf32>
    %1707 = vector.broadcast %1706 : vector<1x128xf32> to vector<8x128xf32>
    %1708 = arith.mulf %1691, %1707 : vector<8x128xf32>
    %1709 = arith.addf %1665, %1708 : vector<8x128xf32>
    %c395 = arith.constant 395 : index
    %c0_348 = arith.constant 0 : index
    %1710 = vector.load %arg4[%c395, %c0_348] : memref<768x128xf32, #tpu.memory_space<vmem>>, vector<1x128xf32>
    %1711 = vector.shape_cast %1710 : vector<1x128xf32> to vector<128xf32>
    %1712 = vector.shape_cast %1711 : vector<128xf32> to vector<1x128xf32>
    %1713 = vector.broadcast %1712 : vector<1x128xf32> to vector<8x128xf32>
    %1714 = arith.mulf %1691, %1713 : vector<8x128xf32>
    %1715 = arith.addf %1670, %1714 : vector<8x128xf32>
    %c396 = arith.constant 396 : index
    %c0_349 = arith.constant 0 : index
    %1716 = vector.load %arg4[%c396, %c0_349] : memref<768x128xf32, #tpu.memory_space<vmem>>, vector<1x128xf32>
    %1717 = vector.shape_cast %1716 : vector<1x128xf32> to vector<128xf32>
    %1718 = vector.shape_cast %1717 : vector<128xf32> to vector<1x128xf32>
    %1719 = vector.broadcast %1718 : vector<1x128xf32> to vector<8x128xf32>
    %1720 = arith.mulf %1691, %1719 : vector<8x128xf32>
    %1721 = arith.addf %1675, %1720 : vector<8x128xf32>
    %c397 = arith.constant 397 : index
    %c0_350 = arith.constant 0 : index
    %1722 = vector.load %arg4[%c397, %c0_350] : memref<768x128xf32, #tpu.memory_space<vmem>>, vector<1x128xf32>
    %1723 = vector.shape_cast %1722 : vector<1x128xf32> to vector<128xf32>
    %1724 = vector.shape_cast %1723 : vector<128xf32> to vector<1x128xf32>
    %1725 = vector.broadcast %1724 : vector<1x128xf32> to vector<8x128xf32>
    %1726 = arith.mulf %1691, %1725 : vector<8x128xf32>
    %1727 = arith.addf %1680, %1726 : vector<8x128xf32>
    %c398 = arith.constant 398 : index
    %c0_351 = arith.constant 0 : index
    %1728 = vector.load %arg4[%c398, %c0_351] : memref<768x128xf32, #tpu.memory_space<vmem>>, vector<1x128xf32>
    %1729 = vector.shape_cast %1728 : vector<1x128xf32> to vector<128xf32>
    %1730 = vector.shape_cast %1729 : vector<128xf32> to vector<1x128xf32>
    %1731 = vector.broadcast %1730 : vector<1x128xf32> to vector<8x128xf32>
    %1732 = arith.mulf %1691, %1731 : vector<8x128xf32>
    %1733 = arith.addf %1685, %1732 : vector<8x128xf32>
    %c399 = arith.constant 399 : index
    %c0_352 = arith.constant 0 : index
    %1734 = vector.load %arg4[%c399, %c0_352] : memref<768x128xf32, #tpu.memory_space<vmem>>, vector<1x128xf32>
    %1735 = vector.shape_cast %1734 : vector<1x128xf32> to vector<128xf32>
    %1736 = vector.shape_cast %1735 : vector<128xf32> to vector<1x128xf32>
    %1737 = vector.broadcast %1736 : vector<1x128xf32> to vector<8x128xf32>
    %1738 = arith.mulf %1691, %1737 : vector<8x128xf32>
    %1739 = arith.addf %1690, %1738 : vector<8x128xf32>
    %c144 = arith.constant 144 : index
    %c0_353 = arith.constant 0 : index
    %1740 = vector.load %arg4[%c144, %c0_353] : memref<768x128xf32, #tpu.memory_space<vmem>>, vector<8x128xf32>
    %c400 = arith.constant 400 : index
    %c0_354 = arith.constant 0 : index
    %1741 = vector.load %arg4[%c400, %c0_354] : memref<768x128xf32, #tpu.memory_space<vmem>>, vector<1x128xf32>
    %1742 = vector.shape_cast %1741 : vector<1x128xf32> to vector<128xf32>
    %1743 = vector.shape_cast %1742 : vector<128xf32> to vector<1x128xf32>
    %1744 = vector.broadcast %1743 : vector<1x128xf32> to vector<8x128xf32>
    %1745 = arith.mulf %1740, %1744 : vector<8x128xf32>
    %1746 = arith.addf %1697, %1745 : vector<8x128xf32>
    %c401 = arith.constant 401 : index
    %c0_355 = arith.constant 0 : index
    %1747 = vector.load %arg4[%c401, %c0_355] : memref<768x128xf32, #tpu.memory_space<vmem>>, vector<1x128xf32>
    %1748 = vector.shape_cast %1747 : vector<1x128xf32> to vector<128xf32>
    %1749 = vector.shape_cast %1748 : vector<128xf32> to vector<1x128xf32>
    %1750 = vector.broadcast %1749 : vector<1x128xf32> to vector<8x128xf32>
    %1751 = arith.mulf %1740, %1750 : vector<8x128xf32>
    %1752 = arith.addf %1703, %1751 : vector<8x128xf32>
    %c402 = arith.constant 402 : index
    %c0_356 = arith.constant 0 : index
    %1753 = vector.load %arg4[%c402, %c0_356] : memref<768x128xf32, #tpu.memory_space<vmem>>, vector<1x128xf32>
    %1754 = vector.shape_cast %1753 : vector<1x128xf32> to vector<128xf32>
    %1755 = vector.shape_cast %1754 : vector<128xf32> to vector<1x128xf32>
    %1756 = vector.broadcast %1755 : vector<1x128xf32> to vector<8x128xf32>
    %1757 = arith.mulf %1740, %1756 : vector<8x128xf32>
    %1758 = arith.addf %1709, %1757 : vector<8x128xf32>
    %c403 = arith.constant 403 : index
    %c0_357 = arith.constant 0 : index
    %1759 = vector.load %arg4[%c403, %c0_357] : memref<768x128xf32, #tpu.memory_space<vmem>>, vector<1x128xf32>
    %1760 = vector.shape_cast %1759 : vector<1x128xf32> to vector<128xf32>
    %1761 = vector.shape_cast %1760 : vector<128xf32> to vector<1x128xf32>
    %1762 = vector.broadcast %1761 : vector<1x128xf32> to vector<8x128xf32>
    %1763 = arith.mulf %1740, %1762 : vector<8x128xf32>
    %1764 = arith.addf %1715, %1763 : vector<8x128xf32>
    %c404 = arith.constant 404 : index
    %c0_358 = arith.constant 0 : index
    %1765 = vector.load %arg4[%c404, %c0_358] : memref<768x128xf32, #tpu.memory_space<vmem>>, vector<1x128xf32>
    %1766 = vector.shape_cast %1765 : vector<1x128xf32> to vector<128xf32>
    %1767 = vector.shape_cast %1766 : vector<128xf32> to vector<1x128xf32>
    %1768 = vector.broadcast %1767 : vector<1x128xf32> to vector<8x128xf32>
    %1769 = arith.mulf %1740, %1768 : vector<8x128xf32>
    %1770 = arith.addf %1721, %1769 : vector<8x128xf32>
    %c405 = arith.constant 405 : index
    %c0_359 = arith.constant 0 : index
    %1771 = vector.load %arg4[%c405, %c0_359] : memref<768x128xf32, #tpu.memory_space<vmem>>, vector<1x128xf32>
    %1772 = vector.shape_cast %1771 : vector<1x128xf32> to vector<128xf32>
    %1773 = vector.shape_cast %1772 : vector<128xf32> to vector<1x128xf32>
    %1774 = vector.broadcast %1773 : vector<1x128xf32> to vector<8x128xf32>
    %1775 = arith.mulf %1740, %1774 : vector<8x128xf32>
    %1776 = arith.addf %1727, %1775 : vector<8x128xf32>
    %c406 = arith.constant 406 : index
    %c0_360 = arith.constant 0 : index
    %1777 = vector.load %arg4[%c406, %c0_360] : memref<768x128xf32, #tpu.memory_space<vmem>>, vector<1x128xf32>
    %1778 = vector.shape_cast %1777 : vector<1x128xf32> to vector<128xf32>
    %1779 = vector.shape_cast %1778 : vector<128xf32> to vector<1x128xf32>
    %1780 = vector.broadcast %1779 : vector<1x128xf32> to vector<8x128xf32>
    %1781 = arith.mulf %1740, %1780 : vector<8x128xf32>
    %1782 = arith.addf %1733, %1781 : vector<8x128xf32>
    %c407 = arith.constant 407 : index
    %c0_361 = arith.constant 0 : index
    %1783 = vector.load %arg4[%c407, %c0_361] : memref<768x128xf32, #tpu.memory_space<vmem>>, vector<1x128xf32>
    %1784 = vector.shape_cast %1783 : vector<1x128xf32> to vector<128xf32>
    %1785 = vector.shape_cast %1784 : vector<128xf32> to vector<1x128xf32>
    %1786 = vector.broadcast %1785 : vector<1x128xf32> to vector<8x128xf32>
    %1787 = arith.mulf %1740, %1786 : vector<8x128xf32>
    %1788 = arith.addf %1739, %1787 : vector<8x128xf32>
    %c152 = arith.constant 152 : index
    %c0_362 = arith.constant 0 : index
    %1789 = vector.load %arg4[%c152, %c0_362] : memref<768x128xf32, #tpu.memory_space<vmem>>, vector<8x128xf32>
    %c408 = arith.constant 408 : index
    %c0_363 = arith.constant 0 : index
    %1790 = vector.load %arg4[%c408, %c0_363] : memref<768x128xf32, #tpu.memory_space<vmem>>, vector<1x128xf32>
    %1791 = vector.shape_cast %1790 : vector<1x128xf32> to vector<128xf32>
    %1792 = vector.shape_cast %1791 : vector<128xf32> to vector<1x128xf32>
    %1793 = vector.broadcast %1792 : vector<1x128xf32> to vector<8x128xf32>
    %1794 = arith.mulf %1789, %1793 : vector<8x128xf32>
    %1795 = arith.addf %1746, %1794 : vector<8x128xf32>
    %c409 = arith.constant 409 : index
    %c0_364 = arith.constant 0 : index
    %1796 = vector.load %arg4[%c409, %c0_364] : memref<768x128xf32, #tpu.memory_space<vmem>>, vector<1x128xf32>
    %1797 = vector.shape_cast %1796 : vector<1x128xf32> to vector<128xf32>
    %1798 = vector.shape_cast %1797 : vector<128xf32> to vector<1x128xf32>
    %1799 = vector.broadcast %1798 : vector<1x128xf32> to vector<8x128xf32>
    %1800 = arith.mulf %1789, %1799 : vector<8x128xf32>
    %1801 = arith.addf %1752, %1800 : vector<8x128xf32>
    %c410 = arith.constant 410 : index
    %c0_365 = arith.constant 0 : index
    %1802 = vector.load %arg4[%c410, %c0_365] : memref<768x128xf32, #tpu.memory_space<vmem>>, vector<1x128xf32>
    %1803 = vector.shape_cast %1802 : vector<1x128xf32> to vector<128xf32>
    %1804 = vector.shape_cast %1803 : vector<128xf32> to vector<1x128xf32>
    %1805 = vector.broadcast %1804 : vector<1x128xf32> to vector<8x128xf32>
    %1806 = arith.mulf %1789, %1805 : vector<8x128xf32>
    %1807 = arith.addf %1758, %1806 : vector<8x128xf32>
    %c411 = arith.constant 411 : index
    %c0_366 = arith.constant 0 : index
    %1808 = vector.load %arg4[%c411, %c0_366] : memref<768x128xf32, #tpu.memory_space<vmem>>, vector<1x128xf32>
    %1809 = vector.shape_cast %1808 : vector<1x128xf32> to vector<128xf32>
    %1810 = vector.shape_cast %1809 : vector<128xf32> to vector<1x128xf32>
    %1811 = vector.broadcast %1810 : vector<1x128xf32> to vector<8x128xf32>
    %1812 = arith.mulf %1789, %1811 : vector<8x128xf32>
    %1813 = arith.addf %1764, %1812 : vector<8x128xf32>
    %c412 = arith.constant 412 : index
    %c0_367 = arith.constant 0 : index
    %1814 = vector.load %arg4[%c412, %c0_367] : memref<768x128xf32, #tpu.memory_space<vmem>>, vector<1x128xf32>
    %1815 = vector.shape_cast %1814 : vector<1x128xf32> to vector<128xf32>
    %1816 = vector.shape_cast %1815 : vector<128xf32> to vector<1x128xf32>
    %1817 = vector.broadcast %1816 : vector<1x128xf32> to vector<8x128xf32>
    %1818 = arith.mulf %1789, %1817 : vector<8x128xf32>
    %1819 = arith.addf %1770, %1818 : vector<8x128xf32>
    %c413 = arith.constant 413 : index
    %c0_368 = arith.constant 0 : index
    %1820 = vector.load %arg4[%c413, %c0_368] : memref<768x128xf32, #tpu.memory_space<vmem>>, vector<1x128xf32>
    %1821 = vector.shape_cast %1820 : vector<1x128xf32> to vector<128xf32>
    %1822 = vector.shape_cast %1821 : vector<128xf32> to vector<1x128xf32>
    %1823 = vector.broadcast %1822 : vector<1x128xf32> to vector<8x128xf32>
    %1824 = arith.mulf %1789, %1823 : vector<8x128xf32>
    %1825 = arith.addf %1776, %1824 : vector<8x128xf32>
    %c414 = arith.constant 414 : index
    %c0_369 = arith.constant 0 : index
    %1826 = vector.load %arg4[%c414, %c0_369] : memref<768x128xf32, #tpu.memory_space<vmem>>, vector<1x128xf32>
    %1827 = vector.shape_cast %1826 : vector<1x128xf32> to vector<128xf32>
    %1828 = vector.shape_cast %1827 : vector<128xf32> to vector<1x128xf32>
    %1829 = vector.broadcast %1828 : vector<1x128xf32> to vector<8x128xf32>
    %1830 = arith.mulf %1789, %1829 : vector<8x128xf32>
    %1831 = arith.addf %1782, %1830 : vector<8x128xf32>
    %c415 = arith.constant 415 : index
    %c0_370 = arith.constant 0 : index
    %1832 = vector.load %arg4[%c415, %c0_370] : memref<768x128xf32, #tpu.memory_space<vmem>>, vector<1x128xf32>
    %1833 = vector.shape_cast %1832 : vector<1x128xf32> to vector<128xf32>
    %1834 = vector.shape_cast %1833 : vector<128xf32> to vector<1x128xf32>
    %1835 = vector.broadcast %1834 : vector<1x128xf32> to vector<8x128xf32>
    %1836 = arith.mulf %1789, %1835 : vector<8x128xf32>
    %1837 = arith.addf %1788, %1836 : vector<8x128xf32>
    %c160 = arith.constant 160 : index
    %c0_371 = arith.constant 0 : index
    %1838 = vector.load %arg4[%c160, %c0_371] : memref<768x128xf32, #tpu.memory_space<vmem>>, vector<8x128xf32>
    %c416 = arith.constant 416 : index
    %c0_372 = arith.constant 0 : index
    %1839 = vector.load %arg4[%c416, %c0_372] : memref<768x128xf32, #tpu.memory_space<vmem>>, vector<1x128xf32>
    %1840 = vector.shape_cast %1839 : vector<1x128xf32> to vector<128xf32>
    %1841 = vector.shape_cast %1840 : vector<128xf32> to vector<1x128xf32>
    %1842 = vector.broadcast %1841 : vector<1x128xf32> to vector<8x128xf32>
    %1843 = arith.mulf %1838, %1842 : vector<8x128xf32>
    %1844 = arith.addf %1795, %1843 : vector<8x128xf32>
    %c417 = arith.constant 417 : index
    %c0_373 = arith.constant 0 : index
    %1845 = vector.load %arg4[%c417, %c0_373] : memref<768x128xf32, #tpu.memory_space<vmem>>, vector<1x128xf32>
    %1846 = vector.shape_cast %1845 : vector<1x128xf32> to vector<128xf32>
    %1847 = vector.shape_cast %1846 : vector<128xf32> to vector<1x128xf32>
    %1848 = vector.broadcast %1847 : vector<1x128xf32> to vector<8x128xf32>
    %1849 = arith.mulf %1838, %1848 : vector<8x128xf32>
    %1850 = arith.addf %1801, %1849 : vector<8x128xf32>
    %c418 = arith.constant 418 : index
    %c0_374 = arith.constant 0 : index
    %1851 = vector.load %arg4[%c418, %c0_374] : memref<768x128xf32, #tpu.memory_space<vmem>>, vector<1x128xf32>
    %1852 = vector.shape_cast %1851 : vector<1x128xf32> to vector<128xf32>
    %1853 = vector.shape_cast %1852 : vector<128xf32> to vector<1x128xf32>
    %1854 = vector.broadcast %1853 : vector<1x128xf32> to vector<8x128xf32>
    %1855 = arith.mulf %1838, %1854 : vector<8x128xf32>
    %1856 = arith.addf %1807, %1855 : vector<8x128xf32>
    %c419 = arith.constant 419 : index
    %c0_375 = arith.constant 0 : index
    %1857 = vector.load %arg4[%c419, %c0_375] : memref<768x128xf32, #tpu.memory_space<vmem>>, vector<1x128xf32>
    %1858 = vector.shape_cast %1857 : vector<1x128xf32> to vector<128xf32>
    %1859 = vector.shape_cast %1858 : vector<128xf32> to vector<1x128xf32>
    %1860 = vector.broadcast %1859 : vector<1x128xf32> to vector<8x128xf32>
    %1861 = arith.mulf %1838, %1860 : vector<8x128xf32>
    %1862 = arith.addf %1813, %1861 : vector<8x128xf32>
    %c420 = arith.constant 420 : index
    %c0_376 = arith.constant 0 : index
    %1863 = vector.load %arg4[%c420, %c0_376] : memref<768x128xf32, #tpu.memory_space<vmem>>, vector<1x128xf32>
    %1864 = vector.shape_cast %1863 : vector<1x128xf32> to vector<128xf32>
    %1865 = vector.shape_cast %1864 : vector<128xf32> to vector<1x128xf32>
    %1866 = vector.broadcast %1865 : vector<1x128xf32> to vector<8x128xf32>
    %1867 = arith.mulf %1838, %1866 : vector<8x128xf32>
    %1868 = arith.addf %1819, %1867 : vector<8x128xf32>
    %c421 = arith.constant 421 : index
    %c0_377 = arith.constant 0 : index
    %1869 = vector.load %arg4[%c421, %c0_377] : memref<768x128xf32, #tpu.memory_space<vmem>>, vector<1x128xf32>
    %1870 = vector.shape_cast %1869 : vector<1x128xf32> to vector<128xf32>
    %1871 = vector.shape_cast %1870 : vector<128xf32> to vector<1x128xf32>
    %1872 = vector.broadcast %1871 : vector<1x128xf32> to vector<8x128xf32>
    %1873 = arith.mulf %1838, %1872 : vector<8x128xf32>
    %1874 = arith.addf %1825, %1873 : vector<8x128xf32>
    %c422 = arith.constant 422 : index
    %c0_378 = arith.constant 0 : index
    %1875 = vector.load %arg4[%c422, %c0_378] : memref<768x128xf32, #tpu.memory_space<vmem>>, vector<1x128xf32>
    %1876 = vector.shape_cast %1875 : vector<1x128xf32> to vector<128xf32>
    %1877 = vector.shape_cast %1876 : vector<128xf32> to vector<1x128xf32>
    %1878 = vector.broadcast %1877 : vector<1x128xf32> to vector<8x128xf32>
    %1879 = arith.mulf %1838, %1878 : vector<8x128xf32>
    %1880 = arith.addf %1831, %1879 : vector<8x128xf32>
    %c423 = arith.constant 423 : index
    %c0_379 = arith.constant 0 : index
    %1881 = vector.load %arg4[%c423, %c0_379] : memref<768x128xf32, #tpu.memory_space<vmem>>, vector<1x128xf32>
    %1882 = vector.shape_cast %1881 : vector<1x128xf32> to vector<128xf32>
    %1883 = vector.shape_cast %1882 : vector<128xf32> to vector<1x128xf32>
    %1884 = vector.broadcast %1883 : vector<1x128xf32> to vector<8x128xf32>
    %1885 = arith.mulf %1838, %1884 : vector<8x128xf32>
    %1886 = arith.addf %1837, %1885 : vector<8x128xf32>
    %c168 = arith.constant 168 : index
    %c0_380 = arith.constant 0 : index
    %1887 = vector.load %arg4[%c168, %c0_380] : memref<768x128xf32, #tpu.memory_space<vmem>>, vector<8x128xf32>
    %c424 = arith.constant 424 : index
    %c0_381 = arith.constant 0 : index
    %1888 = vector.load %arg4[%c424, %c0_381] : memref<768x128xf32, #tpu.memory_space<vmem>>, vector<1x128xf32>
    %1889 = vector.shape_cast %1888 : vector<1x128xf32> to vector<128xf32>
    %1890 = vector.shape_cast %1889 : vector<128xf32> to vector<1x128xf32>
    %1891 = vector.broadcast %1890 : vector<1x128xf32> to vector<8x128xf32>
    %1892 = arith.mulf %1887, %1891 : vector<8x128xf32>
    %1893 = arith.addf %1844, %1892 : vector<8x128xf32>
    %c425 = arith.constant 425 : index
    %c0_382 = arith.constant 0 : index
    %1894 = vector.load %arg4[%c425, %c0_382] : memref<768x128xf32, #tpu.memory_space<vmem>>, vector<1x128xf32>
    %1895 = vector.shape_cast %1894 : vector<1x128xf32> to vector<128xf32>
    %1896 = vector.shape_cast %1895 : vector<128xf32> to vector<1x128xf32>
    %1897 = vector.broadcast %1896 : vector<1x128xf32> to vector<8x128xf32>
    %1898 = arith.mulf %1887, %1897 : vector<8x128xf32>
    %1899 = arith.addf %1850, %1898 : vector<8x128xf32>
    %c426 = arith.constant 426 : index
    %c0_383 = arith.constant 0 : index
    %1900 = vector.load %arg4[%c426, %c0_383] : memref<768x128xf32, #tpu.memory_space<vmem>>, vector<1x128xf32>
    %1901 = vector.shape_cast %1900 : vector<1x128xf32> to vector<128xf32>
    %1902 = vector.shape_cast %1901 : vector<128xf32> to vector<1x128xf32>
    %1903 = vector.broadcast %1902 : vector<1x128xf32> to vector<8x128xf32>
    %1904 = arith.mulf %1887, %1903 : vector<8x128xf32>
    %1905 = arith.addf %1856, %1904 : vector<8x128xf32>
    %c427 = arith.constant 427 : index
    %c0_384 = arith.constant 0 : index
    %1906 = vector.load %arg4[%c427, %c0_384] : memref<768x128xf32, #tpu.memory_space<vmem>>, vector<1x128xf32>
    %1907 = vector.shape_cast %1906 : vector<1x128xf32> to vector<128xf32>
    %1908 = vector.shape_cast %1907 : vector<128xf32> to vector<1x128xf32>
    %1909 = vector.broadcast %1908 : vector<1x128xf32> to vector<8x128xf32>
    %1910 = arith.mulf %1887, %1909 : vector<8x128xf32>
    %1911 = arith.addf %1862, %1910 : vector<8x128xf32>
    %c428 = arith.constant 428 : index
    %c0_385 = arith.constant 0 : index
    %1912 = vector.load %arg4[%c428, %c0_385] : memref<768x128xf32, #tpu.memory_space<vmem>>, vector<1x128xf32>
    %1913 = vector.shape_cast %1912 : vector<1x128xf32> to vector<128xf32>
    %1914 = vector.shape_cast %1913 : vector<128xf32> to vector<1x128xf32>
    %1915 = vector.broadcast %1914 : vector<1x128xf32> to vector<8x128xf32>
    %1916 = arith.mulf %1887, %1915 : vector<8x128xf32>
    %1917 = arith.addf %1868, %1916 : vector<8x128xf32>
    %c429 = arith.constant 429 : index
    %c0_386 = arith.constant 0 : index
    %1918 = vector.load %arg4[%c429, %c0_386] : memref<768x128xf32, #tpu.memory_space<vmem>>, vector<1x128xf32>
    %1919 = vector.shape_cast %1918 : vector<1x128xf32> to vector<128xf32>
    %1920 = vector.shape_cast %1919 : vector<128xf32> to vector<1x128xf32>
    %1921 = vector.broadcast %1920 : vector<1x128xf32> to vector<8x128xf32>
    %1922 = arith.mulf %1887, %1921 : vector<8x128xf32>
    %1923 = arith.addf %1874, %1922 : vector<8x128xf32>
    %c430 = arith.constant 430 : index
    %c0_387 = arith.constant 0 : index
    %1924 = vector.load %arg4[%c430, %c0_387] : memref<768x128xf32, #tpu.memory_space<vmem>>, vector<1x128xf32>
    %1925 = vector.shape_cast %1924 : vector<1x128xf32> to vector<128xf32>
    %1926 = vector.shape_cast %1925 : vector<128xf32> to vector<1x128xf32>
    %1927 = vector.broadcast %1926 : vector<1x128xf32> to vector<8x128xf32>
    %1928 = arith.mulf %1887, %1927 : vector<8x128xf32>
    %1929 = arith.addf %1880, %1928 : vector<8x128xf32>
    %c431 = arith.constant 431 : index
    %c0_388 = arith.constant 0 : index
    %1930 = vector.load %arg4[%c431, %c0_388] : memref<768x128xf32, #tpu.memory_space<vmem>>, vector<1x128xf32>
    %1931 = vector.shape_cast %1930 : vector<1x128xf32> to vector<128xf32>
    %1932 = vector.shape_cast %1931 : vector<128xf32> to vector<1x128xf32>
    %1933 = vector.broadcast %1932 : vector<1x128xf32> to vector<8x128xf32>
    %1934 = arith.mulf %1887, %1933 : vector<8x128xf32>
    %1935 = arith.addf %1886, %1934 : vector<8x128xf32>
    %c176 = arith.constant 176 : index
    %c0_389 = arith.constant 0 : index
    %1936 = vector.load %arg4[%c176, %c0_389] : memref<768x128xf32, #tpu.memory_space<vmem>>, vector<8x128xf32>
    %c432 = arith.constant 432 : index
    %c0_390 = arith.constant 0 : index
    %1937 = vector.load %arg4[%c432, %c0_390] : memref<768x128xf32, #tpu.memory_space<vmem>>, vector<1x128xf32>
    %1938 = vector.shape_cast %1937 : vector<1x128xf32> to vector<128xf32>
    %1939 = vector.shape_cast %1938 : vector<128xf32> to vector<1x128xf32>
    %1940 = vector.broadcast %1939 : vector<1x128xf32> to vector<8x128xf32>
    %1941 = arith.mulf %1936, %1940 : vector<8x128xf32>
    %1942 = arith.addf %1893, %1941 : vector<8x128xf32>
    %c433 = arith.constant 433 : index
    %c0_391 = arith.constant 0 : index
    %1943 = vector.load %arg4[%c433, %c0_391] : memref<768x128xf32, #tpu.memory_space<vmem>>, vector<1x128xf32>
    %1944 = vector.shape_cast %1943 : vector<1x128xf32> to vector<128xf32>
    %1945 = vector.shape_cast %1944 : vector<128xf32> to vector<1x128xf32>
    %1946 = vector.broadcast %1945 : vector<1x128xf32> to vector<8x128xf32>
    %1947 = arith.mulf %1936, %1946 : vector<8x128xf32>
    %1948 = arith.addf %1899, %1947 : vector<8x128xf32>
    %c434 = arith.constant 434 : index
    %c0_392 = arith.constant 0 : index
    %1949 = vector.load %arg4[%c434, %c0_392] : memref<768x128xf32, #tpu.memory_space<vmem>>, vector<1x128xf32>
    %1950 = vector.shape_cast %1949 : vector<1x128xf32> to vector<128xf32>
    %1951 = vector.shape_cast %1950 : vector<128xf32> to vector<1x128xf32>
    %1952 = vector.broadcast %1951 : vector<1x128xf32> to vector<8x128xf32>
    %1953 = arith.mulf %1936, %1952 : vector<8x128xf32>
    %1954 = arith.addf %1905, %1953 : vector<8x128xf32>
    %c435 = arith.constant 435 : index
    %c0_393 = arith.constant 0 : index
    %1955 = vector.load %arg4[%c435, %c0_393] : memref<768x128xf32, #tpu.memory_space<vmem>>, vector<1x128xf32>
    %1956 = vector.shape_cast %1955 : vector<1x128xf32> to vector<128xf32>
    %1957 = vector.shape_cast %1956 : vector<128xf32> to vector<1x128xf32>
    %1958 = vector.broadcast %1957 : vector<1x128xf32> to vector<8x128xf32>
    %1959 = arith.mulf %1936, %1958 : vector<8x128xf32>
    %1960 = arith.addf %1911, %1959 : vector<8x128xf32>
    %c436 = arith.constant 436 : index
    %c0_394 = arith.constant 0 : index
    %1961 = vector.load %arg4[%c436, %c0_394] : memref<768x128xf32, #tpu.memory_space<vmem>>, vector<1x128xf32>
    %1962 = vector.shape_cast %1961 : vector<1x128xf32> to vector<128xf32>
    %1963 = vector.shape_cast %1962 : vector<128xf32> to vector<1x128xf32>
    %1964 = vector.broadcast %1963 : vector<1x128xf32> to vector<8x128xf32>
    %1965 = arith.mulf %1936, %1964 : vector<8x128xf32>
    %1966 = arith.addf %1917, %1965 : vector<8x128xf32>
    %c437 = arith.constant 437 : index
    %c0_395 = arith.constant 0 : index
    %1967 = vector.load %arg4[%c437, %c0_395] : memref<768x128xf32, #tpu.memory_space<vmem>>, vector<1x128xf32>
    %1968 = vector.shape_cast %1967 : vector<1x128xf32> to vector<128xf32>
    %1969 = vector.shape_cast %1968 : vector<128xf32> to vector<1x128xf32>
    %1970 = vector.broadcast %1969 : vector<1x128xf32> to vector<8x128xf32>
    %1971 = arith.mulf %1936, %1970 : vector<8x128xf32>
    %1972 = arith.addf %1923, %1971 : vector<8x128xf32>
    %c438 = arith.constant 438 : index
    %c0_396 = arith.constant 0 : index
    %1973 = vector.load %arg4[%c438, %c0_396] : memref<768x128xf32, #tpu.memory_space<vmem>>, vector<1x128xf32>
    %1974 = vector.shape_cast %1973 : vector<1x128xf32> to vector<128xf32>
    %1975 = vector.shape_cast %1974 : vector<128xf32> to vector<1x128xf32>
    %1976 = vector.broadcast %1975 : vector<1x128xf32> to vector<8x128xf32>
    %1977 = arith.mulf %1936, %1976 : vector<8x128xf32>
    %1978 = arith.addf %1929, %1977 : vector<8x128xf32>
    %c439 = arith.constant 439 : index
    %c0_397 = arith.constant 0 : index
    %1979 = vector.load %arg4[%c439, %c0_397] : memref<768x128xf32, #tpu.memory_space<vmem>>, vector<1x128xf32>
    %1980 = vector.shape_cast %1979 : vector<1x128xf32> to vector<128xf32>
    %1981 = vector.shape_cast %1980 : vector<128xf32> to vector<1x128xf32>
    %1982 = vector.broadcast %1981 : vector<1x128xf32> to vector<8x128xf32>
    %1983 = arith.mulf %1936, %1982 : vector<8x128xf32>
    %1984 = arith.addf %1935, %1983 : vector<8x128xf32>
    %c184 = arith.constant 184 : index
    %c0_398 = arith.constant 0 : index
    %1985 = vector.load %arg4[%c184, %c0_398] : memref<768x128xf32, #tpu.memory_space<vmem>>, vector<8x128xf32>
    %c440 = arith.constant 440 : index
    %c0_399 = arith.constant 0 : index
    %1986 = vector.load %arg4[%c440, %c0_399] : memref<768x128xf32, #tpu.memory_space<vmem>>, vector<1x128xf32>
    %1987 = vector.shape_cast %1986 : vector<1x128xf32> to vector<128xf32>
    %1988 = vector.shape_cast %1987 : vector<128xf32> to vector<1x128xf32>
    %1989 = vector.broadcast %1988 : vector<1x128xf32> to vector<8x128xf32>
    %1990 = arith.mulf %1985, %1989 : vector<8x128xf32>
    %1991 = arith.addf %1942, %1990 : vector<8x128xf32>
    %c441 = arith.constant 441 : index
    %c0_400 = arith.constant 0 : index
    %1992 = vector.load %arg4[%c441, %c0_400] : memref<768x128xf32, #tpu.memory_space<vmem>>, vector<1x128xf32>
    %1993 = vector.shape_cast %1992 : vector<1x128xf32> to vector<128xf32>
    %1994 = vector.shape_cast %1993 : vector<128xf32> to vector<1x128xf32>
    %1995 = vector.broadcast %1994 : vector<1x128xf32> to vector<8x128xf32>
    %1996 = arith.mulf %1985, %1995 : vector<8x128xf32>
    %1997 = arith.addf %1948, %1996 : vector<8x128xf32>
    %c442 = arith.constant 442 : index
    %c0_401 = arith.constant 0 : index
    %1998 = vector.load %arg4[%c442, %c0_401] : memref<768x128xf32, #tpu.memory_space<vmem>>, vector<1x128xf32>
    %1999 = vector.shape_cast %1998 : vector<1x128xf32> to vector<128xf32>
    %2000 = vector.shape_cast %1999 : vector<128xf32> to vector<1x128xf32>
    %2001 = vector.broadcast %2000 : vector<1x128xf32> to vector<8x128xf32>
    %2002 = arith.mulf %1985, %2001 : vector<8x128xf32>
    %2003 = arith.addf %1954, %2002 : vector<8x128xf32>
    %c443 = arith.constant 443 : index
    %c0_402 = arith.constant 0 : index
    %2004 = vector.load %arg4[%c443, %c0_402] : memref<768x128xf32, #tpu.memory_space<vmem>>, vector<1x128xf32>
    %2005 = vector.shape_cast %2004 : vector<1x128xf32> to vector<128xf32>
    %2006 = vector.shape_cast %2005 : vector<128xf32> to vector<1x128xf32>
    %2007 = vector.broadcast %2006 : vector<1x128xf32> to vector<8x128xf32>
    %2008 = arith.mulf %1985, %2007 : vector<8x128xf32>
    %2009 = arith.addf %1960, %2008 : vector<8x128xf32>
    %c444 = arith.constant 444 : index
    %c0_403 = arith.constant 0 : index
    %2010 = vector.load %arg4[%c444, %c0_403] : memref<768x128xf32, #tpu.memory_space<vmem>>, vector<1x128xf32>
    %2011 = vector.shape_cast %2010 : vector<1x128xf32> to vector<128xf32>
    %2012 = vector.shape_cast %2011 : vector<128xf32> to vector<1x128xf32>
    %2013 = vector.broadcast %2012 : vector<1x128xf32> to vector<8x128xf32>
    %2014 = arith.mulf %1985, %2013 : vector<8x128xf32>
    %2015 = arith.addf %1966, %2014 : vector<8x128xf32>
    %c445 = arith.constant 445 : index
    %c0_404 = arith.constant 0 : index
    %2016 = vector.load %arg4[%c445, %c0_404] : memref<768x128xf32, #tpu.memory_space<vmem>>, vector<1x128xf32>
    %2017 = vector.shape_cast %2016 : vector<1x128xf32> to vector<128xf32>
    %2018 = vector.shape_cast %2017 : vector<128xf32> to vector<1x128xf32>
    %2019 = vector.broadcast %2018 : vector<1x128xf32> to vector<8x128xf32>
    %2020 = arith.mulf %1985, %2019 : vector<8x128xf32>
    %2021 = arith.addf %1972, %2020 : vector<8x128xf32>
    %c446 = arith.constant 446 : index
    %c0_405 = arith.constant 0 : index
    %2022 = vector.load %arg4[%c446, %c0_405] : memref<768x128xf32, #tpu.memory_space<vmem>>, vector<1x128xf32>
    %2023 = vector.shape_cast %2022 : vector<1x128xf32> to vector<128xf32>
    %2024 = vector.shape_cast %2023 : vector<128xf32> to vector<1x128xf32>
    %2025 = vector.broadcast %2024 : vector<1x128xf32> to vector<8x128xf32>
    %2026 = arith.mulf %1985, %2025 : vector<8x128xf32>
    %2027 = arith.addf %1978, %2026 : vector<8x128xf32>
    %c447 = arith.constant 447 : index
    %c0_406 = arith.constant 0 : index
    %2028 = vector.load %arg4[%c447, %c0_406] : memref<768x128xf32, #tpu.memory_space<vmem>>, vector<1x128xf32>
    %2029 = vector.shape_cast %2028 : vector<1x128xf32> to vector<128xf32>
    %2030 = vector.shape_cast %2029 : vector<128xf32> to vector<1x128xf32>
    %2031 = vector.broadcast %2030 : vector<1x128xf32> to vector<8x128xf32>
    %2032 = arith.mulf %1985, %2031 : vector<8x128xf32>
    %2033 = arith.addf %1984, %2032 : vector<8x128xf32>
    %2034 = arith.maximumf %1991, %1997 : vector<8x128xf32>
    %2035 = arith.maximumf %2034, %2003 : vector<8x128xf32>
    %2036 = arith.maximumf %2035, %2009 : vector<8x128xf32>
    %2037 = arith.maximumf %2036, %2015 : vector<8x128xf32>
    %2038 = arith.maximumf %2037, %2021 : vector<8x128xf32>
    %2039 = arith.maximumf %2038, %2027 : vector<8x128xf32>
    %2040 = arith.maximumf %2039, %2033 : vector<8x128xf32>
    %2041 = arith.subf %1991, %2040 : vector<8x128xf32>
    %2042 = math.exp %2041 : vector<8x128xf32>
    %2043 = arith.subf %1997, %2040 : vector<8x128xf32>
    %2044 = math.exp %2043 : vector<8x128xf32>
    %2045 = arith.subf %2003, %2040 : vector<8x128xf32>
    %2046 = math.exp %2045 : vector<8x128xf32>
    %2047 = arith.subf %2009, %2040 : vector<8x128xf32>
    %2048 = math.exp %2047 : vector<8x128xf32>
    %2049 = arith.subf %2015, %2040 : vector<8x128xf32>
    %2050 = math.exp %2049 : vector<8x128xf32>
    %2051 = arith.subf %2021, %2040 : vector<8x128xf32>
    %2052 = math.exp %2051 : vector<8x128xf32>
    %2053 = arith.subf %2027, %2040 : vector<8x128xf32>
    %2054 = math.exp %2053 : vector<8x128xf32>
    %2055 = arith.subf %2033, %2040 : vector<8x128xf32>
    %2056 = math.exp %2055 : vector<8x128xf32>
    %2057 = arith.addf %2042, %2044 : vector<8x128xf32>
    %2058 = arith.addf %2057, %2046 : vector<8x128xf32>
    %2059 = arith.addf %2058, %2048 : vector<8x128xf32>
    %2060 = arith.addf %2059, %2050 : vector<8x128xf32>
    %2061 = arith.addf %2060, %2052 : vector<8x128xf32>
    %2062 = arith.addf %2061, %2054 : vector<8x128xf32>
    %2063 = arith.addf %2062, %2056 : vector<8x128xf32>
    %2064 = tpu.reciprocal %2063 : vector<8x128xf32> -> vector<8x128xf32>
    %2065 = arith.mulf %2042, %2064 : vector<8x128xf32>
    %2066 = arith.mulf %2044, %2064 : vector<8x128xf32>
    %2067 = arith.mulf %2046, %2064 : vector<8x128xf32>
    %2068 = arith.mulf %2048, %2064 : vector<8x128xf32>
    %2069 = arith.mulf %2050, %2064 : vector<8x128xf32>
    %2070 = arith.mulf %2052, %2064 : vector<8x128xf32>
    %2071 = arith.mulf %2054, %2064 : vector<8x128xf32>
    %2072 = arith.mulf %2056, %2064 : vector<8x128xf32>
    %c640 = arith.constant 640 : index
    %c0_407 = arith.constant 0 : index
    %2073 = vector.load %arg4[%c640, %c0_407] : memref<768x128xf32, #tpu.memory_space<vmem>>, vector<1x128xf32>
    %2074 = vector.shape_cast %2073 : vector<1x128xf32> to vector<128xf32>
    %2075 = vector.shape_cast %2074 : vector<128xf32> to vector<1x128xf32>
    %2076 = vector.broadcast %2075 : vector<1x128xf32> to vector<8x128xf32>
    %2077 = arith.mulf %2065, %2076 : vector<8x128xf32>
    %c641 = arith.constant 641 : index
    %c0_408 = arith.constant 0 : index
    %2078 = vector.load %arg4[%c641, %c0_408] : memref<768x128xf32, #tpu.memory_space<vmem>>, vector<1x128xf32>
    %2079 = vector.shape_cast %2078 : vector<1x128xf32> to vector<128xf32>
    %2080 = vector.shape_cast %2079 : vector<128xf32> to vector<1x128xf32>
    %2081 = vector.broadcast %2080 : vector<1x128xf32> to vector<8x128xf32>
    %2082 = arith.mulf %2066, %2081 : vector<8x128xf32>
    %2083 = arith.addf %2077, %2082 : vector<8x128xf32>
    %c642 = arith.constant 642 : index
    %c0_409 = arith.constant 0 : index
    %2084 = vector.load %arg4[%c642, %c0_409] : memref<768x128xf32, #tpu.memory_space<vmem>>, vector<1x128xf32>
    %2085 = vector.shape_cast %2084 : vector<1x128xf32> to vector<128xf32>
    %2086 = vector.shape_cast %2085 : vector<128xf32> to vector<1x128xf32>
    %2087 = vector.broadcast %2086 : vector<1x128xf32> to vector<8x128xf32>
    %2088 = arith.mulf %2067, %2087 : vector<8x128xf32>
    %2089 = arith.addf %2083, %2088 : vector<8x128xf32>
    %c643 = arith.constant 643 : index
    %c0_410 = arith.constant 0 : index
    %2090 = vector.load %arg4[%c643, %c0_410] : memref<768x128xf32, #tpu.memory_space<vmem>>, vector<1x128xf32>
    %2091 = vector.shape_cast %2090 : vector<1x128xf32> to vector<128xf32>
    %2092 = vector.shape_cast %2091 : vector<128xf32> to vector<1x128xf32>
    %2093 = vector.broadcast %2092 : vector<1x128xf32> to vector<8x128xf32>
    %2094 = arith.mulf %2068, %2093 : vector<8x128xf32>
    %2095 = arith.addf %2089, %2094 : vector<8x128xf32>
    %c644 = arith.constant 644 : index
    %c0_411 = arith.constant 0 : index
    %2096 = vector.load %arg4[%c644, %c0_411] : memref<768x128xf32, #tpu.memory_space<vmem>>, vector<1x128xf32>
    %2097 = vector.shape_cast %2096 : vector<1x128xf32> to vector<128xf32>
    %2098 = vector.shape_cast %2097 : vector<128xf32> to vector<1x128xf32>
    %2099 = vector.broadcast %2098 : vector<1x128xf32> to vector<8x128xf32>
    %2100 = arith.mulf %2069, %2099 : vector<8x128xf32>
    %2101 = arith.addf %2095, %2100 : vector<8x128xf32>
    %c645 = arith.constant 645 : index
    %c0_412 = arith.constant 0 : index
    %2102 = vector.load %arg4[%c645, %c0_412] : memref<768x128xf32, #tpu.memory_space<vmem>>, vector<1x128xf32>
    %2103 = vector.shape_cast %2102 : vector<1x128xf32> to vector<128xf32>
    %2104 = vector.shape_cast %2103 : vector<128xf32> to vector<1x128xf32>
    %2105 = vector.broadcast %2104 : vector<1x128xf32> to vector<8x128xf32>
    %2106 = arith.mulf %2070, %2105 : vector<8x128xf32>
    %2107 = arith.addf %2101, %2106 : vector<8x128xf32>
    %c646 = arith.constant 646 : index
    %c0_413 = arith.constant 0 : index
    %2108 = vector.load %arg4[%c646, %c0_413] : memref<768x128xf32, #tpu.memory_space<vmem>>, vector<1x128xf32>
    %2109 = vector.shape_cast %2108 : vector<1x128xf32> to vector<128xf32>
    %2110 = vector.shape_cast %2109 : vector<128xf32> to vector<1x128xf32>
    %2111 = vector.broadcast %2110 : vector<1x128xf32> to vector<8x128xf32>
    %2112 = arith.mulf %2071, %2111 : vector<8x128xf32>
    %2113 = arith.addf %2107, %2112 : vector<8x128xf32>
    %c647 = arith.constant 647 : index
    %c0_414 = arith.constant 0 : index
    %2114 = vector.load %arg4[%c647, %c0_414] : memref<768x128xf32, #tpu.memory_space<vmem>>, vector<1x128xf32>
    %2115 = vector.shape_cast %2114 : vector<1x128xf32> to vector<128xf32>
    %2116 = vector.shape_cast %2115 : vector<128xf32> to vector<1x128xf32>
    %2117 = vector.broadcast %2116 : vector<1x128xf32> to vector<8x128xf32>
    %2118 = arith.mulf %2072, %2117 : vector<8x128xf32>
    %2119 = arith.addf %2113, %2118 : vector<8x128xf32>
    %c2_415 = arith.constant 2 : index
    %c0_416 = arith.constant 0 : index
    %c0_417 = arith.constant 0 : index
    %c0_418 = arith.constant 0 : index
    %2120 = vector.load %arg3[%c2_415, %c0_416, %c0_417, %c0_418] : memref<4x8x8x128xf32, #tpu.memory_space<vmem>>, vector<1x1x8x128xf32>
    %2121 = vector.shape_cast %2120 : vector<1x1x8x128xf32> to vector<8x128xf32>
    %2122 = vector.shape_cast %2119 : vector<8x128xf32> to vector<1x1x8x128xf32>
    tpu.vector_store %arg3[%c2_415, %c0_416, %c0_417, %c0_418], %2122 {strides = array<i32>} : memref<4x8x8x128xf32, #tpu.memory_space<vmem>>, vector<1x1x8x128xf32>,
    %c648 = arith.constant 648 : index
    %c0_419 = arith.constant 0 : index
    %2123 = vector.load %arg4[%c648, %c0_419] : memref<768x128xf32, #tpu.memory_space<vmem>>, vector<1x128xf32>
    %2124 = vector.shape_cast %2123 : vector<1x128xf32> to vector<128xf32>
    %2125 = vector.shape_cast %2124 : vector<128xf32> to vector<1x128xf32>
    %2126 = vector.broadcast %2125 : vector<1x128xf32> to vector<8x128xf32>
    %2127 = arith.mulf %2065, %2126 : vector<8x128xf32>
    %c649 = arith.constant 649 : index
    %c0_420 = arith.constant 0 : index
    %2128 = vector.load %arg4[%c649, %c0_420] : memref<768x128xf32, #tpu.memory_space<vmem>>, vector<1x128xf32>
    %2129 = vector.shape_cast %2128 : vector<1x128xf32> to vector<128xf32>
    %2130 = vector.shape_cast %2129 : vector<128xf32> to vector<1x128xf32>
    %2131 = vector.broadcast %2130 : vector<1x128xf32> to vector<8x128xf32>
    %2132 = arith.mulf %2066, %2131 : vector<8x128xf32>
    %2133 = arith.addf %2127, %2132 : vector<8x128xf32>
    %c650 = arith.constant 650 : index
    %c0_421 = arith.constant 0 : index
    %2134 = vector.load %arg4[%c650, %c0_421] : memref<768x128xf32, #tpu.memory_space<vmem>>, vector<1x128xf32>
    %2135 = vector.shape_cast %2134 : vector<1x128xf32> to vector<128xf32>
    %2136 = vector.shape_cast %2135 : vector<128xf32> to vector<1x128xf32>
    %2137 = vector.broadcast %2136 : vector<1x128xf32> to vector<8x128xf32>
    %2138 = arith.mulf %2067, %2137 : vector<8x128xf32>
    %2139 = arith.addf %2133, %2138 : vector<8x128xf32>
    %c651 = arith.constant 651 : index
    %c0_422 = arith.constant 0 : index
    %2140 = vector.load %arg4[%c651, %c0_422] : memref<768x128xf32, #tpu.memory_space<vmem>>, vector<1x128xf32>
    %2141 = vector.shape_cast %2140 : vector<1x128xf32> to vector<128xf32>
    %2142 = vector.shape_cast %2141 : vector<128xf32> to vector<1x128xf32>
    %2143 = vector.broadcast %2142 : vector<1x128xf32> to vector<8x128xf32>
    %2144 = arith.mulf %2068, %2143 : vector<8x128xf32>
    %2145 = arith.addf %2139, %2144 : vector<8x128xf32>
    %c652 = arith.constant 652 : index
    %c0_423 = arith.constant 0 : index
    %2146 = vector.load %arg4[%c652, %c0_423] : memref<768x128xf32, #tpu.memory_space<vmem>>, vector<1x128xf32>
    %2147 = vector.shape_cast %2146 : vector<1x128xf32> to vector<128xf32>
    %2148 = vector.shape_cast %2147 : vector<128xf32> to vector<1x128xf32>
    %2149 = vector.broadcast %2148 : vector<1x128xf32> to vector<8x128xf32>
    %2150 = arith.mulf %2069, %2149 : vector<8x128xf32>
    %2151 = arith.addf %2145, %2150 : vector<8x128xf32>
    %c653 = arith.constant 653 : index
    %c0_424 = arith.constant 0 : index
    %2152 = vector.load %arg4[%c653, %c0_424] : memref<768x128xf32, #tpu.memory_space<vmem>>, vector<1x128xf32>
    %2153 = vector.shape_cast %2152 : vector<1x128xf32> to vector<128xf32>
    %2154 = vector.shape_cast %2153 : vector<128xf32> to vector<1x128xf32>
    %2155 = vector.broadcast %2154 : vector<1x128xf32> to vector<8x128xf32>
    %2156 = arith.mulf %2070, %2155 : vector<8x128xf32>
    %2157 = arith.addf %2151, %2156 : vector<8x128xf32>
    %c654 = arith.constant 654 : index
    %c0_425 = arith.constant 0 : index
    %2158 = vector.load %arg4[%c654, %c0_425] : memref<768x128xf32, #tpu.memory_space<vmem>>, vector<1x128xf32>
    %2159 = vector.shape_cast %2158 : vector<1x128xf32> to vector<128xf32>
    %2160 = vector.shape_cast %2159 : vector<128xf32> to vector<1x128xf32>
    %2161 = vector.broadcast %2160 : vector<1x128xf32> to vector<8x128xf32>
    %2162 = arith.mulf %2071, %2161 : vector<8x128xf32>
    %2163 = arith.addf %2157, %2162 : vector<8x128xf32>
    %c655 = arith.constant 655 : index
    %c0_426 = arith.constant 0 : index
    %2164 = vector.load %arg4[%c655, %c0_426] : memref<768x128xf32, #tpu.memory_space<vmem>>, vector<1x128xf32>
    %2165 = vector.shape_cast %2164 : vector<1x128xf32> to vector<128xf32>
    %2166 = vector.shape_cast %2165 : vector<128xf32> to vector<1x128xf32>
    %2167 = vector.broadcast %2166 : vector<1x128xf32> to vector<8x128xf32>
    %2168 = arith.mulf %2072, %2167 : vector<8x128xf32>
    %2169 = arith.addf %2163, %2168 : vector<8x128xf32>
    %c2_427 = arith.constant 2 : index
    %c1_428 = arith.constant 1 : index
    %c0_429 = arith.constant 0 : index
    %c0_430 = arith.constant 0 : index
    %2170 = vector.load %arg3[%c2_427, %c1_428, %c0_429, %c0_430] : memref<4x8x8x128xf32, #tpu.memory_space<vmem>>, vector<1x1x8x128xf32>
    %2171 = vector.shape_cast %2170 : vector<1x1x8x128xf32> to vector<8x128xf32>
    %2172 = vector.shape_cast %2169 : vector<8x128xf32> to vector<1x1x8x128xf32>
    tpu.vector_store %arg3[%c2_427, %c1_428, %c0_429, %c0_430], %2172 {strides = array<i32>} : memref<4x8x8x128xf32, #tpu.memory_space<vmem>>, vector<1x1x8x128xf32>,
    %c656 = arith.constant 656 : index
    %c0_431 = arith.constant 0 : index
    %2173 = vector.load %arg4[%c656, %c0_431] : memref<768x128xf32, #tpu.memory_space<vmem>>, vector<1x128xf32>
    %2174 = vector.shape_cast %2173 : vector<1x128xf32> to vector<128xf32>
    %2175 = vector.shape_cast %2174 : vector<128xf32> to vector<1x128xf32>
    %2176 = vector.broadcast %2175 : vector<1x128xf32> to vector<8x128xf32>
    %2177 = arith.mulf %2065, %2176 : vector<8x128xf32>
    %c657 = arith.constant 657 : index
    %c0_432 = arith.constant 0 : index
    %2178 = vector.load %arg4[%c657, %c0_432] : memref<768x128xf32, #tpu.memory_space<vmem>>, vector<1x128xf32>
    %2179 = vector.shape_cast %2178 : vector<1x128xf32> to vector<128xf32>
    %2180 = vector.shape_cast %2179 : vector<128xf32> to vector<1x128xf32>
    %2181 = vector.broadcast %2180 : vector<1x128xf32> to vector<8x128xf32>
    %2182 = arith.mulf %2066, %2181 : vector<8x128xf32>
    %2183 = arith.addf %2177, %2182 : vector<8x128xf32>
    %c658 = arith.constant 658 : index
    %c0_433 = arith.constant 0 : index
    %2184 = vector.load %arg4[%c658, %c0_433] : memref<768x128xf32, #tpu.memory_space<vmem>>, vector<1x128xf32>
    %2185 = vector.shape_cast %2184 : vector<1x128xf32> to vector<128xf32>
    %2186 = vector.shape_cast %2185 : vector<128xf32> to vector<1x128xf32>
    %2187 = vector.broadcast %2186 : vector<1x128xf32> to vector<8x128xf32>
    %2188 = arith.mulf %2067, %2187 : vector<8x128xf32>
    %2189 = arith.addf %2183, %2188 : vector<8x128xf32>
    %c659 = arith.constant 659 : index
    %c0_434 = arith.constant 0 : index
    %2190 = vector.load %arg4[%c659, %c0_434] : memref<768x128xf32, #tpu.memory_space<vmem>>, vector<1x128xf32>
    %2191 = vector.shape_cast %2190 : vector<1x128xf32> to vector<128xf32>
    %2192 = vector.shape_cast %2191 : vector<128xf32> to vector<1x128xf32>
    %2193 = vector.broadcast %2192 : vector<1x128xf32> to vector<8x128xf32>
    %2194 = arith.mulf %2068, %2193 : vector<8x128xf32>
    %2195 = arith.addf %2189, %2194 : vector<8x128xf32>
    %c660 = arith.constant 660 : index
    %c0_435 = arith.constant 0 : index
    %2196 = vector.load %arg4[%c660, %c0_435] : memref<768x128xf32, #tpu.memory_space<vmem>>, vector<1x128xf32>
    %2197 = vector.shape_cast %2196 : vector<1x128xf32> to vector<128xf32>
    %2198 = vector.shape_cast %2197 : vector<128xf32> to vector<1x128xf32>
    %2199 = vector.broadcast %2198 : vector<1x128xf32> to vector<8x128xf32>
    %2200 = arith.mulf %2069, %2199 : vector<8x128xf32>
    %2201 = arith.addf %2195, %2200 : vector<8x128xf32>
    %c661 = arith.constant 661 : index
    %c0_436 = arith.constant 0 : index
    %2202 = vector.load %arg4[%c661, %c0_436] : memref<768x128xf32, #tpu.memory_space<vmem>>, vector<1x128xf32>
    %2203 = vector.shape_cast %2202 : vector<1x128xf32> to vector<128xf32>
    %2204 = vector.shape_cast %2203 : vector<128xf32> to vector<1x128xf32>
    %2205 = vector.broadcast %2204 : vector<1x128xf32> to vector<8x128xf32>
    %2206 = arith.mulf %2070, %2205 : vector<8x128xf32>
    %2207 = arith.addf %2201, %2206 : vector<8x128xf32>
    %c662 = arith.constant 662 : index
    %c0_437 = arith.constant 0 : index
    %2208 = vector.load %arg4[%c662, %c0_437] : memref<768x128xf32, #tpu.memory_space<vmem>>, vector<1x128xf32>
    %2209 = vector.shape_cast %2208 : vector<1x128xf32> to vector<128xf32>
    %2210 = vector.shape_cast %2209 : vector<128xf32> to vector<1x128xf32>
    %2211 = vector.broadcast %2210 : vector<1x128xf32> to vector<8x128xf32>
    %2212 = arith.mulf %2071, %2211 : vector<8x128xf32>
    %2213 = arith.addf %2207, %2212 : vector<8x128xf32>
    %c663 = arith.constant 663 : index
    %c0_438 = arith.constant 0 : index
    %2214 = vector.load %arg4[%c663, %c0_438] : memref<768x128xf32, #tpu.memory_space<vmem>>, vector<1x128xf32>
    %2215 = vector.shape_cast %2214 : vector<1x128xf32> to vector<128xf32>
    %2216 = vector.shape_cast %2215 : vector<128xf32> to vector<1x128xf32>
    %2217 = vector.broadcast %2216 : vector<1x128xf32> to vector<8x128xf32>
    %2218 = arith.mulf %2072, %2217 : vector<8x128xf32>
    %2219 = arith.addf %2213, %2218 : vector<8x128xf32>
    %c2_439 = arith.constant 2 : index
    %c2_440 = arith.constant 2 : index
    %c0_441 = arith.constant 0 : index
    %c0_442 = arith.constant 0 : index
    %2220 = vector.load %arg3[%c2_439, %c2_440, %c0_441, %c0_442] : memref<4x8x8x128xf32, #tpu.memory_space<vmem>>, vector<1x1x8x128xf32>
    %2221 = vector.shape_cast %2220 : vector<1x1x8x128xf32> to vector<8x128xf32>
    %2222 = vector.shape_cast %2219 : vector<8x128xf32> to vector<1x1x8x128xf32>
    tpu.vector_store %arg3[%c2_439, %c2_440, %c0_441, %c0_442], %2222 {strides = array<i32>} : memref<4x8x8x128xf32, #tpu.memory_space<vmem>>, vector<1x1x8x128xf32>,
    %c664 = arith.constant 664 : index
    %c0_443 = arith.constant 0 : index
    %2223 = vector.load %arg4[%c664, %c0_443] : memref<768x128xf32, #tpu.memory_space<vmem>>, vector<1x128xf32>
    %2224 = vector.shape_cast %2223 : vector<1x128xf32> to vector<128xf32>
    %2225 = vector.shape_cast %2224 : vector<128xf32> to vector<1x128xf32>
    %2226 = vector.broadcast %2225 : vector<1x128xf32> to vector<8x128xf32>
    %2227 = arith.mulf %2065, %2226 : vector<8x128xf32>
    %c665 = arith.constant 665 : index
    %c0_444 = arith.constant 0 : index
    %2228 = vector.load %arg4[%c665, %c0_444] : memref<768x128xf32, #tpu.memory_space<vmem>>, vector<1x128xf32>
    %2229 = vector.shape_cast %2228 : vector<1x128xf32> to vector<128xf32>
    %2230 = vector.shape_cast %2229 : vector<128xf32> to vector<1x128xf32>
    %2231 = vector.broadcast %2230 : vector<1x128xf32> to vector<8x128xf32>
    %2232 = arith.mulf %2066, %2231 : vector<8x128xf32>
    %2233 = arith.addf %2227, %2232 : vector<8x128xf32>
    %c666 = arith.constant 666 : index
    %c0_445 = arith.constant 0 : index
    %2234 = vector.load %arg4[%c666, %c0_445] : memref<768x128xf32, #tpu.memory_space<vmem>>, vector<1x128xf32>
    %2235 = vector.shape_cast %2234 : vector<1x128xf32> to vector<128xf32>
    %2236 = vector.shape_cast %2235 : vector<128xf32> to vector<1x128xf32>
    %2237 = vector.broadcast %2236 : vector<1x128xf32> to vector<8x128xf32>
    %2238 = arith.mulf %2067, %2237 : vector<8x128xf32>
    %2239 = arith.addf %2233, %2238 : vector<8x128xf32>
    %c667 = arith.constant 667 : index
    %c0_446 = arith.constant 0 : index
    %2240 = vector.load %arg4[%c667, %c0_446] : memref<768x128xf32, #tpu.memory_space<vmem>>, vector<1x128xf32>
    %2241 = vector.shape_cast %2240 : vector<1x128xf32> to vector<128xf32>
    %2242 = vector.shape_cast %2241 : vector<128xf32> to vector<1x128xf32>
    %2243 = vector.broadcast %2242 : vector<1x128xf32> to vector<8x128xf32>
    %2244 = arith.mulf %2068, %2243 : vector<8x128xf32>
    %2245 = arith.addf %2239, %2244 : vector<8x128xf32>
    %c668 = arith.constant 668 : index
    %c0_447 = arith.constant 0 : index
    %2246 = vector.load %arg4[%c668, %c0_447] : memref<768x128xf32, #tpu.memory_space<vmem>>, vector<1x128xf32>
    %2247 = vector.shape_cast %2246 : vector<1x128xf32> to vector<128xf32>
    %2248 = vector.shape_cast %2247 : vector<128xf32> to vector<1x128xf32>
    %2249 = vector.broadcast %2248 : vector<1x128xf32> to vector<8x128xf32>
    %2250 = arith.mulf %2069, %2249 : vector<8x128xf32>
    %2251 = arith.addf %2245, %2250 : vector<8x128xf32>
    %c669 = arith.constant 669 : index
    %c0_448 = arith.constant 0 : index
    %2252 = vector.load %arg4[%c669, %c0_448] : memref<768x128xf32, #tpu.memory_space<vmem>>, vector<1x128xf32>
    %2253 = vector.shape_cast %2252 : vector<1x128xf32> to vector<128xf32>
    %2254 = vector.shape_cast %2253 : vector<128xf32> to vector<1x128xf32>
    %2255 = vector.broadcast %2254 : vector<1x128xf32> to vector<8x128xf32>
    %2256 = arith.mulf %2070, %2255 : vector<8x128xf32>
    %2257 = arith.addf %2251, %2256 : vector<8x128xf32>
    %c670 = arith.constant 670 : index
    %c0_449 = arith.constant 0 : index
    %2258 = vector.load %arg4[%c670, %c0_449] : memref<768x128xf32, #tpu.memory_space<vmem>>, vector<1x128xf32>
    %2259 = vector.shape_cast %2258 : vector<1x128xf32> to vector<128xf32>
    %2260 = vector.shape_cast %2259 : vector<128xf32> to vector<1x128xf32>
    %2261 = vector.broadcast %2260 : vector<1x128xf32> to vector<8x128xf32>
    %2262 = arith.mulf %2071, %2261 : vector<8x128xf32>
    %2263 = arith.addf %2257, %2262 : vector<8x128xf32>
    %c671 = arith.constant 671 : index
    %c0_450 = arith.constant 0 : index
    %2264 = vector.load %arg4[%c671, %c0_450] : memref<768x128xf32, #tpu.memory_space<vmem>>, vector<1x128xf32>
    %2265 = vector.shape_cast %2264 : vector<1x128xf32> to vector<128xf32>
    %2266 = vector.shape_cast %2265 : vector<128xf32> to vector<1x128xf32>
    %2267 = vector.broadcast %2266 : vector<1x128xf32> to vector<8x128xf32>
    %2268 = arith.mulf %2072, %2267 : vector<8x128xf32>
    %2269 = arith.addf %2263, %2268 : vector<8x128xf32>
    %c2_451 = arith.constant 2 : index
    %c3_452 = arith.constant 3 : index
    %c0_453 = arith.constant 0 : index
    %c0_454 = arith.constant 0 : index
    %2270 = vector.load %arg3[%c2_451, %c3_452, %c0_453, %c0_454] : memref<4x8x8x128xf32, #tpu.memory_space<vmem>>, vector<1x1x8x128xf32>
    %2271 = vector.shape_cast %2270 : vector<1x1x8x128xf32> to vector<8x128xf32>
    %2272 = vector.shape_cast %2269 : vector<8x128xf32> to vector<1x1x8x128xf32>
    tpu.vector_store %arg3[%c2_451, %c3_452, %c0_453, %c0_454], %2272 {strides = array<i32>} : memref<4x8x8x128xf32, #tpu.memory_space<vmem>>, vector<1x1x8x128xf32>,
    %c672 = arith.constant 672 : index
    %c0_455 = arith.constant 0 : index
    %2273 = vector.load %arg4[%c672, %c0_455] : memref<768x128xf32, #tpu.memory_space<vmem>>, vector<1x128xf32>
    %2274 = vector.shape_cast %2273 : vector<1x128xf32> to vector<128xf32>
    %2275 = vector.shape_cast %2274 : vector<128xf32> to vector<1x128xf32>
    %2276 = vector.broadcast %2275 : vector<1x128xf32> to vector<8x128xf32>
    %2277 = arith.mulf %2065, %2276 : vector<8x128xf32>
    %c673 = arith.constant 673 : index
    %c0_456 = arith.constant 0 : index
    %2278 = vector.load %arg4[%c673, %c0_456] : memref<768x128xf32, #tpu.memory_space<vmem>>, vector<1x128xf32>
    %2279 = vector.shape_cast %2278 : vector<1x128xf32> to vector<128xf32>
    %2280 = vector.shape_cast %2279 : vector<128xf32> to vector<1x128xf32>
    %2281 = vector.broadcast %2280 : vector<1x128xf32> to vector<8x128xf32>
    %2282 = arith.mulf %2066, %2281 : vector<8x128xf32>
    %2283 = arith.addf %2277, %2282 : vector<8x128xf32>
    %c674 = arith.constant 674 : index
    %c0_457 = arith.constant 0 : index
    %2284 = vector.load %arg4[%c674, %c0_457] : memref<768x128xf32, #tpu.memory_space<vmem>>, vector<1x128xf32>
    %2285 = vector.shape_cast %2284 : vector<1x128xf32> to vector<128xf32>
    %2286 = vector.shape_cast %2285 : vector<128xf32> to vector<1x128xf32>
    %2287 = vector.broadcast %2286 : vector<1x128xf32> to vector<8x128xf32>
    %2288 = arith.mulf %2067, %2287 : vector<8x128xf32>
    %2289 = arith.addf %2283, %2288 : vector<8x128xf32>
    %c675 = arith.constant 675 : index
    %c0_458 = arith.constant 0 : index
    %2290 = vector.load %arg4[%c675, %c0_458] : memref<768x128xf32, #tpu.memory_space<vmem>>, vector<1x128xf32>
    %2291 = vector.shape_cast %2290 : vector<1x128xf32> to vector<128xf32>
    %2292 = vector.shape_cast %2291 : vector<128xf32> to vector<1x128xf32>
    %2293 = vector.broadcast %2292 : vector<1x128xf32> to vector<8x128xf32>
    %2294 = arith.mulf %2068, %2293 : vector<8x128xf32>
    %2295 = arith.addf %2289, %2294 : vector<8x128xf32>
    %c676 = arith.constant 676 : index
    %c0_459 = arith.constant 0 : index
    %2296 = vector.load %arg4[%c676, %c0_459] : memref<768x128xf32, #tpu.memory_space<vmem>>, vector<1x128xf32>
    %2297 = vector.shape_cast %2296 : vector<1x128xf32> to vector<128xf32>
    %2298 = vector.shape_cast %2297 : vector<128xf32> to vector<1x128xf32>
    %2299 = vector.broadcast %2298 : vector<1x128xf32> to vector<8x128xf32>
    %2300 = arith.mulf %2069, %2299 : vector<8x128xf32>
    %2301 = arith.addf %2295, %2300 : vector<8x128xf32>
    %c677 = arith.constant 677 : index
    %c0_460 = arith.constant 0 : index
    %2302 = vector.load %arg4[%c677, %c0_460] : memref<768x128xf32, #tpu.memory_space<vmem>>, vector<1x128xf32>
    %2303 = vector.shape_cast %2302 : vector<1x128xf32> to vector<128xf32>
    %2304 = vector.shape_cast %2303 : vector<128xf32> to vector<1x128xf32>
    %2305 = vector.broadcast %2304 : vector<1x128xf32> to vector<8x128xf32>
    %2306 = arith.mulf %2070, %2305 : vector<8x128xf32>
    %2307 = arith.addf %2301, %2306 : vector<8x128xf32>
    %c678 = arith.constant 678 : index
    %c0_461 = arith.constant 0 : index
    %2308 = vector.load %arg4[%c678, %c0_461] : memref<768x128xf32, #tpu.memory_space<vmem>>, vector<1x128xf32>
    %2309 = vector.shape_cast %2308 : vector<1x128xf32> to vector<128xf32>
    %2310 = vector.shape_cast %2309 : vector<128xf32> to vector<1x128xf32>
    %2311 = vector.broadcast %2310 : vector<1x128xf32> to vector<8x128xf32>
    %2312 = arith.mulf %2071, %2311 : vector<8x128xf32>
    %2313 = arith.addf %2307, %2312 : vector<8x128xf32>
    %c679 = arith.constant 679 : index
    %c0_462 = arith.constant 0 : index
    %2314 = vector.load %arg4[%c679, %c0_462] : memref<768x128xf32, #tpu.memory_space<vmem>>, vector<1x128xf32>
    %2315 = vector.shape_cast %2314 : vector<1x128xf32> to vector<128xf32>
    %2316 = vector.shape_cast %2315 : vector<128xf32> to vector<1x128xf32>
    %2317 = vector.broadcast %2316 : vector<1x128xf32> to vector<8x128xf32>
    %2318 = arith.mulf %2072, %2317 : vector<8x128xf32>
    %2319 = arith.addf %2313, %2318 : vector<8x128xf32>
    %c2_463 = arith.constant 2 : index
    %c4_464 = arith.constant 4 : index
    %c0_465 = arith.constant 0 : index
    %c0_466 = arith.constant 0 : index
    %2320 = vector.load %arg3[%c2_463, %c4_464, %c0_465, %c0_466] : memref<4x8x8x128xf32, #tpu.memory_space<vmem>>, vector<1x1x8x128xf32>
    %2321 = vector.shape_cast %2320 : vector<1x1x8x128xf32> to vector<8x128xf32>
    %2322 = vector.shape_cast %2319 : vector<8x128xf32> to vector<1x1x8x128xf32>
    tpu.vector_store %arg3[%c2_463, %c4_464, %c0_465, %c0_466], %2322 {strides = array<i32>} : memref<4x8x8x128xf32, #tpu.memory_space<vmem>>, vector<1x1x8x128xf32>,
    %c680 = arith.constant 680 : index
    %c0_467 = arith.constant 0 : index
    %2323 = vector.load %arg4[%c680, %c0_467] : memref<768x128xf32, #tpu.memory_space<vmem>>, vector<1x128xf32>
    %2324 = vector.shape_cast %2323 : vector<1x128xf32> to vector<128xf32>
    %2325 = vector.shape_cast %2324 : vector<128xf32> to vector<1x128xf32>
    %2326 = vector.broadcast %2325 : vector<1x128xf32> to vector<8x128xf32>
    %2327 = arith.mulf %2065, %2326 : vector<8x128xf32>
    %c681 = arith.constant 681 : index
    %c0_468 = arith.constant 0 : index
    %2328 = vector.load %arg4[%c681, %c0_468] : memref<768x128xf32, #tpu.memory_space<vmem>>, vector<1x128xf32>
    %2329 = vector.shape_cast %2328 : vector<1x128xf32> to vector<128xf32>
    %2330 = vector.shape_cast %2329 : vector<128xf32> to vector<1x128xf32>
    %2331 = vector.broadcast %2330 : vector<1x128xf32> to vector<8x128xf32>
    %2332 = arith.mulf %2066, %2331 : vector<8x128xf32>
    %2333 = arith.addf %2327, %2332 : vector<8x128xf32>
    %c682 = arith.constant 682 : index
    %c0_469 = arith.constant 0 : index
    %2334 = vector.load %arg4[%c682, %c0_469] : memref<768x128xf32, #tpu.memory_space<vmem>>, vector<1x128xf32>
    %2335 = vector.shape_cast %2334 : vector<1x128xf32> to vector<128xf32>
    %2336 = vector.shape_cast %2335 : vector<128xf32> to vector<1x128xf32>
    %2337 = vector.broadcast %2336 : vector<1x128xf32> to vector<8x128xf32>
    %2338 = arith.mulf %2067, %2337 : vector<8x128xf32>
    %2339 = arith.addf %2333, %2338 : vector<8x128xf32>
    %c683 = arith.constant 683 : index
    %c0_470 = arith.constant 0 : index
    %2340 = vector.load %arg4[%c683, %c0_470] : memref<768x128xf32, #tpu.memory_space<vmem>>, vector<1x128xf32>
    %2341 = vector.shape_cast %2340 : vector<1x128xf32> to vector<128xf32>
    %2342 = vector.shape_cast %2341 : vector<128xf32> to vector<1x128xf32>
    %2343 = vector.broadcast %2342 : vector<1x128xf32> to vector<8x128xf32>
    %2344 = arith.mulf %2068, %2343 : vector<8x128xf32>
    %2345 = arith.addf %2339, %2344 : vector<8x128xf32>
    %c684 = arith.constant 684 : index
    %c0_471 = arith.constant 0 : index
    %2346 = vector.load %arg4[%c684, %c0_471] : memref<768x128xf32, #tpu.memory_space<vmem>>, vector<1x128xf32>
    %2347 = vector.shape_cast %2346 : vector<1x128xf32> to vector<128xf32>
    %2348 = vector.shape_cast %2347 : vector<128xf32> to vector<1x128xf32>
    %2349 = vector.broadcast %2348 : vector<1x128xf32> to vector<8x128xf32>
    %2350 = arith.mulf %2069, %2349 : vector<8x128xf32>
    %2351 = arith.addf %2345, %2350 : vector<8x128xf32>
    %c685 = arith.constant 685 : index
    %c0_472 = arith.constant 0 : index
    %2352 = vector.load %arg4[%c685, %c0_472] : memref<768x128xf32, #tpu.memory_space<vmem>>, vector<1x128xf32>
    %2353 = vector.shape_cast %2352 : vector<1x128xf32> to vector<128xf32>
    %2354 = vector.shape_cast %2353 : vector<128xf32> to vector<1x128xf32>
    %2355 = vector.broadcast %2354 : vector<1x128xf32> to vector<8x128xf32>
    %2356 = arith.mulf %2070, %2355 : vector<8x128xf32>
    %2357 = arith.addf %2351, %2356 : vector<8x128xf32>
    %c686 = arith.constant 686 : index
    %c0_473 = arith.constant 0 : index
    %2358 = vector.load %arg4[%c686, %c0_473] : memref<768x128xf32, #tpu.memory_space<vmem>>, vector<1x128xf32>
    %2359 = vector.shape_cast %2358 : vector<1x128xf32> to vector<128xf32>
    %2360 = vector.shape_cast %2359 : vector<128xf32> to vector<1x128xf32>
    %2361 = vector.broadcast %2360 : vector<1x128xf32> to vector<8x128xf32>
    %2362 = arith.mulf %2071, %2361 : vector<8x128xf32>
    %2363 = arith.addf %2357, %2362 : vector<8x128xf32>
    %c687 = arith.constant 687 : index
    %c0_474 = arith.constant 0 : index
    %2364 = vector.load %arg4[%c687, %c0_474] : memref<768x128xf32, #tpu.memory_space<vmem>>, vector<1x128xf32>
    %2365 = vector.shape_cast %2364 : vector<1x128xf32> to vector<128xf32>
    %2366 = vector.shape_cast %2365 : vector<128xf32> to vector<1x128xf32>
    %2367 = vector.broadcast %2366 : vector<1x128xf32> to vector<8x128xf32>
    %2368 = arith.mulf %2072, %2367 : vector<8x128xf32>
    %2369 = arith.addf %2363, %2368 : vector<8x128xf32>
    %c2_475 = arith.constant 2 : index
    %c5_476 = arith.constant 5 : index
    %c0_477 = arith.constant 0 : index
    %c0_478 = arith.constant 0 : index
    %2370 = vector.load %arg3[%c2_475, %c5_476, %c0_477, %c0_478] : memref<4x8x8x128xf32, #tpu.memory_space<vmem>>, vector<1x1x8x128xf32>
    %2371 = vector.shape_cast %2370 : vector<1x1x8x128xf32> to vector<8x128xf32>
    %2372 = vector.shape_cast %2369 : vector<8x128xf32> to vector<1x1x8x128xf32>
    tpu.vector_store %arg3[%c2_475, %c5_476, %c0_477, %c0_478], %2372 {strides = array<i32>} : memref<4x8x8x128xf32, #tpu.memory_space<vmem>>, vector<1x1x8x128xf32>,
    %c688 = arith.constant 688 : index
    %c0_479 = arith.constant 0 : index
    %2373 = vector.load %arg4[%c688, %c0_479] : memref<768x128xf32, #tpu.memory_space<vmem>>, vector<1x128xf32>
    %2374 = vector.shape_cast %2373 : vector<1x128xf32> to vector<128xf32>
    %2375 = vector.shape_cast %2374 : vector<128xf32> to vector<1x128xf32>
    %2376 = vector.broadcast %2375 : vector<1x128xf32> to vector<8x128xf32>
    %2377 = arith.mulf %2065, %2376 : vector<8x128xf32>
    %c689 = arith.constant 689 : index
    %c0_480 = arith.constant 0 : index
    %2378 = vector.load %arg4[%c689, %c0_480] : memref<768x128xf32, #tpu.memory_space<vmem>>, vector<1x128xf32>
    %2379 = vector.shape_cast %2378 : vector<1x128xf32> to vector<128xf32>
    %2380 = vector.shape_cast %2379 : vector<128xf32> to vector<1x128xf32>
    %2381 = vector.broadcast %2380 : vector<1x128xf32> to vector<8x128xf32>
    %2382 = arith.mulf %2066, %2381 : vector<8x128xf32>
    %2383 = arith.addf %2377, %2382 : vector<8x128xf32>
    %c690 = arith.constant 690 : index
    %c0_481 = arith.constant 0 : index
    %2384 = vector.load %arg4[%c690, %c0_481] : memref<768x128xf32, #tpu.memory_space<vmem>>, vector<1x128xf32>
    %2385 = vector.shape_cast %2384 : vector<1x128xf32> to vector<128xf32>
    %2386 = vector.shape_cast %2385 : vector<128xf32> to vector<1x128xf32>
    %2387 = vector.broadcast %2386 : vector<1x128xf32> to vector<8x128xf32>
    %2388 = arith.mulf %2067, %2387 : vector<8x128xf32>
    %2389 = arith.addf %2383, %2388 : vector<8x128xf32>
    %c691 = arith.constant 691 : index
    %c0_482 = arith.constant 0 : index
    %2390 = vector.load %arg4[%c691, %c0_482] : memref<768x128xf32, #tpu.memory_space<vmem>>, vector<1x128xf32>
    %2391 = vector.shape_cast %2390 : vector<1x128xf32> to vector<128xf32>
    %2392 = vector.shape_cast %2391 : vector<128xf32> to vector<1x128xf32>
    %2393 = vector.broadcast %2392 : vector<1x128xf32> to vector<8x128xf32>
    %2394 = arith.mulf %2068, %2393 : vector<8x128xf32>
    %2395 = arith.addf %2389, %2394 : vector<8x128xf32>
    %c692 = arith.constant 692 : index
    %c0_483 = arith.constant 0 : index
    %2396 = vector.load %arg4[%c692, %c0_483] : memref<768x128xf32, #tpu.memory_space<vmem>>, vector<1x128xf32>
    %2397 = vector.shape_cast %2396 : vector<1x128xf32> to vector<128xf32>
    %2398 = vector.shape_cast %2397 : vector<128xf32> to vector<1x128xf32>
    %2399 = vector.broadcast %2398 : vector<1x128xf32> to vector<8x128xf32>
    %2400 = arith.mulf %2069, %2399 : vector<8x128xf32>
    %2401 = arith.addf %2395, %2400 : vector<8x128xf32>
    %c693 = arith.constant 693 : index
    %c0_484 = arith.constant 0 : index
    %2402 = vector.load %arg4[%c693, %c0_484] : memref<768x128xf32, #tpu.memory_space<vmem>>, vector<1x128xf32>
    %2403 = vector.shape_cast %2402 : vector<1x128xf32> to vector<128xf32>
    %2404 = vector.shape_cast %2403 : vector<128xf32> to vector<1x128xf32>
    %2405 = vector.broadcast %2404 : vector<1x128xf32> to vector<8x128xf32>
    %2406 = arith.mulf %2070, %2405 : vector<8x128xf32>
    %2407 = arith.addf %2401, %2406 : vector<8x128xf32>
    %c694 = arith.constant 694 : index
    %c0_485 = arith.constant 0 : index
    %2408 = vector.load %arg4[%c694, %c0_485] : memref<768x128xf32, #tpu.memory_space<vmem>>, vector<1x128xf32>
    %2409 = vector.shape_cast %2408 : vector<1x128xf32> to vector<128xf32>
    %2410 = vector.shape_cast %2409 : vector<128xf32> to vector<1x128xf32>
    %2411 = vector.broadcast %2410 : vector<1x128xf32> to vector<8x128xf32>
    %2412 = arith.mulf %2071, %2411 : vector<8x128xf32>
    %2413 = arith.addf %2407, %2412 : vector<8x128xf32>
    %c695 = arith.constant 695 : index
    %c0_486 = arith.constant 0 : index
    %2414 = vector.load %arg4[%c695, %c0_486] : memref<768x128xf32, #tpu.memory_space<vmem>>, vector<1x128xf32>
    %2415 = vector.shape_cast %2414 : vector<1x128xf32> to vector<128xf32>
    %2416 = vector.shape_cast %2415 : vector<128xf32> to vector<1x128xf32>
    %2417 = vector.broadcast %2416 : vector<1x128xf32> to vector<8x128xf32>
    %2418 = arith.mulf %2072, %2417 : vector<8x128xf32>
    %2419 = arith.addf %2413, %2418 : vector<8x128xf32>
    %c2_487 = arith.constant 2 : index
    %c6_488 = arith.constant 6 : index
    %c0_489 = arith.constant 0 : index
    %c0_490 = arith.constant 0 : index
    %2420 = vector.load %arg3[%c2_487, %c6_488, %c0_489, %c0_490] : memref<4x8x8x128xf32, #tpu.memory_space<vmem>>, vector<1x1x8x128xf32>
    %2421 = vector.shape_cast %2420 : vector<1x1x8x128xf32> to vector<8x128xf32>
    %2422 = vector.shape_cast %2419 : vector<8x128xf32> to vector<1x1x8x128xf32>
    tpu.vector_store %arg3[%c2_487, %c6_488, %c0_489, %c0_490], %2422 {strides = array<i32>} : memref<4x8x8x128xf32, #tpu.memory_space<vmem>>, vector<1x1x8x128xf32>,
    %c696 = arith.constant 696 : index
    %c0_491 = arith.constant 0 : index
    %2423 = vector.load %arg4[%c696, %c0_491] : memref<768x128xf32, #tpu.memory_space<vmem>>, vector<1x128xf32>
    %2424 = vector.shape_cast %2423 : vector<1x128xf32> to vector<128xf32>
    %2425 = vector.shape_cast %2424 : vector<128xf32> to vector<1x128xf32>
    %2426 = vector.broadcast %2425 : vector<1x128xf32> to vector<8x128xf32>
    %2427 = arith.mulf %2065, %2426 : vector<8x128xf32>
    %c697 = arith.constant 697 : index
    %c0_492 = arith.constant 0 : index
    %2428 = vector.load %arg4[%c697, %c0_492] : memref<768x128xf32, #tpu.memory_space<vmem>>, vector<1x128xf32>
    %2429 = vector.shape_cast %2428 : vector<1x128xf32> to vector<128xf32>
    %2430 = vector.shape_cast %2429 : vector<128xf32> to vector<1x128xf32>
    %2431 = vector.broadcast %2430 : vector<1x128xf32> to vector<8x128xf32>
    %2432 = arith.mulf %2066, %2431 : vector<8x128xf32>
    %2433 = arith.addf %2427, %2432 : vector<8x128xf32>
    %c698 = arith.constant 698 : index
    %c0_493 = arith.constant 0 : index
    %2434 = vector.load %arg4[%c698, %c0_493] : memref<768x128xf32, #tpu.memory_space<vmem>>, vector<1x128xf32>
    %2435 = vector.shape_cast %2434 : vector<1x128xf32> to vector<128xf32>
    %2436 = vector.shape_cast %2435 : vector<128xf32> to vector<1x128xf32>
    %2437 = vector.broadcast %2436 : vector<1x128xf32> to vector<8x128xf32>
    %2438 = arith.mulf %2067, %2437 : vector<8x128xf32>
    %2439 = arith.addf %2433, %2438 : vector<8x128xf32>
    %c699 = arith.constant 699 : index
    %c0_494 = arith.constant 0 : index
    %2440 = vector.load %arg4[%c699, %c0_494] : memref<768x128xf32, #tpu.memory_space<vmem>>, vector<1x128xf32>
    %2441 = vector.shape_cast %2440 : vector<1x128xf32> to vector<128xf32>
    %2442 = vector.shape_cast %2441 : vector<128xf32> to vector<1x128xf32>
    %2443 = vector.broadcast %2442 : vector<1x128xf32> to vector<8x128xf32>
    %2444 = arith.mulf %2068, %2443 : vector<8x128xf32>
    %2445 = arith.addf %2439, %2444 : vector<8x128xf32>
    %c700 = arith.constant 700 : index
    %c0_495 = arith.constant 0 : index
    %2446 = vector.load %arg4[%c700, %c0_495] : memref<768x128xf32, #tpu.memory_space<vmem>>, vector<1x128xf32>
    %2447 = vector.shape_cast %2446 : vector<1x128xf32> to vector<128xf32>
    %2448 = vector.shape_cast %2447 : vector<128xf32> to vector<1x128xf32>
    %2449 = vector.broadcast %2448 : vector<1x128xf32> to vector<8x128xf32>
    %2450 = arith.mulf %2069, %2449 : vector<8x128xf32>
    %2451 = arith.addf %2445, %2450 : vector<8x128xf32>
    %c701 = arith.constant 701 : index
    %c0_496 = arith.constant 0 : index
    %2452 = vector.load %arg4[%c701, %c0_496] : memref<768x128xf32, #tpu.memory_space<vmem>>, vector<1x128xf32>
    %2453 = vector.shape_cast %2452 : vector<1x128xf32> to vector<128xf32>
    %2454 = vector.shape_cast %2453 : vector<128xf32> to vector<1x128xf32>
    %2455 = vector.broadcast %2454 : vector<1x128xf32> to vector<8x128xf32>
    %2456 = arith.mulf %2070, %2455 : vector<8x128xf32>
    %2457 = arith.addf %2451, %2456 : vector<8x128xf32>
    %c702 = arith.constant 702 : index
    %c0_497 = arith.constant 0 : index
    %2458 = vector.load %arg4[%c702, %c0_497] : memref<768x128xf32, #tpu.memory_space<vmem>>, vector<1x128xf32>
    %2459 = vector.shape_cast %2458 : vector<1x128xf32> to vector<128xf32>
    %2460 = vector.shape_cast %2459 : vector<128xf32> to vector<1x128xf32>
    %2461 = vector.broadcast %2460 : vector<1x128xf32> to vector<8x128xf32>
    %2462 = arith.mulf %2071, %2461 : vector<8x128xf32>
    %2463 = arith.addf %2457, %2462 : vector<8x128xf32>
    %c703 = arith.constant 703 : index
    %c0_498 = arith.constant 0 : index
    %2464 = vector.load %arg4[%c703, %c0_498] : memref<768x128xf32, #tpu.memory_space<vmem>>, vector<1x128xf32>
    %2465 = vector.shape_cast %2464 : vector<1x128xf32> to vector<128xf32>
    %2466 = vector.shape_cast %2465 : vector<128xf32> to vector<1x128xf32>
    %2467 = vector.broadcast %2466 : vector<1x128xf32> to vector<8x128xf32>
    %2468 = arith.mulf %2072, %2467 : vector<8x128xf32>
    %2469 = arith.addf %2463, %2468 : vector<8x128xf32>
    %c2_499 = arith.constant 2 : index
    %c7_500 = arith.constant 7 : index
    %c0_501 = arith.constant 0 : index
    %c0_502 = arith.constant 0 : index
    %2470 = vector.load %arg3[%c2_499, %c7_500, %c0_501, %c0_502] : memref<4x8x8x128xf32, #tpu.memory_space<vmem>>, vector<1x1x8x128xf32>
    %2471 = vector.shape_cast %2470 : vector<1x1x8x128xf32> to vector<8x128xf32>
    %2472 = vector.shape_cast %2469 : vector<8x128xf32> to vector<1x1x8x128xf32>
    tpu.vector_store %arg3[%c2_499, %c7_500, %c0_501, %c0_502], %2472 {strides = array<i32>} : memref<4x8x8x128xf32, #tpu.memory_space<vmem>>, vector<1x1x8x128xf32>,
    %c192 = arith.constant 192 : index
    %c0_503 = arith.constant 0 : index
    %2473 = vector.load %arg4[%c192, %c0_503] : memref<768x128xf32, #tpu.memory_space<vmem>>, vector<8x128xf32>
    %c448 = arith.constant 448 : index
    %c0_504 = arith.constant 0 : index
    %2474 = vector.load %arg4[%c448, %c0_504] : memref<768x128xf32, #tpu.memory_space<vmem>>, vector<1x128xf32>
    %2475 = vector.shape_cast %2474 : vector<1x128xf32> to vector<128xf32>
    %2476 = vector.shape_cast %2475 : vector<128xf32> to vector<1x128xf32>
    %2477 = vector.broadcast %2476 : vector<1x128xf32> to vector<8x128xf32>
    %2478 = arith.mulf %2473, %2477 : vector<8x128xf32>
    %c449 = arith.constant 449 : index
    %c0_505 = arith.constant 0 : index
    %2479 = vector.load %arg4[%c449, %c0_505] : memref<768x128xf32, #tpu.memory_space<vmem>>, vector<1x128xf32>
    %2480 = vector.shape_cast %2479 : vector<1x128xf32> to vector<128xf32>
    %2481 = vector.shape_cast %2480 : vector<128xf32> to vector<1x128xf32>
    %2482 = vector.broadcast %2481 : vector<1x128xf32> to vector<8x128xf32>
    %2483 = arith.mulf %2473, %2482 : vector<8x128xf32>
    %c450 = arith.constant 450 : index
    %c0_506 = arith.constant 0 : index
    %2484 = vector.load %arg4[%c450, %c0_506] : memref<768x128xf32, #tpu.memory_space<vmem>>, vector<1x128xf32>
    %2485 = vector.shape_cast %2484 : vector<1x128xf32> to vector<128xf32>
    %2486 = vector.shape_cast %2485 : vector<128xf32> to vector<1x128xf32>
    %2487 = vector.broadcast %2486 : vector<1x128xf32> to vector<8x128xf32>
    %2488 = arith.mulf %2473, %2487 : vector<8x128xf32>
    %c451 = arith.constant 451 : index
    %c0_507 = arith.constant 0 : index
    %2489 = vector.load %arg4[%c451, %c0_507] : memref<768x128xf32, #tpu.memory_space<vmem>>, vector<1x128xf32>
    %2490 = vector.shape_cast %2489 : vector<1x128xf32> to vector<128xf32>
    %2491 = vector.shape_cast %2490 : vector<128xf32> to vector<1x128xf32>
    %2492 = vector.broadcast %2491 : vector<1x128xf32> to vector<8x128xf32>
    %2493 = arith.mulf %2473, %2492 : vector<8x128xf32>
    %c452 = arith.constant 452 : index
    %c0_508 = arith.constant 0 : index
    %2494 = vector.load %arg4[%c452, %c0_508] : memref<768x128xf32, #tpu.memory_space<vmem>>, vector<1x128xf32>
    %2495 = vector.shape_cast %2494 : vector<1x128xf32> to vector<128xf32>
    %2496 = vector.shape_cast %2495 : vector<128xf32> to vector<1x128xf32>
    %2497 = vector.broadcast %2496 : vector<1x128xf32> to vector<8x128xf32>
    %2498 = arith.mulf %2473, %2497 : vector<8x128xf32>
    %c453 = arith.constant 453 : index
    %c0_509 = arith.constant 0 : index
    %2499 = vector.load %arg4[%c453, %c0_509] : memref<768x128xf32, #tpu.memory_space<vmem>>, vector<1x128xf32>
    %2500 = vector.shape_cast %2499 : vector<1x128xf32> to vector<128xf32>
    %2501 = vector.shape_cast %2500 : vector<128xf32> to vector<1x128xf32>
    %2502 = vector.broadcast %2501 : vector<1x128xf32> to vector<8x128xf32>
    %2503 = arith.mulf %2473, %2502 : vector<8x128xf32>
    %c454 = arith.constant 454 : index
    %c0_510 = arith.constant 0 : index
    %2504 = vector.load %arg4[%c454, %c0_510] : memref<768x128xf32, #tpu.memory_space<vmem>>, vector<1x128xf32>
    %2505 = vector.shape_cast %2504 : vector<1x128xf32> to vector<128xf32>
    %2506 = vector.shape_cast %2505 : vector<128xf32> to vector<1x128xf32>
    %2507 = vector.broadcast %2506 : vector<1x128xf32> to vector<8x128xf32>
    %2508 = arith.mulf %2473, %2507 : vector<8x128xf32>
    %c455 = arith.constant 455 : index
    %c0_511 = arith.constant 0 : index
    %2509 = vector.load %arg4[%c455, %c0_511] : memref<768x128xf32, #tpu.memory_space<vmem>>, vector<1x128xf32>
    %2510 = vector.shape_cast %2509 : vector<1x128xf32> to vector<128xf32>
    %2511 = vector.shape_cast %2510 : vector<128xf32> to vector<1x128xf32>
    %2512 = vector.broadcast %2511 : vector<1x128xf32> to vector<8x128xf32>
    %2513 = arith.mulf %2473, %2512 : vector<8x128xf32>
    %c200 = arith.constant 200 : index
    %c0_512 = arith.constant 0 : index
    %2514 = vector.load %arg4[%c200, %c0_512] : memref<768x128xf32, #tpu.memory_space<vmem>>, vector<8x128xf32>
    %c456 = arith.constant 456 : index
    %c0_513 = arith.constant 0 : index
    %2515 = vector.load %arg4[%c456, %c0_513] : memref<768x128xf32, #tpu.memory_space<vmem>>, vector<1x128xf32>
    %2516 = vector.shape_cast %2515 : vector<1x128xf32> to vector<128xf32>
    %2517 = vector.shape_cast %2516 : vector<128xf32> to vector<1x128xf32>
    %2518 = vector.broadcast %2517 : vector<1x128xf32> to vector<8x128xf32>
    %2519 = arith.mulf %2514, %2518 : vector<8x128xf32>
    %2520 = arith.addf %2478, %2519 : vector<8x128xf32>
    %c457 = arith.constant 457 : index
    %c0_514 = arith.constant 0 : index
    %2521 = vector.load %arg4[%c457, %c0_514] : memref<768x128xf32, #tpu.memory_space<vmem>>, vector<1x128xf32>
    %2522 = vector.shape_cast %2521 : vector<1x128xf32> to vector<128xf32>
    %2523 = vector.shape_cast %2522 : vector<128xf32> to vector<1x128xf32>
    %2524 = vector.broadcast %2523 : vector<1x128xf32> to vector<8x128xf32>
    %2525 = arith.mulf %2514, %2524 : vector<8x128xf32>
    %2526 = arith.addf %2483, %2525 : vector<8x128xf32>
    %c458 = arith.constant 458 : index
    %c0_515 = arith.constant 0 : index
    %2527 = vector.load %arg4[%c458, %c0_515] : memref<768x128xf32, #tpu.memory_space<vmem>>, vector<1x128xf32>
    %2528 = vector.shape_cast %2527 : vector<1x128xf32> to vector<128xf32>
    %2529 = vector.shape_cast %2528 : vector<128xf32> to vector<1x128xf32>
    %2530 = vector.broadcast %2529 : vector<1x128xf32> to vector<8x128xf32>
    %2531 = arith.mulf %2514, %2530 : vector<8x128xf32>
    %2532 = arith.addf %2488, %2531 : vector<8x128xf32>
    %c459 = arith.constant 459 : index
    %c0_516 = arith.constant 0 : index
    %2533 = vector.load %arg4[%c459, %c0_516] : memref<768x128xf32, #tpu.memory_space<vmem>>, vector<1x128xf32>
    %2534 = vector.shape_cast %2533 : vector<1x128xf32> to vector<128xf32>
    %2535 = vector.shape_cast %2534 : vector<128xf32> to vector<1x128xf32>
    %2536 = vector.broadcast %2535 : vector<1x128xf32> to vector<8x128xf32>
    %2537 = arith.mulf %2514, %2536 : vector<8x128xf32>
    %2538 = arith.addf %2493, %2537 : vector<8x128xf32>
    %c460 = arith.constant 460 : index
    %c0_517 = arith.constant 0 : index
    %2539 = vector.load %arg4[%c460, %c0_517] : memref<768x128xf32, #tpu.memory_space<vmem>>, vector<1x128xf32>
    %2540 = vector.shape_cast %2539 : vector<1x128xf32> to vector<128xf32>
    %2541 = vector.shape_cast %2540 : vector<128xf32> to vector<1x128xf32>
    %2542 = vector.broadcast %2541 : vector<1x128xf32> to vector<8x128xf32>
    %2543 = arith.mulf %2514, %2542 : vector<8x128xf32>
    %2544 = arith.addf %2498, %2543 : vector<8x128xf32>
    %c461 = arith.constant 461 : index
    %c0_518 = arith.constant 0 : index
    %2545 = vector.load %arg4[%c461, %c0_518] : memref<768x128xf32, #tpu.memory_space<vmem>>, vector<1x128xf32>
    %2546 = vector.shape_cast %2545 : vector<1x128xf32> to vector<128xf32>
    %2547 = vector.shape_cast %2546 : vector<128xf32> to vector<1x128xf32>
    %2548 = vector.broadcast %2547 : vector<1x128xf32> to vector<8x128xf32>
    %2549 = arith.mulf %2514, %2548 : vector<8x128xf32>
    %2550 = arith.addf %2503, %2549 : vector<8x128xf32>
    %c462 = arith.constant 462 : index
    %c0_519 = arith.constant 0 : index
    %2551 = vector.load %arg4[%c462, %c0_519] : memref<768x128xf32, #tpu.memory_space<vmem>>, vector<1x128xf32>
    %2552 = vector.shape_cast %2551 : vector<1x128xf32> to vector<128xf32>
    %2553 = vector.shape_cast %2552 : vector<128xf32> to vector<1x128xf32>
    %2554 = vector.broadcast %2553 : vector<1x128xf32> to vector<8x128xf32>
    %2555 = arith.mulf %2514, %2554 : vector<8x128xf32>
    %2556 = arith.addf %2508, %2555 : vector<8x128xf32>
    %c463 = arith.constant 463 : index
    %c0_520 = arith.constant 0 : index
    %2557 = vector.load %arg4[%c463, %c0_520] : memref<768x128xf32, #tpu.memory_space<vmem>>, vector<1x128xf32>
    %2558 = vector.shape_cast %2557 : vector<1x128xf32> to vector<128xf32>
    %2559 = vector.shape_cast %2558 : vector<128xf32> to vector<1x128xf32>
    %2560 = vector.broadcast %2559 : vector<1x128xf32> to vector<8x128xf32>
    %2561 = arith.mulf %2514, %2560 : vector<8x128xf32>
    %2562 = arith.addf %2513, %2561 : vector<8x128xf32>
    %c208 = arith.constant 208 : index
    %c0_521 = arith.constant 0 : index
    %2563 = vector.load %arg4[%c208, %c0_521] : memref<768x128xf32, #tpu.memory_space<vmem>>, vector<8x128xf32>
    %c464 = arith.constant 464 : index
    %c0_522 = arith.constant 0 : index
    %2564 = vector.load %arg4[%c464, %c0_522] : memref<768x128xf32, #tpu.memory_space<vmem>>, vector<1x128xf32>
    %2565 = vector.shape_cast %2564 : vector<1x128xf32> to vector<128xf32>
    %2566 = vector.shape_cast %2565 : vector<128xf32> to vector<1x128xf32>
    %2567 = vector.broadcast %2566 : vector<1x128xf32> to vector<8x128xf32>
    %2568 = arith.mulf %2563, %2567 : vector<8x128xf32>
    %2569 = arith.addf %2520, %2568 : vector<8x128xf32>
    %c465 = arith.constant 465 : index
    %c0_523 = arith.constant 0 : index
    %2570 = vector.load %arg4[%c465, %c0_523] : memref<768x128xf32, #tpu.memory_space<vmem>>, vector<1x128xf32>
    %2571 = vector.shape_cast %2570 : vector<1x128xf32> to vector<128xf32>
    %2572 = vector.shape_cast %2571 : vector<128xf32> to vector<1x128xf32>
    %2573 = vector.broadcast %2572 : vector<1x128xf32> to vector<8x128xf32>
    %2574 = arith.mulf %2563, %2573 : vector<8x128xf32>
    %2575 = arith.addf %2526, %2574 : vector<8x128xf32>
    %c466 = arith.constant 466 : index
    %c0_524 = arith.constant 0 : index
    %2576 = vector.load %arg4[%c466, %c0_524] : memref<768x128xf32, #tpu.memory_space<vmem>>, vector<1x128xf32>
    %2577 = vector.shape_cast %2576 : vector<1x128xf32> to vector<128xf32>
    %2578 = vector.shape_cast %2577 : vector<128xf32> to vector<1x128xf32>
    %2579 = vector.broadcast %2578 : vector<1x128xf32> to vector<8x128xf32>
    %2580 = arith.mulf %2563, %2579 : vector<8x128xf32>
    %2581 = arith.addf %2532, %2580 : vector<8x128xf32>
    %c467 = arith.constant 467 : index
    %c0_525 = arith.constant 0 : index
    %2582 = vector.load %arg4[%c467, %c0_525] : memref<768x128xf32, #tpu.memory_space<vmem>>, vector<1x128xf32>
    %2583 = vector.shape_cast %2582 : vector<1x128xf32> to vector<128xf32>
    %2584 = vector.shape_cast %2583 : vector<128xf32> to vector<1x128xf32>
    %2585 = vector.broadcast %2584 : vector<1x128xf32> to vector<8x128xf32>
    %2586 = arith.mulf %2563, %2585 : vector<8x128xf32>
    %2587 = arith.addf %2538, %2586 : vector<8x128xf32>
    %c468 = arith.constant 468 : index
    %c0_526 = arith.constant 0 : index
    %2588 = vector.load %arg4[%c468, %c0_526] : memref<768x128xf32, #tpu.memory_space<vmem>>, vector<1x128xf32>
    %2589 = vector.shape_cast %2588 : vector<1x128xf32> to vector<128xf32>
    %2590 = vector.shape_cast %2589 : vector<128xf32> to vector<1x128xf32>
    %2591 = vector.broadcast %2590 : vector<1x128xf32> to vector<8x128xf32>
    %2592 = arith.mulf %2563, %2591 : vector<8x128xf32>
    %2593 = arith.addf %2544, %2592 : vector<8x128xf32>
    %c469 = arith.constant 469 : index
    %c0_527 = arith.constant 0 : index
    %2594 = vector.load %arg4[%c469, %c0_527] : memref<768x128xf32, #tpu.memory_space<vmem>>, vector<1x128xf32>
    %2595 = vector.shape_cast %2594 : vector<1x128xf32> to vector<128xf32>
    %2596 = vector.shape_cast %2595 : vector<128xf32> to vector<1x128xf32>
    %2597 = vector.broadcast %2596 : vector<1x128xf32> to vector<8x128xf32>
    %2598 = arith.mulf %2563, %2597 : vector<8x128xf32>
    %2599 = arith.addf %2550, %2598 : vector<8x128xf32>
    %c470 = arith.constant 470 : index
    %c0_528 = arith.constant 0 : index
    %2600 = vector.load %arg4[%c470, %c0_528] : memref<768x128xf32, #tpu.memory_space<vmem>>, vector<1x128xf32>
    %2601 = vector.shape_cast %2600 : vector<1x128xf32> to vector<128xf32>
    %2602 = vector.shape_cast %2601 : vector<128xf32> to vector<1x128xf32>
    %2603 = vector.broadcast %2602 : vector<1x128xf32> to vector<8x128xf32>
    %2604 = arith.mulf %2563, %2603 : vector<8x128xf32>
    %2605 = arith.addf %2556, %2604 : vector<8x128xf32>
    %c471 = arith.constant 471 : index
    %c0_529 = arith.constant 0 : index
    %2606 = vector.load %arg4[%c471, %c0_529] : memref<768x128xf32, #tpu.memory_space<vmem>>, vector<1x128xf32>
    %2607 = vector.shape_cast %2606 : vector<1x128xf32> to vector<128xf32>
    %2608 = vector.shape_cast %2607 : vector<128xf32> to vector<1x128xf32>
    %2609 = vector.broadcast %2608 : vector<1x128xf32> to vector<8x128xf32>
    %2610 = arith.mulf %2563, %2609 : vector<8x128xf32>
    %2611 = arith.addf %2562, %2610 : vector<8x128xf32>
    %c216 = arith.constant 216 : index
    %c0_530 = arith.constant 0 : index
    %2612 = vector.load %arg4[%c216, %c0_530] : memref<768x128xf32, #tpu.memory_space<vmem>>, vector<8x128xf32>
    %c472 = arith.constant 472 : index
    %c0_531 = arith.constant 0 : index
    %2613 = vector.load %arg4[%c472, %c0_531] : memref<768x128xf32, #tpu.memory_space<vmem>>, vector<1x128xf32>
    %2614 = vector.shape_cast %2613 : vector<1x128xf32> to vector<128xf32>
    %2615 = vector.shape_cast %2614 : vector<128xf32> to vector<1x128xf32>
    %2616 = vector.broadcast %2615 : vector<1x128xf32> to vector<8x128xf32>
    %2617 = arith.mulf %2612, %2616 : vector<8x128xf32>
    %2618 = arith.addf %2569, %2617 : vector<8x128xf32>
    %c473 = arith.constant 473 : index
    %c0_532 = arith.constant 0 : index
    %2619 = vector.load %arg4[%c473, %c0_532] : memref<768x128xf32, #tpu.memory_space<vmem>>, vector<1x128xf32>
    %2620 = vector.shape_cast %2619 : vector<1x128xf32> to vector<128xf32>
    %2621 = vector.shape_cast %2620 : vector<128xf32> to vector<1x128xf32>
    %2622 = vector.broadcast %2621 : vector<1x128xf32> to vector<8x128xf32>
    %2623 = arith.mulf %2612, %2622 : vector<8x128xf32>
    %2624 = arith.addf %2575, %2623 : vector<8x128xf32>
    %c474 = arith.constant 474 : index
    %c0_533 = arith.constant 0 : index
    %2625 = vector.load %arg4[%c474, %c0_533] : memref<768x128xf32, #tpu.memory_space<vmem>>, vector<1x128xf32>
    %2626 = vector.shape_cast %2625 : vector<1x128xf32> to vector<128xf32>
    %2627 = vector.shape_cast %2626 : vector<128xf32> to vector<1x128xf32>
    %2628 = vector.broadcast %2627 : vector<1x128xf32> to vector<8x128xf32>
    %2629 = arith.mulf %2612, %2628 : vector<8x128xf32>
    %2630 = arith.addf %2581, %2629 : vector<8x128xf32>
    %c475 = arith.constant 475 : index
    %c0_534 = arith.constant 0 : index
    %2631 = vector.load %arg4[%c475, %c0_534] : memref<768x128xf32, #tpu.memory_space<vmem>>, vector<1x128xf32>
    %2632 = vector.shape_cast %2631 : vector<1x128xf32> to vector<128xf32>
    %2633 = vector.shape_cast %2632 : vector<128xf32> to vector<1x128xf32>
    %2634 = vector.broadcast %2633 : vector<1x128xf32> to vector<8x128xf32>
    %2635 = arith.mulf %2612, %2634 : vector<8x128xf32>
    %2636 = arith.addf %2587, %2635 : vector<8x128xf32>
    %c476 = arith.constant 476 : index
    %c0_535 = arith.constant 0 : index
    %2637 = vector.load %arg4[%c476, %c0_535] : memref<768x128xf32, #tpu.memory_space<vmem>>, vector<1x128xf32>
    %2638 = vector.shape_cast %2637 : vector<1x128xf32> to vector<128xf32>
    %2639 = vector.shape_cast %2638 : vector<128xf32> to vector<1x128xf32>
    %2640 = vector.broadcast %2639 : vector<1x128xf32> to vector<8x128xf32>
    %2641 = arith.mulf %2612, %2640 : vector<8x128xf32>
    %2642 = arith.addf %2593, %2641 : vector<8x128xf32>
    %c477 = arith.constant 477 : index
    %c0_536 = arith.constant 0 : index
    %2643 = vector.load %arg4[%c477, %c0_536] : memref<768x128xf32, #tpu.memory_space<vmem>>, vector<1x128xf32>
    %2644 = vector.shape_cast %2643 : vector<1x128xf32> to vector<128xf32>
    %2645 = vector.shape_cast %2644 : vector<128xf32> to vector<1x128xf32>
    %2646 = vector.broadcast %2645 : vector<1x128xf32> to vector<8x128xf32>
    %2647 = arith.mulf %2612, %2646 : vector<8x128xf32>
    %2648 = arith.addf %2599, %2647 : vector<8x128xf32>
    %c478 = arith.constant 478 : index
    %c0_537 = arith.constant 0 : index
    %2649 = vector.load %arg4[%c478, %c0_537] : memref<768x128xf32, #tpu.memory_space<vmem>>, vector<1x128xf32>
    %2650 = vector.shape_cast %2649 : vector<1x128xf32> to vector<128xf32>
    %2651 = vector.shape_cast %2650 : vector<128xf32> to vector<1x128xf32>
    %2652 = vector.broadcast %2651 : vector<1x128xf32> to vector<8x128xf32>
    %2653 = arith.mulf %2612, %2652 : vector<8x128xf32>
    %2654 = arith.addf %2605, %2653 : vector<8x128xf32>
    %c479 = arith.constant 479 : index
    %c0_538 = arith.constant 0 : index
    %2655 = vector.load %arg4[%c479, %c0_538] : memref<768x128xf32, #tpu.memory_space<vmem>>, vector<1x128xf32>
    %2656 = vector.shape_cast %2655 : vector<1x128xf32> to vector<128xf32>
    %2657 = vector.shape_cast %2656 : vector<128xf32> to vector<1x128xf32>
    %2658 = vector.broadcast %2657 : vector<1x128xf32> to vector<8x128xf32>
    %2659 = arith.mulf %2612, %2658 : vector<8x128xf32>
    %2660 = arith.addf %2611, %2659 : vector<8x128xf32>
    %c224 = arith.constant 224 : index
    %c0_539 = arith.constant 0 : index
    %2661 = vector.load %arg4[%c224, %c0_539] : memref<768x128xf32, #tpu.memory_space<vmem>>, vector<8x128xf32>
    %c480 = arith.constant 480 : index
    %c0_540 = arith.constant 0 : index
    %2662 = vector.load %arg4[%c480, %c0_540] : memref<768x128xf32, #tpu.memory_space<vmem>>, vector<1x128xf32>
    %2663 = vector.shape_cast %2662 : vector<1x128xf32> to vector<128xf32>
    %2664 = vector.shape_cast %2663 : vector<128xf32> to vector<1x128xf32>
    %2665 = vector.broadcast %2664 : vector<1x128xf32> to vector<8x128xf32>
    %2666 = arith.mulf %2661, %2665 : vector<8x128xf32>
    %2667 = arith.addf %2618, %2666 : vector<8x128xf32>
    %c481 = arith.constant 481 : index
    %c0_541 = arith.constant 0 : index
    %2668 = vector.load %arg4[%c481, %c0_541] : memref<768x128xf32, #tpu.memory_space<vmem>>, vector<1x128xf32>
    %2669 = vector.shape_cast %2668 : vector<1x128xf32> to vector<128xf32>
    %2670 = vector.shape_cast %2669 : vector<128xf32> to vector<1x128xf32>
    %2671 = vector.broadcast %2670 : vector<1x128xf32> to vector<8x128xf32>
    %2672 = arith.mulf %2661, %2671 : vector<8x128xf32>
    %2673 = arith.addf %2624, %2672 : vector<8x128xf32>
    %c482 = arith.constant 482 : index
    %c0_542 = arith.constant 0 : index
    %2674 = vector.load %arg4[%c482, %c0_542] : memref<768x128xf32, #tpu.memory_space<vmem>>, vector<1x128xf32>
    %2675 = vector.shape_cast %2674 : vector<1x128xf32> to vector<128xf32>
    %2676 = vector.shape_cast %2675 : vector<128xf32> to vector<1x128xf32>
    %2677 = vector.broadcast %2676 : vector<1x128xf32> to vector<8x128xf32>
    %2678 = arith.mulf %2661, %2677 : vector<8x128xf32>
    %2679 = arith.addf %2630, %2678 : vector<8x128xf32>
    %c483 = arith.constant 483 : index
    %c0_543 = arith.constant 0 : index
    %2680 = vector.load %arg4[%c483, %c0_543] : memref<768x128xf32, #tpu.memory_space<vmem>>, vector<1x128xf32>
    %2681 = vector.shape_cast %2680 : vector<1x128xf32> to vector<128xf32>
    %2682 = vector.shape_cast %2681 : vector<128xf32> to vector<1x128xf32>
    %2683 = vector.broadcast %2682 : vector<1x128xf32> to vector<8x128xf32>
    %2684 = arith.mulf %2661, %2683 : vector<8x128xf32>
    %2685 = arith.addf %2636, %2684 : vector<8x128xf32>
    %c484 = arith.constant 484 : index
    %c0_544 = arith.constant 0 : index
    %2686 = vector.load %arg4[%c484, %c0_544] : memref<768x128xf32, #tpu.memory_space<vmem>>, vector<1x128xf32>
    %2687 = vector.shape_cast %2686 : vector<1x128xf32> to vector<128xf32>
    %2688 = vector.shape_cast %2687 : vector<128xf32> to vector<1x128xf32>
    %2689 = vector.broadcast %2688 : vector<1x128xf32> to vector<8x128xf32>
    %2690 = arith.mulf %2661, %2689 : vector<8x128xf32>
    %2691 = arith.addf %2642, %2690 : vector<8x128xf32>
    %c485 = arith.constant 485 : index
    %c0_545 = arith.constant 0 : index
    %2692 = vector.load %arg4[%c485, %c0_545] : memref<768x128xf32, #tpu.memory_space<vmem>>, vector<1x128xf32>
    %2693 = vector.shape_cast %2692 : vector<1x128xf32> to vector<128xf32>
    %2694 = vector.shape_cast %2693 : vector<128xf32> to vector<1x128xf32>
    %2695 = vector.broadcast %2694 : vector<1x128xf32> to vector<8x128xf32>
    %2696 = arith.mulf %2661, %2695 : vector<8x128xf32>
    %2697 = arith.addf %2648, %2696 : vector<8x128xf32>
    %c486 = arith.constant 486 : index
    %c0_546 = arith.constant 0 : index
    %2698 = vector.load %arg4[%c486, %c0_546] : memref<768x128xf32, #tpu.memory_space<vmem>>, vector<1x128xf32>
    %2699 = vector.shape_cast %2698 : vector<1x128xf32> to vector<128xf32>
    %2700 = vector.shape_cast %2699 : vector<128xf32> to vector<1x128xf32>
    %2701 = vector.broadcast %2700 : vector<1x128xf32> to vector<8x128xf32>
    %2702 = arith.mulf %2661, %2701 : vector<8x128xf32>
    %2703 = arith.addf %2654, %2702 : vector<8x128xf32>
    %c487 = arith.constant 487 : index
    %c0_547 = arith.constant 0 : index
    %2704 = vector.load %arg4[%c487, %c0_547] : memref<768x128xf32, #tpu.memory_space<vmem>>, vector<1x128xf32>
    %2705 = vector.shape_cast %2704 : vector<1x128xf32> to vector<128xf32>
    %2706 = vector.shape_cast %2705 : vector<128xf32> to vector<1x128xf32>
    %2707 = vector.broadcast %2706 : vector<1x128xf32> to vector<8x128xf32>
    %2708 = arith.mulf %2661, %2707 : vector<8x128xf32>
    %2709 = arith.addf %2660, %2708 : vector<8x128xf32>
    %c232 = arith.constant 232 : index
    %c0_548 = arith.constant 0 : index
    %2710 = vector.load %arg4[%c232, %c0_548] : memref<768x128xf32, #tpu.memory_space<vmem>>, vector<8x128xf32>
    %c488 = arith.constant 488 : index
    %c0_549 = arith.constant 0 : index
    %2711 = vector.load %arg4[%c488, %c0_549] : memref<768x128xf32, #tpu.memory_space<vmem>>, vector<1x128xf32>
    %2712 = vector.shape_cast %2711 : vector<1x128xf32> to vector<128xf32>
    %2713 = vector.shape_cast %2712 : vector<128xf32> to vector<1x128xf32>
    %2714 = vector.broadcast %2713 : vector<1x128xf32> to vector<8x128xf32>
    %2715 = arith.mulf %2710, %2714 : vector<8x128xf32>
    %2716 = arith.addf %2667, %2715 : vector<8x128xf32>
    %c489 = arith.constant 489 : index
    %c0_550 = arith.constant 0 : index
    %2717 = vector.load %arg4[%c489, %c0_550] : memref<768x128xf32, #tpu.memory_space<vmem>>, vector<1x128xf32>
    %2718 = vector.shape_cast %2717 : vector<1x128xf32> to vector<128xf32>
    %2719 = vector.shape_cast %2718 : vector<128xf32> to vector<1x128xf32>
    %2720 = vector.broadcast %2719 : vector<1x128xf32> to vector<8x128xf32>
    %2721 = arith.mulf %2710, %2720 : vector<8x128xf32>
    %2722 = arith.addf %2673, %2721 : vector<8x128xf32>
    %c490 = arith.constant 490 : index
    %c0_551 = arith.constant 0 : index
    %2723 = vector.load %arg4[%c490, %c0_551] : memref<768x128xf32, #tpu.memory_space<vmem>>, vector<1x128xf32>
    %2724 = vector.shape_cast %2723 : vector<1x128xf32> to vector<128xf32>
    %2725 = vector.shape_cast %2724 : vector<128xf32> to vector<1x128xf32>
    %2726 = vector.broadcast %2725 : vector<1x128xf32> to vector<8x128xf32>
    %2727 = arith.mulf %2710, %2726 : vector<8x128xf32>
    %2728 = arith.addf %2679, %2727 : vector<8x128xf32>
    %c491 = arith.constant 491 : index
    %c0_552 = arith.constant 0 : index
    %2729 = vector.load %arg4[%c491, %c0_552] : memref<768x128xf32, #tpu.memory_space<vmem>>, vector<1x128xf32>
    %2730 = vector.shape_cast %2729 : vector<1x128xf32> to vector<128xf32>
    %2731 = vector.shape_cast %2730 : vector<128xf32> to vector<1x128xf32>
    %2732 = vector.broadcast %2731 : vector<1x128xf32> to vector<8x128xf32>
    %2733 = arith.mulf %2710, %2732 : vector<8x128xf32>
    %2734 = arith.addf %2685, %2733 : vector<8x128xf32>
    %c492 = arith.constant 492 : index
    %c0_553 = arith.constant 0 : index
    %2735 = vector.load %arg4[%c492, %c0_553] : memref<768x128xf32, #tpu.memory_space<vmem>>, vector<1x128xf32>
    %2736 = vector.shape_cast %2735 : vector<1x128xf32> to vector<128xf32>
    %2737 = vector.shape_cast %2736 : vector<128xf32> to vector<1x128xf32>
    %2738 = vector.broadcast %2737 : vector<1x128xf32> to vector<8x128xf32>
    %2739 = arith.mulf %2710, %2738 : vector<8x128xf32>
    %2740 = arith.addf %2691, %2739 : vector<8x128xf32>
    %c493 = arith.constant 493 : index
    %c0_554 = arith.constant 0 : index
    %2741 = vector.load %arg4[%c493, %c0_554] : memref<768x128xf32, #tpu.memory_space<vmem>>, vector<1x128xf32>
    %2742 = vector.shape_cast %2741 : vector<1x128xf32> to vector<128xf32>
    %2743 = vector.shape_cast %2742 : vector<128xf32> to vector<1x128xf32>
    %2744 = vector.broadcast %2743 : vector<1x128xf32> to vector<8x128xf32>
    %2745 = arith.mulf %2710, %2744 : vector<8x128xf32>
    %2746 = arith.addf %2697, %2745 : vector<8x128xf32>
    %c494 = arith.constant 494 : index
    %c0_555 = arith.constant 0 : index
    %2747 = vector.load %arg4[%c494, %c0_555] : memref<768x128xf32, #tpu.memory_space<vmem>>, vector<1x128xf32>
    %2748 = vector.shape_cast %2747 : vector<1x128xf32> to vector<128xf32>
    %2749 = vector.shape_cast %2748 : vector<128xf32> to vector<1x128xf32>
    %2750 = vector.broadcast %2749 : vector<1x128xf32> to vector<8x128xf32>
    %2751 = arith.mulf %2710, %2750 : vector<8x128xf32>
    %2752 = arith.addf %2703, %2751 : vector<8x128xf32>
    %c495 = arith.constant 495 : index
    %c0_556 = arith.constant 0 : index
    %2753 = vector.load %arg4[%c495, %c0_556] : memref<768x128xf32, #tpu.memory_space<vmem>>, vector<1x128xf32>
    %2754 = vector.shape_cast %2753 : vector<1x128xf32> to vector<128xf32>
    %2755 = vector.shape_cast %2754 : vector<128xf32> to vector<1x128xf32>
    %2756 = vector.broadcast %2755 : vector<1x128xf32> to vector<8x128xf32>
    %2757 = arith.mulf %2710, %2756 : vector<8x128xf32>
    %2758 = arith.addf %2709, %2757 : vector<8x128xf32>
    %c240 = arith.constant 240 : index
    %c0_557 = arith.constant 0 : index
    %2759 = vector.load %arg4[%c240, %c0_557] : memref<768x128xf32, #tpu.memory_space<vmem>>, vector<8x128xf32>
    %c496 = arith.constant 496 : index
    %c0_558 = arith.constant 0 : index
    %2760 = vector.load %arg4[%c496, %c0_558] : memref<768x128xf32, #tpu.memory_space<vmem>>, vector<1x128xf32>
    %2761 = vector.shape_cast %2760 : vector<1x128xf32> to vector<128xf32>
    %2762 = vector.shape_cast %2761 : vector<128xf32> to vector<1x128xf32>
    %2763 = vector.broadcast %2762 : vector<1x128xf32> to vector<8x128xf32>
    %2764 = arith.mulf %2759, %2763 : vector<8x128xf32>
    %2765 = arith.addf %2716, %2764 : vector<8x128xf32>
    %c497 = arith.constant 497 : index
    %c0_559 = arith.constant 0 : index
    %2766 = vector.load %arg4[%c497, %c0_559] : memref<768x128xf32, #tpu.memory_space<vmem>>, vector<1x128xf32>
    %2767 = vector.shape_cast %2766 : vector<1x128xf32> to vector<128xf32>
    %2768 = vector.shape_cast %2767 : vector<128xf32> to vector<1x128xf32>
    %2769 = vector.broadcast %2768 : vector<1x128xf32> to vector<8x128xf32>
    %2770 = arith.mulf %2759, %2769 : vector<8x128xf32>
    %2771 = arith.addf %2722, %2770 : vector<8x128xf32>
    %c498 = arith.constant 498 : index
    %c0_560 = arith.constant 0 : index
    %2772 = vector.load %arg4[%c498, %c0_560] : memref<768x128xf32, #tpu.memory_space<vmem>>, vector<1x128xf32>
    %2773 = vector.shape_cast %2772 : vector<1x128xf32> to vector<128xf32>
    %2774 = vector.shape_cast %2773 : vector<128xf32> to vector<1x128xf32>
    %2775 = vector.broadcast %2774 : vector<1x128xf32> to vector<8x128xf32>
    %2776 = arith.mulf %2759, %2775 : vector<8x128xf32>
    %2777 = arith.addf %2728, %2776 : vector<8x128xf32>
    %c499 = arith.constant 499 : index
    %c0_561 = arith.constant 0 : index
    %2778 = vector.load %arg4[%c499, %c0_561] : memref<768x128xf32, #tpu.memory_space<vmem>>, vector<1x128xf32>
    %2779 = vector.shape_cast %2778 : vector<1x128xf32> to vector<128xf32>
    %2780 = vector.shape_cast %2779 : vector<128xf32> to vector<1x128xf32>
    %2781 = vector.broadcast %2780 : vector<1x128xf32> to vector<8x128xf32>
    %2782 = arith.mulf %2759, %2781 : vector<8x128xf32>
    %2783 = arith.addf %2734, %2782 : vector<8x128xf32>
    %c500 = arith.constant 500 : index
    %c0_562 = arith.constant 0 : index
    %2784 = vector.load %arg4[%c500, %c0_562] : memref<768x128xf32, #tpu.memory_space<vmem>>, vector<1x128xf32>
    %2785 = vector.shape_cast %2784 : vector<1x128xf32> to vector<128xf32>
    %2786 = vector.shape_cast %2785 : vector<128xf32> to vector<1x128xf32>
    %2787 = vector.broadcast %2786 : vector<1x128xf32> to vector<8x128xf32>
    %2788 = arith.mulf %2759, %2787 : vector<8x128xf32>
    %2789 = arith.addf %2740, %2788 : vector<8x128xf32>
    %c501 = arith.constant 501 : index
    %c0_563 = arith.constant 0 : index
    %2790 = vector.load %arg4[%c501, %c0_563] : memref<768x128xf32, #tpu.memory_space<vmem>>, vector<1x128xf32>
    %2791 = vector.shape_cast %2790 : vector<1x128xf32> to vector<128xf32>
    %2792 = vector.shape_cast %2791 : vector<128xf32> to vector<1x128xf32>
    %2793 = vector.broadcast %2792 : vector<1x128xf32> to vector<8x128xf32>
    %2794 = arith.mulf %2759, %2793 : vector<8x128xf32>
    %2795 = arith.addf %2746, %2794 : vector<8x128xf32>
    %c502 = arith.constant 502 : index
    %c0_564 = arith.constant 0 : index
    %2796 = vector.load %arg4[%c502, %c0_564] : memref<768x128xf32, #tpu.memory_space<vmem>>, vector<1x128xf32>
    %2797 = vector.shape_cast %2796 : vector<1x128xf32> to vector<128xf32>
    %2798 = vector.shape_cast %2797 : vector<128xf32> to vector<1x128xf32>
    %2799 = vector.broadcast %2798 : vector<1x128xf32> to vector<8x128xf32>
    %2800 = arith.mulf %2759, %2799 : vector<8x128xf32>
    %2801 = arith.addf %2752, %2800 : vector<8x128xf32>
    %c503 = arith.constant 503 : index
    %c0_565 = arith.constant 0 : index
    %2802 = vector.load %arg4[%c503, %c0_565] : memref<768x128xf32, #tpu.memory_space<vmem>>, vector<1x128xf32>
    %2803 = vector.shape_cast %2802 : vector<1x128xf32> to vector<128xf32>
    %2804 = vector.shape_cast %2803 : vector<128xf32> to vector<1x128xf32>
    %2805 = vector.broadcast %2804 : vector<1x128xf32> to vector<8x128xf32>
    %2806 = arith.mulf %2759, %2805 : vector<8x128xf32>
    %2807 = arith.addf %2758, %2806 : vector<8x128xf32>
    %c248 = arith.constant 248 : index
    %c0_566 = arith.constant 0 : index
    %2808 = vector.load %arg4[%c248, %c0_566] : memref<768x128xf32, #tpu.memory_space<vmem>>, vector<8x128xf32>
    %c504 = arith.constant 504 : index
    %c0_567 = arith.constant 0 : index
    %2809 = vector.load %arg4[%c504, %c0_567] : memref<768x128xf32, #tpu.memory_space<vmem>>, vector<1x128xf32>
    %2810 = vector.shape_cast %2809 : vector<1x128xf32> to vector<128xf32>
    %2811 = vector.shape_cast %2810 : vector<128xf32> to vector<1x128xf32>
    %2812 = vector.broadcast %2811 : vector<1x128xf32> to vector<8x128xf32>
    %2813 = arith.mulf %2808, %2812 : vector<8x128xf32>
    %2814 = arith.addf %2765, %2813 : vector<8x128xf32>
    %c505 = arith.constant 505 : index
    %c0_568 = arith.constant 0 : index
    %2815 = vector.load %arg4[%c505, %c0_568] : memref<768x128xf32, #tpu.memory_space<vmem>>, vector<1x128xf32>
    %2816 = vector.shape_cast %2815 : vector<1x128xf32> to vector<128xf32>
    %2817 = vector.shape_cast %2816 : vector<128xf32> to vector<1x128xf32>
    %2818 = vector.broadcast %2817 : vector<1x128xf32> to vector<8x128xf32>
    %2819 = arith.mulf %2808, %2818 : vector<8x128xf32>
    %2820 = arith.addf %2771, %2819 : vector<8x128xf32>
    %c506 = arith.constant 506 : index
    %c0_569 = arith.constant 0 : index
    %2821 = vector.load %arg4[%c506, %c0_569] : memref<768x128xf32, #tpu.memory_space<vmem>>, vector<1x128xf32>
    %2822 = vector.shape_cast %2821 : vector<1x128xf32> to vector<128xf32>
    %2823 = vector.shape_cast %2822 : vector<128xf32> to vector<1x128xf32>
    %2824 = vector.broadcast %2823 : vector<1x128xf32> to vector<8x128xf32>
    %2825 = arith.mulf %2808, %2824 : vector<8x128xf32>
    %2826 = arith.addf %2777, %2825 : vector<8x128xf32>
    %c507 = arith.constant 507 : index
    %c0_570 = arith.constant 0 : index
    %2827 = vector.load %arg4[%c507, %c0_570] : memref<768x128xf32, #tpu.memory_space<vmem>>, vector<1x128xf32>
    %2828 = vector.shape_cast %2827 : vector<1x128xf32> to vector<128xf32>
    %2829 = vector.shape_cast %2828 : vector<128xf32> to vector<1x128xf32>
    %2830 = vector.broadcast %2829 : vector<1x128xf32> to vector<8x128xf32>
    %2831 = arith.mulf %2808, %2830 : vector<8x128xf32>
    %2832 = arith.addf %2783, %2831 : vector<8x128xf32>
    %c508 = arith.constant 508 : index
    %c0_571 = arith.constant 0 : index
    %2833 = vector.load %arg4[%c508, %c0_571] : memref<768x128xf32, #tpu.memory_space<vmem>>, vector<1x128xf32>
    %2834 = vector.shape_cast %2833 : vector<1x128xf32> to vector<128xf32>
    %2835 = vector.shape_cast %2834 : vector<128xf32> to vector<1x128xf32>
    %2836 = vector.broadcast %2835 : vector<1x128xf32> to vector<8x128xf32>
    %2837 = arith.mulf %2808, %2836 : vector<8x128xf32>
    %2838 = arith.addf %2789, %2837 : vector<8x128xf32>
    %c509 = arith.constant 509 : index
    %c0_572 = arith.constant 0 : index
    %2839 = vector.load %arg4[%c509, %c0_572] : memref<768x128xf32, #tpu.memory_space<vmem>>, vector<1x128xf32>
    %2840 = vector.shape_cast %2839 : vector<1x128xf32> to vector<128xf32>
    %2841 = vector.shape_cast %2840 : vector<128xf32> to vector<1x128xf32>
    %2842 = vector.broadcast %2841 : vector<1x128xf32> to vector<8x128xf32>
    %2843 = arith.mulf %2808, %2842 : vector<8x128xf32>
    %2844 = arith.addf %2795, %2843 : vector<8x128xf32>
    %c510 = arith.constant 510 : index
    %c0_573 = arith.constant 0 : index
    %2845 = vector.load %arg4[%c510, %c0_573] : memref<768x128xf32, #tpu.memory_space<vmem>>, vector<1x128xf32>
    %2846 = vector.shape_cast %2845 : vector<1x128xf32> to vector<128xf32>
    %2847 = vector.shape_cast %2846 : vector<128xf32> to vector<1x128xf32>
    %2848 = vector.broadcast %2847 : vector<1x128xf32> to vector<8x128xf32>
    %2849 = arith.mulf %2808, %2848 : vector<8x128xf32>
    %2850 = arith.addf %2801, %2849 : vector<8x128xf32>
    %c511 = arith.constant 511 : index
    %c0_574 = arith.constant 0 : index
    %2851 = vector.load %arg4[%c511, %c0_574] : memref<768x128xf32, #tpu.memory_space<vmem>>, vector<1x128xf32>
    %2852 = vector.shape_cast %2851 : vector<1x128xf32> to vector<128xf32>
    %2853 = vector.shape_cast %2852 : vector<128xf32> to vector<1x128xf32>
    %2854 = vector.broadcast %2853 : vector<1x128xf32> to vector<8x128xf32>
    %2855 = arith.mulf %2808, %2854 : vector<8x128xf32>
    %2856 = arith.addf %2807, %2855 : vector<8x128xf32>
    %2857 = arith.maximumf %2814, %2820 : vector<8x128xf32>
    %2858 = arith.maximumf %2857, %2826 : vector<8x128xf32>
    %2859 = arith.maximumf %2858, %2832 : vector<8x128xf32>
    %2860 = arith.maximumf %2859, %2838 : vector<8x128xf32>
    %2861 = arith.maximumf %2860, %2844 : vector<8x128xf32>
    %2862 = arith.maximumf %2861, %2850 : vector<8x128xf32>
    %2863 = arith.maximumf %2862, %2856 : vector<8x128xf32>
    %2864 = arith.subf %2814, %2863 : vector<8x128xf32>
    %2865 = math.exp %2864 : vector<8x128xf32>
    %2866 = arith.subf %2820, %2863 : vector<8x128xf32>
    %2867 = math.exp %2866 : vector<8x128xf32>
    %2868 = arith.subf %2826, %2863 : vector<8x128xf32>
    %2869 = math.exp %2868 : vector<8x128xf32>
    %2870 = arith.subf %2832, %2863 : vector<8x128xf32>
    %2871 = math.exp %2870 : vector<8x128xf32>
    %2872 = arith.subf %2838, %2863 : vector<8x128xf32>
    %2873 = math.exp %2872 : vector<8x128xf32>
    %2874 = arith.subf %2844, %2863 : vector<8x128xf32>
    %2875 = math.exp %2874 : vector<8x128xf32>
    %2876 = arith.subf %2850, %2863 : vector<8x128xf32>
    %2877 = math.exp %2876 : vector<8x128xf32>
    %2878 = arith.subf %2856, %2863 : vector<8x128xf32>
    %2879 = math.exp %2878 : vector<8x128xf32>
    %2880 = arith.addf %2865, %2867 : vector<8x128xf32>
    %2881 = arith.addf %2880, %2869 : vector<8x128xf32>
    %2882 = arith.addf %2881, %2871 : vector<8x128xf32>
    %2883 = arith.addf %2882, %2873 : vector<8x128xf32>
    %2884 = arith.addf %2883, %2875 : vector<8x128xf32>
    %2885 = arith.addf %2884, %2877 : vector<8x128xf32>
    %2886 = arith.addf %2885, %2879 : vector<8x128xf32>
    %2887 = tpu.reciprocal %2886 : vector<8x128xf32> -> vector<8x128xf32>
    %2888 = arith.mulf %2865, %2887 : vector<8x128xf32>
    %2889 = arith.mulf %2867, %2887 : vector<8x128xf32>
    %2890 = arith.mulf %2869, %2887 : vector<8x128xf32>
    %2891 = arith.mulf %2871, %2887 : vector<8x128xf32>
    %2892 = arith.mulf %2873, %2887 : vector<8x128xf32>
    %2893 = arith.mulf %2875, %2887 : vector<8x128xf32>
    %2894 = arith.mulf %2877, %2887 : vector<8x128xf32>
    %2895 = arith.mulf %2879, %2887 : vector<8x128xf32>
    %c704 = arith.constant 704 : index
    %c0_575 = arith.constant 0 : index
    %2896 = vector.load %arg4[%c704, %c0_575] : memref<768x128xf32, #tpu.memory_space<vmem>>, vector<1x128xf32>
    %2897 = vector.shape_cast %2896 : vector<1x128xf32> to vector<128xf32>
    %2898 = vector.shape_cast %2897 : vector<128xf32> to vector<1x128xf32>
    %2899 = vector.broadcast %2898 : vector<1x128xf32> to vector<8x128xf32>
    %2900 = arith.mulf %2888, %2899 : vector<8x128xf32>
    %c705 = arith.constant 705 : index
    %c0_576 = arith.constant 0 : index
    %2901 = vector.load %arg4[%c705, %c0_576] : memref<768x128xf32, #tpu.memory_space<vmem>>, vector<1x128xf32>
    %2902 = vector.shape_cast %2901 : vector<1x128xf32> to vector<128xf32>
    %2903 = vector.shape_cast %2902 : vector<128xf32> to vector<1x128xf32>
    %2904 = vector.broadcast %2903 : vector<1x128xf32> to vector<8x128xf32>
    %2905 = arith.mulf %2889, %2904 : vector<8x128xf32>
    %2906 = arith.addf %2900, %2905 : vector<8x128xf32>
    %c706 = arith.constant 706 : index
    %c0_577 = arith.constant 0 : index
    %2907 = vector.load %arg4[%c706, %c0_577] : memref<768x128xf32, #tpu.memory_space<vmem>>, vector<1x128xf32>
    %2908 = vector.shape_cast %2907 : vector<1x128xf32> to vector<128xf32>
    %2909 = vector.shape_cast %2908 : vector<128xf32> to vector<1x128xf32>
    %2910 = vector.broadcast %2909 : vector<1x128xf32> to vector<8x128xf32>
    %2911 = arith.mulf %2890, %2910 : vector<8x128xf32>
    %2912 = arith.addf %2906, %2911 : vector<8x128xf32>
    %c707 = arith.constant 707 : index
    %c0_578 = arith.constant 0 : index
    %2913 = vector.load %arg4[%c707, %c0_578] : memref<768x128xf32, #tpu.memory_space<vmem>>, vector<1x128xf32>
    %2914 = vector.shape_cast %2913 : vector<1x128xf32> to vector<128xf32>
    %2915 = vector.shape_cast %2914 : vector<128xf32> to vector<1x128xf32>
    %2916 = vector.broadcast %2915 : vector<1x128xf32> to vector<8x128xf32>
    %2917 = arith.mulf %2891, %2916 : vector<8x128xf32>
    %2918 = arith.addf %2912, %2917 : vector<8x128xf32>
    %c708 = arith.constant 708 : index
    %c0_579 = arith.constant 0 : index
    %2919 = vector.load %arg4[%c708, %c0_579] : memref<768x128xf32, #tpu.memory_space<vmem>>, vector<1x128xf32>
    %2920 = vector.shape_cast %2919 : vector<1x128xf32> to vector<128xf32>
    %2921 = vector.shape_cast %2920 : vector<128xf32> to vector<1x128xf32>
    %2922 = vector.broadcast %2921 : vector<1x128xf32> to vector<8x128xf32>
    %2923 = arith.mulf %2892, %2922 : vector<8x128xf32>
    %2924 = arith.addf %2918, %2923 : vector<8x128xf32>
    %c709 = arith.constant 709 : index
    %c0_580 = arith.constant 0 : index
    %2925 = vector.load %arg4[%c709, %c0_580] : memref<768x128xf32, #tpu.memory_space<vmem>>, vector<1x128xf32>
    %2926 = vector.shape_cast %2925 : vector<1x128xf32> to vector<128xf32>
    %2927 = vector.shape_cast %2926 : vector<128xf32> to vector<1x128xf32>
    %2928 = vector.broadcast %2927 : vector<1x128xf32> to vector<8x128xf32>
    %2929 = arith.mulf %2893, %2928 : vector<8x128xf32>
    %2930 = arith.addf %2924, %2929 : vector<8x128xf32>
    %c710 = arith.constant 710 : index
    %c0_581 = arith.constant 0 : index
    %2931 = vector.load %arg4[%c710, %c0_581] : memref<768x128xf32, #tpu.memory_space<vmem>>, vector<1x128xf32>
    %2932 = vector.shape_cast %2931 : vector<1x128xf32> to vector<128xf32>
    %2933 = vector.shape_cast %2932 : vector<128xf32> to vector<1x128xf32>
    %2934 = vector.broadcast %2933 : vector<1x128xf32> to vector<8x128xf32>
    %2935 = arith.mulf %2894, %2934 : vector<8x128xf32>
    %2936 = arith.addf %2930, %2935 : vector<8x128xf32>
    %c711 = arith.constant 711 : index
    %c0_582 = arith.constant 0 : index
    %2937 = vector.load %arg4[%c711, %c0_582] : memref<768x128xf32, #tpu.memory_space<vmem>>, vector<1x128xf32>
    %2938 = vector.shape_cast %2937 : vector<1x128xf32> to vector<128xf32>
    %2939 = vector.shape_cast %2938 : vector<128xf32> to vector<1x128xf32>
    %2940 = vector.broadcast %2939 : vector<1x128xf32> to vector<8x128xf32>
    %2941 = arith.mulf %2895, %2940 : vector<8x128xf32>
    %2942 = arith.addf %2936, %2941 : vector<8x128xf32>
    %c3_583 = arith.constant 3 : index
    %c0_584 = arith.constant 0 : index
    %c0_585 = arith.constant 0 : index
    %c0_586 = arith.constant 0 : index
    %2943 = vector.load %arg3[%c3_583, %c0_584, %c0_585, %c0_586] : memref<4x8x8x128xf32, #tpu.memory_space<vmem>>, vector<1x1x8x128xf32>
    %2944 = vector.shape_cast %2943 : vector<1x1x8x128xf32> to vector<8x128xf32>
    %2945 = vector.shape_cast %2942 : vector<8x128xf32> to vector<1x1x8x128xf32>
    tpu.vector_store %arg3[%c3_583, %c0_584, %c0_585, %c0_586], %2945 {strides = array<i32>} : memref<4x8x8x128xf32, #tpu.memory_space<vmem>>, vector<1x1x8x128xf32>,
    %c712 = arith.constant 712 : index
    %c0_587 = arith.constant 0 : index
    %2946 = vector.load %arg4[%c712, %c0_587] : memref<768x128xf32, #tpu.memory_space<vmem>>, vector<1x128xf32>
    %2947 = vector.shape_cast %2946 : vector<1x128xf32> to vector<128xf32>
    %2948 = vector.shape_cast %2947 : vector<128xf32> to vector<1x128xf32>
    %2949 = vector.broadcast %2948 : vector<1x128xf32> to vector<8x128xf32>
    %2950 = arith.mulf %2888, %2949 : vector<8x128xf32>
    %c713 = arith.constant 713 : index
    %c0_588 = arith.constant 0 : index
    %2951 = vector.load %arg4[%c713, %c0_588] : memref<768x128xf32, #tpu.memory_space<vmem>>, vector<1x128xf32>
    %2952 = vector.shape_cast %2951 : vector<1x128xf32> to vector<128xf32>
    %2953 = vector.shape_cast %2952 : vector<128xf32> to vector<1x128xf32>
    %2954 = vector.broadcast %2953 : vector<1x128xf32> to vector<8x128xf32>
    %2955 = arith.mulf %2889, %2954 : vector<8x128xf32>
    %2956 = arith.addf %2950, %2955 : vector<8x128xf32>
    %c714 = arith.constant 714 : index
    %c0_589 = arith.constant 0 : index
    %2957 = vector.load %arg4[%c714, %c0_589] : memref<768x128xf32, #tpu.memory_space<vmem>>, vector<1x128xf32>
    %2958 = vector.shape_cast %2957 : vector<1x128xf32> to vector<128xf32>
    %2959 = vector.shape_cast %2958 : vector<128xf32> to vector<1x128xf32>
    %2960 = vector.broadcast %2959 : vector<1x128xf32> to vector<8x128xf32>
    %2961 = arith.mulf %2890, %2960 : vector<8x128xf32>
    %2962 = arith.addf %2956, %2961 : vector<8x128xf32>
    %c715 = arith.constant 715 : index
    %c0_590 = arith.constant 0 : index
    %2963 = vector.load %arg4[%c715, %c0_590] : memref<768x128xf32, #tpu.memory_space<vmem>>, vector<1x128xf32>
    %2964 = vector.shape_cast %2963 : vector<1x128xf32> to vector<128xf32>
    %2965 = vector.shape_cast %2964 : vector<128xf32> to vector<1x128xf32>
    %2966 = vector.broadcast %2965 : vector<1x128xf32> to vector<8x128xf32>
    %2967 = arith.mulf %2891, %2966 : vector<8x128xf32>
    %2968 = arith.addf %2962, %2967 : vector<8x128xf32>
    %c716 = arith.constant 716 : index
    %c0_591 = arith.constant 0 : index
    %2969 = vector.load %arg4[%c716, %c0_591] : memref<768x128xf32, #tpu.memory_space<vmem>>, vector<1x128xf32>
    %2970 = vector.shape_cast %2969 : vector<1x128xf32> to vector<128xf32>
    %2971 = vector.shape_cast %2970 : vector<128xf32> to vector<1x128xf32>
    %2972 = vector.broadcast %2971 : vector<1x128xf32> to vector<8x128xf32>
    %2973 = arith.mulf %2892, %2972 : vector<8x128xf32>
    %2974 = arith.addf %2968, %2973 : vector<8x128xf32>
    %c717 = arith.constant 717 : index
    %c0_592 = arith.constant 0 : index
    %2975 = vector.load %arg4[%c717, %c0_592] : memref<768x128xf32, #tpu.memory_space<vmem>>, vector<1x128xf32>
    %2976 = vector.shape_cast %2975 : vector<1x128xf32> to vector<128xf32>
    %2977 = vector.shape_cast %2976 : vector<128xf32> to vector<1x128xf32>
    %2978 = vector.broadcast %2977 : vector<1x128xf32> to vector<8x128xf32>
    %2979 = arith.mulf %2893, %2978 : vector<8x128xf32>
    %2980 = arith.addf %2974, %2979 : vector<8x128xf32>
    %c718 = arith.constant 718 : index
    %c0_593 = arith.constant 0 : index
    %2981 = vector.load %arg4[%c718, %c0_593] : memref<768x128xf32, #tpu.memory_space<vmem>>, vector<1x128xf32>
    %2982 = vector.shape_cast %2981 : vector<1x128xf32> to vector<128xf32>
    %2983 = vector.shape_cast %2982 : vector<128xf32> to vector<1x128xf32>
    %2984 = vector.broadcast %2983 : vector<1x128xf32> to vector<8x128xf32>
    %2985 = arith.mulf %2894, %2984 : vector<8x128xf32>
    %2986 = arith.addf %2980, %2985 : vector<8x128xf32>
    %c719 = arith.constant 719 : index
    %c0_594 = arith.constant 0 : index
    %2987 = vector.load %arg4[%c719, %c0_594] : memref<768x128xf32, #tpu.memory_space<vmem>>, vector<1x128xf32>
    %2988 = vector.shape_cast %2987 : vector<1x128xf32> to vector<128xf32>
    %2989 = vector.shape_cast %2988 : vector<128xf32> to vector<1x128xf32>
    %2990 = vector.broadcast %2989 : vector<1x128xf32> to vector<8x128xf32>
    %2991 = arith.mulf %2895, %2990 : vector<8x128xf32>
    %2992 = arith.addf %2986, %2991 : vector<8x128xf32>
    %c3_595 = arith.constant 3 : index
    %c1_596 = arith.constant 1 : index
    %c0_597 = arith.constant 0 : index
    %c0_598 = arith.constant 0 : index
    %2993 = vector.load %arg3[%c3_595, %c1_596, %c0_597, %c0_598] : memref<4x8x8x128xf32, #tpu.memory_space<vmem>>, vector<1x1x8x128xf32>
    %2994 = vector.shape_cast %2993 : vector<1x1x8x128xf32> to vector<8x128xf32>
    %2995 = vector.shape_cast %2992 : vector<8x128xf32> to vector<1x1x8x128xf32>
    tpu.vector_store %arg3[%c3_595, %c1_596, %c0_597, %c0_598], %2995 {strides = array<i32>} : memref<4x8x8x128xf32, #tpu.memory_space<vmem>>, vector<1x1x8x128xf32>,
    %c720 = arith.constant 720 : index
    %c0_599 = arith.constant 0 : index
    %2996 = vector.load %arg4[%c720, %c0_599] : memref<768x128xf32, #tpu.memory_space<vmem>>, vector<1x128xf32>
    %2997 = vector.shape_cast %2996 : vector<1x128xf32> to vector<128xf32>
    %2998 = vector.shape_cast %2997 : vector<128xf32> to vector<1x128xf32>
    %2999 = vector.broadcast %2998 : vector<1x128xf32> to vector<8x128xf32>
    %3000 = arith.mulf %2888, %2999 : vector<8x128xf32>
    %c721 = arith.constant 721 : index
    %c0_600 = arith.constant 0 : index
    %3001 = vector.load %arg4[%c721, %c0_600] : memref<768x128xf32, #tpu.memory_space<vmem>>, vector<1x128xf32>
    %3002 = vector.shape_cast %3001 : vector<1x128xf32> to vector<128xf32>
    %3003 = vector.shape_cast %3002 : vector<128xf32> to vector<1x128xf32>
    %3004 = vector.broadcast %3003 : vector<1x128xf32> to vector<8x128xf32>
    %3005 = arith.mulf %2889, %3004 : vector<8x128xf32>
    %3006 = arith.addf %3000, %3005 : vector<8x128xf32>
    %c722 = arith.constant 722 : index
    %c0_601 = arith.constant 0 : index
    %3007 = vector.load %arg4[%c722, %c0_601] : memref<768x128xf32, #tpu.memory_space<vmem>>, vector<1x128xf32>
    %3008 = vector.shape_cast %3007 : vector<1x128xf32> to vector<128xf32>
    %3009 = vector.shape_cast %3008 : vector<128xf32> to vector<1x128xf32>
    %3010 = vector.broadcast %3009 : vector<1x128xf32> to vector<8x128xf32>
    %3011 = arith.mulf %2890, %3010 : vector<8x128xf32>
    %3012 = arith.addf %3006, %3011 : vector<8x128xf32>
    %c723 = arith.constant 723 : index
    %c0_602 = arith.constant 0 : index
    %3013 = vector.load %arg4[%c723, %c0_602] : memref<768x128xf32, #tpu.memory_space<vmem>>, vector<1x128xf32>
    %3014 = vector.shape_cast %3013 : vector<1x128xf32> to vector<128xf32>
    %3015 = vector.shape_cast %3014 : vector<128xf32> to vector<1x128xf32>
    %3016 = vector.broadcast %3015 : vector<1x128xf32> to vector<8x128xf32>
    %3017 = arith.mulf %2891, %3016 : vector<8x128xf32>
    %3018 = arith.addf %3012, %3017 : vector<8x128xf32>
    %c724 = arith.constant 724 : index
    %c0_603 = arith.constant 0 : index
    %3019 = vector.load %arg4[%c724, %c0_603] : memref<768x128xf32, #tpu.memory_space<vmem>>, vector<1x128xf32>
    %3020 = vector.shape_cast %3019 : vector<1x128xf32> to vector<128xf32>
    %3021 = vector.shape_cast %3020 : vector<128xf32> to vector<1x128xf32>
    %3022 = vector.broadcast %3021 : vector<1x128xf32> to vector<8x128xf32>
    %3023 = arith.mulf %2892, %3022 : vector<8x128xf32>
    %3024 = arith.addf %3018, %3023 : vector<8x128xf32>
    %c725 = arith.constant 725 : index
    %c0_604 = arith.constant 0 : index
    %3025 = vector.load %arg4[%c725, %c0_604] : memref<768x128xf32, #tpu.memory_space<vmem>>, vector<1x128xf32>
    %3026 = vector.shape_cast %3025 : vector<1x128xf32> to vector<128xf32>
    %3027 = vector.shape_cast %3026 : vector<128xf32> to vector<1x128xf32>
    %3028 = vector.broadcast %3027 : vector<1x128xf32> to vector<8x128xf32>
    %3029 = arith.mulf %2893, %3028 : vector<8x128xf32>
    %3030 = arith.addf %3024, %3029 : vector<8x128xf32>
    %c726 = arith.constant 726 : index
    %c0_605 = arith.constant 0 : index
    %3031 = vector.load %arg4[%c726, %c0_605] : memref<768x128xf32, #tpu.memory_space<vmem>>, vector<1x128xf32>
    %3032 = vector.shape_cast %3031 : vector<1x128xf32> to vector<128xf32>
    %3033 = vector.shape_cast %3032 : vector<128xf32> to vector<1x128xf32>
    %3034 = vector.broadcast %3033 : vector<1x128xf32> to vector<8x128xf32>
    %3035 = arith.mulf %2894, %3034 : vector<8x128xf32>
    %3036 = arith.addf %3030, %3035 : vector<8x128xf32>
    %c727 = arith.constant 727 : index
    %c0_606 = arith.constant 0 : index
    %3037 = vector.load %arg4[%c727, %c0_606] : memref<768x128xf32, #tpu.memory_space<vmem>>, vector<1x128xf32>
    %3038 = vector.shape_cast %3037 : vector<1x128xf32> to vector<128xf32>
    %3039 = vector.shape_cast %3038 : vector<128xf32> to vector<1x128xf32>
    %3040 = vector.broadcast %3039 : vector<1x128xf32> to vector<8x128xf32>
    %3041 = arith.mulf %2895, %3040 : vector<8x128xf32>
    %3042 = arith.addf %3036, %3041 : vector<8x128xf32>
    %c3_607 = arith.constant 3 : index
    %c2_608 = arith.constant 2 : index
    %c0_609 = arith.constant 0 : index
    %c0_610 = arith.constant 0 : index
    %3043 = vector.load %arg3[%c3_607, %c2_608, %c0_609, %c0_610] : memref<4x8x8x128xf32, #tpu.memory_space<vmem>>, vector<1x1x8x128xf32>
    %3044 = vector.shape_cast %3043 : vector<1x1x8x128xf32> to vector<8x128xf32>
    %3045 = vector.shape_cast %3042 : vector<8x128xf32> to vector<1x1x8x128xf32>
    tpu.vector_store %arg3[%c3_607, %c2_608, %c0_609, %c0_610], %3045 {strides = array<i32>} : memref<4x8x8x128xf32, #tpu.memory_space<vmem>>, vector<1x1x8x128xf32>,
    %c728 = arith.constant 728 : index
    %c0_611 = arith.constant 0 : index
    %3046 = vector.load %arg4[%c728, %c0_611] : memref<768x128xf32, #tpu.memory_space<vmem>>, vector<1x128xf32>
    %3047 = vector.shape_cast %3046 : vector<1x128xf32> to vector<128xf32>
    %3048 = vector.shape_cast %3047 : vector<128xf32> to vector<1x128xf32>
    %3049 = vector.broadcast %3048 : vector<1x128xf32> to vector<8x128xf32>
    %3050 = arith.mulf %2888, %3049 : vector<8x128xf32>
    %c729 = arith.constant 729 : index
    %c0_612 = arith.constant 0 : index
    %3051 = vector.load %arg4[%c729, %c0_612] : memref<768x128xf32, #tpu.memory_space<vmem>>, vector<1x128xf32>
    %3052 = vector.shape_cast %3051 : vector<1x128xf32> to vector<128xf32>
    %3053 = vector.shape_cast %3052 : vector<128xf32> to vector<1x128xf32>
    %3054 = vector.broadcast %3053 : vector<1x128xf32> to vector<8x128xf32>
    %3055 = arith.mulf %2889, %3054 : vector<8x128xf32>
    %3056 = arith.addf %3050, %3055 : vector<8x128xf32>
    %c730 = arith.constant 730 : index
    %c0_613 = arith.constant 0 : index
    %3057 = vector.load %arg4[%c730, %c0_613] : memref<768x128xf32, #tpu.memory_space<vmem>>, vector<1x128xf32>
    %3058 = vector.shape_cast %3057 : vector<1x128xf32> to vector<128xf32>
    %3059 = vector.shape_cast %3058 : vector<128xf32> to vector<1x128xf32>
    %3060 = vector.broadcast %3059 : vector<1x128xf32> to vector<8x128xf32>
    %3061 = arith.mulf %2890, %3060 : vector<8x128xf32>
    %3062 = arith.addf %3056, %3061 : vector<8x128xf32>
    %c731 = arith.constant 731 : index
    %c0_614 = arith.constant 0 : index
    %3063 = vector.load %arg4[%c731, %c0_614] : memref<768x128xf32, #tpu.memory_space<vmem>>, vector<1x128xf32>
    %3064 = vector.shape_cast %3063 : vector<1x128xf32> to vector<128xf32>
    %3065 = vector.shape_cast %3064 : vector<128xf32> to vector<1x128xf32>
    %3066 = vector.broadcast %3065 : vector<1x128xf32> to vector<8x128xf32>
    %3067 = arith.mulf %2891, %3066 : vector<8x128xf32>
    %3068 = arith.addf %3062, %3067 : vector<8x128xf32>
    %c732 = arith.constant 732 : index
    %c0_615 = arith.constant 0 : index
    %3069 = vector.load %arg4[%c732, %c0_615] : memref<768x128xf32, #tpu.memory_space<vmem>>, vector<1x128xf32>
    %3070 = vector.shape_cast %3069 : vector<1x128xf32> to vector<128xf32>
    %3071 = vector.shape_cast %3070 : vector<128xf32> to vector<1x128xf32>
    %3072 = vector.broadcast %3071 : vector<1x128xf32> to vector<8x128xf32>
    %3073 = arith.mulf %2892, %3072 : vector<8x128xf32>
    %3074 = arith.addf %3068, %3073 : vector<8x128xf32>
    %c733 = arith.constant 733 : index
    %c0_616 = arith.constant 0 : index
    %3075 = vector.load %arg4[%c733, %c0_616] : memref<768x128xf32, #tpu.memory_space<vmem>>, vector<1x128xf32>
    %3076 = vector.shape_cast %3075 : vector<1x128xf32> to vector<128xf32>
    %3077 = vector.shape_cast %3076 : vector<128xf32> to vector<1x128xf32>
    %3078 = vector.broadcast %3077 : vector<1x128xf32> to vector<8x128xf32>
    %3079 = arith.mulf %2893, %3078 : vector<8x128xf32>
    %3080 = arith.addf %3074, %3079 : vector<8x128xf32>
    %c734 = arith.constant 734 : index
    %c0_617 = arith.constant 0 : index
    %3081 = vector.load %arg4[%c734, %c0_617] : memref<768x128xf32, #tpu.memory_space<vmem>>, vector<1x128xf32>
    %3082 = vector.shape_cast %3081 : vector<1x128xf32> to vector<128xf32>
    %3083 = vector.shape_cast %3082 : vector<128xf32> to vector<1x128xf32>
    %3084 = vector.broadcast %3083 : vector<1x128xf32> to vector<8x128xf32>
    %3085 = arith.mulf %2894, %3084 : vector<8x128xf32>
    %3086 = arith.addf %3080, %3085 : vector<8x128xf32>
    %c735 = arith.constant 735 : index
    %c0_618 = arith.constant 0 : index
    %3087 = vector.load %arg4[%c735, %c0_618] : memref<768x128xf32, #tpu.memory_space<vmem>>, vector<1x128xf32>
    %3088 = vector.shape_cast %3087 : vector<1x128xf32> to vector<128xf32>
    %3089 = vector.shape_cast %3088 : vector<128xf32> to vector<1x128xf32>
    %3090 = vector.broadcast %3089 : vector<1x128xf32> to vector<8x128xf32>
    %3091 = arith.mulf %2895, %3090 : vector<8x128xf32>
    %3092 = arith.addf %3086, %3091 : vector<8x128xf32>
    %c3_619 = arith.constant 3 : index
    %c3_620 = arith.constant 3 : index
    %c0_621 = arith.constant 0 : index
    %c0_622 = arith.constant 0 : index
    %3093 = vector.load %arg3[%c3_619, %c3_620, %c0_621, %c0_622] : memref<4x8x8x128xf32, #tpu.memory_space<vmem>>, vector<1x1x8x128xf32>
    %3094 = vector.shape_cast %3093 : vector<1x1x8x128xf32> to vector<8x128xf32>
    %3095 = vector.shape_cast %3092 : vector<8x128xf32> to vector<1x1x8x128xf32>
    tpu.vector_store %arg3[%c3_619, %c3_620, %c0_621, %c0_622], %3095 {strides = array<i32>} : memref<4x8x8x128xf32, #tpu.memory_space<vmem>>, vector<1x1x8x128xf32>,
    %c736 = arith.constant 736 : index
    %c0_623 = arith.constant 0 : index
    %3096 = vector.load %arg4[%c736, %c0_623] : memref<768x128xf32, #tpu.memory_space<vmem>>, vector<1x128xf32>
    %3097 = vector.shape_cast %3096 : vector<1x128xf32> to vector<128xf32>
    %3098 = vector.shape_cast %3097 : vector<128xf32> to vector<1x128xf32>
    %3099 = vector.broadcast %3098 : vector<1x128xf32> to vector<8x128xf32>
    %3100 = arith.mulf %2888, %3099 : vector<8x128xf32>
    %c737 = arith.constant 737 : index
    %c0_624 = arith.constant 0 : index
    %3101 = vector.load %arg4[%c737, %c0_624] : memref<768x128xf32, #tpu.memory_space<vmem>>, vector<1x128xf32>
    %3102 = vector.shape_cast %3101 : vector<1x128xf32> to vector<128xf32>
    %3103 = vector.shape_cast %3102 : vector<128xf32> to vector<1x128xf32>
    %3104 = vector.broadcast %3103 : vector<1x128xf32> to vector<8x128xf32>
    %3105 = arith.mulf %2889, %3104 : vector<8x128xf32>
    %3106 = arith.addf %3100, %3105 : vector<8x128xf32>
    %c738 = arith.constant 738 : index
    %c0_625 = arith.constant 0 : index
    %3107 = vector.load %arg4[%c738, %c0_625] : memref<768x128xf32, #tpu.memory_space<vmem>>, vector<1x128xf32>
    %3108 = vector.shape_cast %3107 : vector<1x128xf32> to vector<128xf32>
    %3109 = vector.shape_cast %3108 : vector<128xf32> to vector<1x128xf32>
    %3110 = vector.broadcast %3109 : vector<1x128xf32> to vector<8x128xf32>
    %3111 = arith.mulf %2890, %3110 : vector<8x128xf32>
    %3112 = arith.addf %3106, %3111 : vector<8x128xf32>
    %c739 = arith.constant 739 : index
    %c0_626 = arith.constant 0 : index
    %3113 = vector.load %arg4[%c739, %c0_626] : memref<768x128xf32, #tpu.memory_space<vmem>>, vector<1x128xf32>
    %3114 = vector.shape_cast %3113 : vector<1x128xf32> to vector<128xf32>
    %3115 = vector.shape_cast %3114 : vector<128xf32> to vector<1x128xf32>
    %3116 = vector.broadcast %3115 : vector<1x128xf32> to vector<8x128xf32>
    %3117 = arith.mulf %2891, %3116 : vector<8x128xf32>
    %3118 = arith.addf %3112, %3117 : vector<8x128xf32>
    %c740 = arith.constant 740 : index
    %c0_627 = arith.constant 0 : index
    %3119 = vector.load %arg4[%c740, %c0_627] : memref<768x128xf32, #tpu.memory_space<vmem>>, vector<1x128xf32>
    %3120 = vector.shape_cast %3119 : vector<1x128xf32> to vector<128xf32>
    %3121 = vector.shape_cast %3120 : vector<128xf32> to vector<1x128xf32>
    %3122 = vector.broadcast %3121 : vector<1x128xf32> to vector<8x128xf32>
    %3123 = arith.mulf %2892, %3122 : vector<8x128xf32>
    %3124 = arith.addf %3118, %3123 : vector<8x128xf32>
    %c741 = arith.constant 741 : index
    %c0_628 = arith.constant 0 : index
    %3125 = vector.load %arg4[%c741, %c0_628] : memref<768x128xf32, #tpu.memory_space<vmem>>, vector<1x128xf32>
    %3126 = vector.shape_cast %3125 : vector<1x128xf32> to vector<128xf32>
    %3127 = vector.shape_cast %3126 : vector<128xf32> to vector<1x128xf32>
    %3128 = vector.broadcast %3127 : vector<1x128xf32> to vector<8x128xf32>
    %3129 = arith.mulf %2893, %3128 : vector<8x128xf32>
    %3130 = arith.addf %3124, %3129 : vector<8x128xf32>
    %c742 = arith.constant 742 : index
    %c0_629 = arith.constant 0 : index
    %3131 = vector.load %arg4[%c742, %c0_629] : memref<768x128xf32, #tpu.memory_space<vmem>>, vector<1x128xf32>
    %3132 = vector.shape_cast %3131 : vector<1x128xf32> to vector<128xf32>
    %3133 = vector.shape_cast %3132 : vector<128xf32> to vector<1x128xf32>
    %3134 = vector.broadcast %3133 : vector<1x128xf32> to vector<8x128xf32>
    %3135 = arith.mulf %2894, %3134 : vector<8x128xf32>
    %3136 = arith.addf %3130, %3135 : vector<8x128xf32>
    %c743 = arith.constant 743 : index
    %c0_630 = arith.constant 0 : index
    %3137 = vector.load %arg4[%c743, %c0_630] : memref<768x128xf32, #tpu.memory_space<vmem>>, vector<1x128xf32>
    %3138 = vector.shape_cast %3137 : vector<1x128xf32> to vector<128xf32>
    %3139 = vector.shape_cast %3138 : vector<128xf32> to vector<1x128xf32>
    %3140 = vector.broadcast %3139 : vector<1x128xf32> to vector<8x128xf32>
    %3141 = arith.mulf %2895, %3140 : vector<8x128xf32>
    %3142 = arith.addf %3136, %3141 : vector<8x128xf32>
    %c3_631 = arith.constant 3 : index
    %c4_632 = arith.constant 4 : index
    %c0_633 = arith.constant 0 : index
    %c0_634 = arith.constant 0 : index
    %3143 = vector.load %arg3[%c3_631, %c4_632, %c0_633, %c0_634] : memref<4x8x8x128xf32, #tpu.memory_space<vmem>>, vector<1x1x8x128xf32>
    %3144 = vector.shape_cast %3143 : vector<1x1x8x128xf32> to vector<8x128xf32>
    %3145 = vector.shape_cast %3142 : vector<8x128xf32> to vector<1x1x8x128xf32>
    tpu.vector_store %arg3[%c3_631, %c4_632, %c0_633, %c0_634], %3145 {strides = array<i32>} : memref<4x8x8x128xf32, #tpu.memory_space<vmem>>, vector<1x1x8x128xf32>,
    %c744 = arith.constant 744 : index
    %c0_635 = arith.constant 0 : index
    %3146 = vector.load %arg4[%c744, %c0_635] : memref<768x128xf32, #tpu.memory_space<vmem>>, vector<1x128xf32>
    %3147 = vector.shape_cast %3146 : vector<1x128xf32> to vector<128xf32>
    %3148 = vector.shape_cast %3147 : vector<128xf32> to vector<1x128xf32>
    %3149 = vector.broadcast %3148 : vector<1x128xf32> to vector<8x128xf32>
    %3150 = arith.mulf %2888, %3149 : vector<8x128xf32>
    %c745 = arith.constant 745 : index
    %c0_636 = arith.constant 0 : index
    %3151 = vector.load %arg4[%c745, %c0_636] : memref<768x128xf32, #tpu.memory_space<vmem>>, vector<1x128xf32>
    %3152 = vector.shape_cast %3151 : vector<1x128xf32> to vector<128xf32>
    %3153 = vector.shape_cast %3152 : vector<128xf32> to vector<1x128xf32>
    %3154 = vector.broadcast %3153 : vector<1x128xf32> to vector<8x128xf32>
    %3155 = arith.mulf %2889, %3154 : vector<8x128xf32>
    %3156 = arith.addf %3150, %3155 : vector<8x128xf32>
    %c746 = arith.constant 746 : index
    %c0_637 = arith.constant 0 : index
    %3157 = vector.load %arg4[%c746, %c0_637] : memref<768x128xf32, #tpu.memory_space<vmem>>, vector<1x128xf32>
    %3158 = vector.shape_cast %3157 : vector<1x128xf32> to vector<128xf32>
    %3159 = vector.shape_cast %3158 : vector<128xf32> to vector<1x128xf32>
    %3160 = vector.broadcast %3159 : vector<1x128xf32> to vector<8x128xf32>
    %3161 = arith.mulf %2890, %3160 : vector<8x128xf32>
    %3162 = arith.addf %3156, %3161 : vector<8x128xf32>
    %c747 = arith.constant 747 : index
    %c0_638 = arith.constant 0 : index
    %3163 = vector.load %arg4[%c747, %c0_638] : memref<768x128xf32, #tpu.memory_space<vmem>>, vector<1x128xf32>
    %3164 = vector.shape_cast %3163 : vector<1x128xf32> to vector<128xf32>
    %3165 = vector.shape_cast %3164 : vector<128xf32> to vector<1x128xf32>
    %3166 = vector.broadcast %3165 : vector<1x128xf32> to vector<8x128xf32>
    %3167 = arith.mulf %2891, %3166 : vector<8x128xf32>
    %3168 = arith.addf %3162, %3167 : vector<8x128xf32>
    %c748 = arith.constant 748 : index
    %c0_639 = arith.constant 0 : index
    %3169 = vector.load %arg4[%c748, %c0_639] : memref<768x128xf32, #tpu.memory_space<vmem>>, vector<1x128xf32>
    %3170 = vector.shape_cast %3169 : vector<1x128xf32> to vector<128xf32>
    %3171 = vector.shape_cast %3170 : vector<128xf32> to vector<1x128xf32>
    %3172 = vector.broadcast %3171 : vector<1x128xf32> to vector<8x128xf32>
    %3173 = arith.mulf %2892, %3172 : vector<8x128xf32>
    %3174 = arith.addf %3168, %3173 : vector<8x128xf32>
    %c749 = arith.constant 749 : index
    %c0_640 = arith.constant 0 : index
    %3175 = vector.load %arg4[%c749, %c0_640] : memref<768x128xf32, #tpu.memory_space<vmem>>, vector<1x128xf32>
    %3176 = vector.shape_cast %3175 : vector<1x128xf32> to vector<128xf32>
    %3177 = vector.shape_cast %3176 : vector<128xf32> to vector<1x128xf32>
    %3178 = vector.broadcast %3177 : vector<1x128xf32> to vector<8x128xf32>
    %3179 = arith.mulf %2893, %3178 : vector<8x128xf32>
    %3180 = arith.addf %3174, %3179 : vector<8x128xf32>
    %c750 = arith.constant 750 : index
    %c0_641 = arith.constant 0 : index
    %3181 = vector.load %arg4[%c750, %c0_641] : memref<768x128xf32, #tpu.memory_space<vmem>>, vector<1x128xf32>
    %3182 = vector.shape_cast %3181 : vector<1x128xf32> to vector<128xf32>
    %3183 = vector.shape_cast %3182 : vector<128xf32> to vector<1x128xf32>
    %3184 = vector.broadcast %3183 : vector<1x128xf32> to vector<8x128xf32>
    %3185 = arith.mulf %2894, %3184 : vector<8x128xf32>
    %3186 = arith.addf %3180, %3185 : vector<8x128xf32>
    %c751 = arith.constant 751 : index
    %c0_642 = arith.constant 0 : index
    %3187 = vector.load %arg4[%c751, %c0_642] : memref<768x128xf32, #tpu.memory_space<vmem>>, vector<1x128xf32>
    %3188 = vector.shape_cast %3187 : vector<1x128xf32> to vector<128xf32>
    %3189 = vector.shape_cast %3188 : vector<128xf32> to vector<1x128xf32>
    %3190 = vector.broadcast %3189 : vector<1x128xf32> to vector<8x128xf32>
    %3191 = arith.mulf %2895, %3190 : vector<8x128xf32>
    %3192 = arith.addf %3186, %3191 : vector<8x128xf32>
    %c3_643 = arith.constant 3 : index
    %c5_644 = arith.constant 5 : index
    %c0_645 = arith.constant 0 : index
    %c0_646 = arith.constant 0 : index
    %3193 = vector.load %arg3[%c3_643, %c5_644, %c0_645, %c0_646] : memref<4x8x8x128xf32, #tpu.memory_space<vmem>>, vector<1x1x8x128xf32>
    %3194 = vector.shape_cast %3193 : vector<1x1x8x128xf32> to vector<8x128xf32>
    %3195 = vector.shape_cast %3192 : vector<8x128xf32> to vector<1x1x8x128xf32>
    tpu.vector_store %arg3[%c3_643, %c5_644, %c0_645, %c0_646], %3195 {strides = array<i32>} : memref<4x8x8x128xf32, #tpu.memory_space<vmem>>, vector<1x1x8x128xf32>,
    %c752 = arith.constant 752 : index
    %c0_647 = arith.constant 0 : index
    %3196 = vector.load %arg4[%c752, %c0_647] : memref<768x128xf32, #tpu.memory_space<vmem>>, vector<1x128xf32>
    %3197 = vector.shape_cast %3196 : vector<1x128xf32> to vector<128xf32>
    %3198 = vector.shape_cast %3197 : vector<128xf32> to vector<1x128xf32>
    %3199 = vector.broadcast %3198 : vector<1x128xf32> to vector<8x128xf32>
    %3200 = arith.mulf %2888, %3199 : vector<8x128xf32>
    %c753 = arith.constant 753 : index
    %c0_648 = arith.constant 0 : index
    %3201 = vector.load %arg4[%c753, %c0_648] : memref<768x128xf32, #tpu.memory_space<vmem>>, vector<1x128xf32>
    %3202 = vector.shape_cast %3201 : vector<1x128xf32> to vector<128xf32>
    %3203 = vector.shape_cast %3202 : vector<128xf32> to vector<1x128xf32>
    %3204 = vector.broadcast %3203 : vector<1x128xf32> to vector<8x128xf32>
    %3205 = arith.mulf %2889, %3204 : vector<8x128xf32>
    %3206 = arith.addf %3200, %3205 : vector<8x128xf32>
    %c754 = arith.constant 754 : index
    %c0_649 = arith.constant 0 : index
    %3207 = vector.load %arg4[%c754, %c0_649] : memref<768x128xf32, #tpu.memory_space<vmem>>, vector<1x128xf32>
    %3208 = vector.shape_cast %3207 : vector<1x128xf32> to vector<128xf32>
    %3209 = vector.shape_cast %3208 : vector<128xf32> to vector<1x128xf32>
    %3210 = vector.broadcast %3209 : vector<1x128xf32> to vector<8x128xf32>
    %3211 = arith.mulf %2890, %3210 : vector<8x128xf32>
    %3212 = arith.addf %3206, %3211 : vector<8x128xf32>
    %c755 = arith.constant 755 : index
    %c0_650 = arith.constant 0 : index
    %3213 = vector.load %arg4[%c755, %c0_650] : memref<768x128xf32, #tpu.memory_space<vmem>>, vector<1x128xf32>
    %3214 = vector.shape_cast %3213 : vector<1x128xf32> to vector<128xf32>
    %3215 = vector.shape_cast %3214 : vector<128xf32> to vector<1x128xf32>
    %3216 = vector.broadcast %3215 : vector<1x128xf32> to vector<8x128xf32>
    %3217 = arith.mulf %2891, %3216 : vector<8x128xf32>
    %3218 = arith.addf %3212, %3217 : vector<8x128xf32>
    %c756 = arith.constant 756 : index
    %c0_651 = arith.constant 0 : index
    %3219 = vector.load %arg4[%c756, %c0_651] : memref<768x128xf32, #tpu.memory_space<vmem>>, vector<1x128xf32>
    %3220 = vector.shape_cast %3219 : vector<1x128xf32> to vector<128xf32>
    %3221 = vector.shape_cast %3220 : vector<128xf32> to vector<1x128xf32>
    %3222 = vector.broadcast %3221 : vector<1x128xf32> to vector<8x128xf32>
    %3223 = arith.mulf %2892, %3222 : vector<8x128xf32>
    %3224 = arith.addf %3218, %3223 : vector<8x128xf32>
    %c757 = arith.constant 757 : index
    %c0_652 = arith.constant 0 : index
    %3225 = vector.load %arg4[%c757, %c0_652] : memref<768x128xf32, #tpu.memory_space<vmem>>, vector<1x128xf32>
    %3226 = vector.shape_cast %3225 : vector<1x128xf32> to vector<128xf32>
    %3227 = vector.shape_cast %3226 : vector<128xf32> to vector<1x128xf32>
    %3228 = vector.broadcast %3227 : vector<1x128xf32> to vector<8x128xf32>
    %3229 = arith.mulf %2893, %3228 : vector<8x128xf32>
    %3230 = arith.addf %3224, %3229 : vector<8x128xf32>
    %c758 = arith.constant 758 : index
    %c0_653 = arith.constant 0 : index
    %3231 = vector.load %arg4[%c758, %c0_653] : memref<768x128xf32, #tpu.memory_space<vmem>>, vector<1x128xf32>
    %3232 = vector.shape_cast %3231 : vector<1x128xf32> to vector<128xf32>
    %3233 = vector.shape_cast %3232 : vector<128xf32> to vector<1x128xf32>
    %3234 = vector.broadcast %3233 : vector<1x128xf32> to vector<8x128xf32>
    %3235 = arith.mulf %2894, %3234 : vector<8x128xf32>
    %3236 = arith.addf %3230, %3235 : vector<8x128xf32>
    %c759 = arith.constant 759 : index
    %c0_654 = arith.constant 0 : index
    %3237 = vector.load %arg4[%c759, %c0_654] : memref<768x128xf32, #tpu.memory_space<vmem>>, vector<1x128xf32>
    %3238 = vector.shape_cast %3237 : vector<1x128xf32> to vector<128xf32>
    %3239 = vector.shape_cast %3238 : vector<128xf32> to vector<1x128xf32>
    %3240 = vector.broadcast %3239 : vector<1x128xf32> to vector<8x128xf32>
    %3241 = arith.mulf %2895, %3240 : vector<8x128xf32>
    %3242 = arith.addf %3236, %3241 : vector<8x128xf32>
    %c3_655 = arith.constant 3 : index
    %c6_656 = arith.constant 6 : index
    %c0_657 = arith.constant 0 : index
    %c0_658 = arith.constant 0 : index
    %3243 = vector.load %arg3[%c3_655, %c6_656, %c0_657, %c0_658] : memref<4x8x8x128xf32, #tpu.memory_space<vmem>>, vector<1x1x8x128xf32>
    %3244 = vector.shape_cast %3243 : vector<1x1x8x128xf32> to vector<8x128xf32>
    %3245 = vector.shape_cast %3242 : vector<8x128xf32> to vector<1x1x8x128xf32>
    tpu.vector_store %arg3[%c3_655, %c6_656, %c0_657, %c0_658], %3245 {strides = array<i32>} : memref<4x8x8x128xf32, #tpu.memory_space<vmem>>, vector<1x1x8x128xf32>,
    %c760 = arith.constant 760 : index
    %c0_659 = arith.constant 0 : index
    %3246 = vector.load %arg4[%c760, %c0_659] : memref<768x128xf32, #tpu.memory_space<vmem>>, vector<1x128xf32>
    %3247 = vector.shape_cast %3246 : vector<1x128xf32> to vector<128xf32>
    %3248 = vector.shape_cast %3247 : vector<128xf32> to vector<1x128xf32>
    %3249 = vector.broadcast %3248 : vector<1x128xf32> to vector<8x128xf32>
    %3250 = arith.mulf %2888, %3249 : vector<8x128xf32>
    %c761 = arith.constant 761 : index
    %c0_660 = arith.constant 0 : index
    %3251 = vector.load %arg4[%c761, %c0_660] : memref<768x128xf32, #tpu.memory_space<vmem>>, vector<1x128xf32>
    %3252 = vector.shape_cast %3251 : vector<1x128xf32> to vector<128xf32>
    %3253 = vector.shape_cast %3252 : vector<128xf32> to vector<1x128xf32>
    %3254 = vector.broadcast %3253 : vector<1x128xf32> to vector<8x128xf32>
    %3255 = arith.mulf %2889, %3254 : vector<8x128xf32>
    %3256 = arith.addf %3250, %3255 : vector<8x128xf32>
    %c762 = arith.constant 762 : index
    %c0_661 = arith.constant 0 : index
    %3257 = vector.load %arg4[%c762, %c0_661] : memref<768x128xf32, #tpu.memory_space<vmem>>, vector<1x128xf32>
    %3258 = vector.shape_cast %3257 : vector<1x128xf32> to vector<128xf32>
    %3259 = vector.shape_cast %3258 : vector<128xf32> to vector<1x128xf32>
    %3260 = vector.broadcast %3259 : vector<1x128xf32> to vector<8x128xf32>
    %3261 = arith.mulf %2890, %3260 : vector<8x128xf32>
    %3262 = arith.addf %3256, %3261 : vector<8x128xf32>
    %c763 = arith.constant 763 : index
    %c0_662 = arith.constant 0 : index
    %3263 = vector.load %arg4[%c763, %c0_662] : memref<768x128xf32, #tpu.memory_space<vmem>>, vector<1x128xf32>
    %3264 = vector.shape_cast %3263 : vector<1x128xf32> to vector<128xf32>
    %3265 = vector.shape_cast %3264 : vector<128xf32> to vector<1x128xf32>
    %3266 = vector.broadcast %3265 : vector<1x128xf32> to vector<8x128xf32>
    %3267 = arith.mulf %2891, %3266 : vector<8x128xf32>
    %3268 = arith.addf %3262, %3267 : vector<8x128xf32>
    %c764 = arith.constant 764 : index
    %c0_663 = arith.constant 0 : index
    %3269 = vector.load %arg4[%c764, %c0_663] : memref<768x128xf32, #tpu.memory_space<vmem>>, vector<1x128xf32>
    %3270 = vector.shape_cast %3269 : vector<1x128xf32> to vector<128xf32>
    %3271 = vector.shape_cast %3270 : vector<128xf32> to vector<1x128xf32>
    %3272 = vector.broadcast %3271 : vector<1x128xf32> to vector<8x128xf32>
    %3273 = arith.mulf %2892, %3272 : vector<8x128xf32>
    %3274 = arith.addf %3268, %3273 : vector<8x128xf32>
    %c765 = arith.constant 765 : index
    %c0_664 = arith.constant 0 : index
    %3275 = vector.load %arg4[%c765, %c0_664] : memref<768x128xf32, #tpu.memory_space<vmem>>, vector<1x128xf32>
    %3276 = vector.shape_cast %3275 : vector<1x128xf32> to vector<128xf32>
    %3277 = vector.shape_cast %3276 : vector<128xf32> to vector<1x128xf32>
    %3278 = vector.broadcast %3277 : vector<1x128xf32> to vector<8x128xf32>
    %3279 = arith.mulf %2893, %3278 : vector<8x128xf32>
    %3280 = arith.addf %3274, %3279 : vector<8x128xf32>
    %c766 = arith.constant 766 : index
    %c0_665 = arith.constant 0 : index
    %3281 = vector.load %arg4[%c766, %c0_665] : memref<768x128xf32, #tpu.memory_space<vmem>>, vector<1x128xf32>
    %3282 = vector.shape_cast %3281 : vector<1x128xf32> to vector<128xf32>
    %3283 = vector.shape_cast %3282 : vector<128xf32> to vector<1x128xf32>
    %3284 = vector.broadcast %3283 : vector<1x128xf32> to vector<8x128xf32>
    %3285 = arith.mulf %2894, %3284 : vector<8x128xf32>
    %3286 = arith.addf %3280, %3285 : vector<8x128xf32>
    %c767 = arith.constant 767 : index
    %c0_666 = arith.constant 0 : index
    %3287 = vector.load %arg4[%c767, %c0_666] : memref<768x128xf32, #tpu.memory_space<vmem>>, vector<1x128xf32>
    %3288 = vector.shape_cast %3287 : vector<1x128xf32> to vector<128xf32>
    %3289 = vector.shape_cast %3288 : vector<128xf32> to vector<1x128xf32>
    %3290 = vector.broadcast %3289 : vector<1x128xf32> to vector<8x128xf32>
    %3291 = arith.mulf %2895, %3290 : vector<8x128xf32>
    %3292 = arith.addf %3286, %3291 : vector<8x128xf32>
    %c3_667 = arith.constant 3 : index
    %c7_668 = arith.constant 7 : index
    %c0_669 = arith.constant 0 : index
    %c0_670 = arith.constant 0 : index
    %3293 = vector.load %arg3[%c3_667, %c7_668, %c0_669, %c0_670] : memref<4x8x8x128xf32, #tpu.memory_space<vmem>>, vector<1x1x8x128xf32>
    %3294 = vector.shape_cast %3293 : vector<1x1x8x128xf32> to vector<8x128xf32>
    %3295 = vector.shape_cast %3292 : vector<8x128xf32> to vector<1x1x8x128xf32>
    tpu.vector_store %arg3[%c3_667, %c7_668, %c0_669, %c0_670], %3295 {strides = array<i32>} : memref<4x8x8x128xf32, #tpu.memory_space<vmem>>, vector<1x1x8x128xf32>,
    return
  }
  func.func @transform_0(%arg0: i32) -> (i32, i32) {
    %c0_i32 = arith.constant 0 : i32
    %c0_i32_0 = arith.constant 0 : i32
    return %c0_i32, %arg0 : i32, i32
  }
  func.func @transform_1(%arg0: i32) -> (i32, i32) {
    %c0_i32 = arith.constant 0 : i32
    %c0_i32_0 = arith.constant 0 : i32
    %c0_i32_1 = arith.constant 0 : i32
    return %c0_i32, %c0_i32_0 : i32, i32
  }
  func.func @transform_2(%arg0: i32) -> (i32, i32, i32, i32) {
    %c0_i32 = arith.constant 0 : i32
    %c0_i32_0 = arith.constant 0 : i32
    %c0_i32_1 = arith.constant 0 : i32
    %c0_i32_2 = arith.constant 0 : i32
    return %c0_i32, %c0_i32_0, %c0_i32_1, %arg0 : i32, i32, i32, i32
  }
}

</mosaic_0001>

<bundles_post_ra>
// kernel: tpu_custom_call.1
= control target key start
LH: loop header
LB: loop body
LE: loop exit
PB: predicated region body
PF: predicated region fallthrough
CT: control target
= control target key end

     0   :  { %7 = vsyncpa [#allocation4], 0  ;;  %s7115_s0 = inlined_call_operand.hbm [shape: f32[32,128], index: 0, kind: input, shape index: {}]   ;;  %s7116_s1 = inlined_call_operand.hbm [shape: f32[768,32], index: 1, kind: input, shape index: {}]   ;;  %s7117_s2 = inlined_call_operand.hbm [shape: f32[4,8,8,128], index: 2, kind: output, shape index: {}]  }
   0x1   :  { %8 = vsyncpa [#allocation7], 0 }
   0x2   :  { %9 = vsyncpa [#allocation5], 0  ;;  %s5928_s9 = smov [#allocation3]   ;;  %s5856_s13 = scalar_lea.hbm %s7115_s0, 512 }
   0x3   :  { %s15_s10 = sshll.u32 %s5928_s9, 4  ;;  %p5857_p0 = scmp.ne.s32.totalorder %s7115_s0, %s5856_s13  ;;  %s16_s10 = int_to_ptr.vmem [resolvable:$true] %s15_s10 }
   0x4   :  { %p5860_p1 = scmp.lt.u32.totalorder %s5856_s13, %s7115_s0 }
   0x6   :  { %p5862_p2 = pnand %p5860_p1, %p5857_p0 }
   0x8   :  { %5865 = shalt.err (!%p5862_p2)
}
   0x9   :  { %s5866_s18 = scalar_lea.vmem %s16_s10, 512  ;;  %p5871_p4 = scmp.lt.s32.totalorder %s16_s10, %s16_s10 }
   0xa   :  { %p5867_p3 = scmp.ne.s32.totalorder %s16_s10, %s5866_s18  ;;  %p5872_p5 = scmp.lt.s32.totalorder %s5866_s18, %s5866_s18 }
   0xc   :  { %p5873_p6 = por %p5872_p5, %p5871_p4 }
   0xe   :  { %p5874_p7 = pnand %p5873_p6, %p5867_p3 }
  0x10   :  { %5877 = shalt.err (!%p5874_p7)
}
  0x11   :  { %s5929_s19 = smov 128   ;;  %s5930_s20 = smov 8  }
  0x12   :  { %21 = dma.hbm_to_vmem [thread:$0]  %s7115_s0, 512, %s16_s10, [#allocation4], %s5929_s19, %s5929_s19, %s5930_s20  }
  0x13   :  { %s5931_s23 = smov [#allocation6]   ;;  %s5878_s27 = scalar_lea.hbm %s7116_s1, 12288 }
  0x14   :  { %s27_s24 = sshll.u32 %s5931_s23, 4  ;;  %p5879_p8 = scmp.ne.s32.totalorder %s7116_s1, %s5878_s27  ;;  %s28_s24 = int_to_ptr.vmem [resolvable:$true] %s27_s24 }
  0x15   :  { %p5882_p9 = scmp.lt.u32.totalorder %s5878_s27, %s7116_s1 }
  0x17   :  { %p5884_p10 = pnand %p5882_p9, %p5879_p8 }
  0x19   :  { %5887 = shalt.err (!%p5884_p10)
}
  0x1a   :  { %s5888_s4 = scalar_lea.vmem %s28_s24, 12288  ;;  %p5893_p12 = scmp.lt.s32.totalorder %s28_s24, %s28_s24 }
  0x1b   :  { %p5889_p11 = scmp.ne.s32.totalorder %s28_s24, %s5888_s4  ;;  %p5894_p13 = scmp.lt.s32.totalorder %s5888_s4, %s5888_s4 }
  0x1d   :  { %p5895_p0 = por %p5894_p13, %p5893_p12 }
  0x1f   :  { %p5896_p1 = pnand %p5895_p0, %p5889_p11 }
  0x21   :  { %5899 = shalt.err (!%p5896_p1)
}
  0x22   :  { %33 = dma.hbm_to_vmem [thread:$0]  %s7116_s1, 12288, %s28_s24, [#allocation7], %s5929_s19, %s5929_s19, %s5930_s20  }
  0x23   :  { %5922 = dma.done.wait [#allocation4], 512  }
  0x24   :  { %5923 = vsyncadd [#allocation4], 4294966784 }
  0x25   :  { %5924 = dma.done.wait [#allocation7], 12288  }
  0x26   :  { %5925 = vsyncadd [#allocation7], 4294955008  ;;  %vm140_vm0 = vcmask 261120   ;;  %v40_v0 = vld [vmem:[#allocation3] sm:$0xff]  ;;  %v41_v1 = vld [vmem:[#allocation3 + $0x8] sm:$0xff]  ;;  %s5932_s1 = smov [#allocation8]  }
  0x27   :  { %v42_v2 = vld [vmem:[#allocation3 + $0x10] sm:$0xff]  ;;  %v5751_v3 = vpack.c.bf16 %v41_v1, %v40_v0  ;;  %v43_v4 = vld [vmem:[#allocation3 + $0x18] sm:$0xff]  ;;  %v44_v5 = vld [vmem:[#allocation6] sm:$0xff]  ;;  %s4878_s6 = sshll.u32 %s5932_s1, 4  ;;  %s4879_s6 = int_to_ptr.vmem [resolvable:$true] %s4878_s6 }
  0x28   :  { %v5755_v6 = vpack.c.bf16 %v43_v4, %v42_v2  ;;  %5607 = vmatprep.mubr.msk.f32.mxu0 %vm140_vm0, %v44_v5  ;;  %v92_v7 = vld [vmem:[#allocation6 + $0x180] sm:$0xff]  ;;  %v45_v8 = vld [vmem:[#allocation6 + $0x8] sm:$0xff]  ;;  %v46_v10 = vld [vmem:[#allocation6 + $0x10] sm:$0xff]  ;;  %s5900_s7 = scalar_lea.vmem %s4879_s6, 4096  ;;  %p5905_p3 = scmp.lt.s32.totalorder %s4879_s6, %s4879_s6 }
  0x29   :  { %5752 = vmatprep.subr.bf16.mxu0 %v5751_v3  ;;  %5759 = vmatprep.subr.bf16.mxu1 %v5751_v3  ;;  %v93_v9 = vld [vmem:[#allocation6 + $0x188] sm:$0xff]  ;;  %v94_v11 = vld [vmem:[#allocation6 + $0x190] sm:$0xff]  ;;  %v47_v12 = vld [vmem:[#allocation6 + $0x18] sm:$0xff]  ;;  %p5901_p2 = scmp.ne.s32.totalorder %s4879_s6, %s5900_s7  ;;  %p5906_p4 = scmp.lt.s32.totalorder %s5900_s7, %s5900_s7 }
  0x2a   :  { %5754 = vmatpush3.bf16.msra.mxu0 %v5751_v3  ;;  %5761 = vmatpush3.bf16.msra.mxu1 %v5751_v3  ;;  %v95_v13 = vld [vmem:[#allocation6 + $0x198] sm:$0xff]  ;;  %v48_v14 = vld [vmem:[#allocation6 + $0x20] sm:$0xff]  ;;  %v49_v16 = vld [vmem:[#allocation6 + $0x28] sm:$0xff] }
  0x2b   :  { %5756 = vmatprep.subr.bf16.mxu0 %v5755_v6  ;;  %5760 = vmatprep.subr.bf16.mxu1 %v5755_v6  ;;  %v96_v15 = vld [vmem:[#allocation6 + $0x1a0] sm:$0xff]  ;;  %v97_v17 = vld [vmem:[#allocation6 + $0x1a8] sm:$0xff]  ;;  %v50_v18 = vld [vmem:[#allocation6 + $0x30] sm:$0xff]  ;;  %p5907_p5 = por %p5906_p4, %p5905_p3 }
  0x2c   :  { %5679 = vmatprep.mubr.msk.f32.mxu1 %vm140_vm0, %v92_v7  ;;  %v98_v19 = vld [vmem:[#allocation6 + $0x1b0] sm:$0xff]  ;;  %v51_v20 = vld [vmem:[#allocation6 + $0x38] sm:$0xff]  ;;  %v52_v22 = vld [vmem:[#allocation6 + $0x40] sm:$0xff] }
  0x2d   :  { %v99_v21 = vld [vmem:[#allocation6 + $0x1b8] sm:$0xff]  ;;  %v100_v23 = vld [vmem:[#allocation6 + $0x1c0] sm:$0xff]  ;;  %v53_v24 = vld [vmem:[#allocation6 + $0x48] sm:$0xff]  ;;  %p5908_p6 = pnand %p5907_p5, %p5901_p2 }
  0x2e   :  { %5758 = vmatpush3.bf16.msra.mxu0 %v5755_v6  ;;  %5762 = vmatpush3.bf16.msra.mxu1 %v5755_v6  ;;  %v101_v25 = vld [vmem:[#allocation6 + $0x1c8] sm:$0xff]  ;;  %v54_v26 = vld [vmem:[#allocation6 + $0x50] sm:$0xff]  ;;  %v55_v28 = vld [vmem:[#allocation6 + $0x58] sm:$0xff] }
  0x2f   :  { %v102_v27 = vld [vmem:[#allocation6 + $0x1d0] sm:$0xff]  ;;  %v103_v29 = vld [vmem:[#allocation6 + $0x1d8] sm:$0xff]  ;;  %v56_v30 = vld [vmem:[#allocation6 + $0x60] sm:$0xff] }
  0x30   :  { %v104_v31 = vld [vmem:[#allocation6 + $0x1e0] sm:$0xff]  ;;  %v57_v32 = vld [vmem:[#allocation6 + $0x68] sm:$0xff]  ;;  %v58_v34 = vld [vmem:[#allocation6 + $0x70] sm:$0xff] }
  0x31   :  { %5608 = vmatmul.mubr.msk.f32.vlgmr.msra.gmra.mrb[0].mxu0 %vm140_vm0, %v45_v8  ;;  %5680 = vmatmul.mubr.msk.f32.vlgmr.msra.gmra.mrb[0].mxu1 %vm140_vm0, %v93_v9  ;;  %v105_v33 = vld [vmem:[#allocation6 + $0x1e8] sm:$0xff]  ;;  %v106_v35 = vld [vmem:[#allocation6 + $0x1f0] sm:$0xff]  ;;  %v59_v36 = vld [vmem:[#allocation6 + $0x78] sm:$0xff] }
  0x32   :  { %5610 = vmatprep.mubr.msk.f32.mxu0 %vm140_vm0, %v46_v10  ;;  %5682 = vmatprep.mubr.msk.f32.mxu1 %vm140_vm0, %v94_v11  ;;  %v107_v37 = vld [vmem:[#allocation6 + $0x1f8] sm:$0xff]  ;;  %v60_v38 = vld [vmem:[#allocation6 + $0x80] sm:$0xff]  ;;  %v61_v40 = vld [vmem:[#allocation6 + $0x88] sm:$0xff] }
  0x33   :  { %v108_v39 = vld [vmem:[#allocation6 + $0x200] sm:$0xff]  ;;  %v109_v41 = vld [vmem:[#allocation6 + $0x208] sm:$0xff]  ;;  %v62_v42 = vld [vmem:[#allocation6 + $0x90] sm:$0xff] }
  0x34   :  { %v110_v43 = vld [vmem:[#allocation6 + $0x210] sm:$0xff]  ;;  %v63_v44 = vld [vmem:[#allocation6 + $0x98] sm:$0xff]  ;;  %v64_v46 = vld [vmem:[#allocation6 + $0xa0] sm:$0xff] }
  0x35   :  { %5611 = vmatmul.mubr.msk.f32.gmra.mrb[2].mxu0 %vm140_vm0, %v47_v12  ;;  %5683 = vmatmul.mubr.msk.f32.gmra.mrb[2].mxu1 %vm140_vm0, %v95_v13  ;;  %v111_v45 = vld [vmem:[#allocation6 + $0x218] sm:$0xff]  ;;  %v112_v47 = vld [vmem:[#allocation6 + $0x220] sm:$0xff]  ;;  %v65_v48 = vld [vmem:[#allocation6 + $0xa8] sm:$0xff] }
  0x36   :  { %5613 = vmatprep.mubr.msk.f32.mxu0 %vm140_vm0, %v48_v14  ;;  %5685 = vmatprep.mubr.msk.f32.mxu1 %vm140_vm0, %v96_v15  ;;  %v113_v49 = vld [vmem:[#allocation6 + $0x228] sm:$0xff]  ;;  %v66_v50 = vld [vmem:[#allocation6 + $0xb0] sm:$0xff]  ;;  %v67_v52 = vld [vmem:[#allocation6 + $0xb8] sm:$0xff] }
  0x37   :  { %v114_v51 = vld [vmem:[#allocation6 + $0x230] sm:$0xff]  ;;  %v115_v53 = vld [vmem:[#allocation6 + $0x238] sm:$0xff]  ;;  %v68_v54 = vld [vmem:[#allocation6 + $0xc0] sm:$0xff] }
  0x38   :  { %v116_v55 = vld [vmem:[#allocation6 + $0x240] sm:$0xff]  ;;  %v69_v56 = vld [vmem:[#allocation6 + $0xc8] sm:$0xff]  ;;  %v70_v58 = vld [vmem:[#allocation6 + $0xd0] sm:$0xff] }
  0x39   :  { %5614 = vmatmul.mubr.msk.f32.gmra.mrb[4].mxu0 %vm140_vm0, %v49_v16  ;;  %5686 = vmatmul.mubr.msk.f32.gmra.mrb[4].mxu1 %vm140_vm0, %v97_v17  ;;  %v117_v57 = vld [vmem:[#allocation6 + $0x248] sm:$0xff]  ;;  %v118_v59 = vld [vmem:[#allocation6 + $0x250] sm:$0xff]  ;;  %v71_v60 = vld [vmem:[#allocation6 + $0xd8] sm:$0xff] }
  0x3a   :  { %5616 = vmatprep.mubr.msk.f32.mxu0 %vm140_vm0, %v50_v18  ;;  %5688 = vmatprep.mubr.msk.f32.mxu1 %vm140_vm0, %v98_v19  ;;  %v119_v61 = vld [vmem:[#allocation6 + $0x258] sm:$0xff]  ;;  %v72_v62 = vld [vmem:[#allocation6 + $0xe0] sm:$0xff]  ;;  %v73_v0 = vld [vmem:[#allocation6 + $0xe8] sm:$0xff] }
  0x3b   :  { %v120_v63 = vld [vmem:[#allocation6 + $0x260] sm:$0xff]  ;;  %v121_v1 = vld [vmem:[#allocation6 + $0x268] sm:$0xff]  ;;  %v74_v2 = vld [vmem:[#allocation6 + $0xf0] sm:$0xff] }
  0x3c   :  { %v122_v3 = vld [vmem:[#allocation6 + $0x270] sm:$0xff]  ;;  %v75_v4 = vld [vmem:[#allocation6 + $0xf8] sm:$0xff]  ;;  %v76_v6 = vld [vmem:[#allocation6 + $0x100] sm:$0xff] }
  0x3d   :  { %5617 = vmatmul.mubr.msk.f32.gmra.mrb[6].mxu0 %vm140_vm0, %v51_v20  ;;  %5689 = vmatmul.mubr.msk.f32.gmra.mrb[6].mxu1 %vm140_vm0, %v99_v21  ;;  %v123_v5 = vld [vmem:[#allocation6 + $0x278] sm:$0xff]  ;;  %v124_v7 = vld [vmem:[#allocation6 + $0x280] sm:$0xff]  ;;  %v77_v8 = vld [vmem:[#allocation6 + $0x108] sm:$0xff] }
  0x3e   :  { %5619 = vmatprep.mubr.msk.f32.mxu0 %vm140_vm0, %v52_v22  ;;  %5691 = vmatprep.mubr.msk.f32.mxu1 %vm140_vm0, %v100_v23  ;;  %v125_v9 = vld [vmem:[#allocation6 + $0x288] sm:$0xff]  ;;  %v78_v10 = vld [vmem:[#allocation6 + $0x110] sm:$0xff]  ;;  %v79_v12 = vld [vmem:[#allocation6 + $0x118] sm:$0xff] }
  0x3f   :  { %v126_v11 = vld [vmem:[#allocation6 + $0x290] sm:$0xff]  ;;  %v127_v13 = vld [vmem:[#allocation6 + $0x298] sm:$0xff]  ;;  %v80_v14 = vld [vmem:[#allocation6 + $0x120] sm:$0xff] }
  0x40   :  { %v128_v15 = vld [vmem:[#allocation6 + $0x2a0] sm:$0xff]  ;;  %v81_v16 = vld [vmem:[#allocation6 + $0x128] sm:$0xff]  ;;  %v82_v18 = vld [vmem:[#allocation6 + $0x130] sm:$0xff] }
  0x41   :  { %5620 = vmatmul.mubr.msk.f32.gmra.mrb[8].mxu0 %vm140_vm0, %v53_v24  ;;  %5692 = vmatmul.mubr.msk.f32.gmra.mrb[8].mxu1 %vm140_vm0, %v101_v25  ;;  %v129_v17 = vld [vmem:[#allocation6 + $0x2a8] sm:$0xff]  ;;  %v130_v19 = vld [vmem:[#allocation6 + $0x2b0] sm:$0xff]  ;;  %v83_v20 = vld [vmem:[#allocation6 + $0x138] sm:$0xff] }
  0x42   :  { %5622 = vmatprep.mubr.msk.f32.mxu0 %vm140_vm0, %v54_v26  ;;  %5694 = vmatprep.mubr.msk.f32.mxu1 %vm140_vm0, %v102_v27  ;;  %v131_v21 = vld [vmem:[#allocation6 + $0x2b8] sm:$0xff]  ;;  %v84_v22 = vld [vmem:[#allocation6 + $0x140] sm:$0xff]  ;;  %v85_v24 = vld [vmem:[#allocation6 + $0x148] sm:$0xff] }
  0x43   :  { %v132_v23 = vld [vmem:[#allocation6 + $0x2c0] sm:$0xff]  ;;  %v133_v25 = vld [vmem:[#allocation6 + $0x2c8] sm:$0xff]  ;;  %v86_v26 = vld [vmem:[#allocation6 + $0x150] sm:$0xff] }
  0x44   :  { %v134_v27 = vld [vmem:[#allocation6 + $0x2d0] sm:$0xff] }
  0x45   :  { %5623 = vmatmul.mubr.msk.f32.gmra.mrb[10].mxu0 %vm140_vm0, %v55_v28  ;;  %5695 = vmatmul.mubr.msk.f32.gmra.mrb[10].mxu1 %vm140_vm0, %v103_v29  ;;  %v87_v28 = vld [vmem:[#allocation6 + $0x158] sm:$0xff] }
  0x46   :  { %5625 = vmatprep.mubr.msk.f32.mxu0 %vm140_vm0, %v56_v30  ;;  %5697 = vmatprep.mubr.msk.f32.mxu1 %vm140_vm0, %v104_v31  ;;  %v135_v29 = vld [vmem:[#allocation6 + $0x2d8] sm:$0xff]  ;;  %v88_v30 = vld [vmem:[#allocation6 + $0x160] sm:$0xff] }
  0x47   :  { %v136_v31 = vld [vmem:[#allocation6 + $0x2e0] sm:$0xff] }
  0x49   :  { %5626 = vmatmul.mubr.msk.f32.gmra.mrb[12].mxu0 %vm140_vm0, %v57_v32  ;;  %5698 = vmatmul.mubr.msk.f32.gmra.mrb[12].mxu1 %vm140_vm0, %v105_v33  ;;  %v89_v32 = vld [vmem:[#allocation6 + $0x168] sm:$0xff] }
  0x4a   :  { %5628 = vmatprep.mubr.msk.f32.mxu0 %vm140_vm0, %v58_v34  ;;  %5700 = vmatprep.mubr.msk.f32.mxu1 %vm140_vm0, %v106_v35  ;;  %v137_v33 = vld [vmem:[#allocation6 + $0x2e8] sm:$0xff]  ;;  %v90_v34 = vld [vmem:[#allocation6 + $0x170] sm:$0xff] }
  0x4b   :  { %v138_v35 = vld [vmem:[#allocation6 + $0x2f0] sm:$0xff] }
  0x4d   :  { %5629 = vmatmul.mubr.msk.f32.gmra.mrb[14].mxu0 %vm140_vm0, %v59_v36  ;;  %5701 = vmatmul.mubr.msk.f32.gmra.mrb[14].mxu1 %vm140_vm0, %v107_v37  ;;  %v91_v36 = vld [vmem:[#allocation6 + $0x178] sm:$0xff] }
  0x4e   :  { %5631 = vmatprep.mubr.msk.f32.mxu0 %vm140_vm0, %v60_v38  ;;  %5703 = vmatprep.mubr.msk.f32.mxu1 %vm140_vm0, %v108_v39  ;;  %v139_v37 = vld [vmem:[#allocation6 + $0x2f8] sm:$0xff] }
  0x51   :  { %5632 = vmatmul.mubr.msk.f32.gmra.mrb[16].mxu0 %vm140_vm0, %v61_v40  ;;  %5704 = vmatmul.mubr.msk.f32.gmra.mrb[16].mxu1 %vm140_vm0, %v109_v41 }
  0x52   :  { %5634 = vmatprep.mubr.msk.f32.mxu0 %vm140_vm0, %v62_v42  ;;  %5706 = vmatprep.mubr.msk.f32.mxu1 %vm140_vm0, %v110_v43 }
  0x55   :  { %5635 = vmatmul.mubr.msk.f32.gmra.mrb[18].mxu0 %vm140_vm0, %v63_v44  ;;  %5707 = vmatmul.mubr.msk.f32.gmra.mrb[18].mxu1 %vm140_vm0, %v111_v45 }
  0x56   :  { %5637 = vmatprep.mubr.msk.f32.mxu0 %vm140_vm0, %v64_v46  ;;  %5709 = vmatprep.mubr.msk.f32.mxu1 %vm140_vm0, %v112_v47 }
  0x59   :  { %5638 = vmatmul.mubr.msk.f32.gmra.mrb[20].mxu0 %vm140_vm0, %v65_v48  ;;  %5710 = vmatmul.mubr.msk.f32.gmra.mrb[20].mxu1 %vm140_vm0, %v113_v49 }
  0x5a   :  { %5640 = vmatprep.mubr.msk.f32.mxu0 %vm140_vm0, %v66_v50  ;;  %5712 = vmatprep.mubr.msk.f32.mxu1 %vm140_vm0, %v114_v51 }
  0x5d   :  { %5641 = vmatmul.mubr.msk.f32.gmra.mrb[22].mxu0 %vm140_vm0, %v67_v52  ;;  %5713 = vmatmul.mubr.msk.f32.gmra.mrb[22].mxu1 %vm140_vm0, %v115_v53 }
  0x5e   :  { %5643 = vmatprep.mubr.msk.f32.mxu0 %vm140_vm0, %v68_v54  ;;  %5715 = vmatprep.mubr.msk.f32.mxu1 %vm140_vm0, %v116_v55 }
  0x61   :  { %5644 = vmatmul.mubr.msk.f32.gmra.mrb[24].mxu0 %vm140_vm0, %v69_v56  ;;  %5716 = vmatmul.mubr.msk.f32.gmra.mrb[24].mxu1 %vm140_vm0, %v117_v57 }
  0x62   :  { %5646 = vmatprep.mubr.msk.f32.mxu0 %vm140_vm0, %v70_v58  ;;  %5718 = vmatprep.mubr.msk.f32.mxu1 %vm140_vm0, %v118_v59 }
  0x65   :  { %5647 = vmatmul.mubr.msk.f32.gmra.mrb[26].mxu0 %vm140_vm0, %v71_v60  ;;  %5719 = vmatmul.mubr.msk.f32.gmra.mrb[26].mxu1 %vm140_vm0, %v119_v61 }
  0x66   :  { %5649 = vmatprep.mubr.msk.f32.mxu0 %vm140_vm0, %v72_v62  ;;  %5721 = vmatprep.mubr.msk.f32.mxu1 %vm140_vm0, %v120_v63 }
  0x69   :  { %5650 = vmatmul.mubr.msk.f32.gmra.mrb[28].mxu0 %vm140_vm0, %v73_v0  ;;  %5722 = vmatmul.mubr.msk.f32.gmra.mrb[28].mxu1 %vm140_vm0, %v121_v1 }
  0x6a   :  { %5652 = vmatprep.mubr.msk.f32.mxu0 %vm140_vm0, %v74_v2  ;;  %5724 = vmatprep.mubr.msk.f32.mxu1 %vm140_vm0, %v122_v3 }
  0x6d   :  { %5653 = vmatmul.mubr.msk.f32.gmra.mrb[30].mxu0 %vm140_vm0, %v75_v4  ;;  %5725 = vmatmul.mubr.msk.f32.gmra.mrb[30].mxu1 %vm140_vm0, %v123_v5 }
  0x6e   :  { %5655 = vmatprep.mubr.msk.f32.mxu0 %vm140_vm0, %v76_v6  ;;  %5727 = vmatprep.mubr.msk.f32.mxu1 %vm140_vm0, %v124_v7 }
  0x71   :  { %5656 = vmatmul.mubr.msk.f32.gmra.mrb[32].mxu0 %vm140_vm0, %v77_v8  ;;  %5728 = vmatmul.mubr.msk.f32.gmra.mrb[32].mxu1 %vm140_vm0, %v125_v9 }
  0x72   :  { %5658 = vmatprep.mubr.msk.f32.mxu0 %vm140_vm0, %v78_v10  ;;  %5730 = vmatprep.mubr.msk.f32.mxu1 %vm140_vm0, %v126_v11 }
  0x75   :  { %5659 = vmatmul.mubr.msk.f32.gmra.mrb[34].mxu0 %vm140_vm0, %v79_v12  ;;  %5731 = vmatmul.mubr.msk.f32.gmra.mrb[34].mxu1 %vm140_vm0, %v127_v13 }
  0x76   :  { %5661 = vmatprep.mubr.msk.f32.mxu0 %vm140_vm0, %v80_v14  ;;  %5733 = vmatprep.mubr.msk.f32.mxu1 %vm140_vm0, %v128_v15 }
  0x79   :  { %5662 = vmatmul.mubr.msk.f32.gmra.mrb[36].mxu0 %vm140_vm0, %v81_v16  ;;  %5734 = vmatmul.mubr.msk.f32.gmra.mrb[36].mxu1 %vm140_vm0, %v129_v17 }
  0x7a   :  { %5664 = vmatprep.mubr.msk.f32.mxu0 %vm140_vm0, %v82_v18  ;;  %5736 = vmatprep.mubr.msk.f32.mxu1 %vm140_vm0, %v130_v19 }
  0x7d   :  { %5665 = vmatmul.mubr.msk.f32.gmra.mrb[38].mxu0 %vm140_vm0, %v83_v20  ;;  %5737 = vmatmul.mubr.msk.f32.gmra.mrb[38].mxu1 %vm140_vm0, %v131_v21 }
  0x7e   :  { %5667 = vmatprep.mubr.msk.f32.mxu0 %vm140_vm0, %v84_v22  ;;  %5739 = vmatprep.mubr.msk.f32.mxu1 %vm140_vm0, %v132_v23 }
  0x81   :  { %5668 = vmatmul.mubr.msk.f32.gmra.mrb[40].mxu0 %vm140_vm0, %v85_v24  ;;  %5740 = vmatmul.mubr.msk.f32.gmra.mrb[40].mxu1 %vm140_vm0, %v133_v25 }
  0x82   :  { %5670 = vmatprep.mubr.msk.f32.mxu0 %vm140_vm0, %v86_v26  ;;  %5742 = vmatprep.mubr.msk.f32.mxu1 %vm140_vm0, %v134_v27 }
  0x85   :  { %5671 = vmatmul.mubr.msk.f32.gmra.mrb[42].mxu0 %vm140_vm0, %v87_v28  ;;  %5743 = vmatmul.mubr.msk.f32.gmra.mrb[42].mxu1 %vm140_vm0, %v135_v29 }
  0x86   :  { %5673 = vmatprep.mubr.msk.f32.mxu0 %vm140_vm0, %v88_v30  ;;  %5745 = vmatprep.mubr.msk.f32.mxu1 %vm140_vm0, %v136_v31 }
  0x89   :  { %5674 = vmatmul.mubr.msk.f32.gmra.mrb[44].mxu0 %vm140_vm0, %v89_v32  ;;  %5746 = vmatmul.mubr.msk.f32.gmra.mrb[44].mxu1 %vm140_vm0, %v137_v33 }
  0x8a   :  { %5676 = vmatprep.mubr.msk.f32.mxu0 %vm140_vm0, %v90_v34  ;;  %5748 = vmatprep.mubr.msk.f32.mxu1 %vm140_vm0, %v138_v35 }
  0x8d   :  { %5677 = vmatmul.mubr.msk.f32.gmra.mrb[46].mxu0 %vm140_vm0, %v91_v36  ;;  %5749 = vmatmul.mubr.msk.f32.gmra.mrb[46].mxu1 %vm140_vm0, %v139_v37 }
 0x104   :  { %v5609_v38 = vpop.f32.mrb[0].mxu0  ;;  %v5681_v39 = vpop.f32.mrb[0].mxu1 }
 0x105   :  { %975 = vst [vmem:[#allocation2 + $0x8] sm:$0xff] %v5609_v38  ;;  %v495_v40 = vpop.f32.mrb[1].mxu0  ;;  %1023 = vst [vmem:[#allocation2 + $0x188] sm:$0xff] %v5681_v39  ;;  %v735_v41 = vpop.f32.mrb[1].mxu1 }
 0x106   :  { %974 = vst [vmem:[#allocation2] sm:$0xff] %v495_v40  ;;  %1022 = vst [vmem:[#allocation2 + $0x180] sm:$0xff] %v735_v41 }
 0x108   :  { %v5612_v42 = vpop.f32.mrb[2].mxu0  ;;  %v5684_v43 = vpop.f32.mrb[2].mxu1 }
 0x109   :  { %977 = vst [vmem:[#allocation2 + $0x18] sm:$0xff] %v5612_v42  ;;  %v505_v44 = vpop.f32.mrb[3].mxu0  ;;  %1025 = vst [vmem:[#allocation2 + $0x198] sm:$0xff] %v5684_v43  ;;  %v745_v45 = vpop.f32.mrb[3].mxu1 }
 0x10a   :  { %976 = vst [vmem:[#allocation2 + $0x10] sm:$0xff] %v505_v44  ;;  %1024 = vst [vmem:[#allocation2 + $0x190] sm:$0xff] %v745_v45 }
 0x10c   :  { %v5615_v46 = vpop.f32.mrb[4].mxu0  ;;  %v5687_v47 = vpop.f32.mrb[4].mxu1  ;;  %v5251_v3 = vld [vmem:[#allocation2 + $0x188] ss:$0 sm:$0xff]  ;;  %v5252_v4 = vld [vmem:[#allocation2 + $0x189] ss:$0 sm:$0xff] }
 0x10d   :  { %979 = vst [vmem:[#allocation2 + $0x28] sm:$0xff] %v5615_v46  ;;  %v515_v48 = vpop.f32.mrb[5].mxu0  ;;  %1027 = vst [vmem:[#allocation2 + $0x1a8] sm:$0xff] %v5687_v47  ;;  %v755_v49 = vpop.f32.mrb[5].mxu1  ;;  %v5253_v5 = vld [vmem:[#allocation2 + $0x18a] ss:$0 sm:$0xff] }
 0x10e   :  { %978 = vst [vmem:[#allocation2 + $0x20] sm:$0xff] %v515_v48  ;;  %1026 = vst [vmem:[#allocation2 + $0x1a0] sm:$0xff] %v755_v49  ;;  %v5254_v6 = vld [vmem:[#allocation2 + $0x18b] ss:$0 sm:$0xff]  ;;  %v5255_v9 = vld [vmem:[#allocation2 + $0x18c] ss:$0 sm:$0xff] }
 0x10f   :  { %v5256_v10 = vld [vmem:[#allocation2 + $0x18d] ss:$0 sm:$0xff]  ;;  %v5257_v12 = vld [vmem:[#allocation2 + $0x18e] ss:$0 sm:$0xff]  ;;  %v5258_v13 = vld [vmem:[#allocation2 + $0x18f] ss:$0 sm:$0xff] }
 0x110   :  { %v5618_v50 = vpop.f32.mrb[6].mxu0  ;;  %v5690_v51 = vpop.f32.mrb[6].mxu1  ;;  %v5243_v14 = vld [vmem:[#allocation2 + $0x180] ss:$0 sm:$0xff]  ;;  %v5244_v15 = vld [vmem:[#allocation2 + $0x181] ss:$0 sm:$0xff] }
 0x111   :  { %981 = vst [vmem:[#allocation2 + $0x38] sm:$0xff] %v5618_v50  ;;  %v525_v52 = vpop.f32.mrb[7].mxu0  ;;  %1029 = vst [vmem:[#allocation2 + $0x1b8] sm:$0xff] %v5690_v51  ;;  %v765_v53 = vpop.f32.mrb[7].mxu1  ;;  %v5245_v16 = vld [vmem:[#allocation2 + $0x182] ss:$0 sm:$0xff] }
 0x112   :  { %980 = vst [vmem:[#allocation2 + $0x30] sm:$0xff] %v525_v52  ;;  %1028 = vst [vmem:[#allocation2 + $0x1b0] sm:$0xff] %v765_v53  ;;  %v5246_v17 = vld [vmem:[#allocation2 + $0x183] ss:$0 sm:$0xff]  ;;  %v5247_v19 = vld [vmem:[#allocation2 + $0x184] ss:$0 sm:$0xff] }
 0x113   :  { %v5248_v20 = vld [vmem:[#allocation2 + $0x185] ss:$0 sm:$0xff]  ;;  %v5249_v27 = vld [vmem:[#allocation2 + $0x186] ss:$0 sm:$0xff]  ;;  %v5250_v28 = vld [vmem:[#allocation2 + $0x187] ss:$0 sm:$0xff] }
 0x114   :  { %v5621_v54 = vpop.f32.mrb[8].mxu0  ;;  %v5693_v55 = vpop.f32.mrb[8].mxu1  ;;  %v5267_v34 = vld [vmem:[#allocation2 + $0x198] ss:$0 sm:$0xff]  ;;  %v5268_v35 = vld [vmem:[#allocation2 + $0x199] ss:$0 sm:$0xff] }
 0x115   :  { %983 = vst [vmem:[#allocation2 + $0x48] sm:$0xff] %v5621_v54  ;;  %v535_v56 = vpop.f32.mrb[9].mxu0  ;;  %1031 = vst [vmem:[#allocation2 + $0x1c8] sm:$0xff] %v5693_v55  ;;  %v775_v57 = vpop.f32.mrb[9].mxu1  ;;  %v5269_v36 = vld [vmem:[#allocation2 + $0x19a] ss:$0 sm:$0xff] }
 0x116   :  { %982 = vst [vmem:[#allocation2 + $0x40] sm:$0xff] %v535_v56  ;;  %1030 = vst [vmem:[#allocation2 + $0x1c0] sm:$0xff] %v775_v57  ;;  %v5270_v41 = vld [vmem:[#allocation2 + $0x19b] ss:$0 sm:$0xff]  ;;  %v5271_v42 = vld [vmem:[#allocation2 + $0x19c] ss:$0 sm:$0xff] }
 0x117   :  { %v5272_v43 = vld [vmem:[#allocation2 + $0x19d] ss:$0 sm:$0xff]  ;;  %v5273_v49 = vld [vmem:[#allocation2 + $0x19e] ss:$0 sm:$0xff]  ;;  %v5274_v50 = vld [vmem:[#allocation2 + $0x19f] ss:$0 sm:$0xff] }
 0x118   :  { %v5624_v58 = vpop.f32.mrb[10].mxu0  ;;  %v5696_v59 = vpop.f32.mrb[10].mxu1  ;;  %v5259_v57 = vld [vmem:[#allocation2 + $0x190] ss:$0 sm:$0xff] }
 0x119   :  { %985 = vst [vmem:[#allocation2 + $0x58] sm:$0xff] %v5624_v58  ;;  %v545_v60 = vpop.f32.mrb[11].mxu0  ;;  %1033 = vst [vmem:[#allocation2 + $0x1d8] sm:$0xff] %v5696_v59  ;;  %v785_v61 = vpop.f32.mrb[11].mxu1  ;;  %v5260_v58 = vld [vmem:[#allocation2 + $0x191] ss:$0 sm:$0xff] }
 0x11a   :  { %984 = vst [vmem:[#allocation2 + $0x50] sm:$0xff] %v545_v60  ;;  %1032 = vst [vmem:[#allocation2 + $0x1d0] sm:$0xff] %v785_v61 }
 0x11c   :  { %v5627_v62 = vpop.f32.mrb[12].mxu0  ;;  %v5699_v63 = vpop.f32.mrb[12].mxu1 }
 0x11d   :  { %987 = vst [vmem:[#allocation2 + $0x68] sm:$0xff] %v5627_v62  ;;  %v555_v0 = vpop.f32.mrb[13].mxu0  ;;  %1035 = vst [vmem:[#allocation2 + $0x1e8] sm:$0xff] %v5699_v63  ;;  %v795_v1 = vpop.f32.mrb[13].mxu1 }
 0x11e   :  { %986 = vst [vmem:[#allocation2 + $0x60] sm:$0xff] %v555_v0  ;;  %1034 = vst [vmem:[#allocation2 + $0x1e0] sm:$0xff] %v795_v1  ;;  %v5261_v0 = vld [vmem:[#allocation2 + $0x192] ss:$0 sm:$0xff]  ;;  %v5262_v1 = vld [vmem:[#allocation2 + $0x193] ss:$0 sm:$0xff] }
 0x120   :  { %v5630_v2 = vpop.f32.mrb[14].mxu0  ;;  %v5702_v7 = vpop.f32.mrb[14].mxu1 }
 0x121   :  { %989 = vst [vmem:[#allocation2 + $0x78] sm:$0xff] %v5630_v2  ;;  %v565_v8 = vpop.f32.mrb[15].mxu0  ;;  %1037 = vst [vmem:[#allocation2 + $0x1f8] sm:$0xff] %v5702_v7  ;;  %v805_v11 = vpop.f32.mrb[15].mxu1  ;;  %v5263_v2 = vld [vmem:[#allocation2 + $0x194] ss:$0 sm:$0xff] }
 0x122   :  { %988 = vst [vmem:[#allocation2 + $0x70] sm:$0xff] %v565_v8  ;;  %1036 = vst [vmem:[#allocation2 + $0x1f0] sm:$0xff] %v805_v11  ;;  %v5264_v7 = vld [vmem:[#allocation2 + $0x195] ss:$0 sm:$0xff]  ;;  %v5265_v8 = vld [vmem:[#allocation2 + $0x196] ss:$0 sm:$0xff] }
 0x124   :  { %v5633_v18 = vpop.f32.mrb[16].mxu0  ;;  %v5705_v21 = vpop.f32.mrb[16].mxu1 }
 0x125   :  { %v3026_v22 = vmul.f32 %v5633_v18, %v5251_v3  ;;  %v3033_v23 = vmul.f32 %v5633_v18, %v5252_v4  ;;  %v3040_v24 = vmul.f32 %v5633_v18, %v5253_v5  ;;  %v3047_v25 = vmul.f32 %v5633_v18, %v5254_v6  ;;  %v575_v26 = vpop.f32.mrb[17].mxu0  ;;  %1039 = vst [vmem:[#allocation2 + $0x208] sm:$0xff] %v5705_v21  ;;  %v815_v29 = vpop.f32.mrb[17].mxu1  ;;  %v5284_v21 = vld [vmem:[#allocation2 + $0x1a9] ss:$0 sm:$0xff] }
 0x126   :  { %v3054_v30 = vmul.f32 %v5633_v18, %v5255_v9  ;;  %v3061_v31 = vmul.f32 %v5633_v18, %v5256_v10  ;;  %v3068_v32 = vmul.f32 %v5633_v18, %v5257_v12  ;;  %v3075_v33 = vmul.f32 %v5633_v18, %v5258_v13  ;;  %1038 = vst [vmem:[#allocation2 + $0x200] sm:$0xff] %v815_v29  ;;  %v5266_v9 = vld [vmem:[#allocation2 + $0x197] ss:$0 sm:$0xff]  ;;  %v5286_v29 = vld [vmem:[#allocation2 + $0x1ab] ss:$0 sm:$0xff] }
 0x127   :  { %v2977_v37 = vmul.f32 %v5243_v14, %v575_v26  ;;  %v2983_v38 = vmul.f32 %v5244_v15, %v575_v26  ;;  %v2989_v39 = vmul.f32 %v5245_v16, %v575_v26  ;;  %v2995_v40 = vmul.f32 %v5246_v17, %v575_v26 }
 0x128   :  { %v3001_v44 = vmul.f32 %v5247_v19, %v575_v26  ;;  %v3007_v45 = vmul.f32 %v5248_v20, %v575_v26  ;;  %v3013_v46 = vmul.f32 %v5249_v27, %v575_v26  ;;  %v3019_v47 = vmul.f32 %v5250_v28, %v575_v26  ;;  %v5636_v48 = vpop.f32.mrb[18].mxu0  ;;  %v5708_v51 = vpop.f32.mrb[18].mxu1  ;;  %v5283_v20 = vld [vmem:[#allocation2 + $0x1a8] ss:$0 sm:$0xff]  ;;  %v5285_v28 = vld [vmem:[#allocation2 + $0x1aa] ss:$0 sm:$0xff] }
 0x129   :  { %v3027_v52 = vadd.f32 %v3026_v22, %v2977_v37  ;;  %v3034_v53 = vadd.f32 %v3033_v23, %v2983_v38  ;;  %v3041_v54 = vadd.f32 %v3040_v24, %v2989_v39  ;;  %v3048_v55 = vadd.f32 %v3047_v25, %v2995_v40  ;;  %v585_v56 = vpop.f32.mrb[19].mxu0  ;;  %1041 = vst [vmem:[#allocation2 + $0x218] sm:$0xff] %v5708_v51  ;;  %v825_v59 = vpop.f32.mrb[19].mxu1  ;;  %v5290_v37 = vld [vmem:[#allocation2 + $0x1af] ss:$0 sm:$0xff] }
 0x12a   :  { %v3055_v60 = vadd.f32 %v3054_v30, %v3001_v44  ;;  %v3062_v61 = vadd.f32 %v3061_v31, %v3007_v45  ;;  %v3069_v62 = vadd.f32 %v3068_v32, %v3013_v46  ;;  %v3076_v63 = vadd.f32 %v3075_v33, %v3019_v47  ;;  %1040 = vst [vmem:[#allocation2 + $0x210] sm:$0xff] %v825_v59  ;;  %v5287_v30 = vld [vmem:[#allocation2 + $0x1ac] ss:$0 sm:$0xff] }
 0x12b   :  { %v3140_v3 = vmul.f32 %v5636_v48, %v5267_v34  ;;  %v3147_v4 = vmul.f32 %v5636_v48, %v5268_v35  ;;  %v3154_v5 = vmul.f32 %v5636_v48, %v5269_v36  ;;  %v3161_v6 = vmul.f32 %v5636_v48, %v5270_v41  ;;  %v5288_v35 = vld [vmem:[#allocation2 + $0x1ad] ss:$0 sm:$0xff]  ;;  %v5289_v36 = vld [vmem:[#allocation2 + $0x1ae] ss:$0 sm:$0xff] }
 0x12c   :  { %v3168_v10 = vmul.f32 %v5636_v48, %v5271_v42  ;;  %v3175_v11 = vmul.f32 %v5636_v48, %v5272_v43  ;;  %v3182_v12 = vmul.f32 %v5636_v48, %v5273_v49  ;;  %v3189_v13 = vmul.f32 %v5636_v48, %v5274_v50  ;;  %v5639_v14 = vpop.f32.mrb[20].mxu0  ;;  %v5711_v15 = vpop.f32.mrb[20].mxu1  ;;  %v5275_v48 = vld [vmem:[#allocation2 + $0x1a0] ss:$0 sm:$0xff]  ;;  %v5276_v49 = vld [vmem:[#allocation2 + $0x1a1] ss:$0 sm:$0xff] }
 0x12d   :  { %v3083_v16 = vmul.f32 %v5259_v57, %v585_v56  ;;  %v3090_v17 = vmul.f32 %v5260_v58, %v585_v56  ;;  %v3097_v18 = vmul.f32 %v5261_v0, %v585_v56  ;;  %v3104_v19 = vmul.f32 %v5262_v1, %v585_v56  ;;  %v6074_v22 = vpop.f32.mrb[21].mxu0  ;;  %1043 = vst [vmem:[#allocation2 + $0x228] sm:$0xff] %v5711_v15  ;;  %v835_v23 = vpop.f32.mrb[21].mxu1  ;;  %v5278_v57 = vld [vmem:[#allocation2 + $0x1a3] ss:$0 sm:$0xff] }
 0x12e   :  { %v3111_v24 = vmul.f32 %v5263_v2, %v585_v56  ;;  %v3118_v25 = vmul.f32 %v5264_v7, %v585_v56  ;;  %v3125_v26 = vmul.f32 %v5265_v8, %v585_v56  ;;  %v3132_v27 = vmul.f32 %v5266_v9, %v585_v56  ;;  %1042 = vst [vmem:[#allocation2 + $0x220] sm:$0xff] %v835_v23  ;;  %v5277_v56 = vld [vmem:[#allocation2 + $0x1a2] ss:$0 sm:$0xff]  ;;  %v5279_v58 = vld [vmem:[#allocation2 + $0x1a4] ss:$0 sm:$0xff] }
 0x12f   :  { %v3084_v31 = vadd.f32 %v3083_v16, %v3027_v52  ;;  %v3091_v32 = vadd.f32 %v3090_v17, %v3034_v53  ;;  %v3098_v33 = vadd.f32 %v3097_v18, %v3041_v54  ;;  %v3105_v34 = vadd.f32 %v3104_v19, %v3048_v55  ;;  %v5281_v0 = vld [vmem:[#allocation2 + $0x1a6] ss:$0 sm:$0xff]  ;;  %v5282_v1 = vld [vmem:[#allocation2 + $0x1a7] ss:$0 sm:$0xff]  ;;  %v5301_v19 = vld [vmem:[#allocation2 + $0x1ba] ss:$0 sm:$0xff] }
 0x130   :  { %v3112_v38 = vadd.f32 %v3111_v24, %v3055_v60  ;;  %v3119_v39 = vadd.f32 %v3118_v25, %v3062_v61  ;;  %v3126_v40 = vadd.f32 %v3125_v26, %v3069_v62  ;;  %v3133_v41 = vadd.f32 %v3132_v27, %v3076_v63  ;;  %v6076_v42 = vpop.f32.mrb[22].mxu0  ;;  %v5714_v43 = vpop.f32.mrb[22].mxu1  ;;  %v5280_v63 = vld [vmem:[#allocation2 + $0x1a5] ss:$0 sm:$0xff]  ;;  %v5304_v27 = vld [vmem:[#allocation2 + $0x1bd] ss:$0 sm:$0xff] }
 0x131   :  { %v6078_v44 = vmul.f32 %v5639_v14, %v5283_v20  ;;  %v6080_v45 = vmul.f32 %v5639_v14, %v5284_v21  ;;  %v6082_v46 = vmul.f32 %v5639_v14, %v5285_v28  ;;  %v6084_v47 = vmul.f32 %v5639_v14, %v5286_v29  ;;  %v6086_v50 = vpop.f32.mrb[23].mxu0  ;;  %1045 = vst [vmem:[#allocation2 + $0x238] sm:$0xff] %v5714_v43  ;;  %v845_v51 = vpop.f32.mrb[23].mxu1  ;;  %v5302_v20 = vld [vmem:[#allocation2 + $0x1bb] ss:$0 sm:$0xff] }
 0x132   :  { %v6088_v52 = vmul.f32 %v5639_v14, %v5287_v30  ;;  %v6090_v53 = vmul.f32 %v5639_v14, %v5288_v35  ;;  %v6092_v54 = vmul.f32 %v5639_v14, %v5289_v36  ;;  %v6094_v55 = vmul.f32 %v5639_v14, %v5290_v37  ;;  %1044 = vst [vmem:[#allocation2 + $0x230] sm:$0xff] %v845_v51  ;;  %v5303_v21 = vld [vmem:[#allocation2 + $0x1bc] ss:$0 sm:$0xff]  ;;  %v5305_v28 = vld [vmem:[#allocation2 + $0x1be] ss:$0 sm:$0xff] }
 0x133   :  { %v3141_v59 = vadd.f32 %v3140_v3, %v3084_v31  ;;  %v3148_v60 = vadd.f32 %v3147_v4, %v3091_v32  ;;  %v3155_v61 = vadd.f32 %v3154_v5, %v3098_v33  ;;  %v3162_v62 = vadd.f32 %v3161_v6, %v3105_v34  ;;  %v5299_v4 = vld [vmem:[#allocation2 + $0x1b8] ss:$0 sm:$0xff]  ;;  %v5300_v5 = vld [vmem:[#allocation2 + $0x1b9] ss:$0 sm:$0xff]  ;;  %v5306_v29 = vld [vmem:[#allocation2 + $0x1bf] ss:$0 sm:$0xff] }
 0x134   :  { %v3169_v2 = vadd.f32 %v3168_v10, %v3112_v38  ;;  %v3176_v7 = vadd.f32 %v3175_v11, %v3119_v39  ;;  %v3183_v8 = vadd.f32 %v3182_v12, %v3126_v40  ;;  %v3190_v9 = vadd.f32 %v3189_v13, %v3133_v41  ;;  %v6096_v15 = vpop.f32.mrb[24].mxu0  ;;  %v5717_v16 = vpop.f32.mrb[24].mxu1  ;;  %v5291_v38 = vld [vmem:[#allocation2 + $0x1b0] ss:$0 sm:$0xff]  ;;  %v5292_v39 = vld [vmem:[#allocation2 + $0x1b1] ss:$0 sm:$0xff] }
 0x135   :  { %v3197_v14 = vmul.f32 %v5275_v48, %v6074_v22  ;;  %v3204_v17 = vmul.f32 %v5276_v49, %v6074_v22  ;;  %v3211_v18 = vmul.f32 %v5277_v56, %v6074_v22  ;;  %v3218_v3 = vmul.f32 %v5278_v57, %v6074_v22  ;;  %v6102_v6 = vpop.f32.mrb[25].mxu0  ;;  %1047 = vst [vmem:[#allocation2 + $0x248] sm:$0xff] %v5717_v16  ;;  %v5293_v51 = vld [vmem:[#allocation2 + $0x1b2] ss:$0 sm:$0xff]  ;;  %v5294_v56 = vld [vmem:[#allocation2 + $0x1b3] ss:$0 sm:$0xff] }
 0x136   :  { %v3225_v10 = vmul.f32 %v5279_v58, %v6074_v22  ;;  %v3232_v11 = vmul.f32 %v5280_v63, %v6074_v22  ;;  %v3239_v12 = vmul.f32 %v5281_v0, %v6074_v22  ;;  %v3246_v13 = vmul.f32 %v5282_v1, %v6074_v22  ;;  %v5295_v57 = vld [vmem:[#allocation2 + $0x1b4] ss:$0 sm:$0xff]  ;;  %v5297_v63 = vld [vmem:[#allocation2 + $0x1b6] ss:$0 sm:$0xff]  ;;  %v5298_v0 = vld [vmem:[#allocation2 + $0x1b7] ss:$0 sm:$0xff] }
 0x137   :  { %v3198_v23 = vadd.f32 %v3197_v14, %v3141_v59  ;;  %v3205_v24 = vadd.f32 %v3204_v17, %v3148_v60  ;;  %v3212_v25 = vadd.f32 %v3211_v18, %v3155_v61  ;;  %v3219_v26 = vadd.f32 %v3218_v3, %v3162_v62  ;;  %v5296_v62 = vld [vmem:[#allocation2 + $0x1b5] ss:$0 sm:$0xff]  ;;  %v5379_v16 = vld [vmem:[#allocation2 + $0x1c8] ss:$0 sm:$0xff] }
 0x138   :  { %v3226_v30 = vadd.f32 %v3225_v10, %v3169_v2  ;;  %v3233_v31 = vadd.f32 %v3232_v11, %v3176_v7  ;;  %v3240_v32 = vadd.f32 %v3239_v12, %v3183_v8  ;;  %v3247_v33 = vadd.f32 %v3246_v13, %v3190_v9  ;;  %v6108_v34 = vpop.f32.mrb[26].mxu0  ;;  %v5382_v10 = vld [vmem:[#allocation2 + $0x1cb] ss:$0 sm:$0xff] }
 0x139   :  { %v3368_v35 = vmul.f32 %v6076_v42, %v5299_v4  ;;  %v3375_v22 = vmul.f32 %v6076_v42, %v5300_v5  ;;  %v3382_v36 = vmul.f32 %v6076_v42, %v5301_v19  ;;  %v3389_v37 = vmul.f32 %v6076_v42, %v5302_v20  ;;  %v6114_v40 = vpop.f32.mrb[27].mxu0  ;;  %v5380_v4 = vld [vmem:[#allocation2 + $0x1c9] ss:$0 sm:$0xff]  ;;  %v5381_v5 = vld [vmem:[#allocation2 + $0x1ca] ss:$0 sm:$0xff] }
 0x13a   :  { %v3396_v41 = vmul.f32 %v6076_v42, %v5303_v21  ;;  %v3403_v43 = vmul.f32 %v6076_v42, %v5304_v27  ;;  %v3410_v48 = vmul.f32 %v6076_v42, %v5305_v28  ;;  %v3417_v49 = vmul.f32 %v6076_v42, %v5306_v29  ;;  %v5383_v20 = vld [vmem:[#allocation2 + $0x1cc] ss:$0 sm:$0xff]  ;;  %v5384_v21 = vld [vmem:[#allocation2 + $0x1cd] ss:$0 sm:$0xff]  ;;  %v5385_v27 = vld [vmem:[#allocation2 + $0x1ce] ss:$0 sm:$0xff] }
 0x13b   :  { %v3255_v58 = vadd.f32 %v6078_v44, %v3198_v23  ;;  %v3262_v59 = vadd.f32 %v6080_v45, %v3205_v24  ;;  %v3269_v60 = vadd.f32 %v6082_v46, %v3212_v25  ;;  %v3276_v61 = vadd.f32 %v6084_v47, %v3219_v26  ;;  %v5386_v28 = vld [vmem:[#allocation2 + $0x1cf] ss:$0 sm:$0xff] }
 0x13c   :  { %v3283_v1 = vadd.f32 %v6088_v52, %v3226_v30  ;;  %v3290_v2 = vadd.f32 %v6090_v53, %v3233_v31  ;;  %v3297_v42 = vadd.f32 %v6092_v54, %v3240_v32  ;;  %v3304_v7 = vadd.f32 %v6094_v55, %v3247_v33  ;;  %v6128_v8 = vpop.f32.mrb[28].mxu0 }
 0x13d   :  { %v3311_v44 = vmul.f32 %v5291_v38, %v6086_v50  ;;  %v3318_v45 = vmul.f32 %v5292_v39, %v6086_v50  ;;  %v3325_v46 = vmul.f32 %v5293_v51, %v6086_v50  ;;  %v3332_v47 = vmul.f32 %v5294_v56, %v6086_v50  ;;  %v6134_v9 = vpop.f32.mrb[29].mxu0  ;;  %v5372_v38 = vld [vmem:[#allocation2 + $0x1c1] ss:$0 sm:$0xff]  ;;  %v5375_v56 = vld [vmem:[#allocation2 + $0x1c4] ss:$0 sm:$0xff] }
 0x13e   :  { %v3339_v52 = vmul.f32 %v5295_v57, %v6086_v50  ;;  %v3346_v53 = vmul.f32 %v5296_v62, %v6086_v50  ;;  %v3353_v54 = vmul.f32 %v5297_v63, %v6086_v50  ;;  %v3360_v55 = vmul.f32 %v5298_v0, %v6086_v50 }
 0x13f   :  { %v3312_v14 = vadd.f32 %v3311_v44, %v3255_v58  ;;  %v3319_v17 = vadd.f32 %v3318_v45, %v3262_v59  ;;  %v3326_v18 = vadd.f32 %v3325_v46, %v3269_v60  ;;  %v3333_v3 = vadd.f32 %v3332_v47, %v3276_v61  ;;  %v5377_v59 = vld [vmem:[#allocation2 + $0x1c6] ss:$0 sm:$0xff]  ;;  %v5378_v60 = vld [vmem:[#allocation2 + $0x1c7] ss:$0 sm:$0xff]  ;;  %v5396_v47 = vld [vmem:[#allocation2 + $0x1d9] ss:$0 sm:$0xff] }
 0x140   :  { %v3340_v11 = vadd.f32 %v3339_v52, %v3283_v1  ;;  %v3347_v12 = vadd.f32 %v3346_v53, %v3290_v2  ;;  %v3354_v13 = vadd.f32 %v3353_v54, %v3297_v42  ;;  %v3361_v19 = vadd.f32 %v3360_v55, %v3304_v7  ;;  %v6140_v23 = vpop.f32.mrb[30].mxu0  ;;  %v5395_v2 = vld [vmem:[#allocation2 + $0x1d8] ss:$0 sm:$0xff]  ;;  %v5397_v52 = vld [vmem:[#allocation2 + $0x1da] ss:$0 sm:$0xff] }
 0x141   :  { %v6142_v24 = vadd.f32 %v3368_v35, %v3312_v14  ;;  %v6144_v25 = vadd.f32 %v3375_v22, %v3319_v17  ;;  %v6146_v50 = vadd.f32 %v3382_v36, %v3326_v18  ;;  %v6148_v26 = vadd.f32 %v3389_v37, %v3333_v3  ;;  %v6150_v29 = vpop.f32.mrb[31].mxu0  ;;  %v5371_v35 = vld [vmem:[#allocation2 + $0x1c0] ss:$0 sm:$0xff]  ;;  %v5373_v22 = vld [vmem:[#allocation2 + $0x1c2] ss:$0 sm:$0xff] }
 0x142   :  { %v6152_v30 = vadd.f32 %v3396_v41, %v3340_v11  ;;  %v6154_v31 = vadd.f32 %v3403_v43, %v3347_v12  ;;  %v6156_v32 = vadd.f32 %v3410_v48, %v3354_v13  ;;  %v6158_v33 = vadd.f32 %v3417_v49, %v3361_v19  ;;  %v5374_v41 = vld [vmem:[#allocation2 + $0x1c3] ss:$0 sm:$0xff]  ;;  %v5376_v43 = vld [vmem:[#allocation2 + $0x1c5] ss:$0 sm:$0xff]  ;;  %v5398_v53 = vld [vmem:[#allocation2 + $0x1db] ss:$0 sm:$0xff] }
 0x143   :  { %v3419_v36 = vmax.f32 %v6142_v24, %v6144_v25  ;;  %v3977_v37 = vmul.f32 %v6096_v15, %v5379_v16  ;;  %v3984_v39 = vmul.f32 %v6096_v15, %v5380_v4  ;;  %v3991_v51 = vmul.f32 %v6096_v15, %v5381_v5  ;;  %v5399_v14 = vld [vmem:[#allocation2 + $0x1dc] ss:$0 sm:$0xff]  ;;  %v5400_v17 = vld [vmem:[#allocation2 + $0x1dd] ss:$0 sm:$0xff]  ;;  %v5401_v18 = vld [vmem:[#allocation2 + $0x1de] ss:$0 sm:$0xff] }
 0x144   :  { %v3998_v48 = vmul.f32 %v6096_v15, %v5382_v10  ;;  %v4005_v49 = vmul.f32 %v6096_v15, %v5383_v20  ;;  %v4012_v57 = vmul.f32 %v6096_v15, %v5384_v21  ;;  %v4019_v58 = vmul.f32 %v6096_v15, %v5385_v27  ;;  %v5657_v61 = vpop.f32.mrb[32].mxu0  ;;  %v5402_v11 = vld [vmem:[#allocation2 + $0x1df] ss:$0 sm:$0xff]  ;;  %v5387_v12 = vld [vmem:[#allocation2 + $0x1d0] ss:$0 sm:$0xff] }
 0x145   :  { %v3420_v62 = vmax.f32 %v3419_v36, %v6146_v50  ;;  %v4026_v63 = vmul.f32 %v6096_v15, %v5386_v28  ;;  %v3928_v0 = vmul.f32 %v5371_v35, %v6102_v6  ;;  %v3934_v1 = vmul.f32 %v5372_v38, %v6102_v6  ;;  %1007 = vst [vmem:[#allocation2 + $0x108] sm:$0xff] %v5657_v61  ;;  %v655_v42 = vpop.f32.mrb[33].mxu0  ;;  %v5388_v28 = vld [vmem:[#allocation2 + $0x1d1] ss:$0 sm:$0xff]  ;;  %v5389_v35 = vld [vmem:[#allocation2 + $0x1d2] ss:$0 sm:$0xff] }
 0x146   :  { %v3940_v7 = vmul.f32 %v5373_v22, %v6102_v6  ;;  %v3946_v44 = vmul.f32 %v5374_v41, %v6102_v6  ;;  %v3952_v45 = vmul.f32 %v5375_v56, %v6102_v6  ;;  %v3958_v46 = vmul.f32 %v5376_v43, %v6102_v6  ;;  %1006 = vst [vmem:[#allocation2 + $0x100] sm:$0xff] %v655_v42  ;;  %v855_v38 = vpop.f32.mrb[25].mxu1  ;;  %v5391_v41 = vld [vmem:[#allocation2 + $0x1d4] ss:$0 sm:$0xff]  ;;  %v5392_v56 = vld [vmem:[#allocation2 + $0x1d5] ss:$0 sm:$0xff] }
 0x147   :  { %v3421_v15 = vmax.f32 %v3420_v62, %v6148_v26  ;;  %v3964_v54 = vmul.f32 %v5377_v59, %v6102_v6  ;;  %v3970_v55 = vmul.f32 %v5378_v60, %v6102_v6  ;;  %v3978_v16 = vadd.f32 %v3977_v37, %v3928_v0  ;;  %1046 = vst [vmem:[#allocation2 + $0x240] sm:$0xff] %v855_v38  ;;  %v5394_v42 = vld [vmem:[#allocation2 + $0x1d7] ss:$0 sm:$0xff] }
 0x148   :  { %v3985_v3 = vadd.f32 %v3984_v39, %v3934_v1  ;;  %v3992_v4 = vadd.f32 %v3991_v51, %v3940_v7  ;;  %v3999_v5 = vadd.f32 %v3998_v48, %v3946_v44  ;;  %v4006_v10 = vadd.f32 %v4005_v49, %v3952_v45  ;;  %v5660_v13 = vpop.f32.mrb[34].mxu0  ;;  %v5390_v51 = vld [vmem:[#allocation2 + $0x1d3] ss:$0 sm:$0xff]  ;;  %v5411_v7 = vld [vmem:[#allocation2 + $0x1e8] ss:$0 sm:$0xff] }
 0x149   :  { %v3422_v19 = vmax.f32 %v3421_v15, %v6152_v30  ;;  %v4013_v20 = vadd.f32 %v4012_v57, %v3958_v46  ;;  %v4020_v21 = vadd.f32 %v4019_v58, %v3964_v54  ;;  %v4027_v27 = vadd.f32 %v4026_v63, %v3970_v55  ;;  %1009 = vst [vmem:[#allocation2 + $0x118] sm:$0xff] %v5660_v13  ;;  %v665_v6 = vpop.f32.mrb[35].mxu0  ;;  %v5393_v58 = vld [vmem:[#allocation2 + $0x1d6] ss:$0 sm:$0xff]  ;;  %v5412_v44 = vld [vmem:[#allocation2 + $0x1e9] ss:$0 sm:$0xff] }
 0x14a   :  { %v6182_v22 = vmul.f32 %v6108_v34, %v5395_v2  ;;  %v6185_v36 = vmul.f32 %v6108_v34, %v5396_v47  ;;  %v6188_v37 = vmul.f32 %v6108_v34, %v5397_v52  ;;  %v6191_v39 = vmul.f32 %v6108_v34, %v5398_v53  ;;  %1008 = vst [vmem:[#allocation2 + $0x110] sm:$0xff] %v665_v6 }
 0x14b   :  { %v3423_v43 = vmax.f32 %v3422_v19, %v6154_v31  ;;  %v6195_v48 = vmul.f32 %v6108_v34, %v5399_v14  ;;  %v6198_v49 = vmul.f32 %v6108_v34, %v5400_v17  ;;  %v6201_v57 = vmul.f32 %v6108_v34, %v5401_v18 }
 0x14c   :  { %v6204_v59 = vmul.f32 %v6108_v34, %v5402_v11  ;;  %v4034_v60 = vmul.f32 %v5387_v12, %v6114_v40  ;;  %v4041_v61 = vmul.f32 %v5388_v28, %v6114_v40  ;;  %v4048_v62 = vmul.f32 %v5389_v35, %v6114_v40  ;;  %v5415_v12 = vld [vmem:[#allocation2 + $0x1ec] ss:$0 sm:$0xff]  ;;  %v5417_v28 = vld [vmem:[#allocation2 + $0x1ee] ss:$0 sm:$0xff] }
 0x14d   :  { %v3424_v63 = vmax.f32 %v3423_v43, %v6156_v32  ;;  %v4055_v0 = vmul.f32 %v5390_v51, %v6114_v40  ;;  %v4062_v1 = vmul.f32 %v5391_v41, %v6114_v40  ;;  %v4069_v2 = vmul.f32 %v5392_v56, %v6114_v40 }
 0x14e   :  { %v4035_v45 = vadd.f32 %v4034_v60, %v3978_v16  ;;  %v4042_v34 = vadd.f32 %v4041_v61, %v3985_v3  ;;  %v4049_v46 = vadd.f32 %v4048_v62, %v3992_v4  ;;  %v4076_v47 = vmul.f32 %v5393_v58, %v6114_v40  ;;  %v5403_v61 = vld [vmem:[#allocation2 + $0x1e0] ss:$0 sm:$0xff]  ;;  %v5404_v62 = vld [vmem:[#allocation2 + $0x1e1] ss:$0 sm:$0xff] }
 0x14f   :  { %v3425_v52 = vmax.f32 %v3424_v63, %v6158_v33  ;;  %v4056_v53 = vadd.f32 %v4055_v0, %v3999_v5  ;;  %v4063_v15 = vadd.f32 %v4062_v1, %v4006_v10  ;;  %v4070_v54 = vadd.f32 %v4069_v2, %v4013_v20  ;;  %v5413_v5 = vld [vmem:[#allocation2 + $0x1ea] ss:$0 sm:$0xff]  ;;  %v5414_v10 = vld [vmem:[#allocation2 + $0x1eb] ss:$0 sm:$0xff]  ;;  %v5405_v63 = vld [vmem:[#allocation2 + $0x1e2] ss:$0 sm:$0xff] }
 0x150   :  { %v4077_v55 = vadd.f32 %v4076_v47, %v4020_v21  ;;  %v4083_v14 = vmul.f32 %v5394_v42, %v6114_v40  ;;  %v6217_v17 = vmul.f32 %v6128_v8, %v5411_v7  ;;  %v6220_v18 = vmul.f32 %v6128_v8, %v5412_v44  ;;  %v5416_v21 = vld [vmem:[#allocation2 + $0x1ed] ss:$0 sm:$0xff]  ;;  %v5406_v42 = vld [vmem:[#allocation2 + $0x1e3] ss:$0 sm:$0xff]  ;;  %v5407_v7 = vld [vmem:[#allocation2 + $0x1e4] ss:$0 sm:$0xff] }
 0x151   :  { %v3426_v16 = vsub.f32 %v6142_v24, %v3425_v52  ;;  %v3429_v3 = vsub.f32 %v6144_v25, %v3425_v52  ;;  %v3432_v4 = vsub.f32 %v6146_v50, %v3425_v52  ;;  %v3435_v11 = vsub.f32 %v6148_v26, %v3425_v52  ;;  %v5418_v24 = vld [vmem:[#allocation2 + $0x1ef] ss:$0 sm:$0xff]  ;;  %v5408_v44 = vld [vmem:[#allocation2 + $0x1e5] ss:$0 sm:$0xff]  ;;  %v5663_v47 = vpop.f32.mrb[36].mxu0 }
 0x152   :  { %v3438_v13 = vsub.f32 %v6152_v30, %v3425_v52  ;;  %v3441_v40 = vsub.f32 %v6154_v31, %v3425_v52  ;;  %v3444_v19 = vsub.f32 %v6156_v32, %v3425_v52  ;;  %v3447_v20 = vsub.f32 %v6158_v33, %v3425_v52  ;;  %v5720_v52 = vpop.f32.mrb[26].mxu1  ;;  %1011 = vst [vmem:[#allocation2 + $0x128] sm:$0xff] %v5663_v47 }
 0x153   :  { %v3427_v35 = vmul.f32 1.442695, %v3426_v16  ;;  %v3430_v25 = vmul.f32 1.442695, %v3429_v3  ;;  %v3433_v6 = vmul.f32 1.442695, %v3432_v4  ;;  %v4084_v50 = vadd.f32 %v4083_v14, %v4027_v27 }
 0x154   :  { %v3436_v38 = vmul.f32 1.442695, %v3435_v11  ;;  %v3439_v26 = vmul.f32 1.442695, %v3438_v13  ;;  %v3442_v51 = vmul.f32 1.442695, %v3441_v40  ;;  %v6231_v41 = vmul.f32 %v6128_v8, %v5413_v5 }
 0x155   :  { %5768 = vpow2.f32 %v3427_v35  ;;  %v3445_v30 = vmul.f32 1.442695, %v3444_v19  ;;  %v3448_v31 = vmul.f32 1.442695, %v3447_v20  ;;  %v6234_v32 = vmul.f32 %v6128_v8, %v5414_v10  ;;  %1049 = vst [vmem:[#allocation2 + $0x258] sm:$0xff] %v5720_v52 }
 0x156   :  { %5770 = vpow2.f32 %v3430_v25  ;;  %v6237_v33 = vmul.f32 %v6128_v8, %v5415_v12  ;;  %v6240_v56 = vmul.f32 %v6128_v8, %v5416_v21  ;;  %v6243_v27 = vmul.f32 %v6128_v8, %v5417_v28  ;;  %v5430_v14 = vld [vmem:[#allocation2 + $0x1fb] ss:$0 sm:$0xff]  ;;  %v5431_v10 = vld [vmem:[#allocation2 + $0x1fc] ss:$0 sm:$0xff]  ;;  %v5432_v12 = vld [vmem:[#allocation2 + $0x1fd] ss:$0 sm:$0xff] }
 0x157   :  { %5772 = vpow2.f32 %v3433_v6  ;;  %v6246_v43 = vmul.f32 %v6128_v8, %v5418_v24  ;;  %v4092_v58 = vadd.f32 %v6182_v22, %v4035_v45  ;;  %v4099_v60 = vadd.f32 %v6185_v36, %v4042_v34  ;;  %v5409_v45 = vld [vmem:[#allocation2 + $0x1e6] ss:$0 sm:$0xff]  ;;  %v5410_v34 = vld [vmem:[#allocation2 + $0x1e7] ss:$0 sm:$0xff]  ;;  %v5433_v24 = vld [vmem:[#allocation2 + $0x1fe] ss:$0 sm:$0xff] }
 0x158   :  { %5774 = vpow2.f32 %v3436_v38  ;;  %v4106_v0 = vadd.f32 %v6188_v37, %v4049_v46  ;;  %v4113_v1 = vadd.f32 %v6191_v39, %v4056_v53  ;;  %v4120_v2 = vadd.f32 %v6195_v48, %v4063_v15  ;;  %v5427_v46 = vld [vmem:[#allocation2 + $0x1f8] ss:$0 sm:$0xff]  ;;  %v5428_v53 = vld [vmem:[#allocation2 + $0x1f9] ss:$0 sm:$0xff]  ;;  %v675_v15 = vpop.f32.mrb[37].mxu0 }
 0x159   :  { %5776 = vpow2.f32 %v3439_v26  ;;  %v4127_v8 = vadd.f32 %v6198_v49, %v4070_v54  ;;  %v4134_v22 = vadd.f32 %v6201_v57, %v4077_v55  ;;  %v4141_v36 = vadd.f32 %v6204_v59, %v4084_v50  ;;  %v865_v49 = vpop.f32.mrb[27].mxu1  ;;  %v5429_v55 = vld [vmem:[#allocation2 + $0x1fa] ss:$0 sm:$0xff]  ;;  %1010 = vst [vmem:[#allocation2 + $0x120] sm:$0xff] %v675_v15  ;;  %v5666_v16 = vpop.f32.mrb[38].mxu0 }
 0x15a   :  { %5778 = vpow2.f32 %v3442_v51  ;;  %v4148_v37 = vmul.f32 %v5403_v61, %v6134_v9  ;;  %v4155_v39 = vmul.f32 %v5404_v62, %v6134_v9  ;;  %v4162_v48 = vmul.f32 %v5405_v63, %v6134_v9  ;;  %1048 = vst [vmem:[#allocation2 + $0x250] sm:$0xff] %v865_v49  ;;  %v5723_v3 = vpop.f32.mrb[28].mxu1  ;;  %1013 = vst [vmem:[#allocation2 + $0x138] sm:$0xff] %v5666_v16  ;;  %v685_v13 = vpop.f32.mrb[39].mxu0  ;;  %v5434_v35 = vld [vmem:[#allocation2 + $0x1ff] ss:$0 sm:$0xff] }
 0x15b   :  { %5780 = vpow2.f32 %v3445_v30  ;;  %v4169_v57 = vmul.f32 %v5406_v42, %v6134_v9  ;;  %v4176_v59 = vmul.f32 %v5407_v7, %v6134_v9  ;;  %v4183_v54 = vmul.f32 %v5408_v44, %v6134_v9  ;;  %1051 = vst [vmem:[#allocation2 + $0x268] sm:$0xff] %v5723_v3  ;;  %v875_v40 = vpop.f32.mrb[29].mxu1  ;;  %1012 = vst [vmem:[#allocation2 + $0x130] sm:$0xff] %v685_v13  ;;  %v5669_v25 = vpop.f32.mrb[40].mxu0  ;;  %v5419_v62 = vld [vmem:[#allocation2 + $0x1f0] ss:$0 sm:$0xff] }
 0x15c   :  { %5782 = vpow2.f32 %v3448_v31  ;;  %v4149_v4 = vadd.f32 %v4148_v37, %v4092_v58  ;;  %v4156_v11 = vadd.f32 %v4155_v39, %v4099_v60  ;;  %v4163_v5 = vadd.f32 %v4162_v48, %v4106_v0  ;;  %1050 = vst [vmem:[#allocation2 + $0x260] sm:$0xff] %v875_v40  ;;  %v5726_v6 = vpop.f32.mrb[30].mxu1  ;;  %1015 = vst [vmem:[#allocation2 + $0x148] sm:$0xff] %v5669_v25  ;;  %v695_v30 = vpop.f32.mrb[41].mxu0  ;;  %v5420_v63 = vld [vmem:[#allocation2 + $0x1f1] ss:$0 sm:$0xff] }
 0x15d   :  { %v4170_v19 = vadd.f32 %v4169_v57, %v4113_v1  ;;  %v4177_v20 = vadd.f32 %v4176_v59, %v4120_v2  ;;  %v4184_v21 = vadd.f32 %v4183_v54, %v4127_v8  ;;  %v4190_v28 = vmul.f32 %v5409_v45, %v6134_v9  ;;  %1053 = vst [vmem:[#allocation2 + $0x278] sm:$0xff] %v5726_v6  ;;  %v5672_v0 = vpop.f32.mrb[42].mxu0  ;;  %v5421_v8 = vld [vmem:[#allocation2 + $0x1f2] ss:$0 sm:$0xff]  ;;  %v5424_v48 = vld [vmem:[#allocation2 + $0x1f5] ss:$0 sm:$0xff] }
 0x15e   :  { %v4197_v50 = vmul.f32 %v5410_v34, %v6134_v9  ;;  %v6265_v38 = vmul.f32 %v6140_v23, %v5427_v46  ;;  %v6268_v26 = vmul.f32 %v6140_v23, %v5428_v53  ;;  %v6271_v51 = vmul.f32 %v6140_v23, %v5429_v55  ;;  %1014 = vst [vmem:[#allocation2 + $0x140] sm:$0xff] %v695_v30  ;;  %v705_v45 = vpop.f32.mrb[43].mxu0  ;;  %v885_v34 = vpop.f32.mrb[31].mxu1  ;;  %v5425_v46 = vld [vmem:[#allocation2 + $0x1f6] ss:$0 sm:$0xff] }
 0x15f   :  { %v6273_v31 = vpop.eup %5768  ;;  %v4191_v58 = vadd.f32 %v4190_v28, %v4134_v22  ;;  %v4340_v60 = vmul.f32 %v6140_v23, %v5430_v14  ;;  %v4347_v61 = vmul.f32 %v6140_v23, %v5431_v10  ;;  %v4354_v9 = vmul.f32 %v6140_v23, %v5432_v12  ;;  %v5422_v22 = vld [vmem:[#allocation2 + $0x1f3] ss:$0 sm:$0xff]  ;;  %1017 = vst [vmem:[#allocation2 + $0x158] sm:$0xff] %v5672_v0  ;;  %v5426_v14 = vld [vmem:[#allocation2 + $0x1f7] ss:$0 sm:$0xff] }
 0x160   :  { %v6278_v1 = vpop.eup %5770  ;;  %v4198_v2 = vadd.f32 %v4197_v50, %v4141_v36  ;;  %v4361_v42 = vmul.f32 %v6140_v23, %v5433_v24  ;;  %v6282_v7 = vmul.f32 %v6140_v23, %v5434_v35  ;;  %v4206_v44 = vadd.f32 %v6217_v17, %v4149_v4  ;;  %v5423_v23 = vld [vmem:[#allocation2 + $0x1f4] ss:$0 sm:$0xff]  ;;  %1016 = vst [vmem:[#allocation2 + $0x150] sm:$0xff] %v705_v45  ;;  %v4996_v25 = vld [vmem:[#allocation2 + $0x109] ss:$0 sm:$0xff] }
 0x161   :  { %v6285_v47 = vpop.eup %5772  ;;  %v3450_v52 = vadd.f32 %v6278_v1, %v6273_v31  ;;  %v4213_v37 = vadd.f32 %v6220_v18, %v4156_v11  ;;  %v4220_v36 = vadd.f32 %v6231_v41, %v4163_v5  ;;  %v4227_v39 = vadd.f32 %v6234_v32, %v4170_v19  ;;  %1052 = vst [vmem:[#allocation2 + $0x270] sm:$0xff] %v885_v34  ;;  %v4997_v6 = vld [vmem:[#allocation2 + $0x10a] ss:$0 sm:$0xff]  ;;  %v4998_v50 = vld [vmem:[#allocation2 + $0x10b] ss:$0 sm:$0xff] }
 0x162   :  { %v6292_v17 = vpop.eup %5774  ;;  %v4234_v53 = vadd.f32 %v6237_v33, %v4177_v20  ;;  %v4241_v15 = vadd.f32 %v6240_v56, %v4184_v21  ;;  %v4248_v49 = vadd.f32 %v6243_v27, %v4191_v58  ;;  %v4255_v57 = vadd.f32 %v6246_v43, %v4198_v2  ;;  %v4995_v20 = vld [vmem:[#allocation2 + $0x108] ss:$0 sm:$0xff]  ;;  %v4999_v0 = vld [vmem:[#allocation2 + $0x10c] ss:$0 sm:$0xff] }
 0x163   :  { %v6298_v18 = vpop.eup %5776  ;;  %v3451_v41 = vadd.f32 %v6285_v47, %v3450_v52  ;;  %v4262_v32 = vmul.f32 %v5419_v62, %v6150_v29  ;;  %v4269_v59 = vmul.f32 %v5420_v63, %v6150_v29  ;;  %v4276_v54 = vmul.f32 %v5421_v8, %v6150_v29  ;;  %v5001_v8 = vld [vmem:[#allocation2 + $0x10e] ss:$0 sm:$0xff] }
 0x164   :  { %v6304_v55 = vpop.eup %5778  ;;  %v4283_v33 = vmul.f32 %v5422_v22, %v6150_v29  ;;  %v4290_v56 = vmul.f32 %v5423_v23, %v6150_v29  ;;  %v4297_v27 = vmul.f32 %v5424_v48, %v6150_v29  ;;  %v4304_v43 = vmul.f32 %v5425_v46, %v6150_v29  ;;  %v5002_v22 = vld [vmem:[#allocation2 + $0x10f] ss:$0 sm:$0xff]  ;;  %v4991_v46 = vld [vmem:[#allocation2 + $0x104] ss:$0 sm:$0xff] }
 0x165   :  { %v6310_v16 = vpop.eup %5780  ;;  %v3452_v3 = vadd.f32 %v6292_v17, %v3451_v41  ;;  %v4263_v4 = vadd.f32 %v4262_v32, %v4206_v44  ;;  %v4270_v11 = vadd.f32 %v4269_v59, %v4213_v37  ;;  %v4277_v5 = vadd.f32 %v4276_v54, %v4220_v36  ;;  %v5840_v45 = vld [vmem:[#allocation2 + $0x8] sm:$0xff]  ;;  %v4989_v37 = vld [vmem:[#allocation2 + $0x102] ss:$0 sm:$0xff]  ;;  %v4990_v36 = vld [vmem:[#allocation2 + $0x103] ss:$0 sm:$0xff] }
 0x166   :  { %v6313_v10 = vpop.eup %5782  ;;  %v4284_v12 = vadd.f32 %v4283_v33, %v4227_v39  ;;  %v4291_v13 = vadd.f32 %v4290_v56, %v4234_v53  ;;  %v4298_v40 = vadd.f32 %v4297_v27, %v4241_v15  ;;  %v4305_v19 = vadd.f32 %v4304_v43, %v4248_v49  ;;  %v4992_v53 = vld [vmem:[#allocation2 + $0x105] ss:$0 sm:$0xff]  ;;  %v4993_v15 = vld [vmem:[#allocation2 + $0x106] ss:$0 sm:$0xff]  ;;  %v4994_v54 = vld [vmem:[#allocation2 + $0x107] ss:$0 sm:$0xff] }
 0x167   :  { %v3453_v21 = vadd.f32 %v6298_v18, %v3452_v3  ;;  %v4311_v28 = vmul.f32 %v5426_v14, %v6150_v29  ;;  %v6318_v24 = vadd.f32 %v6265_v38, %v4263_v4  ;;  %v6321_v35 = vadd.f32 %v6268_v26, %v4270_v11  ;;  %v5000_v29 = vld [vmem:[#allocation2 + $0x10d] ss:$0 sm:$0xff]  ;;  %v5841_v32 = vld [vmem:[#allocation2] sm:$0xff]  ;;  %v5011_v11 = vld [vmem:[#allocation2 + $0x118] ss:$0 sm:$0xff] }
 0x168   :  { %v6324_v30 = vadd.f32 %v6271_v51, %v4277_v5  ;;  %v6326_v58 = vadd.f32 %v4340_v60, %v4284_v12  ;;  %v6328_v62 = vadd.f32 %v4347_v61, %v4291_v13  ;;  %v6330_v63 = vadd.f32 %v4354_v9, %v4298_v40  ;;  %v4987_v51 = vld [vmem:[#allocation2 + $0x100] ss:$0 sm:$0xff]  ;;  %v4988_v9 = vld [vmem:[#allocation2 + $0x101] ss:$0 sm:$0xff]  ;;  %v5012_v5 = vld [vmem:[#allocation2 + $0x119] ss:$0 sm:$0xff] }
 0x169   :  { %v3454_v38 = vadd.f32 %v6304_v55, %v3453_v21  ;;  %v4312_v2 = vadd.f32 %v4311_v28, %v4255_v57  ;;  %v6333_v44 = vadd.f32 %v4361_v42, %v4305_v19  ;;  %v4370_v26 = vmax.f32 %v6318_v24, %v6321_v35  ;;  %v5013_v19 = vld [vmem:[#allocation2 + $0x11a] ss:$0 sm:$0xff]  ;;  %v5015_v21 = vld [vmem:[#allocation2 + $0x11c] ss:$0 sm:$0xff] }
 0x16a   :  { %v1125_v60 = vmul.f32 %v5840_v45, %v4995_v20  ;;  %v1132_v34 = vmul.f32 %v5840_v45, %v4996_v25  ;;  %v1139_v61 = vmul.f32 %v5840_v45, %v4997_v6  ;;  %v1146_v52 = vmul.f32 %v5840_v45, %v4998_v50  ;;  %v5014_v20 = vld [vmem:[#allocation2 + $0x11b] ss:$0 sm:$0xff] }
 0x16b   :  { %v3455_v39 = vadd.f32 %v6310_v16, %v3454_v38  ;;  %v6339_v23 = vadd.f32 %v6282_v7, %v4312_v2  ;;  %v4371_v42 = vmax.f32 %v4370_v26, %v6324_v30  ;;  %v1153_v48 = vmul.f32 %v5840_v45, %v4999_v0  ;;  %v5016_v0 = vld [vmem:[#allocation2 + $0x11d] ss:$0 sm:$0xff]  ;;  %v5018_v38 = vld [vmem:[#allocation2 + $0x11f] ss:$0 sm:$0xff] }
 0x16c   :  { %v1160_v49 = vmul.f32 %v5840_v45, %v5000_v29  ;;  %v1167_v57 = vmul.f32 %v5840_v45, %v5001_v8  ;;  %v1174_v41 = vmul.f32 %v5840_v45, %v5002_v22  ;;  %v1076_v59 = vmul.f32 %v5841_v32, %v4987_v51  ;;  %v5017_v29 = vld [vmem:[#allocation2 + $0x11e] ss:$0 sm:$0xff]  ;;  %v5003_v51 = vld [vmem:[#allocation2 + $0x110] ss:$0 sm:$0xff]  ;;  %v5004_v45 = vld [vmem:[#allocation2 + $0x111] ss:$0 sm:$0xff] }
 0x16d   :  { %v3456_v33 = vadd.f32 %v6313_v10, %v3455_v39  ;;  %v4372_v56 = vmax.f32 %v4371_v42, %v6326_v58  ;;  %v1082_v27 = vmul.f32 %v5841_v32, %v4988_v9  ;;  %v1088_v43 = vmul.f32 %v5841_v32, %v4989_v37  ;;  %v5842_v9 = vld [vmem:[#allocation2 + $0x18] sm:$0xff]  ;;  %v5007_v39 = vld [vmem:[#allocation2 + $0x114] ss:$0 sm:$0xff]  ;;  %v5008_v42 = vld [vmem:[#allocation2 + $0x115] ss:$0 sm:$0xff] }
 0x16e   :  { %v1094_v7 = vmul.f32 %v5841_v32, %v4990_v36  ;;  %v1100_v14 = vmul.f32 %v5841_v32, %v4991_v46  ;;  %v1106_v3 = vmul.f32 %v5841_v32, %v4992_v53  ;;  %v1112_v4 = vmul.f32 %v5841_v32, %v4993_v15  ;;  %v5006_v36 = vld [vmem:[#allocation2 + $0x113] ss:$0 sm:$0xff] }
 0x16f   :  { %5784 = vrcp.f32 %v3456_v33  ;;  %v4373_v12 = vmax.f32 %v4372_v56, %v6328_v62  ;;  %v1118_v13 = vmul.f32 %v5841_v32, %v4994_v54  ;;  %v1126_v40 = vadd.f32 %v1125_v60, %v1076_v59  ;;  %v5005_v60 = vld [vmem:[#allocation2 + $0x112] ss:$0 sm:$0xff] }
 0x170   :  { %v1133_v28 = vadd.f32 %v1132_v34, %v1082_v27  ;;  %v1140_v25 = vadd.f32 %v1139_v61, %v1088_v43  ;;  %v1147_v6 = vadd.f32 %v1146_v52, %v1094_v7  ;;  %v6345_v50 = vadd.f32 %v1153_v48, %v1100_v14 }
 0x171   :  { %v4374_v2 = vmax.f32 %v4373_v12, %v6330_v63  ;;  %v6348_v26 = vadd.f32 %v1160_v49, %v1106_v3  ;;  %v6350_v8 = vadd.f32 %v1167_v57, %v1112_v4  ;;  %v6352_v22 = vadd.f32 %v1174_v41, %v1118_v13  ;;  %v5009_v49 = vld [vmem:[#allocation2 + $0x116] ss:$0 sm:$0xff] }
 0x172   :  { %v6354_v34 = vmul.f32 %v5842_v9, %v5011_v11  ;;  %v6356_v61 = vmul.f32 %v5842_v9, %v5012_v5  ;;  %v6358_v52 = vmul.f32 %v5842_v9, %v5013_v19  ;;  %v6360_v37 = vmul.f32 %v5842_v9, %v5014_v20  ;;  %v5843_v41 = vld [vmem:[#allocation2 + $0x10] sm:$0xff]  ;;  %v5675_v11 = vpop.f32.mrb[44].mxu0  ;;  %v5729_v5 = vpop.f32.mrb[32].mxu1 }
 0x173   :  { %v4375_v48 = vmax.f32 %v4374_v2, %v6333_v44  ;;  %v6363_v46 = vmul.f32 %v5842_v9, %v5015_v21  ;;  %v6365_v53 = vmul.f32 %v5842_v9, %v5016_v0  ;;  %v6367_v15 = vmul.f32 %v5842_v9, %v5017_v29  ;;  %1019 = vst [vmem:[#allocation2 + $0x168] sm:$0xff] %v5675_v11  ;;  %v715_v21 = vpop.f32.mrb[45].mxu0 }
 0x174   :  { %v6369_v57 = vmul.f32 %v5842_v9, %v5018_v38  ;;  %v1182_v32 = vmul.f32 %v5843_v41, %v5003_v51  ;;  %v1189_v59 = vmul.f32 %v5843_v41, %v5004_v45  ;;  %v1196_v54 = vmul.f32 %v5843_v41, %v5005_v60  ;;  %1055 = vst [vmem:[#allocation2 + $0x288] sm:$0xff] %v5729_v5  ;;  %v5030_v9 = vld [vmem:[#allocation2 + $0x12b] ss:$0 sm:$0xff] }
 0x175   :  { %v4376_v33 = vmax.f32 %v4375_v48, %v6339_v23  ;;  %v1203_v56 = vmul.f32 %v5843_v41, %v5006_v36  ;;  %v1210_v27 = vmul.f32 %v5843_v41, %v5007_v39  ;;  %v1217_v43 = vmul.f32 %v5843_v41, %v5008_v42  ;;  %1018 = vst [vmem:[#allocation2 + $0x160] sm:$0xff] %v715_v21  ;;  %v5022_v21 = vld [vmem:[#allocation2 + $0x123] ss:$0 sm:$0xff] }
 0x176   :  { %v6372_v7 = vadd.f32 %v1182_v32, %v1126_v40  ;;  %v6374_v14 = vadd.f32 %v1189_v59, %v1133_v28  ;;  %v6376_v3 = vadd.f32 %v1196_v54, %v1140_v25  ;;  %v1224_v4 = vmul.f32 %v5843_v41, %v5009_v49  ;;  %v895_v40 = vpop.f32.mrb[33].mxu1  ;;  %v5032_v32 = vld [vmem:[#allocation2 + $0x12d] ss:$0 sm:$0xff]  ;;  %v5033_v59 = vld [vmem:[#allocation2 + $0x12e] ss:$0 sm:$0xff] }
 0x177   :  { %v4377_v12 = vsub.f32 %v6318_v24, %v4376_v33  ;;  %v4380_v13 = vsub.f32 %v6321_v35, %v4376_v33  ;;  %v4383_v19 = vsub.f32 %v6324_v30, %v4376_v33  ;;  %v4386_v20 = vsub.f32 %v6326_v58, %v4376_v33  ;;  %1054 = vst [vmem:[#allocation2 + $0x280] sm:$0xff] %v895_v40  ;;  %v5034_v54 = vld [vmem:[#allocation2 + $0x12f] ss:$0 sm:$0xff]  ;;  %v5023_v40 = vld [vmem:[#allocation2 + $0x124] ss:$0 sm:$0xff] }
 0x178   :  { %v4389_v28 = vsub.f32 %v6328_v62, %v4376_v33  ;;  %v4392_v25 = vsub.f32 %v6330_v63, %v4376_v33  ;;  %v4395_v0 = vsub.f32 %v6333_v44, %v4376_v33  ;;  %v4398_v29 = vsub.f32 %v6339_v23, %v4376_v33  ;;  %v5010_v44 = vld [vmem:[#allocation2 + $0x117] ss:$0 sm:$0xff]  ;;  %v5027_v23 = vld [vmem:[#allocation2 + $0x128] ss:$0 sm:$0xff] }
 0x179   :  { %v5785_v24 = vpop.eup %5784  ;;  %v4378_v35 = vmul.f32 1.442695, %v4377_v12  ;;  %v4381_v38 = vmul.f32 1.442695, %v4380_v13  ;;  %v4384_v30 = vmul.f32 1.442695, %v4383_v19  ;;  %v1204_v2 = vadd.f32 %v1203_v56, %v1147_v6 }
 0x17a   :  { %v6387_v58 = vmul.f32 %v5785_v24, %v6273_v31  ;;  %v6390_v51 = vmul.f32 %v5785_v24, %v6278_v1  ;;  %v6393_v62 = vmul.f32 %v5785_v24, %v6285_v47  ;;  %v6396_v63 = vmul.f32 %v5785_v24, %v6292_v17  ;;  %v5028_v6 = vld [vmem:[#allocation2 + $0x129] ss:$0 sm:$0xff]  ;;  %v5029_v47 = vld [vmem:[#allocation2 + $0x12a] ss:$0 sm:$0xff]  ;;  %v5020_v12 = vld [vmem:[#allocation2 + $0x121] ss:$0 sm:$0xff] }
 0x17b   :  { %v6399_v45 = vmul.f32 %v5785_v24, %v6298_v18  ;;  %v6402_v60 = vmul.f32 %v5785_v24, %v6304_v55  ;;  %v6405_v31 = vmul.f32 %v5785_v24, %v6310_v16  ;;  %v6408_v1 = vmul.f32 %v5785_v24, %v6313_v10  ;;  %v5031_v55 = vld [vmem:[#allocation2 + $0x12c] ss:$0 sm:$0xff]  ;;  %v5021_v13 = vld [vmem:[#allocation2 + $0x122] ss:$0 sm:$0xff]  ;;  %v5025_v24 = vld [vmem:[#allocation2 + $0x126] ss:$0 sm:$0xff] }
 0x17c   :  { %7142 = vst [vmem:[#allocation12_spill] sm:$0xff] %v6387_v58  ;;  %7143 = vst [vmem:[#allocation13_spill] sm:$0xff] %v6390_v51  ;;  %5786 = vpow2.f32 %v4378_v35  ;;  %v4387_v17 = vmul.f32 1.442695, %v4386_v20  ;;  %v4390_v36 = vmul.f32 1.442695, %v4389_v28  ;;  %v1211_v48 = vadd.f32 %v1210_v27, %v6345_v50 }
 0x17d   :  { %7144 = vst [vmem:[#allocation14_spill] sm:$0xff] %v6393_v62  ;;  %7145 = vst [vmem:[#allocation15_spill] sm:$0xff] %v6396_v63  ;;  %v4393_v39 = vmul.f32 1.442695, %v4392_v25  ;;  %5788 = vpow2.f32 %v4381_v38  ;;  %v4396_v42 = vmul.f32 1.442695, %v4395_v0  ;;  %v1218_v16 = vadd.f32 %v1217_v43, %v6348_v26 }
 0x17e   :  { %7146 = vst [vmem:[#allocation16_spill] sm:$0xff] %v6399_v45  ;;  %7147 = vst [vmem:[#allocation17_spill] sm:$0xff] %v6402_v60  ;;  %v4399_v18 = vmul.f32 1.442695, %v4398_v29  ;;  %5790 = vpow2.f32 %v4384_v30  ;;  %v1225_v49 = vadd.f32 %v1224_v4, %v6350_v8  ;;  %v1231_v10 = vmul.f32 %v5843_v41, %v5010_v44  ;;  %v5844_v33 = vld [vmem:[#allocation2 + $0x28] sm:$0xff] }
 0x17f   :  { %7148 = vst [vmem:[#allocation18_spill] sm:$0xff] %v6405_v31  ;;  %7149 = vst [vmem:[#allocation19_spill] sm:$0xff] %v6408_v1  ;;  %5792 = vpow2.f32 %v4387_v17  ;;  %v6413_v56 = vmul.f32 %v5844_v33, %v5027_v23  ;;  %v6415_v11 = vmul.f32 %v5844_v33, %v5028_v6  ;;  %v6417_v5 = vmul.f32 %v5844_v33, %v5029_v47  ;;  %v5019_v4 = vld [vmem:[#allocation2 + $0x120] ss:$0 sm:$0xff]  ;;  %v5024_v28 = vld [vmem:[#allocation2 + $0x125] ss:$0 sm:$0xff] }
 0x180   :  { %5794 = vpow2.f32 %v4390_v36  ;;  %v1232_v50 = vadd.f32 %v1231_v10, %v6352_v22  ;;  %v6420_v27 = vmul.f32 %v5844_v33, %v5030_v9  ;;  %v6422_v26 = vmul.f32 %v5844_v33, %v5031_v55  ;;  %v5026_v35 = vld [vmem:[#allocation2 + $0x127] ss:$0 sm:$0xff]  ;;  %v5046_v17 = vld [vmem:[#allocation2 + $0x13b] ss:$0 sm:$0xff]  ;;  %v5047_v36 = vld [vmem:[#allocation2 + $0x13c] ss:$0 sm:$0xff] }
 0x181   :  { %5796 = vpow2.f32 %v4393_v39  ;;  %v6424_v8 = vmul.f32 %v5844_v33, %v5032_v32  ;;  %v6426_v41 = vmul.f32 %v5844_v33, %v5033_v59  ;;  %v6428_v43 = vmul.f32 %v5844_v33, %v5034_v54  ;;  %v5048_v39 = vld [vmem:[#allocation2 + $0x13d] ss:$0 sm:$0xff]  ;;  %v5050_v10 = vld [vmem:[#allocation2 + $0x13f] ss:$0 sm:$0xff] }
 0x182   :  { %5798 = vpow2.f32 %v4396_v42  ;;  %v1240_v19 = vadd.f32 %v6354_v34, %v6372_v7  ;;  %v1247_v22 = vadd.f32 %v6356_v61, %v6374_v14  ;;  %v1254_v20 = vadd.f32 %v6358_v52, %v6376_v3  ;;  %v5845_v61 = vld [vmem:[#allocation2 + $0x20] sm:$0xff]  ;;  %v5678_v52 = vpop.f32.mrb[46].mxu0  ;;  %v5732_v3 = vpop.f32.mrb[34].mxu1 }
 0x183   :  { %5800 = vpow2.f32 %v4399_v18  ;;  %v1261_v25 = vadd.f32 %v6360_v37, %v1204_v2  ;;  %v1268_v0 = vadd.f32 %v6363_v46, %v1211_v48  ;;  %v1275_v29 = vadd.f32 %v6365_v53, %v1218_v16  ;;  %v5043_v37 = vld [vmem:[#allocation2 + $0x138] ss:$0 sm:$0xff]  ;;  %v5044_v2 = vld [vmem:[#allocation2 + $0x139] ss:$0 sm:$0xff]  ;;  %v5045_v46 = vld [vmem:[#allocation2 + $0x13a] ss:$0 sm:$0xff] }
 0x184   :  { %v1282_v34 = vadd.f32 %v6367_v15, %v1225_v49  ;;  %v1289_v7 = vadd.f32 %v6369_v57, %v1232_v50  ;;  %v1296_v14 = vmul.f32 %v5845_v61, %v5019_v4  ;;  %v1303_v38 = vmul.f32 %v5845_v61, %v5020_v12  ;;  %1021 = vst [vmem:[#allocation2 + $0x178] sm:$0xff] %v5678_v52  ;;  %v5049_v49 = vld [vmem:[#allocation2 + $0x13e] ss:$0 sm:$0xff]  ;;  %v725_v32 = vpop.f32.mrb[47].mxu0  ;;  %v905_v59 = vpop.f32.mrb[35].mxu1 }
 0x185   :  { %v1310_v30 = vmul.f32 %v5845_v61, %v5021_v13  ;;  %v1317_v44 = vmul.f32 %v5845_v61, %v5022_v21  ;;  %v1324_v23 = vmul.f32 %v5845_v61, %v5023_v40  ;;  %v1331_v6 = vmul.f32 %v5845_v61, %v5024_v28  ;;  %1057 = vst [vmem:[#allocation2 + $0x298] sm:$0xff] %v5732_v3  ;;  %v5846_v12 = vld [vmem:[#allocation2 + $0x38] sm:$0xff] }
 0x186   :  { %v6441_v53 = vpop.eup %5786  ;;  %v1297_v47 = vadd.f32 %v1296_v14, %v1240_v19  ;;  %v1304_v15 = vadd.f32 %v1303_v38, %v1247_v22  ;;  %v1338_v9 = vmul.f32 %v5845_v61, %v5025_v24  ;;  %v1345_v57 = vmul.f32 %v5845_v61, %v5026_v35  ;;  %1020 = vst [vmem:[#allocation2 + $0x170] sm:$0xff] %v725_v32  ;;  %v5035_v35 = vld [vmem:[#allocation2 + $0x130] ss:$0 sm:$0xff] }
 0x187   :  { %v6443_v42 = vpop.eup %5788  ;;  %v1311_v18 = vadd.f32 %v1310_v30, %v1254_v20  ;;  %v1318_v48 = vadd.f32 %v1317_v44, %v1261_v25  ;;  %v1325_v55 = vadd.f32 %v1324_v23, %v1268_v0  ;;  %v1332_v16 = vadd.f32 %v1331_v6, %v1275_v29  ;;  %1056 = vst [vmem:[#allocation2 + $0x290] sm:$0xff] %v905_v59  ;;  %v5038_v30 = vld [vmem:[#allocation2 + $0x133] ss:$0 sm:$0xff]  ;;  %v5039_v44 = vld [vmem:[#allocation2 + $0x134] ss:$0 sm:$0xff] }
 0x188   :  { %v6445_v54 = vpop.eup %5790  ;;  %v4401_v33 = vadd.f32 %v6443_v42, %v6441_v53  ;;  %v1339_v50 = vadd.f32 %v1338_v9, %v1282_v34  ;;  %v1346_v4 = vadd.f32 %v1345_v57, %v1289_v7  ;;  %v1467_v13 = vmul.f32 %v5846_v12, %v5043_v37  ;;  %v5036_v34 = vld [vmem:[#allocation2 + $0x131] ss:$0 sm:$0xff]  ;;  %v5037_v7 = vld [vmem:[#allocation2 + $0x132] ss:$0 sm:$0xff]  ;;  %v5040_v23 = vld [vmem:[#allocation2 + $0x135] ss:$0 sm:$0xff] }
 0x189   :  { %v6449_v19 = vpop.eup %5792  ;;  %v1474_v22 = vmul.f32 %v5846_v12, %v5044_v2  ;;  %v1481_v20 = vmul.f32 %v5846_v12, %v5045_v46  ;;  %v1488_v21 = vmul.f32 %v5846_v12, %v5046_v17  ;;  %v1495_v40 = vmul.f32 %v5846_v12, %v5047_v36 }
 0x18a   :  { %v6451_v28 = vpop.eup %5794  ;;  %v4402_v25 = vadd.f32 %v6445_v54, %v4401_v33  ;;  %v1502_v0 = vmul.f32 %v5846_v12, %v5048_v39  ;;  %v1509_v29 = vmul.f32 %v5846_v12, %v5049_v49  ;;  %v6454_v24 = vmul.f32 %v5846_v12, %v5050_v10  ;;  %v5124_v12 = vld [vmem:[#allocation2 + $0x149] ss:$0 sm:$0xff] }
 0x18b   :  { %v6456_v61 = vpop.eup %5796  ;;  %v1354_v14 = vadd.f32 %v6413_v56, %v1297_v47  ;;  %v1361_v38 = vadd.f32 %v6415_v11, %v1304_v15  ;;  %v1368_v52 = vadd.f32 %v6417_v5, %v1311_v18  ;;  %v1375_v3 = vadd.f32 %v6420_v27, %v1318_v48  ;;  %v5041_v56 = vld [vmem:[#allocation2 + $0x136] ss:$0 sm:$0xff]  ;;  %v5042_v48 = vld [vmem:[#allocation2 + $0x137] ss:$0 sm:$0xff] }
 0x18c   :  { %v6462_v6 = vpop.eup %5798  ;;  %v4403_v37 = vadd.f32 %v6449_v19, %v4402_v25  ;;  %v1382_v2 = vadd.f32 %v6422_v26, %v1325_v55  ;;  %v1389_v46 = vadd.f32 %v6424_v8, %v1332_v16  ;;  %v1396_v9 = vadd.f32 %v6426_v41, %v1339_v50  ;;  %v5847_v5 = vld [vmem:[#allocation2 + $0x30] sm:$0xff]  ;;  %v5125_v25 = vld [vmem:[#allocation2 + $0x14a] ss:$0 sm:$0xff] }
 0x18d   :  { %v6468_v47 = vpop.eup %5800  ;;  %v1403_v11 = vadd.f32 %v6428_v43, %v1346_v4  ;;  %v1410_v27 = vmul.f32 %v5847_v5, %v5035_v35  ;;  %v1417_v15 = vmul.f32 %v5847_v5, %v5036_v34  ;;  %v1424_v57 = vmul.f32 %v5847_v5, %v5037_v7  ;;  %v5123_v4 = vld [vmem:[#allocation2 + $0x148] ss:$0 sm:$0xff] }
 0x18e   :  { %v4404_v17 = vadd.f32 %v6451_v28, %v4403_v37  ;;  %v1431_v36 = vmul.f32 %v5847_v5, %v5038_v30  ;;  %v1438_v39 = vmul.f32 %v5847_v5, %v5039_v44  ;;  %v1445_v18 = vmul.f32 %v5847_v5, %v5040_v23  ;;  %v5129_v23 = vld [vmem:[#allocation2 + $0x14e] ss:$0 sm:$0xff]  ;;  %v5130_v37 = vld [vmem:[#allocation2 + $0x14f] ss:$0 sm:$0xff] }
 0x18f   :  { %v1411_v26 = vadd.f32 %v1410_v27, %v1354_v14  ;;  %v1418_v55 = vadd.f32 %v1417_v15, %v1361_v38  ;;  %v1425_v8 = vadd.f32 %v1424_v57, %v1368_v52  ;;  %v1452_v16 = vmul.f32 %v5847_v5, %v5041_v56  ;;  %v5126_v38 = vld [vmem:[#allocation2 + $0x14b] ss:$0 sm:$0xff]  ;;  %v5127_v52 = vld [vmem:[#allocation2 + $0x14c] ss:$0 sm:$0xff]  ;;  %v5116_v56 = vld [vmem:[#allocation2 + $0x141] ss:$0 sm:$0xff] }
 0x190   :  { %v4405_v41 = vadd.f32 %v6456_v61, %v4404_v17  ;;  %v1432_v49 = vadd.f32 %v1431_v36, %v1375_v3  ;;  %v1439_v10 = vadd.f32 %v1438_v39, %v1382_v2  ;;  %v1446_v32 = vadd.f32 %v1445_v18, %v1389_v46  ;;  %v5128_v3 = vld [vmem:[#allocation2 + $0x14d] ss:$0 sm:$0xff]  ;;  %v5115_v2 = vld [vmem:[#allocation2 + $0x140] ss:$0 sm:$0xff]  ;;  %v5118_v27 = vld [vmem:[#allocation2 + $0x143] ss:$0 sm:$0xff] }
 0x191   :  { %v1453_v43 = vadd.f32 %v1452_v16, %v1396_v9  ;;  %v1459_v59 = vmul.f32 %v5847_v5, %v5042_v48  ;;  %v6473_v33 = vadd.f32 %v1467_v13, %v1411_v26  ;;  %v6475_v50 = vadd.f32 %v1474_v22, %v1418_v55  ;;  %v5117_v5 = vld [vmem:[#allocation2 + $0x142] ss:$0 sm:$0xff]  ;;  %v5119_v57 = vld [vmem:[#allocation2 + $0x144] ss:$0 sm:$0xff]  ;;  %v5120_v17 = vld [vmem:[#allocation2 + $0x145] ss:$0 sm:$0xff] }
 0x192   :  { %v4406_v35 = vadd.f32 %v6462_v6, %v4405_v41  ;;  %v6478_v34 = vadd.f32 %v1481_v20, %v1425_v8  ;;  %v6480_v7 = vadd.f32 %v1488_v21, %v1432_v49  ;;  %v6482_v14 = vadd.f32 %v1495_v40, %v1439_v10  ;;  %v5848_v21 = vld [vmem:[#allocation2 + $0x48] sm:$0xff]  ;;  %v5121_v36 = vld [vmem:[#allocation2 + $0x146] ss:$0 sm:$0xff]  ;;  %v5122_v26 = vld [vmem:[#allocation2 + $0x147] ss:$0 sm:$0xff] }
 0x193   :  { %v1460_v30 = vadd.f32 %v1459_v59, %v1403_v11  ;;  %v6484_v44 = vadd.f32 %v1502_v0, %v1446_v32  ;;  %v6486_v13 = vadd.f32 %v1509_v29, %v1453_v43  ;;  %v1518_v22 = vmax.f32 %v6473_v33, %v6475_v50  ;;  %v5849_v8 = vld [vmem:[#allocation2 + $0x40] sm:$0xff]  ;;  %v5139_v59 = vld [vmem:[#allocation2 + $0x158] ss:$0 sm:$0xff] }
 0x194   :  { %v4407_v20 = vadd.f32 %v6468_v47, %v4406_v35  ;;  %v2075_v46 = vmul.f32 %v5848_v21, %v5123_v4  ;;  %v2082_v40 = vmul.f32 %v5848_v21, %v5124_v12  ;;  %v2089_v9 = vmul.f32 %v5848_v21, %v5125_v25  ;;  %v5140_v4 = vld [vmem:[#allocation2 + $0x159] ss:$0 sm:$0xff]  ;;  %v5141_v12 = vld [vmem:[#allocation2 + $0x15a] ss:$0 sm:$0xff] }
 0x195   :  { %v6492_v0 = vadd.f32 %v6454_v24, %v1460_v30  ;;  %v1519_v29 = vmax.f32 %v1518_v22, %v6478_v34  ;;  %v2096_v11 = vmul.f32 %v5848_v21, %v5126_v38  ;;  %v2103_v15 = vmul.f32 %v5848_v21, %v5127_v52  ;;  %v5143_v30 = vld [vmem:[#allocation2 + $0x15c] ss:$0 sm:$0xff]  ;;  %v5144_v22 = vld [vmem:[#allocation2 + $0x15d] ss:$0 sm:$0xff] }
 0x196   :  { %5802 = vrcp.f32 %v4407_v20  ;;  %v2110_v39 = vmul.f32 %v5848_v21, %v5128_v3  ;;  %v2117_v18 = vmul.f32 %v5848_v21, %v5129_v23  ;;  %v2124_v48 = vmul.f32 %v5848_v21, %v5130_v37  ;;  %v5142_v3 = vld [vmem:[#allocation2 + $0x15b] ss:$0 sm:$0xff]  ;;  %v5145_v21 = vld [vmem:[#allocation2 + $0x15e] ss:$0 sm:$0xff] }
 0x197   :  { %v1520_v55 = vmax.f32 %v1519_v29, %v6480_v7  ;;  %v2026_v16 = vmul.f32 %v5849_v8, %v5115_v2  ;;  %v2032_v41 = vmul.f32 %v5849_v8, %v5116_v56  ;;  %v2038_v49 = vmul.f32 %v5849_v8, %v5117_v5  ;;  %v5146_v56 = vld [vmem:[#allocation2 + $0x15f] ss:$0 sm:$0xff]  ;;  %v5131_v5 = vld [vmem:[#allocation2 + $0x150] ss:$0 sm:$0xff] }
 0x198   :  { %v2044_v24 = vmul.f32 %v5849_v8, %v5118_v27  ;;  %v2050_v10 = vmul.f32 %v5849_v8, %v5119_v57  ;;  %v2056_v32 = vmul.f32 %v5849_v8, %v5120_v17  ;;  %v2062_v43 = vmul.f32 %v5849_v8, %v5121_v36  ;;  %v5132_v17 = vld [vmem:[#allocation2 + $0x151] ss:$0 sm:$0xff]  ;;  %v5133_v36 = vld [vmem:[#allocation2 + $0x152] ss:$0 sm:$0xff] }
 0x199   :  { %v1521_v25 = vmax.f32 %v1520_v55, %v6482_v14  ;;  %v2068_v35 = vmul.f32 %v5849_v8, %v5122_v26  ;;  %v2076_v38 = vadd.f32 %v2075_v46, %v2026_v16  ;;  %v2083_v52 = vadd.f32 %v2082_v40, %v2032_v41  ;;  %v5850_v46 = vld [vmem:[#allocation2 + $0x58] sm:$0xff]  ;;  %v5135_v55 = vld [vmem:[#allocation2 + $0x154] ss:$0 sm:$0xff]  ;;  %v5136_v8 = vld [vmem:[#allocation2 + $0x155] ss:$0 sm:$0xff] }
 0x19a   :  { %v2090_v23 = vadd.f32 %v2089_v9, %v2038_v49  ;;  %v2097_v37 = vadd.f32 %v2096_v11, %v2044_v24  ;;  %v6497_v2 = vadd.f32 %v2103_v15, %v2050_v10  ;;  %v6499_v20 = vadd.f32 %v2110_v39, %v2056_v32  ;;  %v5134_v9 = vld [vmem:[#allocation2 + $0x153] ss:$0 sm:$0xff] }
 0x19b   :  { %v1522_v27 = vmax.f32 %v1521_v25, %v6484_v44  ;;  %v6502_v29 = vadd.f32 %v2117_v18, %v2062_v43  ;;  %v6504_v57 = vadd.f32 %v2124_v48, %v2068_v35  ;;  %v6506_v40 = vmul.f32 %v5850_v46, %v5139_v59  ;;  %v5137_v18 = vld [vmem:[#allocation2 + $0x156] ss:$0 sm:$0xff] }
 0x19c   :  { %v6508_v11 = vmul.f32 %v5850_v46, %v5140_v4  ;;  %v6510_v15 = vmul.f32 %v5850_v46, %v5141_v12  ;;  %v6512_v39 = vmul.f32 %v5850_v46, %v5142_v3  ;;  %v6514_v26 = vmul.f32 %v5850_v46, %v5143_v30  ;;  %v5851_v24 = vld [vmem:[#allocation2 + $0x50] sm:$0xff] }
 0x19d   :  { %v1523_v48 = vmax.f32 %v1522_v27, %v6486_v13  ;;  %v6517_v16 = vmul.f32 %v5850_v46, %v5144_v22  ;;  %v6519_v41 = vmul.f32 %v5850_v46, %v5145_v21  ;;  %v6521_v49 = vmul.f32 %v5850_v46, %v5146_v56 }
 0x19e   :  { %v2132_v10 = vmul.f32 %v5851_v24, %v5131_v5  ;;  %v2139_v32 = vmul.f32 %v5851_v24, %v5132_v17  ;;  %v2146_v43 = vmul.f32 %v5851_v24, %v5133_v36  ;;  %v2153_v59 = vmul.f32 %v5851_v24, %v5134_v9  ;;  %v5156_v36 = vld [vmem:[#allocation2 + $0x169] ss:$0 sm:$0xff] }
 0x19f   :  { %v1524_v4 = vmax.f32 %v1523_v48, %v6492_v0  ;;  %v2160_v12 = vmul.f32 %v5851_v24, %v5135_v55  ;;  %v2167_v25 = vmul.f32 %v5851_v24, %v5136_v8  ;;  %v2174_v35 = vmul.f32 %v5851_v24, %v5137_v18  ;;  %v5157_v55 = vld [vmem:[#allocation2 + $0x16a] ss:$0 sm:$0xff]  ;;  %v5158_v8 = vld [vmem:[#allocation2 + $0x16b] ss:$0 sm:$0xff] }
 0x1a0   :  { %v5803_v3 = vpop.eup %5802  ;;  %v2133_v30 = vadd.f32 %v2132_v10, %v2076_v38  ;;  %v2140_v1 = vadd.f32 %v2139_v32, %v2083_v52  ;;  %v2147_v27 = vadd.f32 %v2146_v43, %v2090_v23  ;;  %v2154_v22 = vadd.f32 %v2153_v59, %v2097_v37  ;;  %v5138_v37 = vld [vmem:[#allocation2 + $0x157] ss:$0 sm:$0xff] }
 0x1a1   :  { %v6525_v21 = vmul.f32 %v5803_v3, %v6441_v53  ;;  %v6528_v56 = vmul.f32 %v5803_v3, %v6443_v42  ;;  %v6531_v5 = vmul.f32 %v5803_v3, %v6445_v54  ;;  %v6534_v46 = vmul.f32 %v5803_v3, %v6449_v19 }
 0x1a2   :  { %v6537_v17 = vmul.f32 %v5803_v3, %v6451_v28  ;;  %v6540_v38 = vmul.f32 %v5803_v3, %v6456_v61  ;;  %v6543_v52 = vmul.f32 %v5803_v3, %v6462_v6  ;;  %v6546_v53 = vmul.f32 %v5803_v3, %v6468_v47  ;;  %v5155_v28 = vld [vmem:[#allocation2 + $0x168] ss:$0 sm:$0xff] }
 0x1a3   :  { %7150 = vst [vmem:[#allocation20_spill] sm:$0xff] %v6525_v21  ;;  %7151 = vst [vmem:[#allocation21_spill] sm:$0xff] %v6528_v56  ;;  %v1525_v42 = vsub.f32 %v6473_v33, %v1524_v4  ;;  %v1528_v54 = vsub.f32 %v6475_v50, %v1524_v4  ;;  %v1531_v23 = vsub.f32 %v6478_v34, %v1524_v4  ;;  %v5159_v33 = vld [vmem:[#allocation2 + $0x16c] ss:$0 sm:$0xff]  ;;  %v5076_v56 = vld [vmem:[#allocation2 + $0x219] ss:$0 sm:$0xff] }
 0x1a4   :  { %7152 = vst [vmem:[#allocation22_spill] sm:$0xff] %v6531_v5  ;;  %7153 = vst [vmem:[#allocation23_spill] sm:$0xff] %v6534_v46  ;;  %v1534_v19 = vsub.f32 %v6480_v7, %v1524_v4  ;;  %v1537_v61 = vsub.f32 %v6482_v14, %v1524_v4  ;;  %v1540_v9 = vsub.f32 %v6484_v44, %v1524_v4  ;;  %v5160_v7 = vld [vmem:[#allocation2 + $0x16d] ss:$0 sm:$0xff]  ;;  %v5077_v21 = vld [vmem:[#allocation2 + $0x21a] ss:$0 sm:$0xff] }
 0x1a5   :  { %7154 = vst [vmem:[#allocation24_spill] sm:$0xff] %v6537_v17  ;;  %7155 = vst [vmem:[#allocation25_spill] sm:$0xff] %v6540_v38  ;;  %v1543_v6 = vsub.f32 %v6486_v13, %v1524_v4  ;;  %v1546_v47 = vsub.f32 %v6492_v0, %v1524_v4  ;;  %v1526_v18 = vmul.f32 1.442695, %v1525_v42  ;;  %v1529_v50 = vmul.f32 1.442695, %v1528_v54 }
 0x1a6   :  { %7156 = vst [vmem:[#allocation26_spill] sm:$0xff] %v6543_v52  ;;  %7157 = vst [vmem:[#allocation27_spill] sm:$0xff] %v6546_v53  ;;  %v1532_v48 = vmul.f32 1.442695, %v1531_v23  ;;  %v2161_v34 = vadd.f32 %v2160_v12, %v6497_v2  ;;  %v1535_v10 = vmul.f32 1.442695, %v1534_v19  ;;  %v2168_v14 = vadd.f32 %v2167_v25, %v6499_v20 }
 0x1a7   :  { %v1538_v32 = vmul.f32 1.442695, %v1537_v61  ;;  %v1541_v43 = vmul.f32 1.442695, %v1540_v9  ;;  %5804 = vpow2.f32 %v1526_v18  ;;  %v1544_v44 = vmul.f32 1.442695, %v1543_v6 }
 0x1a8   :  { %v1547_v59 = vmul.f32 1.442695, %v1546_v47  ;;  %v2175_v13 = vadd.f32 %v2174_v35, %v6502_v29  ;;  %v5161_v0 = vld [vmem:[#allocation2 + $0x16e] ss:$0 sm:$0xff]  ;;  %5806 = vpow2.f32 %v1529_v50  ;;  %v2181_v4 = vmul.f32 %v5851_v24, %v5138_v37  ;;  %v5162_v2 = vld [vmem:[#allocation2 + $0x16f] ss:$0 sm:$0xff] }
 0x1a9   :  { %v5852_v3 = vld [vmem:[#allocation2 + $0x68] sm:$0xff]  ;;  %5808 = vpow2.f32 %v1532_v48  ;;  %v5147_v24 = vld [vmem:[#allocation2 + $0x160] ss:$0 sm:$0xff]  ;;  %v2190_v37 = vadd.f32 %v6506_v40, %v2133_v30  ;;  %v5149_v61 = vld [vmem:[#allocation2 + $0x162] ss:$0 sm:$0xff]  ;;  %v2204_v6 = vadd.f32 %v6510_v15, %v2147_v27  ;;  %v2218_v47 = vadd.f32 %v6514_v26, %v2161_v34  ;;  %v5735_v30 = vpop.f32.mrb[36].mxu1 }
 0x1aa   :  { %v6559_v42 = vmul.f32 %v5852_v3, %v5155_v28  ;;  %v6561_v54 = vmul.f32 %v5852_v3, %v5156_v36  ;;  %v6563_v12 = vmul.f32 %v5852_v3, %v5157_v55  ;;  %v6565_v23 = vmul.f32 %v5852_v3, %v5158_v8  ;;  %v5148_v36 = vld [vmem:[#allocation2 + $0x161] ss:$0 sm:$0xff]  ;;  %v5150_v9 = vld [vmem:[#allocation2 + $0x163] ss:$0 sm:$0xff]  ;;  %v5151_v55 = vld [vmem:[#allocation2 + $0x164] ss:$0 sm:$0xff] }
 0x1ab   :  { %v6567_v20 = vmul.f32 %v5852_v3, %v5159_v33  ;;  %5810 = vpow2.f32 %v1535_v10  ;;  %v2182_v25 = vadd.f32 %v2181_v4, %v6504_v57  ;;  %v6570_v29 = vmul.f32 %v5852_v3, %v5160_v7  ;;  %v5152_v8 = vld [vmem:[#allocation2 + $0x165] ss:$0 sm:$0xff]  ;;  %v5153_v33 = vld [vmem:[#allocation2 + $0x166] ss:$0 sm:$0xff]  ;;  %1059 = vst [vmem:[#allocation2 + $0x2a8] sm:$0xff] %v5735_v30  ;;  %v915_v26 = vpop.f32.mrb[37].mxu1 }
 0x1ac   :  { %v6572_v35 = vmul.f32 %v5852_v3, %v5161_v0  ;;  %5812 = vpow2.f32 %v1538_v32  ;;  %v6574_v19 = vmul.f32 %v5852_v3, %v5162_v2  ;;  %v2197_v28 = vadd.f32 %v6508_v11, %v2140_v1  ;;  %v5154_v11 = vld [vmem:[#allocation2 + $0x167] ss:$0 sm:$0xff]  ;;  %1058 = vst [vmem:[#allocation2 + $0x2a0] sm:$0xff] %v915_v26  ;;  %v5176_v0 = vld [vmem:[#allocation2 + $0x17d] ss:$0 sm:$0xff] }
 0x1ad   :  { %5814 = vpow2.f32 %v1541_v43  ;;  %v2211_v57 = vadd.f32 %v6512_v39, %v2154_v22  ;;  %v2225_v18 = vadd.f32 %v6517_v16, %v2168_v14  ;;  %v2232_v40 = vadd.f32 %v6519_v41, %v2175_v13  ;;  %v5853_v50 = vld [vmem:[#allocation2 + $0x60] sm:$0xff]  ;;  %v5171_v39 = vld [vmem:[#allocation2 + $0x178] ss:$0 sm:$0xff]  ;;  %v5172_v22 = vld [vmem:[#allocation2 + $0x179] ss:$0 sm:$0xff]  ;;  %v5738_v41 = vpop.f32.mrb[38].mxu1 }
 0x1ae   :  { %5816 = vpow2.f32 %v1544_v44  ;;  %v2239_v1 = vadd.f32 %v6521_v49, %v2182_v25  ;;  %v2246_v48 = vmul.f32 %v5853_v50, %v5147_v24  ;;  %v2253_v15 = vmul.f32 %v5853_v50, %v5148_v36  ;;  %v5173_v16 = vld [vmem:[#allocation2 + $0x17a] ss:$0 sm:$0xff]  ;;  %v5174_v43 = vld [vmem:[#allocation2 + $0x17b] ss:$0 sm:$0xff]  ;;  %v5175_v13 = vld [vmem:[#allocation2 + $0x17c] ss:$0 sm:$0xff] }
 0x1af   :  { %5818 = vpow2.f32 %v1547_v59  ;;  %v2260_v27 = vmul.f32 %v5853_v50, %v5149_v61  ;;  %v2267_v34 = vmul.f32 %v5853_v50, %v5150_v9  ;;  %v2274_v7 = vmul.f32 %v5853_v50, %v5151_v55  ;;  %1061 = vst [vmem:[#allocation2 + $0x2b8] sm:$0xff] %v5738_v41  ;;  %v925_v4 = vpop.f32.mrb[39].mxu1  ;;  %v5177_v61 = vld [vmem:[#allocation2 + $0x17e] ss:$0 sm:$0xff]  ;;  %v5178_v9 = vld [vmem:[#allocation2 + $0x17f] ss:$0 sm:$0xff] }
 0x1b0   :  { %v2281_v10 = vmul.f32 %v5853_v50, %v5152_v8  ;;  %v2288_v32 = vmul.f32 %v5853_v50, %v5153_v33  ;;  %v2247_v49 = vadd.f32 %v2246_v48, %v2190_v37  ;;  %v2254_v14 = vadd.f32 %v2253_v15, %v2197_v28  ;;  %1060 = vst [vmem:[#allocation2 + $0x2b0] sm:$0xff] %v925_v4  ;;  %v5741_v55 = vpop.f32.mrb[40].mxu1  ;;  %v5854_v28 = vld [vmem:[#allocation2 + $0x78] sm:$0xff]  ;;  %v5163_v48 = vld [vmem:[#allocation2 + $0x170] ss:$0 sm:$0xff] }
 0x1b1   :  { %v2261_v44 = vadd.f32 %v2260_v27, %v2204_v6  ;;  %v2295_v59 = vmul.f32 %v5853_v50, %v5154_v11  ;;  %v6584_v3 = vpop.eup %5804  ;;  %v2268_v2 = vadd.f32 %v2267_v34, %v2211_v57  ;;  %v2275_v25 = vadd.f32 %v2274_v7, %v2218_v47  ;;  %1063 = vst [vmem:[#allocation2 + $0x2c8] sm:$0xff] %v5741_v55  ;;  %v935_v30 = vpop.f32.mrb[41].mxu1  ;;  %v5164_v15 = vld [vmem:[#allocation2 + $0x171] ss:$0 sm:$0xff]  ;;  %v5165_v7 = vld [vmem:[#allocation2 + $0x172] ss:$0 sm:$0xff] }
 0x1b2   :  { %v2282_v24 = vadd.f32 %v2281_v10, %v2225_v18  ;;  %v2289_v36 = vadd.f32 %v2288_v32, %v2232_v40  ;;  %v6586_v8 = vpop.eup %5806  ;;  %v2417_v6 = vmul.f32 %v5854_v28, %v5171_v39  ;;  %v2424_v33 = vmul.f32 %v5854_v28, %v5172_v22  ;;  %1062 = vst [vmem:[#allocation2 + $0x2c0] sm:$0xff] %v935_v30  ;;  %v5744_v27 = vpop.f32.mrb[42].mxu1  ;;  %v5166_v10 = vld [vmem:[#allocation2 + $0x173] ss:$0 sm:$0xff]  ;;  %v5168_v4 = vld [vmem:[#allocation2 + $0x175] ss:$0 sm:$0xff] }
 0x1b3   :  { %v2296_v37 = vadd.f32 %v2295_v59, %v2239_v1  ;;  %v2431_v11 = vmul.f32 %v5854_v28, %v5173_v16  ;;  %v6588_v50 = vpop.eup %5808  ;;  %v1549_v57 = vadd.f32 %v6586_v8, %v6584_v3  ;;  %v2438_v47 = vmul.f32 %v5854_v28, %v5174_v43  ;;  %1065 = vst [vmem:[#allocation2 + $0x2d8] sm:$0xff] %v5744_v27  ;;  %v945_v32 = vpop.f32.mrb[43].mxu1  ;;  %v5054_v52 = vld [vmem:[#allocation2 + $0x203] ss:$0 sm:$0xff] }
 0x1b4   :  { %v2445_v18 = vmul.f32 %v5854_v28, %v5175_v13  ;;  %v2452_v40 = vmul.f32 %v5854_v28, %v5176_v0  ;;  %v2459_v1 = vmul.f32 %v5854_v28, %v5177_v61  ;;  %v2466_v39 = vmul.f32 %v5854_v28, %v5178_v9  ;;  %v5167_v0 = vld [vmem:[#allocation2 + $0x174] ss:$0 sm:$0xff]  ;;  %v5169_v61 = vld [vmem:[#allocation2 + $0x176] ss:$0 sm:$0xff]  ;;  %1064 = vst [vmem:[#allocation2 + $0x2d0] sm:$0xff] %v945_v32 }
 0x1b5   :  { %v6592_v26 = vpop.eup %5810  ;;  %v2304_v22 = vadd.f32 %v6559_v42, %v2247_v49  ;;  %v2311_v34 = vadd.f32 %v6561_v54, %v2254_v14  ;;  %v1550_v43 = vadd.f32 %v6588_v50, %v1549_v57  ;;  %v2318_v41 = vadd.f32 %v6563_v12, %v2261_v44  ;;  %v5855_v9 = vld [vmem:[#allocation2 + $0x70] sm:$0xff] }
 0x1b6   :  { %v6596_v16 = vpop.eup %5812  ;;  %v2325_v59 = vadd.f32 %v6565_v23, %v2268_v2  ;;  %v2332_v13 = vadd.f32 %v6567_v20, %v2275_v25  ;;  %v2339_v54 = vadd.f32 %v6570_v29, %v2282_v24  ;;  %v2346_v49 = vadd.f32 %v6572_v35, %v2289_v36  ;;  %v5170_v2 = vld [vmem:[#allocation2 + $0x177] ss:$0 sm:$0xff] }
 0x1b7   :  { %v6602_v42 = vpop.eup %5814  ;;  %v2353_v14 = vadd.f32 %v6574_v19, %v2296_v37  ;;  %v2360_v55 = vmul.f32 %v5855_v9, %v5163_v48  ;;  %v1551_v12 = vadd.f32 %v6592_v26, %v1550_v43  ;;  %v2367_v23 = vmul.f32 %v5855_v9, %v5164_v15  ;;  %v5315_v43 = vld [vmem:[#allocation2 + $0x288] ss:$0 sm:$0xff] }
 0x1b8   :  { %v6607_v28 = vpop.eup %5816  ;;  %v2374_v20 = vmul.f32 %v5855_v9, %v5165_v7  ;;  %v2381_v44 = vmul.f32 %v5855_v9, %v5166_v10  ;;  %v2388_v57 = vmul.f32 %v5855_v9, %v5167_v0  ;;  %v2395_v27 = vmul.f32 %v5855_v9, %v5168_v4  ;;  %v5316_v0 = vld [vmem:[#allocation2 + $0x289] ss:$0 sm:$0xff] }
 0x1b9   :  { %v6610_v25 = vpop.eup %5818  ;;  %v2361_v30 = vadd.f32 %v2360_v55, %v2304_v22  ;;  %v2402_v29 = vmul.f32 %v5855_v9, %v5169_v61  ;;  %v1552_v35 = vadd.f32 %v6596_v16, %v1551_v12  ;;  %v2368_v24 = vadd.f32 %v2367_v23, %v2311_v34  ;;  %v5321_v55 = vld [vmem:[#allocation2 + $0x28e] ss:$0 sm:$0xff] }
 0x1ba   :  { %v2375_v19 = vadd.f32 %v2374_v20, %v2318_v41  ;;  %v2382_v36 = vadd.f32 %v2381_v44, %v2325_v59  ;;  %v2389_v37 = vadd.f32 %v2388_v57, %v2332_v13  ;;  %v2396_v48 = vadd.f32 %v2395_v27, %v2339_v54  ;;  %v5317_v54 = vld [vmem:[#allocation2 + $0x28a] ss:$0 sm:$0xff]  ;;  %v5322_v20 = vld [vmem:[#allocation2 + $0x28f] ss:$0 sm:$0xff]  ;;  %v5310_v27 = vld [vmem:[#allocation2 + $0x283] ss:$0 sm:$0xff] }
 0x1bb   :  { %v2403_v32 = vadd.f32 %v2402_v29, %v2346_v49  ;;  %v2409_v53 = vmul.f32 %v5855_v9, %v5170_v2  ;;  %v1553_v15 = vadd.f32 %v6602_v42, %v1552_v35  ;;  %v6614_v7 = vadd.f32 %v2417_v6, %v2361_v30  ;;  %v5319_v9 = vld [vmem:[#allocation2 + $0x28c] ss:$0 sm:$0xff]  ;;  %v5309_v2 = vld [vmem:[#allocation2 + $0x282] ss:$0 sm:$0xff]  ;;  %v5331_v29 = vld [vmem:[#allocation2 + $0x298] ss:$0 sm:$0xff] }
 0x1bc   :  { %v6616_v10 = vadd.f32 %v2424_v33, %v2368_v24  ;;  %v6618_v22 = vadd.f32 %v2431_v11, %v2375_v19  ;;  %v6620_v61 = vadd.f32 %v2438_v47, %v2382_v36  ;;  %v6622_v34 = vadd.f32 %v2445_v18, %v2389_v37  ;;  %v5307_v11 = vld [vmem:[#allocation2 + $0x280] ss:$0 sm:$0xff]  ;;  %v5318_v47 = vld [vmem:[#allocation2 + $0x28b] ss:$0 sm:$0xff]  ;;  %v5308_v18 = vld [vmem:[#allocation2 + $0x281] ss:$0 sm:$0xff] }
 0x1bd   :  { %v2410_v4 = vadd.f32 %v2409_v53, %v2353_v14  ;;  %v6624_v41 = vadd.f32 %v2452_v40, %v2396_v48  ;;  %v1554_v59 = vadd.f32 %v6607_v28, %v1553_v15  ;;  %v6627_v13 = vadd.f32 %v2459_v1, %v2403_v32  ;;  %v5320_v1 = vld [vmem:[#allocation2 + $0x28d] ss:$0 sm:$0xff]  ;;  %v5332_v35 = vld [vmem:[#allocation2 + $0x299] ss:$0 sm:$0xff]  ;;  %v5311_v48 = vld [vmem:[#allocation2 + $0x284] ss:$0 sm:$0xff] }
 0x1be   :  { %v2468_v6 = vmax.f32 %v6614_v7, %v6616_v10  ;;  %v3528_v33 = vmul.f32 %v5315_v43, %v6387_v58  ;;  %v3534_v53 = vmul.f32 %v5316_v0, %v6390_v51  ;;  %v3541_v23 = vmul.f32 %v5317_v54, %v6393_v62  ;;  %v5312_v32 = vld [vmem:[#allocation2 + $0x285] ss:$0 sm:$0xff]  ;;  %v7158_v15 = vld [vmem:[#allocation19_spill] sm:$0xff] }
 0x1bf   :  { %v6632_v49 = vadd.f32 %v2466_v39, %v2410_v4  ;;  %v1555_v40 = vadd.f32 %v6610_v25, %v1554_v59  ;;  %v3471_v44 = vmul.f32 %v5307_v11, %v6387_v58  ;;  %v3548_v30 = vmul.f32 %v5318_v47, %v6396_v63 }
 0x1c0   :  { %v2469_v14 = vmax.f32 %v2468_v6, %v6618_v22  ;;  %v3535_v12 = vadd.f32 %v3534_v53, %v3528_v33  ;;  %v3477_v57 = vmul.f32 %v5308_v18, %v6390_v51  ;;  %v3555_v19 = vmul.f32 %v5319_v9, %v6399_v45  ;;  %v5313_v6 = vld [vmem:[#allocation2 + $0x286] ss:$0 sm:$0xff]  ;;  %v5333_v33 = vld [vmem:[#allocation2 + $0x29a] ss:$0 sm:$0xff]  ;;  %v5314_v53 = vld [vmem:[#allocation2 + $0x287] ss:$0 sm:$0xff] }
 0x1c1   :  { %5820 = vrcp.f32 %v1555_v40  ;;  %v3562_v36 = vmul.f32 %v5320_v1, %v6402_v60  ;;  %v3569_v37 = vmul.f32 %v5321_v55, %v6405_v31  ;;  %v6647_v0 = vmul.f32 %v5322_v20, %v7158_v15  ;;  %v5323_v40 = vld [vmem:[#allocation2 + $0x290] ss:$0 sm:$0xff] }
 0x1c2   :  { %v2470_v39 = vmax.f32 %v2469_v14, %v6620_v61  ;;  %v3542_v24 = vadd.f32 %v3541_v23, %v3535_v12  ;;  %v3478_v4 = vadd.f32 %v3477_v57, %v3471_v44  ;;  %v3484_v59 = vmul.f32 %v5309_v2, %v6393_v62  ;;  %v5334_v12 = vld [vmem:[#allocation2 + $0x29b] ss:$0 sm:$0xff]  ;;  %v5324_v23 = vld [vmem:[#allocation2 + $0x291] ss:$0 sm:$0xff]  ;;  %v5336_v57 = vld [vmem:[#allocation2 + $0x29d] ss:$0 sm:$0xff] }
 0x1c3   :  { %v3491_v11 = vmul.f32 %v5310_v27, %v6396_v63  ;;  %v3642_v47 = vmul.f32 %v5331_v29, %v6387_v58  ;;  %v3648_v18 = vmul.f32 %v5332_v35, %v6390_v51  ;;  %v3498_v1 = vmul.f32 %v5311_v48, %v6399_v45 }
 0x1c4   :  { %v2471_v43 = vmax.f32 %v2470_v39, %v6622_v34  ;;  %v3549_v54 = vadd.f32 %v3548_v30, %v3542_v24  ;;  %v3485_v9 = vadd.f32 %v3484_v59, %v3478_v4  ;;  %v6656_v55 = vmul.f32 %v5312_v32, %v6402_v60  ;;  %v5335_v30 = vld [vmem:[#allocation2 + $0x29c] ss:$0 sm:$0xff]  ;;  %v5337_v24 = vld [vmem:[#allocation2 + $0x29e] ss:$0 sm:$0xff] }
 0x1c5   :  { %v6659_v44 = vmul.f32 %v5313_v6, %v6405_v31  ;;  %v3649_v2 = vadd.f32 %v3648_v18, %v3642_v47  ;;  %v3655_v39 = vmul.f32 %v5333_v33, %v6393_v62  ;;  %v6664_v35 = vmul.f32 %v5314_v53, %v7158_v15  ;;  %v5747_v18 = vpop.f32.mrb[44].mxu1 }
 0x1c6   :  { %v2472_v14 = vmax.f32 %v2471_v43, %v6624_v41  ;;  %v3556_v20 = vadd.f32 %v3555_v19, %v3549_v54  ;;  %v3492_v29 = vadd.f32 %v3491_v11, %v3485_v9  ;;  %v3585_v48 = vmul.f32 %v5323_v40, %v6387_v58  ;;  %1067 = vst [vmem:[#allocation2 + $0x2e8] sm:$0xff] %v5747_v18  ;;  %v5063_v18 = vld [vmem:[#allocation2 + $0x20c] ss:$0 sm:$0xff] }
 0x1c7   :  { %7159 = vst [vmem:[#allocation19_spill] sm:$0xff] %v6664_v35  ;;  %v3656_v43 = vadd.f32 %v3655_v39, %v3649_v2  ;;  %v3662_v19 = vmul.f32 %v5334_v12, %v6396_v63  ;;  %v3591_v4 = vmul.f32 %v5324_v23, %v6390_v51  ;;  %v6675_v33 = vmul.f32 %v5335_v30, %v6399_v45  ;;  %v5325_v12 = vld [vmem:[#allocation2 + $0x292] ss:$0 sm:$0xff]  ;;  %v5326_v23 = vld [vmem:[#allocation2 + $0x293] ss:$0 sm:$0xff] }
 0x1c8   :  { %v2473_v27 = vmax.f32 %v2472_v14, %v6627_v13  ;;  %v3563_v32 = vadd.f32 %v3562_v36, %v3556_v20  ;;  %v6672_v6 = vadd.f32 %v3498_v1, %v3492_v29  ;;  %v6678_v54 = vmul.f32 %v5336_v57, %v6402_v60  ;;  %v955_v20 = vpop.f32.mrb[45].mxu1  ;;  %v5060_v29 = vld [vmem:[#allocation2 + $0x209] ss:$0 sm:$0xff]  ;;  %v5052_v1 = vld [vmem:[#allocation2 + $0x201] ss:$0 sm:$0xff] }
 0x1c9   :  { %v6682_v53 = vadd.f32 %v3662_v19, %v3656_v43  ;;  %v6685_v36 = vmul.f32 %v5337_v24, %v6405_v31  ;;  %v6687_v47 = vadd.f32 %v3591_v4, %v3585_v48  ;;  %1066 = vst [vmem:[#allocation2 + $0x2e0] sm:$0xff] %v955_v20  ;;  %v5750_v24 = vpop.f32.mrb[46].mxu1  ;;  %v5062_v43 = vld [vmem:[#allocation2 + $0x20b] ss:$0 sm:$0xff]  ;;  %v5065_v20 = vld [vmem:[#allocation2 + $0x20e] ss:$0 sm:$0xff] }
 0x1ca   :  { %v6670_v59 = vmax.f32 %v2473_v27, %v6632_v49  ;;  %v6680_v11 = vadd.f32 %v3569_v37, %v3563_v32  ;;  %v5059_v27 = vld [vmem:[#allocation2 + $0x208] ss:$0 sm:$0xff]  ;;  %1069 = vst [vmem:[#allocation2 + $0x2f8] sm:$0xff] %v5750_v24  ;;  %v5066_v37 = vld [vmem:[#allocation2 + $0x20f] ss:$0 sm:$0xff] }
 0x1cb   :  { %7160 = vst [vmem:[#allocation28_spill] sm:$0xff] %v6685_v36  ;;  %v5821_v40 = vpop.eup %5820  ;;  %v5068_v31 = vld [vmem:[#allocation2 + $0x211] ss:$0 sm:$0xff]  ;;  %v5082_v60 = vld [vmem:[#allocation2 + $0x21f] ss:$0 sm:$0xff] }
 0x1cc   :  { %v6698_v2 = vmul.f32 %v5821_v40, %v6584_v3  ;;  %v6701_v39 = vmul.f32 %v5821_v40, %v6586_v8  ;;  %v6704_v30 = vmul.f32 %v5821_v40, %v6588_v50  ;;  %v6707_v57 = vmul.f32 %v5821_v40, %v6592_v26  ;;  %v5061_v50 = vld [vmem:[#allocation2 + $0x20a] ss:$0 sm:$0xff]  ;;  %v965_v26 = vpop.f32.mrb[47].mxu1  ;;  %v5072_v35 = vld [vmem:[#allocation2 + $0x215] ss:$0 sm:$0xff] }
 0x1cd   :  { %v6710_v48 = vmul.f32 %v5821_v40, %v6596_v16  ;;  %v6713_v32 = vmul.f32 %v5821_v40, %v6602_v42  ;;  %v6716_v3 = vmul.f32 %v5821_v40, %v6607_v28  ;;  %v6719_v8 = vmul.f32 %v5821_v40, %v6610_v25  ;;  %v5064_v16 = vld [vmem:[#allocation2 + $0x20d] ss:$0 sm:$0xff]  ;;  %1068 = vst [vmem:[#allocation2 + $0x2f0] sm:$0xff] %v965_v26  ;;  %v5053_v26 = vld [vmem:[#allocation2 + $0x202] ss:$0 sm:$0xff] }
 0x1ce   :  { %v1626_v19 = vmul.f32 %v5059_v27, %v6698_v2  ;;  %v1632_v4 = vmul.f32 %v5060_v29, %v6701_v39  ;;  %v6724_v42 = vmul.f32 %v5325_v12, %v6393_v62  ;;  %v6727_v28 = vmul.f32 %v5326_v23, %v6396_v63  ;;  %v5051_v29 = vld [vmem:[#allocation2 + $0x200] ss:$0 sm:$0xff]  ;;  %v5078_v63 = vld [vmem:[#allocation2 + $0x21b] ss:$0 sm:$0xff]  ;;  %v5079_v62 = vld [vmem:[#allocation2 + $0x21c] ss:$0 sm:$0xff] }
 0x1cf   :  { %v1639_v25 = vmul.f32 %v5061_v50, %v6704_v30  ;;  %v1646_v40 = vmul.f32 %v5062_v43, %v6707_v57  ;;  %v1653_v24 = vmul.f32 %v5063_v18, %v6710_v48  ;;  %v1660_v27 = vmul.f32 %v5064_v16, %v6713_v32  ;;  %v5055_v50 = vld [vmem:[#allocation2 + $0x204] ss:$0 sm:$0xff] }
 0x1d0   :  { %7161 = vst [vmem:[#allocation29_spill] sm:$0xff] %v6727_v28  ;;  %v1633_v9 = vadd.f32 %v1632_v4, %v1626_v19  ;;  %v6734_v14 = vmul.f32 %v5065_v20, %v6716_v3  ;;  %v1570_v12 = vmul.f32 %v5051_v29, %v6698_v2  ;;  %v1576_v23 = vmul.f32 %v5052_v1, %v6701_v39  ;;  %v5056_v19 = vld [vmem:[#allocation2 + $0x205] ss:$0 sm:$0xff]  ;;  %v5057_v4 = vld [vmem:[#allocation2 + $0x206] ss:$0 sm:$0xff] }
 0x1d1   :  { %v6739_v43 = vmul.f32 %v5066_v37, %v6719_v8  ;;  %v1583_v18 = vmul.f32 %v5053_v26, %v6704_v30  ;;  %v1590_v16 = vmul.f32 %v5054_v52, %v6707_v57  ;;  %v1597_v38 = vmul.f32 %v5055_v50, %v6710_v48  ;;  %v5075_v20 = vld [vmem:[#allocation2 + $0x218] ss:$0 sm:$0xff]  ;;  %v5058_v1 = vld [vmem:[#allocation2 + $0x207] ss:$0 sm:$0xff]  ;;  %v5074_v28 = vld [vmem:[#allocation2 + $0x217] ss:$0 sm:$0xff] }
 0x1d2   :  { %v1640_v17 = vadd.f32 %v1639_v25, %v1633_v9  ;;  %v1577_v46 = vadd.f32 %v1576_v23, %v1570_v12  ;;  %v1604_v29 = vmul.f32 %v5056_v19, %v6713_v32  ;;  %v1740_v5 = vmul.f32 %v5075_v20, %v6698_v2  ;;  %v5080_v19 = vld [vmem:[#allocation2 + $0x21d] ss:$0 sm:$0xff]  ;;  %v5067_v20 = vld [vmem:[#allocation2 + $0x210] ss:$0 sm:$0xff] }
 0x1d3   :  { %v1611_v37 = vmul.f32 %v5057_v4, %v6716_v3  ;;  %v6748_v26 = vmul.f32 %v5058_v1, %v6719_v8  ;;  %v1746_v52 = vmul.f32 %v5076_v56, %v6701_v39  ;;  %v1753_v50 = vmul.f32 %v5077_v21, %v6704_v30  ;;  %v5081_v1 = vld [vmem:[#allocation2 + $0x21e] ss:$0 sm:$0xff] }
 0x1d4   :  { %v1647_v9 = vadd.f32 %v1646_v40, %v1640_v17  ;;  %v1584_v25 = vadd.f32 %v1583_v18, %v1577_v46  ;;  %v1760_v12 = vmul.f32 %v5078_v63, %v6707_v57  ;;  %v1767_v23 = vmul.f32 %v5079_v62, %v6710_v48  ;;  %v5069_v62 = vld [vmem:[#allocation2 + $0x212] ss:$0 sm:$0xff]  ;;  %v5070_v17 = vld [vmem:[#allocation2 + $0x213] ss:$0 sm:$0xff] }
 0x1d5   :  { %v1747_v51 = vadd.f32 %v1746_v52, %v1740_v5  ;;  %v1774_v4 = vmul.f32 %v5080_v19, %v6713_v32  ;;  %v1683_v56 = vmul.f32 %v5067_v20, %v6698_v2  ;;  %v1689_v21 = vmul.f32 %v5068_v31, %v6701_v39  ;;  %v5071_v19 = vld [vmem:[#allocation2 + $0x214] ss:$0 sm:$0xff] }
 0x1d6   :  { %v1654_v58 = vadd.f32 %v1653_v24, %v1647_v9  ;;  %v1591_v36 = vadd.f32 %v1590_v16, %v1584_v25  ;;  %v1781_v46 = vmul.f32 %v5081_v1, %v6716_v3  ;;  %v6759_v63 = vmul.f32 %v5082_v60, %v6719_v8  ;;  %v5091_v16 = vld [vmem:[#allocation2 + $0x228] ss:$0 sm:$0xff]  ;;  %v5092_v9 = vld [vmem:[#allocation2 + $0x229] ss:$0 sm:$0xff]  ;;  %v5073_v1 = vld [vmem:[#allocation2 + $0x216] ss:$0 sm:$0xff] }
 0x1d7   :  { %v1754_v40 = vadd.f32 %v1753_v50, %v1747_v51  ;;  %v1690_v18 = vadd.f32 %v1689_v21, %v1683_v56  ;;  %v1696_v5 = vmul.f32 %v5069_v62, %v6704_v30  ;;  %v1703_v52 = vmul.f32 %v5070_v17, %v6707_v57  ;;  %v5094_v17 = vld [vmem:[#allocation2 + $0x22b] ss:$0 sm:$0xff] }
 0x1d8   :  { %v1661_v20 = vadd.f32 %v1660_v27, %v1654_v58  ;;  %v1598_v45 = vadd.f32 %v1597_v38, %v1591_v36  ;;  %v1710_v31 = vmul.f32 %v5071_v19, %v6710_v48  ;;  %v1717_v24 = vmul.f32 %v5072_v35, %v6713_v32  ;;  %v5093_v36 = vld [vmem:[#allocation2 + $0x22a] ss:$0 sm:$0xff] }
 0x1d9   :  { %v1761_v60 = vadd.f32 %v1760_v12, %v1754_v40  ;;  %v1697_v25 = vadd.f32 %v1696_v5, %v1690_v18  ;;  %v1854_v51 = vmul.f32 %v5091_v16, %v6698_v2  ;;  %v1860_v50 = vmul.f32 %v5092_v9, %v6701_v39  ;;  %v5095_v40 = vld [vmem:[#allocation2 + $0x22c] ss:$0 sm:$0xff]  ;;  %v5084_v9 = vld [vmem:[#allocation2 + $0x221] ss:$0 sm:$0xff] }
 0x1da   :  { %v1668_v56 = vadd.f32 %v6734_v14, %v1661_v20  ;;  %v1605_v21 = vadd.f32 %v1604_v29, %v1598_v45  ;;  %v1724_v58 = vmul.f32 %v5073_v1, %v6716_v3  ;;  %v1731_v38 = vmul.f32 %v5074_v28, %v6719_v8  ;;  %v5096_v45 = vld [vmem:[#allocation2 + $0x22d] ss:$0 sm:$0xff] }
 0x1db   :  { %v1768_v27 = vadd.f32 %v1767_v23, %v1761_v60  ;;  %v1704_v35 = vadd.f32 %v1703_v52, %v1697_v25  ;;  %v1861_v62 = vadd.f32 %v1860_v50, %v1854_v51  ;;  %v1867_v12 = vmul.f32 %v5093_v36, %v6704_v30  ;;  %v5097_v23 = vld [vmem:[#allocation2 + $0x22e] ss:$0 sm:$0xff]  ;;  %v5083_v52 = vld [vmem:[#allocation2 + $0x220] ss:$0 sm:$0xff]  ;;  %v5087_v36 = vld [vmem:[#allocation2 + $0x224] ss:$0 sm:$0xff] }
 0x1dc   :  { %v1675_v18 = vadd.f32 %v6739_v43, %v1668_v56  ;;  %v1612_v5 = vadd.f32 %v1611_v37, %v1605_v21  ;;  %v1874_v19 = vmul.f32 %v5094_v17, %v6707_v57  ;;  %v1881_v14 = vmul.f32 %v5095_v40, %v6710_v48  ;;  %v5098_v43 = vld [vmem:[#allocation2 + $0x22f] ss:$0 sm:$0xff]  ;;  %v5085_v56 = vld [vmem:[#allocation2 + $0x222] ss:$0 sm:$0xff]  ;;  %v5086_v21 = vld [vmem:[#allocation2 + $0x223] ss:$0 sm:$0xff] }
 0x1dd   :  { %v1775_v29 = vadd.f32 %v1774_v4, %v1768_v27  ;;  %v1711_v20 = vadd.f32 %v1710_v31, %v1704_v35  ;;  %v1868_v16 = vadd.f32 %v1867_v12, %v1861_v62  ;;  %v1888_v28 = vmul.f32 %v5096_v45, %v6713_v32  ;;  %v5088_v12 = vld [vmem:[#allocation2 + $0x225] ss:$0 sm:$0xff] }
 0x1de   :  { %1677 = vst [vmem:[#allocation8 + $0x8] sm:$0xff] %v1675_v18  ;;  %v1619_v60 = vadd.f32 %v6748_v26, %v1612_v5  ;;  %v1895_v25 = vmul.f32 %v5097_v23, %v6716_v3  ;;  %v1797_v37 = vmul.f32 %v5083_v52, %v6698_v2  ;;  %v1803_v1 = vmul.f32 %v5084_v9, %v6701_v39  ;;  %v5089_v18 = vld [vmem:[#allocation2 + $0x226] ss:$0 sm:$0xff]  ;;  %v5107_v5 = vld [vmem:[#allocation2 + $0x238] ss:$0 sm:$0xff] }
 0x1df   :  { %v1782_v51 = vadd.f32 %v1781_v46, %v1775_v29  ;;  %v1718_v50 = vadd.f32 %v1717_v24, %v1711_v20  ;;  %v1875_v4 = vadd.f32 %v1874_v19, %v1868_v16  ;;  %v1902_v31 = vmul.f32 %v5098_v43, %v6719_v8  ;;  %v5108_v19 = vld [vmem:[#allocation2 + $0x239] ss:$0 sm:$0xff]  ;;  %v5090_v20 = vld [vmem:[#allocation2 + $0x227] ss:$0 sm:$0xff]  ;;  %v5109_v52 = vld [vmem:[#allocation2 + $0x23a] ss:$0 sm:$0xff] }
 0x1e0   :  { %1620 = vst [vmem:[#allocation8] sm:$0xff] %v1619_v60  ;;  %v1804_v27 = vadd.f32 %v1803_v1, %v1797_v37  ;;  %v1810_v35 = vmul.f32 %v5085_v56, %v6704_v30  ;;  %v1817_v26 = vmul.f32 %v5086_v21, %v6707_v57  ;;  %v1824_v62 = vmul.f32 %v5087_v36, %v6710_v48  ;;  %v5111_v43 = vld [vmem:[#allocation2 + $0x23c] ss:$0 sm:$0xff]  ;;  %v5099_v56 = vld [vmem:[#allocation2 + $0x230] ss:$0 sm:$0xff] }
 0x1e1   :  { %v1789_v17 = vadd.f32 %v6759_v63, %v1782_v51  ;;  %v1725_v40 = vadd.f32 %v1724_v58, %v1718_v50  ;;  %v1882_v46 = vadd.f32 %v1881_v14, %v1875_v4  ;;  %v1831_v24 = vmul.f32 %v5088_v12, %v6713_v32  ;;  %v5110_v14 = vld [vmem:[#allocation2 + $0x23b] ss:$0 sm:$0xff]  ;;  %v5112_v4 = vld [vmem:[#allocation2 + $0x23d] ss:$0 sm:$0xff]  ;;  %v5100_v21 = vld [vmem:[#allocation2 + $0x231] ss:$0 sm:$0xff] }
 0x1e2   :  { %v1811_v45 = vadd.f32 %v1810_v35, %v1804_v27  ;;  %v1838_v29 = vmul.f32 %v5089_v18, %v6716_v3  ;;  %v1968_v16 = vmul.f32 %v5107_v5, %v6698_v2  ;;  %v1974_v23 = vmul.f32 %v5108_v19, %v6701_v39  ;;  %v5114_v27 = vld [vmem:[#allocation2 + $0x23f] ss:$0 sm:$0xff]  ;;  %v5101_v18 = vld [vmem:[#allocation2 + $0x232] ss:$0 sm:$0xff]  ;;  %v5102_v5 = vld [vmem:[#allocation2 + $0x233] ss:$0 sm:$0xff] }
 0x1e3   :  { %1791 = vst [vmem:[#allocation8 + $0x18] sm:$0xff] %v1789_v17  ;;  %v1732_v9 = vadd.f32 %v1731_v38, %v1725_v40  ;;  %v1889_v60 = vadd.f32 %v1888_v28, %v1882_v46  ;;  %v1845_v63 = vmul.f32 %v5090_v20, %v6719_v8  ;;  %v1981_v58 = vmul.f32 %v5109_v52, %v6704_v30  ;;  %v5113_v28 = vld [vmem:[#allocation2 + $0x23e] ss:$0 sm:$0xff] }
 0x1e4   :  { %v1818_v37 = vadd.f32 %v1817_v26, %v1811_v45  ;;  %v1975_v1 = vadd.f32 %v1974_v23, %v1968_v16  ;;  %v1988_v51 = vmul.f32 %v5110_v14, %v6707_v57  ;;  %v1995_v50 = vmul.f32 %v5111_v43, %v6710_v48  ;;  %v5103_v16 = vld [vmem:[#allocation2 + $0x234] ss:$0 sm:$0xff]  ;;  %v5104_v23 = vld [vmem:[#allocation2 + $0x235] ss:$0 sm:$0xff] }
 0x1e5   :  { %1734 = vst [vmem:[#allocation8 + $0x10] sm:$0xff] %v1732_v9  ;;  %v1896_v36 = vadd.f32 %v1895_v25, %v1889_v60  ;;  %v2002_v38 = vmul.f32 %v5112_v4, %v6713_v32  ;;  %v1911_v35 = vmul.f32 %v5099_v56, %v6698_v2  ;;  %v1917_v12 = vmul.f32 %v5100_v21, %v6701_v39  ;;  %v5105_v4 = vld [vmem:[#allocation2 + $0x236] ss:$0 sm:$0xff] }
 0x1e6   :  { %v1825_v17 = vadd.f32 %v1824_v62, %v1818_v37  ;;  %v1982_v26 = vadd.f32 %v1981_v58, %v1975_v1  ;;  %v2009_v40 = vmul.f32 %v5113_v28, %v6716_v3  ;;  %v2016_v46 = vmul.f32 %v5114_v27, %v6719_v8  ;;  %v5338_v28 = vld [vmem:[#allocation2 + $0x29f] ss:$0 sm:$0xff] }
 0x1e7   :  { %v1903_v19 = vadd.f32 %v1902_v31, %v1896_v36  ;;  %v1918_v45 = vadd.f32 %v1917_v12, %v1911_v35  ;;  %v1924_v25 = vmul.f32 %v5101_v18, %v6704_v30  ;;  %v1931_v20 = vmul.f32 %v5102_v5, %v6707_v57  ;;  %v5329_v18 = vld [vmem:[#allocation2 + $0x296] ss:$0 sm:$0xff]  ;;  %v5330_v5 = vld [vmem:[#allocation2 + $0x297] ss:$0 sm:$0xff] }
 0x1e8   :  { %v1832_v52 = vadd.f32 %v1831_v24, %v1825_v17  ;;  %v1989_v2 = vadd.f32 %v1988_v51, %v1982_v26  ;;  %v1938_v39 = vmul.f32 %v5103_v16, %v6710_v48  ;;  %v1945_v62 = vmul.f32 %v5104_v23, %v6713_v32  ;;  %v5339_v16 = vld [vmem:[#allocation2 + $0x2a0] ss:$0 sm:$0xff] }
 0x1e9   :  { %1905 = vst [vmem:[#allocation8 + $0x28] sm:$0xff] %v1903_v19  ;;  %v1925_v9 = vadd.f32 %v1924_v25, %v1918_v45  ;;  %v7162_v60 = vsub.f32 %v6614_v7, %v6670_v59  ;;  %v7163_v31 = vsub.f32 %v6616_v10, %v6670_v59  ;;  %v7164_v57 = vsub.f32 %v6618_v22, %v6670_v59  ;;  %v7169_v45 = vld [vmem:[#allocation28_spill] sm:$0xff] }
 0x1ea   :  { %v1839_v24 = vadd.f32 %v1838_v29, %v1832_v52  ;;  %v1996_v43 = vadd.f32 %v1995_v50, %v1989_v2  ;;  %v7165_v48 = vsub.f32 %v6620_v61, %v6670_v59  ;;  %v2487_v37 = vsub.f32 %v6622_v34, %v6670_v59  ;;  %v5106_v29 = vld [vmem:[#allocation2 + $0x237] ss:$0 sm:$0xff]  ;;  %v7171_v52 = vld [vmem:[#allocation17_spill] sm:$0xff] }
 0x1eb   :  { %v2476_v58 = vmul.f32 1.442695, %v7162_v60  ;;  %v2479_v30 = vmul.f32 1.442695, %v7163_v31  ;;  %v2482_v14 = vmul.f32 1.442695, %v7164_v57  ;;  %v1932_v1 = vadd.f32 %v1931_v20, %v1925_v9 }
 0x1ec   :  { %v2485_v32 = vmul.f32 1.442695, %v7165_v48  ;;  %v2490_v7 = vsub.f32 %v6624_v41, %v6670_v59  ;;  %v2493_v10 = vsub.f32 %v6627_v13, %v6670_v59  ;;  %v1846_v51 = vadd.f32 %v1845_v63, %v1839_v24  ;;  %v5350_v9 = vld [vmem:[#allocation2 + $0x2ab] ss:$0 sm:$0xff]  ;;  %v5351_v60 = vld [vmem:[#allocation2 + $0x2ac] ss:$0 sm:$0xff] }
 0x1ed   :  { %5822 = vpow2.f32 %v2476_v58  ;;  %v2003_v22 = vadd.f32 %v2002_v38, %v1996_v43  ;;  %v2488_v50 = vmul.f32 1.442695, %v2487_v37  ;;  %v1939_v56 = vadd.f32 %v1938_v39, %v1932_v1  ;;  %v7172_v39 = vld [vmem:[#allocation13_spill] sm:$0xff]  ;;  %v5340_v58 = vld [vmem:[#allocation2 + $0x2a1] ss:$0 sm:$0xff]  ;;  %v7173_v57 = vld [vmem:[#allocation18_spill] sm:$0xff] }
 0x1ee   :  { %5824 = vpow2.f32 %v2479_v30  ;;  %v1952_v61 = vmul.f32 %v5105_v4, %v6716_v3  ;;  %v1959_v21 = vmul.f32 %v5106_v29, %v6719_v8  ;;  %1848 = vst [vmem:[#allocation8 + $0x20] sm:$0xff] %v1846_v51  ;;  %v2491_v36 = vmul.f32 1.442695, %v2490_v7  ;;  %v5327_v8 = vld [vmem:[#allocation2 + $0x294] ss:$0 sm:$0xff] }
 0x1ef   :  { %5826 = vpow2.f32 %v2482_v14  ;;  %v2010_v34 = vadd.f32 %v2009_v40, %v2003_v22  ;;  %v2496_v41 = vsub.f32 %v6632_v49, %v6670_v59  ;;  %v3577_v13 = vadd.f32 %v6647_v0, %v6680_v11  ;;  %v5347_v59 = vld [vmem:[#allocation2 + $0x2a8] ss:$0 sm:$0xff]  ;;  %v7167_v40 = vld [vmem:[#allocation16_spill] sm:$0xff]  ;;  %v5352_v43 = vld [vmem:[#allocation2 + $0x2ad] ss:$0 sm:$0xff] }
 0x1f0   :  { %v1946_v63 = vadd.f32 %v1945_v62, %v1939_v56  ;;  %5828 = vpow2.f32 %v2485_v32  ;;  %v3506_v38 = vadd.f32 %v6656_v55, %v6672_v6  ;;  %v3670_v3 = vadd.f32 %v6675_v33, %v6682_v53  ;;  %v5328_v55 = vld [vmem:[#allocation2 + $0x295] ss:$0 sm:$0xff]  ;;  %v5348_v6 = vld [vmem:[#allocation2 + $0x2a9] ss:$0 sm:$0xff]  ;;  %v5353_v48 = vld [vmem:[#allocation2 + $0x2ae] ss:$0 sm:$0xff] }
 0x1f1   :  { %v2017_v27 = vadd.f32 %v2016_v46, %v2010_v34  ;;  %5830 = vpow2.f32 %v2488_v50  ;;  %v2494_v35 = vmul.f32 1.442695, %v2493_v10  ;;  %3579 = vst [vmem:[#allocation8 + $0x88] sm:$0xff] %v3577_v13  ;;  %v3599_v49 = vadd.f32 %v6724_v42, %v6687_v47  ;;  %v7166_v53 = vld [vmem:[#allocation29_spill] sm:$0xff]  ;;  %v7168_v42 = vld [vmem:[#allocation19_spill] sm:$0xff]  ;;  %v7174_v7 = vld [vmem:[#allocation14_spill] sm:$0xff] }
 0x1f2   :  { %v1953_v12 = vadd.f32 %v1952_v61, %v1946_v63  ;;  %v2497_v0 = vmul.f32 1.442695, %v2496_v41  ;;  %v3513_v11 = vadd.f32 %v6659_v44, %v3506_v38  ;;  %v3677_v17 = vadd.f32 %v6678_v54, %v3670_v3  ;;  %v7170_v44 = vld [vmem:[#allocation12_spill] sm:$0xff]  ;;  %v5349_v54 = vld [vmem:[#allocation2 + $0x2aa] ss:$0 sm:$0xff]  ;;  %v7175_v56 = vld [vmem:[#allocation15_spill] sm:$0xff] }
 0x1f3   :  { %2019 = vst [vmem:[#allocation8 + $0x38] sm:$0xff] %v2017_v27  ;;  %5832 = vpow2.f32 %v2491_v36  ;;  %v3690_v33 = vmul.f32 %v5338_v28, %v7158_v15  ;;  %v3606_v26 = vadd.f32 %v7166_v53, %v3599_v49  ;;  %v3612_v46 = vmul.f32 %v5327_v8, %v7167_v40  ;;  %v5354_v51 = vld [vmem:[#allocation2 + $0x2af] ss:$0 sm:$0xff]  ;;  %v5341_v4 = vld [vmem:[#allocation2 + $0x2a2] ss:$0 sm:$0xff] }
 0x1f4   :  { %v1960_v47 = vadd.f32 %v1959_v21, %v1953_v12  ;;  %v3520_v19 = vadd.f32 %v7168_v42, %v3513_v11  ;;  %v3684_v25 = vadd.f32 %v7169_v45, %v3677_v17  ;;  %v3756_v20 = vmul.f32 %v5347_v59, %v7170_v44  ;;  %v5363_v36 = vld [vmem:[#allocation2 + $0x2b8] ss:$0 sm:$0xff]  ;;  %v5364_v41 = vld [vmem:[#allocation2 + $0x2b9] ss:$0 sm:$0xff]  ;;  %v5342_v28 = vld [vmem:[#allocation2 + $0x2a3] ss:$0 sm:$0xff] }
 0x1f5   :  { %5834 = vpow2.f32 %v2494_v35  ;;  %v3613_v23 = vadd.f32 %v3612_v46, %v3606_v26  ;;  %v3619_v2 = vmul.f32 %v5328_v55, %v7171_v52  ;;  %v3762_v62 = vmul.f32 %v5348_v6, %v7172_v39  ;;  %v5343_v8 = vld [vmem:[#allocation2 + $0x2a4] ss:$0 sm:$0xff]  ;;  %v5365_v11 = vld [vmem:[#allocation2 + $0x2ba] ss:$0 sm:$0xff]  ;;  %v5366_v46 = vld [vmem:[#allocation2 + $0x2bb] ss:$0 sm:$0xff] }
 0x1f6   :  { %1962 = vst [vmem:[#allocation8 + $0x30] sm:$0xff] %v1960_v47  ;;  %5836 = vpow2.f32 %v2497_v0  ;;  %3522 = vst [vmem:[#allocation8 + $0x80] sm:$0xff] %v3520_v19  ;;  %v3691_v30 = vadd.f32 %v3690_v33, %v3684_v25  ;;  %v3626_v14 = vmul.f32 %v5329_v18, %v7173_v57  ;;  %v3633_v24 = vmul.f32 %v5330_v5, %v7158_v15  ;;  %v5344_v0 = vld [vmem:[#allocation2 + $0x2a5] ss:$0 sm:$0xff]  ;;  %v5345_v33 = vld [vmem:[#allocation2 + $0x2a6] ss:$0 sm:$0xff] }
 0x1f7   :  { %v6841_v31 = vpop.eup %5822  ;;  %v3620_v37 = vadd.f32 %v3619_v2, %v3613_v23  ;;  %v3763_v1 = vadd.f32 %v3762_v62, %v3756_v20  ;;  %v3769_v10 = vmul.f32 %v5349_v54, %v7174_v7  ;;  %v3699_v22 = vmul.f32 %v5339_v16, %v7170_v44  ;;  %v5355_v19 = vld [vmem:[#allocation2 + $0x2b0] ss:$0 sm:$0xff]  ;;  %v5356_v45 = vld [vmem:[#allocation2 + $0x2b1] ss:$0 sm:$0xff]  ;;  %v5346_v16 = vld [vmem:[#allocation2 + $0x2a7] ss:$0 sm:$0xff] }
 0x1f8   :  { %v6845_v32 = vpop.eup %5824  ;;  %3693 = vst [vmem:[#allocation8 + $0x98] sm:$0xff] %v3691_v30  ;;  %v3776_v61 = vmul.f32 %v5350_v9, %v7175_v56  ;;  %v3783_v21 = vmul.f32 %v5351_v60, %v7167_v40  ;;  %v3705_v34 = vmul.f32 %v5340_v58, %v7172_v39  ;;  %v3790_v38 = vmul.f32 %v5352_v43, %v7171_v52  ;;  %v5367_v62 = vld [vmem:[#allocation2 + $0x2bc] ss:$0 sm:$0xff] }
 0x1f9   :  { %v6849_v29 = vpop.eup %5826  ;;  %v2499_v50 = vadd.f32 %v6845_v32, %v6841_v31  ;;  %v3627_v13 = vadd.f32 %v3626_v14, %v3620_v37  ;;  %v3770_v63 = vadd.f32 %v3769_v10, %v3763_v1  ;;  %v3797_v3 = vmul.f32 %v5353_v48, %v7173_v57  ;;  %v5357_v14 = vld [vmem:[#allocation2 + $0x2b2] ss:$0 sm:$0xff]  ;;  %v5368_v37 = vld [vmem:[#allocation2 + $0x2bd] ss:$0 sm:$0xff]  ;;  %v5369_v1 = vld [vmem:[#allocation2 + $0x2be] ss:$0 sm:$0xff] }
 0x1fa   :  { %v6858_v27 = vpop.eup %5828  ;;  %v3804_v49 = vmul.f32 %v5354_v51, %v7158_v15  ;;  %v3706_v59 = vadd.f32 %v3705_v34, %v3699_v22  ;;  %v3712_v12 = vmul.f32 %v5341_v4, %v7174_v7  ;;  %v3870_v53 = vmul.f32 %v5363_v36, %v7170_v44  ;;  %v5358_v34 = vld [vmem:[#allocation2 + $0x2b3] ss:$0 sm:$0xff] }
 0x1fb   :  { %v2500_v35 = vadd.f32 %v6849_v29, %v2499_v50  ;;  %v6863_v17 = vpop.eup %5830  ;;  %v3634_v55 = vadd.f32 %v3633_v24, %v3627_v13  ;;  %v3777_v6 = vadd.f32 %v3776_v61, %v3770_v63  ;;  %v3876_v26 = vmul.f32 %v5364_v41, %v7172_v39 }
 0x1fc   :  { %v3713_v5 = vadd.f32 %v3712_v12, %v3706_v59  ;;  %v3719_v47 = vmul.f32 %v5342_v28, %v7175_v56  ;;  %v3726_v42 = vmul.f32 %v5343_v8, %v7167_v40  ;;  %v3733_v54 = vmul.f32 %v5344_v0, %v7171_v52  ;;  %v5444_v28 = vld [vmem:[#allocation2 + $0x2c9] ss:$0 sm:$0xff]  ;;  %v5370_v59 = vld [vmem:[#allocation2 + $0x2bf] ss:$0 sm:$0xff]  ;;  %v5359_v12 = vld [vmem:[#allocation2 + $0x2b4] ss:$0 sm:$0xff] }
 0x1fd   :  { %v2501_v18 = vadd.f32 %v6858_v27, %v2500_v35  ;;  %v6870_v25 = vpop.eup %5832  ;;  %3636 = vst [vmem:[#allocation8 + $0x90] sm:$0xff] %v3634_v55  ;;  %v3784_v20 = vadd.f32 %v3783_v21, %v3777_v6  ;;  %v3877_v23 = vadd.f32 %v3876_v26, %v3870_v53  ;;  %v3883_v2 = vmul.f32 %v5365_v11, %v7174_v7  ;;  %v5445_v6 = vld [vmem:[#allocation2 + $0x2ca] ss:$0 sm:$0xff]  ;;  %v5360_v53 = vld [vmem:[#allocation2 + $0x2b5] ss:$0 sm:$0xff] }
 0x1fe   :  { %v3720_v60 = vadd.f32 %v3719_v47, %v3713_v5  ;;  %v3740_v58 = vmul.f32 %v5345_v33, %v7173_v57  ;;  %v3890_v30 = vmul.f32 %v5366_v46, %v7175_v56  ;;  %v3813_v10 = vmul.f32 %v5355_v19, %v7170_v44  ;;  %v5361_v26 = vld [vmem:[#allocation2 + $0x2b6] ss:$0 sm:$0xff]  ;;  %v7176_v46 = vld [vmem:[#allocation20_spill] sm:$0xff]  ;;  %v7177_v5 = vld [vmem:[#allocation21_spill] sm:$0xff] }
 0x1ff   :  { %v2502_v9 = vadd.f32 %v6863_v17, %v2501_v18  ;;  %v6877_v24 = vpop.eup %5834  ;;  %v3791_v43 = vadd.f32 %v3790_v38, %v3784_v20  ;;  %v3884_v48 = vadd.f32 %v3883_v2, %v3877_v23  ;;  %v3819_v51 = vmul.f32 %v5356_v45, %v7172_v39  ;;  %v5443_v38 = vld [vmem:[#allocation2 + $0x2c8] ss:$0 sm:$0xff]  ;;  %v5446_v20 = vld [vmem:[#allocation2 + $0x2cb] ss:$0 sm:$0xff]  ;;  %v5362_v23 = vld [vmem:[#allocation2 + $0x2b7] ss:$0 sm:$0xff] }
 0x200   :  { %v6881_v22 = vpop.eup %5836  ;;  %v3727_v50 = vadd.f32 %v3726_v42, %v3720_v60  ;;  %v3747_v61 = vmul.f32 %v5346_v16, %v7158_v15  ;;  %v3897_v21 = vmul.f32 %v5367_v62, %v7167_v40  ;;  %v3826_v63 = vmul.f32 %v5357_v14, %v7174_v7  ;;  %v7178_v62 = vld [vmem:[#allocation22_spill] sm:$0xff]  ;;  %v5447_v60 = vld [vmem:[#allocation2 + $0x2cc] ss:$0 sm:$0xff] }
 0x201   :  { %v2503_v4 = vadd.f32 %v6870_v25, %v2502_v9  ;;  %v3798_v36 = vadd.f32 %v3797_v3, %v3791_v43  ;;  %v3891_v41 = vadd.f32 %v3890_v30, %v3884_v48  ;;  %v3820_v13 = vadd.f32 %v3819_v51, %v3813_v10  ;;  %v5448_v48 = vld [vmem:[#allocation2 + $0x2cd] ss:$0 sm:$0xff]  ;;  %v5449_v51 = vld [vmem:[#allocation2 + $0x2ce] ss:$0 sm:$0xff] }
 0x202   :  { %v3734_v39 = vadd.f32 %v3733_v54, %v3727_v50  ;;  %v3904_v8 = vmul.f32 %v5368_v37, %v7171_v52  ;;  %v3911_v35 = vmul.f32 %v5369_v1, %v7173_v57  ;;  %v3833_v3 = vmul.f32 %v5358_v34, %v7175_v56  ;;  %v5435_v54 = vld [vmem:[#allocation2 + $0x2c0] ss:$0 sm:$0xff]  ;;  %v5436_v56 = vld [vmem:[#allocation2 + $0x2c1] ss:$0 sm:$0xff]  ;;  %v5437_v37 = vld [vmem:[#allocation2 + $0x2c2] ss:$0 sm:$0xff] }
 0x203   :  { %v2504_v44 = vadd.f32 %v6877_v24, %v2503_v4  ;;  %v3805_v0 = vadd.f32 %v3804_v49, %v3798_v36  ;;  %v3898_v11 = vadd.f32 %v3897_v21, %v3891_v41  ;;  %v3827_v55 = vadd.f32 %v3826_v63, %v3820_v13  ;;  %v7179_v1 = vld [vmem:[#allocation23_spill] sm:$0xff]  ;;  %v5450_v4 = vld [vmem:[#allocation2 + $0x2cf] ss:$0 sm:$0xff] }
 0x204   :  { %v3741_v7 = vadd.f32 %v3740_v58, %v3734_v39  ;;  %v4479_v18 = vmul.f32 %v5443_v38, %v7176_v46  ;;  %v4485_v47 = vmul.f32 %v5444_v28, %v7177_v5  ;;  %v3918_v19 = vmul.f32 %v5370_v59, %v7158_v15  ;;  %v5459_v21 = vld [vmem:[#allocation2 + $0x2d8] ss:$0 sm:$0xff]  ;;  %v5460_v63 = vld [vmem:[#allocation2 + $0x2d9] ss:$0 sm:$0xff]  ;;  %v7181_v28 = vld [vmem:[#allocation25_spill] sm:$0xff] }
 0x205   :  { %v2505_v33 = vadd.f32 %v6881_v22, %v2504_v44  ;;  %3807 = vst [vmem:[#allocation8 + $0xa8] sm:$0xff] %v3805_v0  ;;  %v3905_v42 = vadd.f32 %v3904_v8, %v3898_v11  ;;  %v3834_v45 = vadd.f32 %v3833_v3, %v3827_v55  ;;  %v3840_v49 = vmul.f32 %v5359_v12, %v7167_v40  ;;  %v5440_v59 = vld [vmem:[#allocation2 + $0x2c5] ss:$0 sm:$0xff]  ;;  %v5441_v12 = vld [vmem:[#allocation2 + $0x2c6] ss:$0 sm:$0xff]  ;;  %v7182_v11 = vld [vmem:[#allocation26_spill] sm:$0xff] }
 0x206   :  { %v3748_v16 = vadd.f32 %v3747_v61, %v3741_v7  ;;  %v4486_v2 = vadd.f32 %v4485_v47, %v4479_v18  ;;  %v4492_v9 = vmul.f32 %v5445_v6, %v7178_v62  ;;  %v3847_v14 = vmul.f32 %v5360_v53, %v7171_v52  ;;  %v7180_v52 = vld [vmem:[#allocation24_spill] sm:$0xff]  ;;  %v7183_v3 = vld [vmem:[#allocation27_spill] sm:$0xff] }
 0x207   :  { %5838 = vrcp.f32 %v2505_v33  ;;  %v3912_v58 = vadd.f32 %v3911_v35, %v3905_v42  ;;  %v3841_v30 = vadd.f32 %v3840_v49, %v3834_v45  ;;  %v3854_v43 = vmul.f32 %v5361_v26, %v7173_v57  ;;  %v5438_v57 = vld [vmem:[#allocation2 + $0x2c3] ss:$0 sm:$0xff]  ;;  %v5439_v35 = vld [vmem:[#allocation2 + $0x2c4] ss:$0 sm:$0xff]  ;;  %v5461_v7 = vld [vmem:[#allocation2 + $0x2da] ss:$0 sm:$0xff] }
 0x208   :  { %3750 = vst [vmem:[#allocation8 + $0xa0] sm:$0xff] %v3748_v16  ;;  %v4493_v40 = vadd.f32 %v4492_v9, %v4486_v2  ;;  %v4499_v10 = vmul.f32 %v5446_v20, %v7179_v1  ;;  %v4422_v50 = vmul.f32 %v5435_v54, %v7176_v46  ;;  %v4428_v61 = vmul.f32 %v5436_v56, %v7177_v5  ;;  %v5462_v42 = vld [vmem:[#allocation2 + $0x2db] ss:$0 sm:$0xff]  ;;  %v5464_v45 = vld [vmem:[#allocation2 + $0x2dd] ss:$0 sm:$0xff] }
 0x209   :  { %v3919_v34 = vadd.f32 %v3918_v19, %v3912_v58  ;;  %v3848_v36 = vadd.f32 %v3847_v14, %v3841_v30  ;;  %v3861_v41 = vmul.f32 %v5362_v23, %v7158_v15  ;;  %v4506_v13 = vmul.f32 %v5447_v60, %v7180_v52  ;;  %v5442_v15 = vld [vmem:[#allocation2 + $0x2c7] ss:$0 sm:$0xff]  ;;  %v5463_v19 = vld [vmem:[#allocation2 + $0x2dc] ss:$0 sm:$0xff]  ;;  %v5465_v16 = vld [vmem:[#allocation2 + $0x2de] ss:$0 sm:$0xff] }
 0x20a   :  { %v4500_v38 = vadd.f32 %v4499_v10, %v4493_v40  ;;  %v4513_v44 = vmul.f32 %v5448_v48, %v7181_v28  ;;  %v4429_v39 = vadd.f32 %v4428_v61, %v4422_v50  ;;  %v4435_v8 = vmul.f32 %v5437_v37, %v7178_v62  ;;  %v5451_v50 = vld [vmem:[#allocation2 + $0x2d0] ss:$0 sm:$0xff] }
 0x20b   :  { %3921 = vst [vmem:[#allocation8 + $0xb8] sm:$0xff] %v3919_v34  ;;  %v3855_v0 = vadd.f32 %v3854_v43, %v3848_v36  ;;  %v4520_v55 = vmul.f32 %v5449_v51, %v7182_v11  ;;  %v6908_v6 = vmul.f32 %v5450_v4, %v7183_v3  ;;  %v4593_v33 = vmul.f32 %v5459_v21, %v7176_v46  ;;  %v5466_v4 = vld [vmem:[#allocation2 + $0x2df] ss:$0 sm:$0xff] }
 0x20c   :  { %v4507_v53 = vadd.f32 %v4506_v13, %v4500_v38  ;;  %v4436_v26 = vadd.f32 %v4435_v8, %v4429_v39  ;;  %v4442_v18 = vmul.f32 %v5438_v57, %v7179_v1  ;;  %v4599_v47 = vmul.f32 %v5460_v63, %v7177_v5  ;;  %v5453_v13 = vld [vmem:[#allocation2 + $0x2d2] ss:$0 sm:$0xff]  ;;  %v5454_v57 = vld [vmem:[#allocation2 + $0x2d3] ss:$0 sm:$0xff]  ;;  %v5187_v63 = vld [vmem:[#allocation2 + $0x248] ss:$0 sm:$0xff] }
 0x20d   :  { %v3862_v49 = vadd.f32 %v3861_v41, %v3855_v0  ;;  %v4449_v20 = vmul.f32 %v5439_v35, %v7180_v52  ;;  %v6915_v54 = vmul.f32 %v5440_v59, %v7181_v28  ;;  %v6918_v56 = vmul.f32 %v5441_v12, %v7182_v11  ;;  %v5452_v41 = vld [vmem:[#allocation2 + $0x2d1] ss:$0 sm:$0xff]  ;;  %v5188_v38 = vld [vmem:[#allocation2 + $0x249] ss:$0 sm:$0xff]  ;;  %v5189_v39 = vld [vmem:[#allocation2 + $0x24a] ss:$0 sm:$0xff] }
 0x20e   :  { %v4514_v23 = vadd.f32 %v4513_v44, %v4507_v53  ;;  %v4443_v2 = vadd.f32 %v4442_v18, %v4436_v26  ;;  %v4600_v9 = vadd.f32 %v4599_v47, %v4593_v33  ;;  %v4606_v60 = vmul.f32 %v5461_v7, %v7178_v62  ;;  %v5180_v0 = vld [vmem:[#allocation2 + $0x241] ss:$0 sm:$0xff]  ;;  %v5192_v33 = vld [vmem:[#allocation2 + $0x24d] ss:$0 sm:$0xff]  ;;  %v5193_v7 = vld [vmem:[#allocation2 + $0x24e] ss:$0 sm:$0xff] }
 0x20f   :  { %3864 = vst [vmem:[#allocation8 + $0xb0] sm:$0xff] %v3862_v49  ;;  %v6922_v58 = vmul.f32 %v5442_v15, %v7183_v3  ;;  %v6925_v30 = vmul.f32 %v5462_v42, %v7179_v1  ;;  %v6928_v14 = vmul.f32 %v5463_v19, %v7180_v52  ;;  %v6931_v43 = vmul.f32 %v5464_v45, %v7181_v28  ;;  %v5194_v53 = vld [vmem:[#allocation2 + $0x24f] ss:$0 sm:$0xff] }
 0x210   :  { %v6933_v37 = vadd.f32 %v4520_v55, %v4514_v23  ;;  %v6935_v40 = vadd.f32 %v4449_v20, %v4443_v2  ;;  %v6937_v10 = vadd.f32 %v4606_v60, %v4600_v9  ;;  %v6940_v51 = vmul.f32 %v5465_v16, %v7182_v11  ;;  %v5181_v16 = vld [vmem:[#allocation2 + $0x242] ss:$0 sm:$0xff]  ;;  %v5182_v23 = vld [vmem:[#allocation2 + $0x243] ss:$0 sm:$0xff]  ;;  %v5203_v2 = vld [vmem:[#allocation2 + $0x258] ss:$0 sm:$0xff] }
 0x211   :  { %v5839_v48 = vpop.eup %5838  ;;  %v6969_v59 = vmul.f32 %v5466_v4, %v7183_v3  ;;  %v6979_v55 = vmul.f32 %v5453_v13, %v7178_v62  ;;  %v6982_v15 = vmul.f32 %v5454_v57, %v7179_v1  ;;  %v5183_v4 = vld [vmem:[#allocation2 + $0x244] ss:$0 sm:$0xff]  ;;  %v5204_v13 = vld [vmem:[#allocation2 + $0x259] ss:$0 sm:$0xff]  ;;  %v5199_v3 = vld [vmem:[#allocation2 + $0x254] ss:$0 sm:$0xff] }
 0x212   :  { %v6943_v61 = vmul.f32 %v5839_v48, %v6841_v31  ;;  %v6946_v21 = vmul.f32 %v5839_v48, %v6845_v32  ;;  %v6949_v34 = vmul.f32 %v5839_v48, %v6849_v29  ;;  %v6952_v36 = vmul.f32 %v5839_v48, %v6858_v27  ;;  %v5190_v27 = vld [vmem:[#allocation2 + $0x24b] ss:$0 sm:$0xff] }
 0x213   :  { %v6955_v44 = vmul.f32 %v5839_v48, %v6863_v17  ;;  %v6958_v31 = vmul.f32 %v5839_v48, %v6870_v25  ;;  %v6961_v32 = vmul.f32 %v5839_v48, %v6877_v24  ;;  %v6964_v29 = vmul.f32 %v5839_v48, %v6881_v22  ;;  %v5191_v25 = vld [vmem:[#allocation2 + $0x24c] ss:$0 sm:$0xff]  ;;  %v5179_v24 = vld [vmem:[#allocation2 + $0x240] ss:$0 sm:$0xff] }
 0x214   :  { %v2577_v8 = vmul.f32 %v5187_v63, %v6943_v61  ;;  %v2583_v35 = vmul.f32 %v5188_v38, %v6946_v21  ;;  %v6972_v17 = vmul.f32 %v5451_v50, %v7176_v46  ;;  %v2590_v12 = vmul.f32 %v5189_v39, %v6949_v34  ;;  %v5184_v50 = vld [vmem:[#allocation2 + $0x245] ss:$0 sm:$0xff]  ;;  %v5185_v39 = vld [vmem:[#allocation2 + $0x246] ss:$0 sm:$0xff] }
 0x215   :  { %v6976_v22 = vmul.f32 %v5452_v41, %v7177_v5  ;;  %v2597_v18 = vmul.f32 %v5190_v27, %v6952_v36  ;;  %v2520_v47 = vmul.f32 %v5179_v24, %v6943_v61  ;;  %v2526_v42 = vmul.f32 %v5180_v0, %v6946_v21  ;;  %v5186_v27 = vld [vmem:[#allocation2 + $0x247] ss:$0 sm:$0xff]  ;;  %v5205_v0 = vld [vmem:[#allocation2 + $0x25a] ss:$0 sm:$0xff] }
 0x216   :  { %v2584_v26 = vadd.f32 %v2583_v35, %v2577_v8  ;;  %v2604_v19 = vmul.f32 %v5191_v25, %v6955_v44  ;;  %v2611_v45 = vmul.f32 %v5192_v33, %v6958_v31  ;;  %v2618_v49 = vmul.f32 %v5193_v7, %v6961_v32  ;;  %v5195_v33 = vld [vmem:[#allocation2 + $0x250] ss:$0 sm:$0xff]  ;;  %v5196_v7 = vld [vmem:[#allocation2 + $0x251] ss:$0 sm:$0xff] }
 0x217   :  { %v6991_v20 = vmul.f32 %v5194_v53, %v6964_v29  ;;  %v2527_v60 = vadd.f32 %v2526_v42, %v2520_v47  ;;  %v2533_v48 = vmul.f32 %v5181_v16, %v6949_v34  ;;  %v2691_v41 = vmul.f32 %v5203_v2, %v6943_v61  ;;  %v5206_v47 = vld [vmem:[#allocation2 + $0x25b] ss:$0 sm:$0xff]  ;;  %v5207_v42 = vld [vmem:[#allocation2 + $0x25c] ss:$0 sm:$0xff] }
 0x218   :  { %v2591_v9 = vadd.f32 %v2590_v12, %v2584_v26  ;;  %v2540_v57 = vmul.f32 %v5182_v23, %v6952_v36  ;;  %v2547_v63 = vmul.f32 %v5183_v4, %v6955_v44  ;;  %v2554_v38 = vmul.f32 %v5184_v50, %v6958_v31 }
 0x219   :  { %v2697_v8 = vmul.f32 %v5204_v13, %v6946_v21  ;;  %v2534_v25 = vadd.f32 %v2533_v48, %v2527_v60  ;;  %v2561_v12 = vmul.f32 %v5185_v39, %v6961_v32  ;;  %v2568_v24 = vmul.f32 %v5186_v27, %v6964_v29  ;;  %v5208_v60 = vld [vmem:[#allocation2 + $0x25d] ss:$0 sm:$0xff]  ;;  %v5197_v48 = vld [vmem:[#allocation2 + $0x252] ss:$0 sm:$0xff] }
 0x21a   :  { %v2598_v35 = vadd.f32 %v2597_v18, %v2591_v9  ;;  %v2704_v26 = vmul.f32 %v5205_v0, %v6949_v34  ;;  %v2634_v16 = vmul.f32 %v5195_v33, %v6943_v61  ;;  %v2640_v23 = vmul.f32 %v5196_v7, %v6946_v21 }
 0x21b   :  { %v2698_v53 = vadd.f32 %v2697_v8, %v2691_v41  ;;  %v2541_v4 = vadd.f32 %v2540_v57, %v2534_v25  ;;  %v2711_v18 = vmul.f32 %v5206_v47, %v6952_v36  ;;  %v2718_v9 = vmul.f32 %v5207_v42, %v6955_v44  ;;  %v5209_v41 = vld [vmem:[#allocation2 + $0x25e] ss:$0 sm:$0xff]  ;;  %v5198_v8 = vld [vmem:[#allocation2 + $0x253] ss:$0 sm:$0xff]  ;;  %v5219_v57 = vld [vmem:[#allocation2 + $0x268] ss:$0 sm:$0xff] }
 0x21c   :  { %v2605_v2 = vadd.f32 %v2604_v19, %v2598_v35  ;;  %v2725_v13 = vmul.f32 %v5208_v60, %v6958_v31  ;;  %v2641_v39 = vadd.f32 %v2640_v23, %v2634_v16  ;;  %v2647_v27 = vmul.f32 %v5197_v48, %v6949_v34  ;;  %v5220_v35 = vld [vmem:[#allocation2 + $0x269] ss:$0 sm:$0xff]  ;;  %v5210_v47 = vld [vmem:[#allocation2 + $0x25f] ss:$0 sm:$0xff]  ;;  %v5200_v48 = vld [vmem:[#allocation2 + $0x255] ss:$0 sm:$0xff] }
 0x21d   :  { %v2705_v50 = vadd.f32 %v2704_v26, %v2698_v53  ;;  %v2548_v33 = vadd.f32 %v2547_v63, %v2541_v4  ;;  %v2732_v7 = vmul.f32 %v5209_v41, %v6961_v32  ;;  %v2654_v19 = vmul.f32 %v5198_v8, %v6952_v36  ;;  %v5221_v63 = vld [vmem:[#allocation2 + $0x26a] ss:$0 sm:$0xff]  ;;  %v5201_v41 = vld [vmem:[#allocation2 + $0x256] ss:$0 sm:$0xff] }
 0x21e   :  { %v2612_v0 = vadd.f32 %v2611_v45, %v2605_v2  ;;  %v2648_v42 = vadd.f32 %v2647_v27, %v2641_v39  ;;  %v2805_v53 = vmul.f32 %v5219_v57, %v6943_v61  ;;  %v2811_v26 = vmul.f32 %v5220_v35, %v6946_v21  ;;  %v5202_v57 = vld [vmem:[#allocation2 + $0x257] ss:$0 sm:$0xff]  ;;  %v5212_v35 = vld [vmem:[#allocation2 + $0x261] ss:$0 sm:$0xff] }
 0x21f   :  { %v2712_v25 = vadd.f32 %v2711_v18, %v2705_v50  ;;  %v2555_v23 = vadd.f32 %v2554_v38, %v2548_v33  ;;  %v2739_v60 = vmul.f32 %v5210_v47, %v6964_v29  ;;  %v2661_v45 = vmul.f32 %v5199_v3, %v6955_v44  ;;  %v5222_v38 = vld [vmem:[#allocation2 + $0x26b] ss:$0 sm:$0xff] }
 0x220   :  { %v2619_v16 = vadd.f32 %v2618_v49, %v2612_v0  ;;  %v2655_v4 = vadd.f32 %v2654_v19, %v2648_v42  ;;  %v2812_v8 = vadd.f32 %v2811_v26, %v2805_v53  ;;  %v2818_v18 = vmul.f32 %v5221_v63, %v6949_v34  ;;  %v5211_v19 = vld [vmem:[#allocation2 + $0x260] ss:$0 sm:$0xff]  ;;  %v5223_v42 = vld [vmem:[#allocation2 + $0x26c] ss:$0 sm:$0xff]  ;;  %v5213_v63 = vld [vmem:[#allocation2 + $0x262] ss:$0 sm:$0xff] }
 0x221   :  { %v2719_v2 = vadd.f32 %v2718_v9, %v2712_v25  ;;  %v2562_v39 = vadd.f32 %v2561_v12, %v2555_v23  ;;  %v2668_v27 = vmul.f32 %v5200_v48, %v6958_v31  ;;  %v2675_v49 = vmul.f32 %v5201_v41, %v6961_v32  ;;  %v5224_v23 = vld [vmem:[#allocation2 + $0x26d] ss:$0 sm:$0xff] }
 0x222   :  { %v2626_v50 = vadd.f32 %v6991_v20, %v2619_v16  ;;  %v2662_v33 = vadd.f32 %v2661_v45, %v2655_v4  ;;  %v2819_v3 = vadd.f32 %v2818_v18, %v2812_v8  ;;  %v2825_v9 = vmul.f32 %v5222_v38, %v6952_v36  ;;  %v5225_v45 = vld [vmem:[#allocation2 + $0x26e] ss:$0 sm:$0xff]  ;;  %v5226_v4 = vld [vmem:[#allocation2 + $0x26f] ss:$0 sm:$0xff]  ;;  %v5236_v38 = vld [vmem:[#allocation2 + $0x279] ss:$0 sm:$0xff] }
 0x223   :  { %v2726_v0 = vadd.f32 %v2725_v13, %v2719_v2  ;;  %v2569_v25 = vadd.f32 %v2568_v24, %v2562_v39  ;;  %v2682_v47 = vmul.f32 %v5202_v57, %v6964_v29  ;;  %v2748_v20 = vmul.f32 %v5211_v19, %v6943_v61  ;;  %v5214_v39 = vld [vmem:[#allocation2 + $0x263] ss:$0 sm:$0xff]  ;;  %v5215_v57 = vld [vmem:[#allocation2 + $0x264] ss:$0 sm:$0xff] }
 0x224   :  { %2628 = vst [vmem:[#allocation8 + $0x48] sm:$0xff] %v2626_v50  ;;  %v2754_v12 = vmul.f32 %v5212_v35, %v6946_v21  ;;  %v2669_v26 = vadd.f32 %v2668_v27, %v2662_v33  ;;  %v2826_v16 = vadd.f32 %v2825_v9, %v2819_v3  ;;  %v2832_v13 = vmul.f32 %v5223_v42, %v6955_v44  ;;  %v5235_v27 = vld [vmem:[#allocation2 + $0x278] ss:$0 sm:$0xff]  ;;  %v5216_v3 = vld [vmem:[#allocation2 + $0x265] ss:$0 sm:$0xff] }
 0x225   :  { %v2733_v53 = vadd.f32 %v2732_v7, %v2726_v0  ;;  %2571 = vst [vmem:[#allocation8 + $0x40] sm:$0xff] %v2569_v25  ;;  %v2839_v2 = vmul.f32 %v5224_v23, %v6958_v31  ;;  %v2846_v24 = vmul.f32 %v5225_v45, %v6961_v32  ;;  %v2761_v41 = vmul.f32 %v5213_v63, %v6949_v34  ;;  %v5217_v42 = vld [vmem:[#allocation2 + $0x266] ss:$0 sm:$0xff]  ;;  %v5227_v23 = vld [vmem:[#allocation2 + $0x270] ss:$0 sm:$0xff] }
 0x226   :  { %v2755_v48 = vadd.f32 %v2754_v12, %v2748_v20  ;;  %v2676_v18 = vadd.f32 %v2675_v49, %v2669_v26  ;;  %v2833_v50 = vadd.f32 %v2832_v13, %v2826_v16  ;;  %v2853_v7 = vmul.f32 %v5226_v4, %v6964_v29  ;;  %v5237_v20 = vld [vmem:[#allocation2 + $0x27a] ss:$0 sm:$0xff]  ;;  %v5218_v26 = vld [vmem:[#allocation2 + $0x267] ss:$0 sm:$0xff]  ;;  %v5228_v45 = vld [vmem:[#allocation2 + $0x271] ss:$0 sm:$0xff] }
 0x227   :  { %v2740_v8 = vadd.f32 %v2739_v60, %v2733_v53  ;;  %v2768_v33 = vmul.f32 %v5214_v39, %v6952_v36  ;;  %v2919_v9 = vmul.f32 %v5235_v27, %v6943_v61  ;;  %v2925_v19 = vmul.f32 %v5236_v38, %v6946_v21  ;;  %v5239_v4 = vld [vmem:[#allocation2 + $0x27c] ss:$0 sm:$0xff]  ;;  %v5240_v27 = vld [vmem:[#allocation2 + $0x27d] ss:$0 sm:$0xff]  ;;  %v5229_v38 = vld [vmem:[#allocation2 + $0x272] ss:$0 sm:$0xff] }
 0x228   :  { %v2762_v0 = vadd.f32 %v2761_v41, %v2755_v48  ;;  %v2683_v35 = vadd.f32 %v2682_v47, %v2676_v18  ;;  %v2840_v25 = vadd.f32 %v2839_v2, %v2833_v50  ;;  %v2775_v60 = vmul.f32 %v5215_v57, %v6955_v44  ;;  %v5238_v2 = vld [vmem:[#allocation2 + $0x27b] ss:$0 sm:$0xff] }
 0x229   :  { %2742 = vst [vmem:[#allocation8 + $0x58] sm:$0xff] %v2740_v8  ;;  %v2782_v49 = vmul.f32 %v5216_v3, %v6958_v31  ;;  %v2789_v53 = vmul.f32 %v5217_v42, %v6961_v32  ;;  %v2926_v16 = vadd.f32 %v2925_v19, %v2919_v9  ;;  %v2932_v13 = vmul.f32 %v5237_v20, %v6949_v34  ;;  %v5230_v9 = vld [vmem:[#allocation2 + $0x273] ss:$0 sm:$0xff] }
 0x22a   :  { %v2769_v12 = vadd.f32 %v2768_v33, %v2762_v0  ;;  %2685 = vst [vmem:[#allocation8 + $0x50] sm:$0xff] %v2683_v35  ;;  %v2847_v63 = vadd.f32 %v2846_v24, %v2840_v25  ;;  %v2796_v47 = vmul.f32 %v5218_v26, %v6964_v29  ;;  %v2862_v48 = vmul.f32 %v5227_v23, %v6943_v61  ;;  %v5241_v24 = vld [vmem:[#allocation2 + $0x27e] ss:$0 sm:$0xff]  ;;  %v5242_v25 = vld [vmem:[#allocation2 + $0x27f] ss:$0 sm:$0xff] }
 0x22b   :  { %v2868_v41 = vmul.f32 %v5228_v45, %v6946_v21  ;;  %v2933_v18 = vadd.f32 %v2932_v13, %v2926_v16  ;;  %v2939_v50 = vmul.f32 %v5238_v2, %v6952_v36  ;;  %v2946_v39 = vmul.f32 %v5239_v4, %v6955_v44  ;;  %v5231_v26 = vld [vmem:[#allocation2 + $0x274] ss:$0 sm:$0xff]  ;;  %v5232_v45 = vld [vmem:[#allocation2 + $0x275] ss:$0 sm:$0xff] }
 0x22c   :  { %v2776_v8 = vadd.f32 %v2775_v60, %v2769_v12  ;;  %v2854_v0 = vadd.f32 %v2853_v7, %v2847_v63  ;;  %v2953_v33 = vmul.f32 %v5240_v27, %v6958_v31  ;;  %v2875_v3 = vmul.f32 %v5229_v38, %v6949_v34  ;;  %v5455_v16 = vld [vmem:[#allocation2 + $0x2d4] ss:$0 sm:$0xff]  ;;  %v5456_v2 = vld [vmem:[#allocation2 + $0x2d5] ss:$0 sm:$0xff]  ;;  %v5234_v38 = vld [vmem:[#allocation2 + $0x277] ss:$0 sm:$0xff] }
 0x22d   :  { %v2869_v57 = vadd.f32 %v2868_v41, %v2862_v48  ;;  %v2940_v61 = vadd.f32 %v2939_v50, %v2933_v18  ;;  %v2960_v21 = vmul.f32 %v5241_v24, %v6961_v32  ;;  %v2882_v35 = vmul.f32 %v5230_v9, %v6952_v36  ;;  %v5477_v48 = vld [vmem:[#allocation2 + $0x2ea] ss:$0 sm:$0xff]  ;;  %v5478_v50 = vld [vmem:[#allocation2 + $0x2eb] ss:$0 sm:$0xff]  ;;  %v5468_v24 = vld [vmem:[#allocation2 + $0x2e1] ss:$0 sm:$0xff] }
 0x22e   :  { %v2783_v19 = vadd.f32 %v2782_v49, %v2776_v8  ;;  %2856 = vst [vmem:[#allocation8 + $0x68] sm:$0xff] %v2854_v0  ;;  %v4528_v42 = vadd.f32 %v6908_v6, %v6933_v37  ;;  %v4457_v7 = vadd.f32 %v6915_v54, %v6935_v40  ;;  %v4614_v20 = vadd.f32 %v6925_v30, %v6937_v10  ;;  %v5475_v37 = vld [vmem:[#allocation2 + $0x2e8] ss:$0 sm:$0xff]  ;;  %v5476_v30 = vld [vmem:[#allocation2 + $0x2e9] ss:$0 sm:$0xff] }
 0x22f   :  { %v2876_v60 = vadd.f32 %v2875_v3, %v2869_v57  ;;  %v2947_v12 = vadd.f32 %v2946_v39, %v2940_v61  ;;  %v2967_v49 = vmul.f32 %v5242_v25, %v6964_v29  ;;  %v4543_v36 = vadd.f32 %v6976_v22, %v6972_v17  ;;  %v5467_v39 = vld [vmem:[#allocation2 + $0x2e0] ss:$0 sm:$0xff] }
 0x230   :  { %v2790_v34 = vadd.f32 %v2789_v53, %v2783_v19  ;;  %v2889_v23 = vmul.f32 %v5231_v26, %v6955_v44  ;;  %4530 = vst [vmem:[#allocation8 + $0xc8] sm:$0xff] %v4528_v42  ;;  %v4464_v6 = vadd.f32 %v6918_v56, %v4457_v7  ;;  %v4621_v54 = vadd.f32 %v6928_v14, %v4614_v20  ;;  %v5233_v14 = vld [vmem:[#allocation2 + $0x276] ss:$0 sm:$0xff]  ;;  %v5458_v19 = vld [vmem:[#allocation2 + $0x2d7] ss:$0 sm:$0xff] }
 0x231   :  { %v2883_v13 = vadd.f32 %v2882_v35, %v2876_v60  ;;  %v2954_v10 = vadd.f32 %v2953_v33, %v2947_v12  ;;  %v2896_v53 = vmul.f32 %v5232_v45, %v6958_v31  ;;  %v4550_v63 = vadd.f32 %v6979_v55, %v4543_v36  ;;  %v5469_v60 = vld [vmem:[#allocation2 + $0x2e2] ss:$0 sm:$0xff]  ;;  %v5491_v42 = vld [vmem:[#allocation2 + $0x2f8] ss:$0 sm:$0xff]  ;;  %v5480_v20 = vld [vmem:[#allocation2 + $0x2ed] ss:$0 sm:$0xff] }
 0x232   :  { %v2797_v40 = vadd.f32 %v2796_v47, %v2790_v34  ;;  %v4471_v22 = vadd.f32 %v6922_v58, %v4464_v6  ;;  %v4628_v44 = vadd.f32 %v6931_v43, %v4621_v54  ;;  %v4563_v4 = vmul.f32 %v5455_v16, %v7180_v52  ;;  %v5457_v47 = vld [vmem:[#allocation2 + $0x2d6] ss:$0 sm:$0xff]  ;;  %v5492_v34 = vld [vmem:[#allocation2 + $0x2f9] ss:$0 sm:$0xff]  ;;  %v5470_v16 = vld [vmem:[#allocation2 + $0x2e3] ss:$0 sm:$0xff] }
 0x233   :  { %v2890_v17 = vadd.f32 %v2889_v23, %v2883_v13  ;;  %v2961_v56 = vadd.f32 %v2960_v21, %v2954_v10  ;;  %v4557_v41 = vadd.f32 %v6982_v15, %v4550_v63  ;;  %v4707_v8 = vmul.f32 %v5475_v37, %v7176_v46  ;;  %v7184_v12 = vld [vmem:[#allocation27_spill] sm:$0xff]  ;;  %v5481_v13 = vld [vmem:[#allocation2 + $0x2ee] ss:$0 sm:$0xff]  ;;  %v5471_v10 = vld [vmem:[#allocation2 + $0x2e4] ss:$0 sm:$0xff] }
 0x234   :  { %2799 = vst [vmem:[#allocation8 + $0x60] sm:$0xff] %v2797_v40  ;;  %v4713_v31 = vmul.f32 %v5476_v30, %v7177_v5  ;;  %v2903_v18 = vmul.f32 %v5233_v14, %v6961_v32  ;;  %4473 = vst [vmem:[#allocation8 + $0xc0] sm:$0xff] %v4471_v22  ;;  %v4635_v58 = vadd.f32 %v6940_v51, %v4628_v44  ;;  %v5479_v51 = vld [vmem:[#allocation2 + $0x2ec] ss:$0 sm:$0xff]  ;;  %v5493_v54 = vld [vmem:[#allocation2 + $0x2fa] ss:$0 sm:$0xff] }
 0x235   :  { %v2897_v55 = vadd.f32 %v2896_v53, %v2890_v17  ;;  %v4570_v43 = vmul.f32 %v5456_v2, %v7181_v28  ;;  %v2968_v27 = vadd.f32 %v2967_v49, %v2961_v56  ;;  %v4564_v0 = vadd.f32 %v4563_v4, %v4557_v41  ;;  %v5483_v63 = vld [vmem:[#allocation2 + $0x2f0] ss:$0 sm:$0xff]  ;;  %v5484_v2 = vld [vmem:[#allocation2 + $0x2f1] ss:$0 sm:$0xff]  ;;  %v5482_v17 = vld [vmem:[#allocation2 + $0x2ef] ss:$0 sm:$0xff] }
 0x236   :  { %v4714_v33 = vadd.f32 %v4713_v31, %v4707_v8  ;;  %v4720_v15 = vmul.f32 %v5477_v48, %v7178_v62  ;;  %v2910_v3 = vmul.f32 %v5234_v38, %v6964_v29  ;;  %v4642_v9 = vadd.f32 %v6969_v59, %v4635_v58  ;;  %v5494_v4 = vld [vmem:[#allocation2 + $0x2fb] ss:$0 sm:$0xff]  ;;  %v5472_v14 = vld [vmem:[#allocation2 + $0x2e5] ss:$0 sm:$0xff]  ;;  %v5485_v8 = vld [vmem:[#allocation2 + $0x2f2] ss:$0 sm:$0xff] }
 0x237   :  { %v2904_v57 = vadd.f32 %v2903_v18, %v2897_v55  ;;  %v4577_v32 = vmul.f32 %v5457_v47, %v7182_v11  ;;  %2970 = vst [vmem:[#allocation8 + $0x78] sm:$0xff] %v2968_v27  ;;  %v4571_v61 = vadd.f32 %v4570_v43, %v4564_v0  ;;  %v4727_v35 = vmul.f32 %v5478_v50, %v7179_v1  ;;  %v5495_v18 = vld [vmem:[#allocation2 + $0x2fc] ss:$0 sm:$0xff]  ;;  %v5473_v27 = vld [vmem:[#allocation2 + $0x2e6] ss:$0 sm:$0xff] }
 0x238   :  { %v4721_v21 = vadd.f32 %v4720_v15, %v4714_v33  ;;  %v4650_v25 = vmul.f32 %v5467_v39, %v7176_v46  ;;  %4644 = vst [vmem:[#allocation8 + $0xd8] sm:$0xff] %v4642_v9  ;;  %v4656_v29 = vmul.f32 %v5468_v24, %v7177_v5  ;;  %v4584_v49 = vmul.f32 %v5458_v19, %v7184_v12  ;;  %v5486_v33 = vld [vmem:[#allocation2 + $0x2f3] ss:$0 sm:$0xff]  ;;  %v5474_v19 = vld [vmem:[#allocation2 + $0x2e7] ss:$0 sm:$0xff] }
 0x239   :  { %v2911_v7 = vadd.f32 %v2910_v3, %v2904_v57  ;;  %v4578_v59 = vadd.f32 %v4577_v32, %v4571_v61  ;;  %v4734_v36 = vmul.f32 %v5479_v51, %v7180_v52  ;;  %v4663_v45 = vmul.f32 %v5469_v60, %v7178_v62  ;;  %v5496_v57 = vld [vmem:[#allocation2 + $0x2fd] ss:$0 sm:$0xff]  ;;  %v5487_v51 = vld [vmem:[#allocation2 + $0x2f4] ss:$0 sm:$0xff] }
 0x23a   :  { %v4728_v26 = vadd.f32 %v4727_v35, %v4721_v21  ;;  %v4657_v23 = vadd.f32 %v4656_v29, %v4650_v25  ;;  %v4821_v6 = vmul.f32 %v5491_v42, %v7176_v46  ;;  %v4741_v40 = vmul.f32 %v5480_v20, %v7181_v28  ;;  %v5497_v35 = vld [vmem:[#allocation2 + $0x2fe] ss:$0 sm:$0xff]  ;;  %v5488_v20 = vld [vmem:[#allocation2 + $0x2f5] ss:$0 sm:$0xff] }
 0x23b   :  { %2913 = vst [vmem:[#allocation8 + $0x70] sm:$0xff] %v2911_v7  ;;  %v4585_v37 = vadd.f32 %v4584_v49, %v4578_v59  ;;  %v4827_v53 = vmul.f32 %v5492_v34, %v7177_v5  ;;  %v4670_v44 = vmul.f32 %v5470_v16, %v7179_v1  ;;  %v4748_v56 = vmul.f32 %v5481_v13, %v7182_v11  ;;  %v5498_v34 = vld [vmem:[#allocation2 + $0x2ff] ss:$0 sm:$0xff]  ;;  %v5489_v16 = vld [vmem:[#allocation2 + $0x2f6] ss:$0 sm:$0xff] }
 0x23c   :  { %v4735_v30 = vadd.f32 %v4734_v36, %v4728_v26  ;;  %v4664_v22 = vadd.f32 %v4663_v45, %v4657_v23  ;;  %v4834_v47 = vmul.f32 %v5493_v54, %v7178_v62  ;;  %v4677_v55 = vmul.f32 %v5471_v10, %v7180_v52  ;;  %v5490_v54 = vld [vmem:[#allocation2 + $0x2f7] ss:$0 sm:$0xff] }
 0x23d   :  { %4587 = vst [vmem:[#allocation8 + $0xd0] sm:$0xff] %v4585_v37  ;;  %v4828_v41 = vadd.f32 %v4827_v53, %v4821_v6  ;;  %v4764_v58 = vmul.f32 %v5483_v63, %v7176_v46  ;;  %v4770_v43 = vmul.f32 %v5484_v2, %v7177_v5  ;;  %v4755_v39 = vmul.f32 %v5482_v17, %v7184_v12 }
 0x23e   :  { %v4742_v48 = vadd.f32 %v4741_v40, %v4735_v30  ;;  %v4671_v31 = vadd.f32 %v4670_v44, %v4664_v22  ;;  %v4841_v0 = vmul.f32 %v5494_v4, %v7179_v1  ;;  %v4684_v24 = vmul.f32 %v5472_v14, %v7181_v28 }
 0x23f   :  { %v4835_v38 = vadd.f32 %v4834_v47, %v4828_v41  ;;  %v4771_v3 = vadd.f32 %v4770_v43, %v4764_v58  ;;  %v4777_v9 = vmul.f32 %v5485_v8, %v7178_v62  ;;  %v4848_v5 = vmul.f32 %v5495_v18, %v7180_v52 }
 0x240   :  { %v4749_v50 = vadd.f32 %v4748_v56, %v4742_v48  ;;  %v4678_v15 = vadd.f32 %v4677_v55, %v4671_v31  ;;  %v4691_v21 = vmul.f32 %v5473_v27, %v7182_v11  ;;  %v4784_v60 = vmul.f32 %v5486_v33, %v7179_v1 }
 0x241   :  { %v4842_v46 = vadd.f32 %v4841_v0, %v4835_v38  ;;  %v4778_v25 = vadd.f32 %v4777_v9, %v4771_v3  ;;  %v4855_v7 = vmul.f32 %v5496_v57, %v7181_v28  ;;  %v4698_v62 = vmul.f32 %v5474_v19, %v7184_v12 }
 0x242   :  { %v4756_v32 = vadd.f32 %v4755_v39, %v4749_v50  ;;  %v4685_v61 = vadd.f32 %v4684_v24, %v4678_v15  ;;  %v4791_v49 = vmul.f32 %v5487_v51, %v7180_v52  ;;  %v4862_v36 = vmul.f32 %v5497_v35, %v7182_v11 }
 0x243   :  { %v4849_v42 = vadd.f32 %v4848_v5, %v4842_v46  ;;  %v4785_v59 = vadd.f32 %v4784_v60, %v4778_v25  ;;  %v4798_v1 = vmul.f32 %v5488_v20, %v7181_v28  ;;  %v4869_v6 = vmul.f32 %v5498_v34, %v7184_v12 }
 0x244   :  { %4758 = vst [vmem:[#allocation8 + $0xe8] sm:$0xff] %v4756_v32  ;;  %v4692_v29 = vadd.f32 %v4691_v21, %v4685_v61  ;;  %v4805_v30 = vmul.f32 %v5489_v16, %v7182_v11  ;;  %v4812_v10 = vmul.f32 %v5490_v54, %v7184_v12 }
 0x245   :  { %v4856_v26 = vadd.f32 %v4855_v7, %v4849_v42  ;;  %v4792_v23 = vadd.f32 %v4791_v49, %v4785_v59 }
 0x246   :  { %v4699_v13 = vadd.f32 %v4698_v62, %v4692_v29 }
 0x247   :  { %v4863_v45 = vadd.f32 %v4862_v36, %v4856_v26  ;;  %v4799_v37 = vadd.f32 %v4798_v1, %v4792_v23 }
 0x248   :  { %4701 = vst [vmem:[#allocation8 + $0xe0] sm:$0xff] %v4699_v13 }
 0x249   :  { %v4870_v40 = vadd.f32 %v4869_v6, %v4863_v45  ;;  %v4806_v52 = vadd.f32 %v4805_v30, %v4799_v37 }
 0x24b   :  { %4872 = vst [vmem:[#allocation8 + $0xf8] sm:$0xff] %v4870_v40  ;;  %v4813_v53 = vadd.f32 %v4812_v10, %v4806_v52 }
 0x24d   :  { %4815 = vst [vmem:[#allocation8 + $0xf0] sm:$0xff] %v4813_v53 }
 0x24e   :  { %5911 = shalt.err (!%p5908_p6)
}
 0x24f   :  { %s5912_s10 = scalar_lea.hbm %s7117_s2, 4096 }
 0x250   :  { %p5913_p7 = scmp.ne.s32.totalorder %s7117_s2, %s5912_s10  ;;  %p5916_p8 = scmp.lt.u32.totalorder %s5912_s10, %s7117_s2 }
 0x252   :  { %p5918_p9 = pnand %p5916_p8, %p5913_p7 }
 0x254   :  { %5921 = shalt.err (!%p5918_p9)
}
 0x255   :  { %4884 = dma.vmem_to_hbm [thread:$0]  %s4879_s6, 4096, %s7117_s2, [#allocation5], %s5929_s19, %s5929_s19, %s5930_s20  }
 0x256   :  { %5926 = dma.done.wait [#allocation5], 4096  }
 0x257   :  { %5927 = vsyncadd [#allocation5], 4294963200 }
 0x258   :  { %4888 = vsyncpa [#allocation4], 1 }
 0x259   :  { %4889 = vsyncpa [#allocation7], 1 }
 0x25a   :  { %4890 = vsyncpa [#allocation5], 1 }

</bundles_post_ra>
